<compile_context>
chip_gen: v6e
topology: v6e:2x2x1
jax: 0.10.0
libtpu: 0.0.40
codegen_flags: <defaults>
</compile_context>

<pallas_src>
import functools

import jax
import jax.numpy as jnp
from jax.experimental import pallas as pl
from jax.experimental.pallas import tpu as pltpu

EPS = 1e-5
LANE = 128                       # keep every kernel's last dim a multiple of this
VMEM_LIMIT = 48 * 1024 * 1024    # under v7x's 64 MiB physical; plenty on v5e/v6e


def _round_up(x, m):
    return ((x + m - 1) // m) * m


def _pick_div(n, candidates):
    for c in candidates:
        if n % c == 0:
            return c
    return candidates[-1]


# ----------------------------- Pallas kernels ------------------------------

def _matmul_bias_kernel(a_ref, b_ref, bias_ref, o_ref, acc_ref, *, act):
    """(tm,tk)@(tk,tn) tile with f32 VMEM accumulator; bias/act fused at k==last."""
    @pl.when(pl.program_id(2) == 0)
    def _():
        acc_ref[...] = jnp.zeros_like(acc_ref)

    acc_ref[...] += jnp.dot(a_ref[...], b_ref[...],
                            preferred_element_type=jnp.float32)

    @pl.when(pl.program_id(2) == pl.num_programs(2) - 1)
    def _():
        y = acc_ref[...] + bias_ref[...]
        if act == "tanh":
            y = jnp.tanh(y)
        o_ref[...] = y


def matmul_bias_act(a, b, bias, act="none"):
    """a:(M,K) bf16, b:(K,N) bf16, bias:(N,) f32 -> (M,N) f32 (tiled, pipelined)."""
    M, K = a.shape
    _, N = b.shape

    tm = min(256, _round_up(M, 8))
    Mp = _round_up(M, tm)
    Kp = _round_up(K, LANE)
    Np = _round_up(N, LANE)
    tk = _pick_div(Kp, (512, 384, 256, 128))
    tn = _pick_div(Np, (256, 128))

    if (Mp, Kp) != (M, K):
        a = jnp.pad(a, ((0, Mp - M), (0, Kp - K)))
    if (Kp, Np) != (K, N):
        b = jnp.pad(b, ((0, Kp - K), (0, Np - N)))
    if Np != N:
        bias = jnp.pad(bias, (0, Np - N))

    grid = (Mp // tm, Np // tn, Kp // tk)
    kern = functools.partial(_matmul_bias_kernel, act=act)

    out = pl.pallas_call(
        kern,
        out_shape=jax.ShapeDtypeStruct((Mp, Np), jnp.float32),
        grid_spec=pltpu.PrefetchScalarGridSpec(
            num_scalar_prefetch=0,
            grid=grid,
            in_specs=[
                pl.BlockSpec((tm, tk), lambda i, j, k: (i, k)),
                pl.BlockSpec((tk, tn), lambda i, j, k: (k, j)),
                pl.BlockSpec((1, tn), lambda i, j, k: (0, j)),
            ],
            out_specs=pl.BlockSpec((tm, tn), lambda i, j, k: (i, j)),
            scratch_shapes=[pltpu.VMEM((tm, tn), jnp.float32)]),
        compiler_params=pltpu.CompilerParams(
            dimension_semantics=("parallel", "parallel", "arbitrary"),
            vmem_limit_bytes=VMEM_LIMIT),
        cost_estimate=pl.CostEstimate(
            flops=2 * Mp * Np * Kp,
            transcendentals=Mp * Np if act == "tanh" else 0,
            bytes_accessed=Mp * Kp * 2 + Kp * Np * 2 + Mp * Np * 4),
    )(a, b, bias.reshape(1, Np))
    return out[:M, :N]


def _bn_stats_kernel(x_ref, s_ref, q_ref):
    # Accumulated per-channel sum / sum-of-squares over the M grid axis.
    @pl.when(pl.program_id(0) == 0)
    def _():
        s_ref[...] = jnp.zeros_like(s_ref)
        q_ref[...] = jnp.zeros_like(q_ref)
    x = x_ref[...]
    s_ref[...] += jnp.sum(x, axis=0, keepdims=True)
    q_ref[...] += jnp.sum(x * x, axis=0, keepdims=True)


def bn_stats(x2d):
    M, C = x2d.shape
    tm = min(1024, _round_up(M, 8))
    Mp = _round_up(M, tm)
    if Mp != M:
        x2d = jnp.pad(x2d, ((0, Mp - M), (0, 0)))   # zero rows: no effect on sums
    return pl.pallas_call(
        _bn_stats_kernel,
        out_shape=(jax.ShapeDtypeStruct((1, C), jnp.float32),
                   jax.ShapeDtypeStruct((1, C), jnp.float32)),
        grid_spec=pltpu.PrefetchScalarGridSpec(
            num_scalar_prefetch=0,
            grid=(Mp // tm,),
            in_specs=[pl.BlockSpec((tm, C), lambda i: (i, 0))],
            out_specs=(pl.BlockSpec((1, C), lambda i: (0, 0)),
                       pl.BlockSpec((1, C), lambda i: (0, 0)))),
        compiler_params=pltpu.CompilerParams(
            dimension_semantics=("arbitrary",),
            vmem_limit_bytes=VMEM_LIMIT),
    )(x2d)


def _affine_act_kernel(x_ref, sc_ref, sh_ref, o_ref, *, act):
    y = x_ref[...] * sc_ref[...] + sh_ref[...]
    if act == "relu":
        y = jnp.maximum(y, 0.0)
    elif act == "tanh":
        y = jnp.tanh(y)
    o_ref[...] = y


def _affine_act_res_kernel(x_ref, sc_ref, sh_ref, r_ref, o_ref, *, act):
    y = x_ref[...] * sc_ref[...] + sh_ref[...]
    if act == "relu":
        y = jnp.maximum(y, 0.0)
    elif act == "tanh":
        y = jnp.tanh(y)
    o_ref[...] = y + r_ref[...]          # fused residual add


def affine_act(x2d, scale, shift, act, res2d=None):
    M, C = x2d.shape
    tm = min(512, _round_up(M, 8))
    Mp = _round_up(M, tm)
    if Mp != M:
        x2d = jnp.pad(x2d, ((0, Mp - M), (0, 0)))
        if res2d is not None:
            res2d = jnp.pad(res2d, ((0, Mp - M), (0, 0)))
    row_spec = pl.BlockSpec((tm, C), lambda i: (i, 0))
    vec_spec = pl.BlockSpec((1, C), lambda i: (0, 0))
    cp = pltpu.CompilerParams(dimension_semantics=("parallel",),
                              vmem_limit_bytes=VMEM_LIMIT)
    if res2d is None:
        out = pl.pallas_call(
            functools.partial(_affine_act_kernel, act=act),
            out_shape=jax.ShapeDtypeStruct((Mp, C), jnp.float32),
            grid_spec=pltpu.PrefetchScalarGridSpec(
                num_scalar_prefetch=0, grid=(Mp // tm,),
                in_specs=[row_spec, vec_spec, vec_spec],
                out_specs=row_spec),
            compiler_params=cp,
        )(x2d, scale.reshape(1, C), shift.reshape(1, C))
    else:
        out = pl.pallas_call(
            functools.partial(_affine_act_res_kernel, act=act),
            out_shape=jax.ShapeDtypeStruct((Mp, C), jnp.float32),
            grid_spec=pltpu.PrefetchScalarGridSpec(
                num_scalar_prefetch=0, grid=(Mp // tm,),
                in_specs=[row_spec, vec_spec, vec_spec, row_spec],
                out_specs=row_spec),
            compiler_params=cp,
        )(x2d, scale.reshape(1, C), shift.reshape(1, C), res2d)
    return out[:M]


# ----------------------------- JAX glue (layout) ----------------------------

def reflect_pad(x, p):
    return jnp.pad(x, ((0, 0), (p, p), (p, p), (0, 0)), mode="reflect")


def _im2col(x, kh, kw, stride):
    # TODO(synk): replace with in-kernel halo DMA to avoid the kh*kw HBM read
    #             amplification of materializing the patch matrix.
    N, H, W, C = x.shape
    Ho = (H - kh) // stride + 1
    Wo = (W - kw) // stride + 1
    cols = []
    for i in range(kh):
        for j in range(kw):
            cols.append(
                x[:, i:i + (Ho - 1) * stride + 1:stride,
                     j:j + (Wo - 1) * stride + 1:stride, :])
    p = jnp.stack(cols, axis=3).reshape(N, Ho, Wo, kh * kw * C)
    return p.reshape(N * Ho * Wo, kh * kw * C).astype(jnp.bfloat16), (N, Ho, Wo)


def conv2d(x, w, b=None, stride=1, padding=0, act="none"):
    # x: NHWC with channels already zero-padded to a multiple of LANE.
    # w: torch layout (Cout, Cin, kh, kw) with true (unpadded) channel counts.
    Cout, Cin, kh, kw = w.shape
    Cp_in = x.shape[-1]
    Cp_out = _round_up(Cout, LANE)
    if padding:
        x = jnp.pad(x, ((0, 0), (padding, padding), (padding, padding), (0, 0)))
    cols, (N, Ho, Wo) = _im2col(x, kh, kw, stride)
    wp = jnp.zeros((kh, kw, Cp_in, Cp_out), jnp.float32)
    wp = wp.at[:, :, :Cin, :Cout].set(jnp.transpose(w, (2, 3, 1, 0)))
    wm = wp.reshape(kh * kw * Cp_in, Cp_out).astype(jnp.bfloat16)
    bias = jnp.zeros((Cp_out,), jnp.float32)
    if b is not None:
        bias = bias.at[:Cout].set(b)
    out = matmul_bias_act(cols, wm, bias, act=act)   # (M, Cp_out) f32
    return out.reshape(N, Ho, Wo, Cp_out)


def conv_transpose2d(x, w):
    # Sub-pixel decomposition of ConvTranspose2d(3x3, stride=2, padding=1,
    # output_padding=1): one stride-1 matmul over a 2x2 window producing the
    # four output phases, then interleave.  No zero-stuffed dilation.
    Cin, Cout, kh, kw = w.shape          # torch ConvTranspose2d layout
    N, H, W, Cp_in = x.shape
    Cp_out = _round_up(Cout, LANE)

    wp = jnp.zeros((Cp_in, Cp_out, 3, 3), jnp.float32)
    wp = wp.at[:Cin, :Cout].set(w)

    xp = jnp.pad(x, ((0, 0), (0, 1), (0, 1), (0, 0)))
    taps = [x,                               # x[m,   n  ]
            xp[:, :H, 1:W + 1, :],           # x[m,   n+1]
            xp[:, 1:H + 1, :W, :],           # x[m+1, n  ]
            xp[:, 1:H + 1, 1:W + 1, :]]      # x[m+1, n+1]
    cols = jnp.concatenate(taps, axis=-1).reshape(
        N * H * W, 4 * Cp_in).astype(jnp.bfloat16)

    # Phase weight matrix: rows = tap blocks, cols = output-phase blocks.
    # Phases: 0->(dy=0,dx=0), 1->(0,1), 2->(1,0), 3->(1,1).
    entries = [(0, 0, 1, 1),
               (0, 1, 1, 2), (1, 1, 1, 0),
               (0, 2, 2, 1), (2, 2, 0, 1),
               (0, 3, 2, 2), (1, 3, 2, 0), (2, 3, 0, 2), (3, 3, 0, 0)]
    wmat = jnp.zeros((4 * Cp_in, 4 * Cp_out), jnp.float32)
    for t, p, ky, kx in entries:
        wmat = wmat.at[t * Cp_in:(t + 1) * Cp_in,
                       p * Cp_out:(p + 1) * Cp_out].set(wp[:, :, ky, kx])
    wmat = wmat.astype(jnp.bfloat16)

    bias = jnp.zeros((4 * Cp_out,), jnp.float32)     # use_bias=False (BatchNorm)
    out = matmul_bias_act(cols, wmat, bias)          # (N*H*W, 4*Cp_out)
    out = out.reshape(N, H, W, 2, 2, Cp_out)
    out = jnp.transpose(out, (0, 1, 3, 2, 4, 5)).reshape(N, 2 * H, 2 * W, Cp_out)
    return out


def batchnorm_act(x, gamma, beta, act, res=None):
    # Train-mode BatchNorm2d (batch stats, biased var, eps=1e-5) fused with the
    # activation (and optionally the residual add).
    N, H, W, C = x.shape
    M = N * H * W
    x2 = x.reshape(M, C)
    s, q = bn_stats(x2)                              # tiled Pallas reduction
    mean = s / M
    var = jnp.maximum(q / M - mean * mean, 0.0)      # guard against cancellation
    scale = gamma.reshape(1, C) / jnp.sqrt(var + EPS)
    shift = beta.reshape(1, C) - mean * scale
    r2 = res.reshape(M, C) if res is not None else None
    out = affine_act(x2, scale, shift, act, r2)      # tiled Pallas elementwise
    return out.reshape(N, H, W, C)


# ----------------------------- parameters -----------------------------------

def _init_conv(key, cout, cin, kh, kw, bias=False):
    k1, k2 = jax.random.split(key)
    w = 0.05 * jax.random.normal(k1, (cout, cin, kh, kw), jnp.float32)
    b = 0.05 * jax.random.normal(k2, (cout,), jnp.float32) if bias else None
    return w, b


def build_params(key, input_nc, output_nc, ngf, n_blocks):
    keys = iter(jax.random.split(key, 8 + 2 * n_blocks + 8))
    p = {}
    # head: ReflectionPad(3) + Conv(input_nc, ngf, 7, bias=False) + BN + ReLU
    p["head_w"], _ = _init_conv(next(keys), ngf, input_nc, 7, 7)
    p["head_g"] = jnp.ones((ngf,), jnp.float32)
    p["head_b"] = jnp.zeros((ngf,), jnp.float32)
    # 2x downsample
    for i in range(2):
        cin, cout = ngf * (2 ** i), ngf * (2 ** (i + 1))
        p[f"down{i}_w"], _ = _init_conv(next(keys), cout, cin, 3, 3)
        p[f"down{i}_g"] = jnp.ones((cout,), jnp.float32)
        p[f"down{i}_b"] = jnp.zeros((cout,), jnp.float32)
    # resblocks at dim = ngf * 4
    dim = ngf * 4
    for i in range(n_blocks):
        p[f"res{i}_w1"], _ = _init_conv(next(keys), dim, dim, 3, 3)
        p[f"res{i}_g1"] = jnp.ones((dim,), jnp.float32)
        p[f"res{i}_b1"] = jnp.zeros((dim,), jnp.float32)
        p[f"res{i}_w2"], _ = _init_conv(next(keys), dim, dim, 3, 3)
        p[f"res{i}_g2"] = jnp.ones((dim,), jnp.float32)
        p[f"res{i}_b2"] = jnp.zeros((dim,), jnp.float32)
    # 2x upsample (ConvTranspose weight layout: (Cin, Cout, kh, kw))
    for i in range(2):
        mult = 2 ** (2 - i)
        cin, cout = ngf * mult, ngf * mult // 2
        wt, _ = _init_conv(next(keys), cin, cout, 3, 3)  # (Cin, Cout, 3, 3)
        p[f"up{i}_w"] = wt
        p[f"up{i}_g"] = jnp.ones((cout,), jnp.float32)
        p[f"up{i}_b"] = jnp.zeros((cout,), jnp.float32)
    # tail: ReflectionPad(3) + Conv(ngf, output_nc, 7, bias=True) + Tanh
    p["tail_w"], p["tail_bias"] = _init_conv(next(keys), output_nc, ngf, 7, 7,
                                             bias=True)
    return p


# ----------------------------- forward ---------------------------------------

def _pad_bn_params(g, b):
    C = g.shape[0]
    Cp = _round_up(C, LANE)
    gp = jnp.pad(g, (0, Cp - C), constant_values=1.0)
    bp = jnp.pad(b, (0, Cp - C))
    return gp, bp


def resnet_generator_forward(x_nchw, params, ngf, n_blocks):
    x = jnp.transpose(x_nchw, (0, 2, 3, 1)).astype(jnp.float32)   # -> NHWC
    # Pad channels once at the boundary so every kernel is lane-dense (128).
    Cp0 = _round_up(x.shape[-1], LANE)
    x = jnp.pad(x, ((0, 0), (0, 0), (0, 0), (0, Cp0 - x.shape[-1])))

    # head
    x = reflect_pad(x, 3)
    x = conv2d(x, params["head_w"])
    g, b = _pad_bn_params(params["head_g"], params["head_b"])
    x = batchnorm_act(x, g, b, "relu")

    # downsampling
    for i in range(2):
        x = conv2d(x, params[f"down{i}_w"], stride=2, padding=1)
        g, b = _pad_bn_params(params[f"down{i}_g"], params[f"down{i}_b"])
        x = batchnorm_act(x, g, b, "relu")

    # resnet blocks (padding_type='reflect', no dropout, no CBAM/SE)
    for i in range(n_blocks):
        res = x
        y = reflect_pad(x, 1)
        y = conv2d(y, params[f"res{i}_w1"])
        g1, b1 = _pad_bn_params(params[f"res{i}_g1"], params[f"res{i}_b1"])
        y = batchnorm_act(y, g1, b1, "relu")
        y = reflect_pad(y, 1)
        y = conv2d(y, params[f"res{i}_w2"])
        g2, b2 = _pad_bn_params(params[f"res{i}_g2"], params[f"res{i}_b2"])
        x = batchnorm_act(y, g2, b2, "none", res=res)   # fused BN + residual add

    # upsampling (sub-pixel transposed conv)
    for i in range(2):
        x = conv_transpose2d(x, params[f"up{i}_w"])
        g, b = _pad_bn_params(params[f"up{i}_g"], params[f"up{i}_b"])
        x = batchnorm_act(x, g, b, "relu")

    # tail: reflect pad + conv7 (with bias) + tanh fused into the matmul epilogue
    x = reflect_pad(x, 3)
    x = conv2d(x, params["tail_w"], params["tail_bias"], act="tanh")

    out_nc = params["tail_w"].shape[0]
    x = x[..., :out_nc]                                  # strip channel padding
    return jnp.transpose(x, (0, 3, 1, 2))                # back to NCHW


# ----------------------------- main ------------------------------------------

if __name__ == "__main__":
    key = jax.random.PRNGKey(0)
    k_x, k_p = jax.random.split(key)

    # small config: ResnetGenerator(input_nc=3, output_nc=3, ngf=8,
    #                               norm_layer=BatchNorm2d, n_blocks=2,
    #                               padding_type='reflect', use_dropout=False)
    input_nc, output_nc, ngf, n_blocks = 3, 3, 8, 2
    B, H, W = 2, 16, 16

    x = jax.random.normal(k_x, (B, input_nc, H, W), jnp.float32)
    params = build_params(k_p, input_nc, output_nc, ngf, n_blocks)

    fwd = jax.jit(functools.partial(resnet_generator_forward,
                                    ngf=ngf, n_blocks=n_blocks))
    out = fwd(x, params)
    jax.block_until_ready(out)

    assert out.shape == (B, output_nc, H, W), out.shape
    assert bool(jnp.all(jnp.isfinite(out)))
    print("KERNEL_OK")
</pallas_src>

<mosaic_0001>
module attributes {stable_mosaic.version = 11 : i64} {
  func.func @_matmul_bias_kernel(%arg0: i32, %arg1: i32, %arg2: i32, %arg3: memref<256x128xbf16, #tpu.memory_space<vmem>>, %arg4: memref<128x128xbf16, #tpu.memory_space<vmem>>, %arg5: memref<1x128xf32, #tpu.memory_space<vmem>>, %arg6: memref<256x128xf32, #tpu.memory_space<vmem>>, %arg7: memref<256x128xf32, #tpu.memory_space<vmem>>) attributes {dimension_semantics = [#tpu.dimension_semantics<parallel>, #tpu.dimension_semantics<parallel>, #tpu.dimension_semantics<arbitrary>], iteration_bounds = array<i64: 2, 1, 49>, scalar_prefetch = 0 : i64, scratch_operands = 1 : i64, tpu.core_type = #tpu.core_type<tc>, window_params = [{transform_indices = @transform_0, window_bounds = array<i64: 256, 128>}, {transform_indices = @transform_1, window_bounds = array<i64: 128, 128>}, {transform_indices = @transform_2, window_bounds = array<i64: 1, 128>}, {transform_indices = @transform_3, window_bounds = array<i64: 256, 128>}]} {
    %c0_i32 = arith.constant 0 : i32
    %0 = arith.cmpi eq, %arg2, %c0_i32 : i32
    %1 = arith.extui %0 : i1 to i32
    %c0_i32_0 = arith.constant 0 : i32
    %2 = arith.cmpi ne, %1, %c0_i32_0 : i32
    scf.if %2 {
      %cst_9 = arith.constant 0.000000e+00 : f32
      %12 = vector.broadcast %cst_9 : f32 to vector<256x128xf32>
      %c0_10 = arith.constant 0 : index
      %c0_11 = arith.constant 0 : index
      %13 = vector.load %arg7[%c0_10, %c0_11] : memref<256x128xf32, #tpu.memory_space<vmem>>, vector<256x128xf32>
      tpu.vector_store %arg7[%c0_10, %c0_11], %12 {strides = array<i32>} : memref<256x128xf32, #tpu.memory_space<vmem>>, vector<256x128xf32>,
    } else {
    }
    %c0 = arith.constant 0 : index
    %c0_1 = arith.constant 0 : index
    %3 = vector.load %arg7[%c0, %c0_1] : memref<256x128xf32, #tpu.memory_space<vmem>>, vector<256x128xf32>
    %c0_2 = arith.constant 0 : index
    %c0_3 = arith.constant 0 : index
    %4 = vector.load %arg3[%c0_2, %c0_3] : memref<256x128xbf16, #tpu.memory_space<vmem>>, vector<256x128xbf16>
    %c0_4 = arith.constant 0 : index
    %c0_5 = arith.constant 0 : index
    %5 = vector.load %arg4[%c0_4, %c0_5] : memref<128x128xbf16, #tpu.memory_space<vmem>>, vector<128x128xbf16>
    %cst = arith.constant dense<0.000000e+00> : vector<256x128xf32>
    %6 = tpu.matmul %4, %5, %cst {dimension_numbers = #tpu.dot_dimension_numbers<[1], [0], [0], [1], [0, 0, 1, 1], [], []>} : vector<256x128xbf16>, vector<128x128xbf16>, vector<256x128xf32> -> vector<256x128xf32>
    %7 = arith.addf %3, %6 : vector<256x128xf32>
    %c0_6 = arith.constant 0 : index
    %c0_7 = arith.constant 0 : index
    %8 = vector.load %arg7[%c0_6, %c0_7] : memref<256x128xf32, #tpu.memory_space<vmem>>, vector<256x128xf32>
    tpu.vector_store %arg7[%c0_6, %c0_7], %7 {strides = array<i32>} : memref<256x128xf32, #tpu.memory_space<vmem>>, vector<256x128xf32>,
    %c48_i32 = arith.constant 48 : i32
    %9 = arith.cmpi eq, %arg2, %c48_i32 : i32
    %10 = arith.extui %9 : i1 to i32
    %c0_i32_8 = arith.constant 0 : i32
    %11 = arith.cmpi ne, %10, %c0_i32_8 : i32
    scf.if %11 {
      %c0_9 = arith.constant 0 : index
      %c0_10 = arith.constant 0 : index
      %12 = vector.load %arg7[%c0_9, %c0_10] : memref<256x128xf32, #tpu.memory_space<vmem>>, vector<256x128xf32>
      %c0_11 = arith.constant 0 : index
      %c0_12 = arith.constant 0 : index
      %13 = vector.load %arg5[%c0_11, %c0_12] : memref<1x128xf32, #tpu.memory_space<vmem>>, vector<1x128xf32>
      %14 = vector.broadcast %13 : vector<1x128xf32> to vector<256x128xf32>
      %15 = arith.addf %12, %14 : vector<256x128xf32>
      %c0_13 = arith.constant 0 : index
      %c0_14 = arith.constant 0 : index
      %16 = vector.load %arg6[%c0_13, %c0_14] : memref<256x128xf32, #tpu.memory_space<vmem>>, vector<256x128xf32>
      tpu.vector_store %arg6[%c0_13, %c0_14], %15 {strides = array<i32>} : memref<256x128xf32, #tpu.memory_space<vmem>>, vector<256x128xf32>,
    } else {
    }
    return
  }
  func.func @transform_0(%arg0: i32, %arg1: i32, %arg2: i32) -> (i32, i32) {
    %c0_i32 = arith.constant 0 : i32
    return %arg0, %arg2 : i32, i32
  }
  func.func @transform_1(%arg0: i32, %arg1: i32, %arg2: i32) -> (i32, i32) {
    %c0_i32 = arith.constant 0 : i32
    return %arg2, %arg1 : i32, i32
  }
  func.func @transform_2(%arg0: i32, %arg1: i32, %arg2: i32) -> (i32, i32) {
    %c0_i32 = arith.constant 0 : i32
    %c0_i32_0 = arith.constant 0 : i32
    return %c0_i32, %arg1 : i32, i32
  }
  func.func @transform_3(%arg0: i32, %arg1: i32, %arg2: i32) -> (i32, i32) {
    %c0_i32 = arith.constant 0 : i32
    return %arg0, %arg1 : i32, i32
  }
}

module attributes {stable_mosaic.version = 11 : i64} {
  func.func @_bn_stats_kernel(%arg0: i32, %arg1: memref<512x128xf32, #tpu.memory_space<vmem>>, %arg2: memref<1x128xf32, #tpu.memory_space<vmem>>, %arg3: memref<1x128xf32, #tpu.memory_space<vmem>>) attributes {dimension_semantics = [#tpu.dimension_semantics<arbitrary>], iteration_bounds = array<i64: 1>, scalar_prefetch = 0 : i64, scratch_operands = 0 : i64, tpu.core_type = #tpu.core_type<tc>, window_params = [{transform_indices = @transform_0, window_bounds = array<i64: 512, 128>}, {pipeline_mode = #tpu.pipeline_mode<synchronous>, transform_indices = @transform_1, window_bounds = array<i64: 1, 128>}, {pipeline_mode = #tpu.pipeline_mode<synchronous>, transform_indices = @transform_2, window_bounds = array<i64: 1, 128>}]} {
    %c0_i32 = arith.constant 0 : i32
    %0 = arith.cmpi eq, %arg0, %c0_i32 : i32
    %1 = arith.extui %0 : i1 to i32
    %c0_i32_0 = arith.constant 0 : i32
    %2 = arith.cmpi ne, %1, %c0_i32_0 : i32
    scf.if %2 {
      %cst_11 = arith.constant 0.000000e+00 : f32
      %15 = vector.broadcast %cst_11 : f32 to vector<1x128xf32>
      %c0_12 = arith.constant 0 : index
      %c0_13 = arith.constant 0 : index
      %16 = vector.load %arg2[%c0_12, %c0_13] : memref<1x128xf32, #tpu.memory_space<vmem>>, vector<1x128xf32>
      tpu.vector_store %arg2[%c0_12, %c0_13], %15 {strides = array<i32>} : memref<1x128xf32, #tpu.memory_space<vmem>>, vector<1x128xf32>,
      %cst_14 = arith.constant 0.000000e+00 : f32
      %17 = vector.broadcast %cst_14 : f32 to vector<1x128xf32>
      %c0_15 = arith.constant 0 : index
      %c0_16 = arith.constant 0 : index
      %18 = vector.load %arg3[%c0_15, %c0_16] : memref<1x128xf32, #tpu.memory_space<vmem>>, vector<1x128xf32>
      tpu.vector_store %arg3[%c0_15, %c0_16], %17 {strides = array<i32>} : memref<1x128xf32, #tpu.memory_space<vmem>>, vector<1x128xf32>,
    } else {
    }
    %c0 = arith.constant 0 : index
    %c0_1 = arith.constant 0 : index
    %3 = vector.load %arg1[%c0, %c0_1] : memref<512x128xf32, #tpu.memory_space<vmem>>, vector<512x128xf32>
    %c0_2 = arith.constant 0 : index
    %c0_3 = arith.constant 0 : index
    %4 = vector.load %arg2[%c0_2, %c0_3] : memref<1x128xf32, #tpu.memory_space<vmem>>, vector<1x128xf32>
    %cst = arith.constant dense<0.000000e+00> : vector<128xf32>
    %5 = vector.multi_reduction <add>, %3, %cst [0] : vector<512x128xf32> to vector<128xf32>
    %6 = vector.shape_cast %5 : vector<128xf32> to vector<1x128xf32>
    %7 = arith.addf %4, %6 : vector<1x128xf32>
    %c0_4 = arith.constant 0 : index
    %c0_5 = arith.constant 0 : index
    %8 = vector.load %arg2[%c0_4, %c0_5] : memref<1x128xf32, #tpu.memory_space<vmem>>, vector<1x128xf32>
    tpu.vector_store %arg2[%c0_4, %c0_5], %7 {strides = array<i32>} : memref<1x128xf32, #tpu.memory_space<vmem>>, vector<1x128xf32>,
    %c0_6 = arith.constant 0 : index
    %c0_7 = arith.constant 0 : index
    %9 = vector.load %arg3[%c0_6, %c0_7] : memref<1x128xf32, #tpu.memory_space<vmem>>, vector<1x128xf32>
    %10 = arith.mulf %3, %3 : vector<512x128xf32>
    %cst_8 = arith.constant dense<0.000000e+00> : vector<128xf32>
    %11 = vector.multi_reduction <add>, %10, %cst_8 [0] : vector<512x128xf32> to vector<128xf32>
    %12 = vector.shape_cast %11 : vector<128xf32> to vector<1x128xf32>
    %13 = arith.addf %9, %12 : vector<1x128xf32>
    %c0_9 = arith.constant 0 : index
    %c0_10 = arith.constant 0 : index
    %14 = vector.load %arg3[%c0_9, %c0_10] : memref<1x128xf32, #tpu.memory_space<vmem>>, vector<1x128xf32>
    tpu.vector_store %arg3[%c0_9, %c0_10], %13 {strides = array<i32>} : memref<1x128xf32, #tpu.memory_space<vmem>>, vector<1x128xf32>,
    return
  }
  func.func @transform_0(%arg0: i32) -> (i32, i32) {
    %c0_i32 = arith.constant 0 : i32
    %c0_i32_0 = arith.constant 0 : i32
    return %arg0, %c0_i32 : i32, i32
  }
  func.func @transform_1(%arg0: i32) -> (i32, i32) {
    %c0_i32 = arith.constant 0 : i32
    %c0_i32_0 = arith.constant 0 : i32
    %c0_i32_1 = arith.constant 0 : i32
    return %c0_i32, %c0_i32_0 : i32, i32
  }
  func.func @transform_2(%arg0: i32) -> (i32, i32) {
    %c0_i32 = arith.constant 0 : i32
    %c0_i32_0 = arith.constant 0 : i32
    %c0_i32_1 = arith.constant 0 : i32
    return %c0_i32, %c0_i32_0 : i32, i32
  }
}

module attributes {stable_mosaic.version = 11 : i64} {
  func.func @_affine_act_kernel(%arg0: i32, %arg1: memref<512x128xf32, #tpu.memory_space<vmem>>, %arg2: memref<1x128xf32, #tpu.memory_space<vmem>>, %arg3: memref<1x128xf32, #tpu.memory_space<vmem>>, %arg4: memref<512x128xf32, #tpu.memory_space<vmem>>) attributes {dimension_semantics = [#tpu.dimension_semantics<parallel>], iteration_bounds = array<i64: 1>, scalar_prefetch = 0 : i64, scratch_operands = 0 : i64, tpu.core_type = #tpu.core_type<tc>, window_params = [{transform_indices = @transform_0, window_bounds = array<i64: 512, 128>}, {pipeline_mode = #tpu.pipeline_mode<synchronous>, transform_indices = @transform_1, window_bounds = array<i64: 1, 128>}, {pipeline_mode = #tpu.pipeline_mode<synchronous>, transform_indices = @transform_2, window_bounds = array<i64: 1, 128>}, {transform_indices = @transform_3, window_bounds = array<i64: 512, 128>}]} {
    %c0 = arith.constant 0 : index
    %c0_0 = arith.constant 0 : index
    %0 = vector.load %arg1[%c0, %c0_0] : memref<512x128xf32, #tpu.memory_space<vmem>>, vector<512x128xf32>
    %c0_1 = arith.constant 0 : index
    %c0_2 = arith.constant 0 : index
    %1 = vector.load %arg2[%c0_1, %c0_2] : memref<1x128xf32, #tpu.memory_space<vmem>>, vector<1x128xf32>
    %2 = vector.broadcast %1 : vector<1x128xf32> to vector<512x128xf32>
    %3 = arith.mulf %0, %2 : vector<512x128xf32>
    %c0_3 = arith.constant 0 : index
    %c0_4 = arith.constant 0 : index
    %4 = vector.load %arg3[%c0_3, %c0_4] : memref<1x128xf32, #tpu.memory_space<vmem>>, vector<1x128xf32>
    %5 = vector.broadcast %4 : vector<1x128xf32> to vector<512x128xf32>
    %6 = arith.addf %3, %5 : vector<512x128xf32>
    %cst = arith.constant 0.000000e+00 : f32
    %7 = vector.broadcast %cst : f32 to vector<512x128xf32>
    %8 = arith.maximumf %6, %7 : vector<512x128xf32>
    %c0_5 = arith.constant 0 : index
    %c0_6 = arith.constant 0 : index
    %9 = vector.load %arg4[%c0_5, %c0_6] : memref<512x128xf32, #tpu.memory_space<vmem>>, vector<512x128xf32>
    tpu.vector_store %arg4[%c0_5, %c0_6], %8 {strides = array<i32>} : memref<512x128xf32, #tpu.memory_space<vmem>>, vector<512x128xf32>,
    return
  }
  func.func @transform_0(%arg0: i32) -> (i32, i32) {
    %c0_i32 = arith.constant 0 : i32
    %c0_i32_0 = arith.constant 0 : i32
    return %arg0, %c0_i32 : i32, i32
  }
  func.func @transform_1(%arg0: i32) -> (i32, i32) {
    %c0_i32 = arith.constant 0 : i32
    %c0_i32_0 = arith.constant 0 : i32
    %c0_i32_1 = arith.constant 0 : i32
    return %c0_i32, %c0_i32_0 : i32, i32
  }
  func.func @transform_2(%arg0: i32) -> (i32, i32) {
    %c0_i32 = arith.constant 0 : i32
    %c0_i32_0 = arith.constant 0 : i32
    %c0_i32_1 = arith.constant 0 : i32
    return %c0_i32, %c0_i32_0 : i32, i32
  }
  func.func @transform_3(%arg0: i32) -> (i32, i32) {
    %c0_i32 = arith.constant 0 : i32
    %c0_i32_0 = arith.constant 0 : i32
    return %arg0, %c0_i32 : i32, i32
  }
}

module attributes {stable_mosaic.version = 11 : i64} {
  func.func @_bn_stats_kernel(%arg0: i32, %arg1: memref<128x128xf32, #tpu.memory_space<vmem>>, %arg2: memref<1x128xf32, #tpu.memory_space<vmem>>, %arg3: memref<1x128xf32, #tpu.memory_space<vmem>>) attributes {dimension_semantics = [#tpu.dimension_semantics<arbitrary>], iteration_bounds = array<i64: 1>, scalar_prefetch = 0 : i64, scratch_operands = 0 : i64, tpu.core_type = #tpu.core_type<tc>, window_params = [{transform_indices = @transform_0, window_bounds = array<i64: 128, 128>}, {pipeline_mode = #tpu.pipeline_mode<synchronous>, transform_indices = @transform_1, window_bounds = array<i64: 1, 128>}, {pipeline_mode = #tpu.pipeline_mode<synchronous>, transform_indices = @transform_2, window_bounds = array<i64: 1, 128>}]} {
    %c0_i32 = arith.constant 0 : i32
    %0 = arith.cmpi eq, %arg0, %c0_i32 : i32
    %1 = arith.extui %0 : i1 to i32
    %c0_i32_0 = arith.constant 0 : i32
    %2 = arith.cmpi ne, %1, %c0_i32_0 : i32
    scf.if %2 {
      %cst_11 = arith.constant 0.000000e+00 : f32
      %15 = vector.broadcast %cst_11 : f32 to vector<1x128xf32>
      %c0_12 = arith.constant 0 : index
      %c0_13 = arith.constant 0 : index
      %16 = vector.load %arg2[%c0_12, %c0_13] : memref<1x128xf32, #tpu.memory_space<vmem>>, vector<1x128xf32>
      tpu.vector_store %arg2[%c0_12, %c0_13], %15 {strides = array<i32>} : memref<1x128xf32, #tpu.memory_space<vmem>>, vector<1x128xf32>,
      %cst_14 = arith.constant 0.000000e+00 : f32
      %17 = vector.broadcast %cst_14 : f32 to vector<1x128xf32>
      %c0_15 = arith.constant 0 : index
      %c0_16 = arith.constant 0 : index
      %18 = vector.load %arg3[%c0_15, %c0_16] : memref<1x128xf32, #tpu.memory_space<vmem>>, vector<1x128xf32>
      tpu.vector_store %arg3[%c0_15, %c0_16], %17 {strides = array<i32>} : memref<1x128xf32, #tpu.memory_space<vmem>>, vector<1x128xf32>,
    } else {
    }
    %c0 = arith.constant 0 : index
    %c0_1 = arith.constant 0 : index
    %3 = vector.load %arg1[%c0, %c0_1] : memref<128x128xf32, #tpu.memory_space<vmem>>, vector<128x128xf32>
    %c0_2 = arith.constant 0 : index
    %c0_3 = arith.constant 0 : index
    %4 = vector.load %arg2[%c0_2, %c0_3] : memref<1x128xf32, #tpu.memory_space<vmem>>, vector<1x128xf32>
    %cst = arith.constant dense<0.000000e+00> : vector<128xf32>
    %5 = vector.multi_reduction <add>, %3, %cst [0] : vector<128x128xf32> to vector<128xf32>
    %6 = vector.shape_cast %5 : vector<128xf32> to vector<1x128xf32>
    %7 = arith.addf %4, %6 : vector<1x128xf32>
    %c0_4 = arith.constant 0 : index
    %c0_5 = arith.constant 0 : index
    %8 = vector.load %arg2[%c0_4, %c0_5] : memref<1x128xf32, #tpu.memory_space<vmem>>, vector<1x128xf32>
    tpu.vector_store %arg2[%c0_4, %c0_5], %7 {strides = array<i32>} : memref<1x128xf32, #tpu.memory_space<vmem>>, vector<1x128xf32>,
    %c0_6 = arith.constant 0 : index
    %c0_7 = arith.constant 0 : index
    %9 = vector.load %arg3[%c0_6, %c0_7] : memref<1x128xf32, #tpu.memory_space<vmem>>, vector<1x128xf32>
    %10 = arith.mulf %3, %3 : vector<128x128xf32>
    %cst_8 = arith.constant dense<0.000000e+00> : vector<128xf32>
    %11 = vector.multi_reduction <add>, %10, %cst_8 [0] : vector<128x128xf32> to vector<128xf32>
    %12 = vector.shape_cast %11 : vector<128xf32> to vector<1x128xf32>
    %13 = arith.addf %9, %12 : vector<1x128xf32>
    %c0_9 = arith.constant 0 : index
    %c0_10 = arith.constant 0 : index
    %14 = vector.load %arg3[%c0_9, %c0_10] : memref<1x128xf32, #tpu.memory_space<vmem>>, vector<1x128xf32>
    tpu.vector_store %arg3[%c0_9, %c0_10], %13 {strides = array<i32>} : memref<1x128xf32, #tpu.memory_space<vmem>>, vector<1x128xf32>,
    return
  }
  func.func @transform_0(%arg0: i32) -> (i32, i32) {
    %c0_i32 = arith.constant 0 : i32
    %c0_i32_0 = arith.constant 0 : i32
    return %arg0, %c0_i32 : i32, i32
  }
  func.func @transform_1(%arg0: i32) -> (i32, i32) {
    %c0_i32 = arith.constant 0 : i32
    %c0_i32_0 = arith.constant 0 : i32
    %c0_i32_1 = arith.constant 0 : i32
    return %c0_i32, %c0_i32_0 : i32, i32
  }
  func.func @transform_2(%arg0: i32) -> (i32, i32) {
    %c0_i32 = arith.constant 0 : i32
    %c0_i32_0 = arith.constant 0 : i32
    %c0_i32_1 = arith.constant 0 : i32
    return %c0_i32, %c0_i32_0 : i32, i32
  }
}

module attributes {stable_mosaic.version = 11 : i64} {
  func.func @_matmul_bias_kernel(%arg0: i32, %arg1: i32, %arg2: i32, %arg3: memref<128x384xbf16, #tpu.memory_space<vmem>>, %arg4: memref<384x128xbf16, #tpu.memory_space<vmem>>, %arg5: memref<1x128xf32, #tpu.memory_space<vmem>>, %arg6: memref<128x128xf32, #tpu.memory_space<vmem>>, %arg7: memref<128x128xf32, #tpu.memory_space<vmem>>) attributes {dimension_semantics = [#tpu.dimension_semantics<parallel>, #tpu.dimension_semantics<parallel>, #tpu.dimension_semantics<arbitrary>], iteration_bounds = array<i64: 1, 1, 3>, scalar_prefetch = 0 : i64, scratch_operands = 1 : i64, tpu.core_type = #tpu.core_type<tc>, window_params = [{transform_indices = @transform_0, window_bounds = array<i64: 128, 384>}, {transform_indices = @transform_1, window_bounds = array<i64: 384, 128>}, {transform_indices = @transform_2, window_bounds = array<i64: 1, 128>}, {transform_indices = @transform_3, window_bounds = array<i64: 128, 128>}]} {
    %c0_i32 = arith.constant 0 : i32
    %0 = arith.cmpi eq, %arg2, %c0_i32 : i32
    %1 = arith.extui %0 : i1 to i32
    %c0_i32_0 = arith.constant 0 : i32
    %2 = arith.cmpi ne, %1, %c0_i32_0 : i32
    scf.if %2 {
      %cst_9 = arith.constant 0.000000e+00 : f32
      %12 = vector.broadcast %cst_9 : f32 to vector<128x128xf32>
      %c0_10 = arith.constant 0 : index
      %c0_11 = arith.constant 0 : index
      %13 = vector.load %arg7[%c0_10, %c0_11] : memref<128x128xf32, #tpu.memory_space<vmem>>, vector<128x128xf32>
      tpu.vector_store %arg7[%c0_10, %c0_11], %12 {strides = array<i32>} : memref<128x128xf32, #tpu.memory_space<vmem>>, vector<128x128xf32>,
    } else {
    }
    %c0 = arith.constant 0 : index
    %c0_1 = arith.constant 0 : index
    %3 = vector.load %arg7[%c0, %c0_1] : memref<128x128xf32, #tpu.memory_space<vmem>>, vector<128x128xf32>
    %c0_2 = arith.constant 0 : index
    %c0_3 = arith.constant 0 : index
    %4 = vector.load %arg3[%c0_2, %c0_3] : memref<128x384xbf16, #tpu.memory_space<vmem>>, vector<128x384xbf16>
    %c0_4 = arith.constant 0 : index
    %c0_5 = arith.constant 0 : index
    %5 = vector.load %arg4[%c0_4, %c0_5] : memref<384x128xbf16, #tpu.memory_space<vmem>>, vector<384x128xbf16>
    %cst = arith.constant dense<0.000000e+00> : vector<128x128xf32>
    %6 = tpu.matmul %4, %5, %cst {dimension_numbers = #tpu.dot_dimension_numbers<[1], [0], [0], [1], [0, 0, 1, 1], [], []>} : vector<128x384xbf16>, vector<384x128xbf16>, vector<128x128xf32> -> vector<128x128xf32>
    %7 = arith.addf %3, %6 : vector<128x128xf32>
    %c0_6 = arith.constant 0 : index
    %c0_7 = arith.constant 0 : index
    %8 = vector.load %arg7[%c0_6, %c0_7] : memref<128x128xf32, #tpu.memory_space<vmem>>, vector<128x128xf32>
    tpu.vector_store %arg7[%c0_6, %c0_7], %7 {strides = array<i32>} : memref<128x128xf32, #tpu.memory_space<vmem>>, vector<128x128xf32>,
    %c2_i32 = arith.constant 2 : i32
    %9 = arith.cmpi eq, %arg2, %c2_i32 : i32
    %10 = arith.extui %9 : i1 to i32
    %c0_i32_8 = arith.constant 0 : i32
    %11 = arith.cmpi ne, %10, %c0_i32_8 : i32
    scf.if %11 {
      %c0_9 = arith.constant 0 : index
      %c0_10 = arith.constant 0 : index
      %12 = vector.load %arg7[%c0_9, %c0_10] : memref<128x128xf32, #tpu.memory_space<vmem>>, vector<128x128xf32>
      %c0_11 = arith.constant 0 : index
      %c0_12 = arith.constant 0 : index
      %13 = vector.load %arg5[%c0_11, %c0_12] : memref<1x128xf32, #tpu.memory_space<vmem>>, vector<1x128xf32>
      %14 = vector.broadcast %13 : vector<1x128xf32> to vector<128x128xf32>
      %15 = arith.addf %12, %14 : vector<128x128xf32>
      %c0_13 = arith.constant 0 : index
      %c0_14 = arith.constant 0 : index
      %16 = vector.load %arg6[%c0_13, %c0_14] : memref<128x128xf32, #tpu.memory_space<vmem>>, vector<128x128xf32>
      tpu.vector_store %arg6[%c0_13, %c0_14], %15 {strides = array<i32>} : memref<128x128xf32, #tpu.memory_space<vmem>>, vector<128x128xf32>,
    } else {
    }
    return
  }
  func.func @transform_0(%arg0: i32, %arg1: i32, %arg2: i32) -> (i32, i32) {
    %c0_i32 = arith.constant 0 : i32
    return %arg0, %arg2 : i32, i32
  }
  func.func @transform_1(%arg0: i32, %arg1: i32, %arg2: i32) -> (i32, i32) {
    %c0_i32 = arith.constant 0 : i32
    return %arg2, %arg1 : i32, i32
  }
  func.func @transform_2(%arg0: i32, %arg1: i32, %arg2: i32) -> (i32, i32) {
    %c0_i32 = arith.constant 0 : i32
    %c0_i32_0 = arith.constant 0 : i32
    return %c0_i32, %arg1 : i32, i32
  }
  func.func @transform_3(%arg0: i32, %arg1: i32, %arg2: i32) -> (i32, i32) {
    %c0_i32 = arith.constant 0 : i32
    return %arg0, %arg1 : i32, i32
  }
}

module attributes {stable_mosaic.version = 11 : i64} {
  func.func @_affine_act_kernel(%arg0: i32, %arg1: memref<128x128xf32, #tpu.memory_space<vmem>>, %arg2: memref<1x128xf32, #tpu.memory_space<vmem>>, %arg3: memref<1x128xf32, #tpu.memory_space<vmem>>, %arg4: memref<128x128xf32, #tpu.memory_space<vmem>>) attributes {dimension_semantics = [#tpu.dimension_semantics<parallel>], iteration_bounds = array<i64: 1>, scalar_prefetch = 0 : i64, scratch_operands = 0 : i64, tpu.core_type = #tpu.core_type<tc>, window_params = [{transform_indices = @transform_0, window_bounds = array<i64: 128, 128>}, {pipeline_mode = #tpu.pipeline_mode<synchronous>, transform_indices = @transform_1, window_bounds = array<i64: 1, 128>}, {pipeline_mode = #tpu.pipeline_mode<synchronous>, transform_indices = @transform_2, window_bounds = array<i64: 1, 128>}, {transform_indices = @transform_3, window_bounds = array<i64: 128, 128>}]} {
    %c0 = arith.constant 0 : index
    %c0_0 = arith.constant 0 : index
    %0 = vector.load %arg1[%c0, %c0_0] : memref<128x128xf32, #tpu.memory_space<vmem>>, vector<128x128xf32>
    %c0_1 = arith.constant 0 : index
    %c0_2 = arith.constant 0 : index
    %1 = vector.load %arg2[%c0_1, %c0_2] : memref<1x128xf32, #tpu.memory_space<vmem>>, vector<1x128xf32>
    %2 = vector.broadcast %1 : vector<1x128xf32> to vector<128x128xf32>
    %3 = arith.mulf %0, %2 : vector<128x128xf32>
    %c0_3 = arith.constant 0 : index
    %c0_4 = arith.constant 0 : index
    %4 = vector.load %arg3[%c0_3, %c0_4] : memref<1x128xf32, #tpu.memory_space<vmem>>, vector<1x128xf32>
    %5 = vector.broadcast %4 : vector<1x128xf32> to vector<128x128xf32>
    %6 = arith.addf %3, %5 : vector<128x128xf32>
    %cst = arith.constant 0.000000e+00 : f32
    %7 = vector.broadcast %cst : f32 to vector<128x128xf32>
    %8 = arith.maximumf %6, %7 : vector<128x128xf32>
    %c0_5 = arith.constant 0 : index
    %c0_6 = arith.constant 0 : index
    %9 = vector.load %arg4[%c0_5, %c0_6] : memref<128x128xf32, #tpu.memory_space<vmem>>, vector<128x128xf32>
    tpu.vector_store %arg4[%c0_5, %c0_6], %8 {strides = array<i32>} : memref<128x128xf32, #tpu.memory_space<vmem>>, vector<128x128xf32>,
    return
  }
  func.func @transform_0(%arg0: i32) -> (i32, i32) {
    %c0_i32 = arith.constant 0 : i32
    %c0_i32_0 = arith.constant 0 : i32
    return %arg0, %c0_i32 : i32, i32
  }
  func.func @transform_1(%arg0: i32) -> (i32, i32) {
    %c0_i32 = arith.constant 0 : i32
    %c0_i32_0 = arith.constant 0 : i32
    %c0_i32_1 = arith.constant 0 : i32
    return %c0_i32, %c0_i32_0 : i32, i32
  }
  func.func @transform_2(%arg0: i32) -> (i32, i32) {
    %c0_i32 = arith.constant 0 : i32
    %c0_i32_0 = arith.constant 0 : i32
    %c0_i32_1 = arith.constant 0 : i32
    return %c0_i32, %c0_i32_0 : i32, i32
  }
  func.func @transform_3(%arg0: i32) -> (i32, i32) {
    %c0_i32 = arith.constant 0 : i32
    %c0_i32_0 = arith.constant 0 : i32
    return %arg0, %c0_i32 : i32, i32
  }
}

module attributes {stable_mosaic.version = 11 : i64} {
  func.func @_matmul_bias_kernel(%arg0: i32, %arg1: i32, %arg2: i32, %arg3: memref<32x384xbf16, #tpu.memory_space<vmem>>, %arg4: memref<384x128xbf16, #tpu.memory_space<vmem>>, %arg5: memref<1x128xf32, #tpu.memory_space<vmem>>, %arg6: memref<32x128xf32, #tpu.memory_space<vmem>>, %arg7: memref<32x128xf32, #tpu.memory_space<vmem>>) attributes {dimension_semantics = [#tpu.dimension_semantics<parallel>, #tpu.dimension_semantics<parallel>, #tpu.dimension_semantics<arbitrary>], iteration_bounds = array<i64: 1, 1, 3>, scalar_prefetch = 0 : i64, scratch_operands = 1 : i64, tpu.core_type = #tpu.core_type<tc>, window_params = [{transform_indices = @transform_0, window_bounds = array<i64: 32, 384>}, {transform_indices = @transform_1, window_bounds = array<i64: 384, 128>}, {transform_indices = @transform_2, window_bounds = array<i64: 1, 128>}, {transform_indices = @transform_3, window_bounds = array<i64: 32, 128>}]} {
    %c0_i32 = arith.constant 0 : i32
    %0 = arith.cmpi eq, %arg2, %c0_i32 : i32
    %1 = arith.extui %0 : i1 to i32
    %c0_i32_0 = arith.constant 0 : i32
    %2 = arith.cmpi ne, %1, %c0_i32_0 : i32
    scf.if %2 {
      %cst_9 = arith.constant 0.000000e+00 : f32
      %12 = vector.broadcast %cst_9 : f32 to vector<32x128xf32>
      %c0_10 = arith.constant 0 : index
      %c0_11 = arith.constant 0 : index
      %13 = vector.load %arg7[%c0_10, %c0_11] : memref<32x128xf32, #tpu.memory_space<vmem>>, vector<32x128xf32>
      tpu.vector_store %arg7[%c0_10, %c0_11], %12 {strides = array<i32>} : memref<32x128xf32, #tpu.memory_space<vmem>>, vector<32x128xf32>,
    } else {
    }
    %c0 = arith.constant 0 : index
    %c0_1 = arith.constant 0 : index
    %3 = vector.load %arg7[%c0, %c0_1] : memref<32x128xf32, #tpu.memory_space<vmem>>, vector<32x128xf32>
    %c0_2 = arith.constant 0 : index
    %c0_3 = arith.constant 0 : index
    %4 = vector.load %arg3[%c0_2, %c0_3] : memref<32x384xbf16, #tpu.memory_space<vmem>>, vector<32x384xbf16>
    %c0_4 = arith.constant 0 : index
    %c0_5 = arith.constant 0 : index
    %5 = vector.load %arg4[%c0_4, %c0_5] : memref<384x128xbf16, #tpu.memory_space<vmem>>, vector<384x128xbf16>
    %cst = arith.constant dense<0.000000e+00> : vector<32x128xf32>
    %6 = tpu.matmul %4, %5, %cst {dimension_numbers = #tpu.dot_dimension_numbers<[1], [0], [0], [1], [0, 0, 1, 1], [], []>} : vector<32x384xbf16>, vector<384x128xbf16>, vector<32x128xf32> -> vector<32x128xf32>
    %7 = arith.addf %3, %6 : vector<32x128xf32>
    %c0_6 = arith.constant 0 : index
    %c0_7 = arith.constant 0 : index
    %8 = vector.load %arg7[%c0_6, %c0_7] : memref<32x128xf32, #tpu.memory_space<vmem>>, vector<32x128xf32>
    tpu.vector_store %arg7[%c0_6, %c0_7], %7 {strides = array<i32>} : memref<32x128xf32, #tpu.memory_space<vmem>>, vector<32x128xf32>,
    %c2_i32 = arith.constant 2 : i32
    %9 = arith.cmpi eq, %arg2, %c2_i32 : i32
    %10 = arith.extui %9 : i1 to i32
    %c0_i32_8 = arith.constant 0 : i32
    %11 = arith.cmpi ne, %10, %c0_i32_8 : i32
    scf.if %11 {
      %c0_9 = arith.constant 0 : index
      %c0_10 = arith.constant 0 : index
      %12 = vector.load %arg7[%c0_9, %c0_10] : memref<32x128xf32, #tpu.memory_space<vmem>>, vector<32x128xf32>
      %c0_11 = arith.constant 0 : index
      %c0_12 = arith.constant 0 : index
      %13 = vector.load %arg5[%c0_11, %c0_12] : memref<1x128xf32, #tpu.memory_space<vmem>>, vector<1x128xf32>
      %14 = vector.broadcast %13 : vector<1x128xf32> to vector<32x128xf32>
      %15 = arith.addf %12, %14 : vector<32x128xf32>
      %c0_13 = arith.constant 0 : index
      %c0_14 = arith.constant 0 : index
      %16 = vector.load %arg6[%c0_13, %c0_14] : memref<32x128xf32, #tpu.memory_space<vmem>>, vector<32x128xf32>
      tpu.vector_store %arg6[%c0_13, %c0_14], %15 {strides = array<i32>} : memref<32x128xf32, #tpu.memory_space<vmem>>, vector<32x128xf32>,
    } else {
    }
    return
  }
  func.func @transform_0(%arg0: i32, %arg1: i32, %arg2: i32) -> (i32, i32) {
    %c0_i32 = arith.constant 0 : i32
    return %arg0, %arg2 : i32, i32
  }
  func.func @transform_1(%arg0: i32, %arg1: i32, %arg2: i32) -> (i32, i32) {
    %c0_i32 = arith.constant 0 : i32
    return %arg2, %arg1 : i32, i32
  }
  func.func @transform_2(%arg0: i32, %arg1: i32, %arg2: i32) -> (i32, i32) {
    %c0_i32 = arith.constant 0 : i32
    %c0_i32_0 = arith.constant 0 : i32
    return %c0_i32, %arg1 : i32, i32
  }
  func.func @transform_3(%arg0: i32, %arg1: i32, %arg2: i32) -> (i32, i32) {
    %c0_i32 = arith.constant 0 : i32
    return %arg0, %arg1 : i32, i32
  }
}

module attributes {stable_mosaic.version = 11 : i64} {
  func.func @_bn_stats_kernel(%arg0: i32, %arg1: memref<32x128xf32, #tpu.memory_space<vmem>>, %arg2: memref<1x128xf32, #tpu.memory_space<vmem>>, %arg3: memref<1x128xf32, #tpu.memory_space<vmem>>) attributes {dimension_semantics = [#tpu.dimension_semantics<arbitrary>], iteration_bounds = array<i64: 1>, scalar_prefetch = 0 : i64, scratch_operands = 0 : i64, tpu.core_type = #tpu.core_type<tc>, window_params = [{transform_indices = @transform_0, window_bounds = array<i64: 32, 128>}, {pipeline_mode = #tpu.pipeline_mode<synchronous>, transform_indices = @transform_1, window_bounds = array<i64: 1, 128>}, {pipeline_mode = #tpu.pipeline_mode<synchronous>, transform_indices = @transform_2, window_bounds = array<i64: 1, 128>}]} {
    %c0_i32 = arith.constant 0 : i32
    %0 = arith.cmpi eq, %arg0, %c0_i32 : i32
    %1 = arith.extui %0 : i1 to i32
    %c0_i32_0 = arith.constant 0 : i32
    %2 = arith.cmpi ne, %1, %c0_i32_0 : i32
    scf.if %2 {
      %cst_11 = arith.constant 0.000000e+00 : f32
      %15 = vector.broadcast %cst_11 : f32 to vector<1x128xf32>
      %c0_12 = arith.constant 0 : index
      %c0_13 = arith.constant 0 : index
      %16 = vector.load %arg2[%c0_12, %c0_13] : memref<1x128xf32, #tpu.memory_space<vmem>>, vector<1x128xf32>
      tpu.vector_store %arg2[%c0_12, %c0_13], %15 {strides = array<i32>} : memref<1x128xf32, #tpu.memory_space<vmem>>, vector<1x128xf32>,
      %cst_14 = arith.constant 0.000000e+00 : f32
      %17 = vector.broadcast %cst_14 : f32 to vector<1x128xf32>
      %c0_15 = arith.constant 0 : index
      %c0_16 = arith.constant 0 : index
      %18 = vector.load %arg3[%c0_15, %c0_16] : memref<1x128xf32, #tpu.memory_space<vmem>>, vector<1x128xf32>
      tpu.vector_store %arg3[%c0_15, %c0_16], %17 {strides = array<i32>} : memref<1x128xf32, #tpu.memory_space<vmem>>, vector<1x128xf32>,
    } else {
    }
    %c0 = arith.constant 0 : index
    %c0_1 = arith.constant 0 : index
    %3 = vector.load %arg1[%c0, %c0_1] : memref<32x128xf32, #tpu.memory_space<vmem>>, vector<32x128xf32>
    %c0_2 = arith.constant 0 : index
    %c0_3 = arith.constant 0 : index
    %4 = vector.load %arg2[%c0_2, %c0_3] : memref<1x128xf32, #tpu.memory_space<vmem>>, vector<1x128xf32>
    %cst = arith.constant dense<0.000000e+00> : vector<128xf32>
    %5 = vector.multi_reduction <add>, %3, %cst [0] : vector<32x128xf32> to vector<128xf32>
    %6 = vector.shape_cast %5 : vector<128xf32> to vector<1x128xf32>
    %7 = arith.addf %4, %6 : vector<1x128xf32>
    %c0_4 = arith.constant 0 : index
    %c0_5 = arith.constant 0 : index
    %8 = vector.load %arg2[%c0_4, %c0_5] : memref<1x128xf32, #tpu.memory_space<vmem>>, vector<1x128xf32>
    tpu.vector_store %arg2[%c0_4, %c0_5], %7 {strides = array<i32>} : memref<1x128xf32, #tpu.memory_space<vmem>>, vector<1x128xf32>,
    %c0_6 = arith.constant 0 : index
    %c0_7 = arith.constant 0 : index
    %9 = vector.load %arg3[%c0_6, %c0_7] : memref<1x128xf32, #tpu.memory_space<vmem>>, vector<1x128xf32>
    %10 = arith.mulf %3, %3 : vector<32x128xf32>
    %cst_8 = arith.constant dense<0.000000e+00> : vector<128xf32>
    %11 = vector.multi_reduction <add>, %10, %cst_8 [0] : vector<32x128xf32> to vector<128xf32>
    %12 = vector.shape_cast %11 : vector<128xf32> to vector<1x128xf32>
    %13 = arith.addf %9, %12 : vector<1x128xf32>
    %c0_9 = arith.constant 0 : index
    %c0_10 = arith.constant 0 : index
    %14 = vector.load %arg3[%c0_9, %c0_10] : memref<1x128xf32, #tpu.memory_space<vmem>>, vector<1x128xf32>
    tpu.vector_store %arg3[%c0_9, %c0_10], %13 {strides = array<i32>} : memref<1x128xf32, #tpu.memory_space<vmem>>, vector<1x128xf32>,
    return
  }
  func.func @transform_0(%arg0: i32) -> (i32, i32) {
    %c0_i32 = arith.constant 0 : i32
    %c0_i32_0 = arith.constant 0 : i32
    return %arg0, %c0_i32 : i32, i32
  }
  func.func @transform_1(%arg0: i32) -> (i32, i32) {
    %c0_i32 = arith.constant 0 : i32
    %c0_i32_0 = arith.constant 0 : i32
    %c0_i32_1 = arith.constant 0 : i32
    return %c0_i32, %c0_i32_0 : i32, i32
  }
  func.func @transform_2(%arg0: i32) -> (i32, i32) {
    %c0_i32 = arith.constant 0 : i32
    %c0_i32_0 = arith.constant 0 : i32
    %c0_i32_1 = arith.constant 0 : i32
    return %c0_i32, %c0_i32_0 : i32, i32
  }
}

module attributes {stable_mosaic.version = 11 : i64} {
  func.func @_affine_act_kernel(%arg0: i32, %arg1: memref<32x128xf32, #tpu.memory_space<vmem>>, %arg2: memref<1x128xf32, #tpu.memory_space<vmem>>, %arg3: memref<1x128xf32, #tpu.memory_space<vmem>>, %arg4: memref<32x128xf32, #tpu.memory_space<vmem>>) attributes {dimension_semantics = [#tpu.dimension_semantics<parallel>], iteration_bounds = array<i64: 1>, scalar_prefetch = 0 : i64, scratch_operands = 0 : i64, tpu.core_type = #tpu.core_type<tc>, window_params = [{transform_indices = @transform_0, window_bounds = array<i64: 32, 128>}, {pipeline_mode = #tpu.pipeline_mode<synchronous>, transform_indices = @transform_1, window_bounds = array<i64: 1, 128>}, {pipeline_mode = #tpu.pipeline_mode<synchronous>, transform_indices = @transform_2, window_bounds = array<i64: 1, 128>}, {transform_indices = @transform_3, window_bounds = array<i64: 32, 128>}]} {
    %c0 = arith.constant 0 : index
    %c0_0 = arith.constant 0 : index
    %0 = vector.load %arg1[%c0, %c0_0] : memref<32x128xf32, #tpu.memory_space<vmem>>, vector<32x128xf32>
    %c0_1 = arith.constant 0 : index
    %c0_2 = arith.constant 0 : index
    %1 = vector.load %arg2[%c0_1, %c0_2] : memref<1x128xf32, #tpu.memory_space<vmem>>, vector<1x128xf32>
    %2 = vector.broadcast %1 : vector<1x128xf32> to vector<32x128xf32>
    %3 = arith.mulf %0, %2 : vector<32x128xf32>
    %c0_3 = arith.constant 0 : index
    %c0_4 = arith.constant 0 : index
    %4 = vector.load %arg3[%c0_3, %c0_4] : memref<1x128xf32, #tpu.memory_space<vmem>>, vector<1x128xf32>
    %5 = vector.broadcast %4 : vector<1x128xf32> to vector<32x128xf32>
    %6 = arith.addf %3, %5 : vector<32x128xf32>
    %cst = arith.constant 0.000000e+00 : f32
    %7 = vector.broadcast %cst : f32 to vector<32x128xf32>
    %8 = arith.maximumf %6, %7 : vector<32x128xf32>
    %c0_5 = arith.constant 0 : index
    %c0_6 = arith.constant 0 : index
    %9 = vector.load %arg4[%c0_5, %c0_6] : memref<32x128xf32, #tpu.memory_space<vmem>>, vector<32x128xf32>
    tpu.vector_store %arg4[%c0_5, %c0_6], %8 {strides = array<i32>} : memref<32x128xf32, #tpu.memory_space<vmem>>, vector<32x128xf32>,
    return
  }
  func.func @transform_0(%arg0: i32) -> (i32, i32) {
    %c0_i32 = arith.constant 0 : i32
    %c0_i32_0 = arith.constant 0 : i32
    return %arg0, %c0_i32 : i32, i32
  }
  func.func @transform_1(%arg0: i32) -> (i32, i32) {
    %c0_i32 = arith.constant 0 : i32
    %c0_i32_0 = arith.constant 0 : i32
    %c0_i32_1 = arith.constant 0 : i32
    return %c0_i32, %c0_i32_0 : i32, i32
  }
  func.func @transform_2(%arg0: i32) -> (i32, i32) {
    %c0_i32 = arith.constant 0 : i32
    %c0_i32_0 = arith.constant 0 : i32
    %c0_i32_1 = arith.constant 0 : i32
    return %c0_i32, %c0_i32_0 : i32, i32
  }
  func.func @transform_3(%arg0: i32) -> (i32, i32) {
    %c0_i32 = arith.constant 0 : i32
    %c0_i32_0 = arith.constant 0 : i32
    return %arg0, %c0_i32 : i32, i32
  }
}

module attributes {stable_mosaic.version = 11 : i64} {
  func.func @_affine_act_res_kernel(%arg0: i32, %arg1: memref<32x128xf32, #tpu.memory_space<vmem>>, %arg2: memref<1x128xf32, #tpu.memory_space<vmem>>, %arg3: memref<1x128xf32, #tpu.memory_space<vmem>>, %arg4: memref<32x128xf32, #tpu.memory_space<vmem>>, %arg5: memref<32x128xf32, #tpu.memory_space<vmem>>) attributes {dimension_semantics = [#tpu.dimension_semantics<parallel>], iteration_bounds = array<i64: 1>, scalar_prefetch = 0 : i64, scratch_operands = 0 : i64, tpu.core_type = #tpu.core_type<tc>, window_params = [{transform_indices = @transform_0, window_bounds = array<i64: 32, 128>}, {pipeline_mode = #tpu.pipeline_mode<synchronous>, transform_indices = @transform_1, window_bounds = array<i64: 1, 128>}, {pipeline_mode = #tpu.pipeline_mode<synchronous>, transform_indices = @transform_2, window_bounds = array<i64: 1, 128>}, {transform_indices = @transform_3, window_bounds = array<i64: 32, 128>}, {transform_indices = @transform_4, window_bounds = array<i64: 32, 128>}]} {
    %c0 = arith.constant 0 : index
    %c0_0 = arith.constant 0 : index
    %0 = vector.load %arg1[%c0, %c0_0] : memref<32x128xf32, #tpu.memory_space<vmem>>, vector<32x128xf32>
    %c0_1 = arith.constant 0 : index
    %c0_2 = arith.constant 0 : index
    %1 = vector.load %arg2[%c0_1, %c0_2] : memref<1x128xf32, #tpu.memory_space<vmem>>, vector<1x128xf32>
    %2 = vector.broadcast %1 : vector<1x128xf32> to vector<32x128xf32>
    %3 = arith.mulf %0, %2 : vector<32x128xf32>
    %c0_3 = arith.constant 0 : index
    %c0_4 = arith.constant 0 : index
    %4 = vector.load %arg3[%c0_3, %c0_4] : memref<1x128xf32, #tpu.memory_space<vmem>>, vector<1x128xf32>
    %5 = vector.broadcast %4 : vector<1x128xf32> to vector<32x128xf32>
    %6 = arith.addf %3, %5 : vector<32x128xf32>
    %c0_5 = arith.constant 0 : index
    %c0_6 = arith.constant 0 : index
    %7 = vector.load %arg4[%c0_5, %c0_6] : memref<32x128xf32, #tpu.memory_space<vmem>>, vector<32x128xf32>
    %8 = arith.addf %6, %7 : vector<32x128xf32>
    %c0_7 = arith.constant 0 : index
    %c0_8 = arith.constant 0 : index
    %9 = vector.load %arg5[%c0_7, %c0_8] : memref<32x128xf32, #tpu.memory_space<vmem>>, vector<32x128xf32>
    tpu.vector_store %arg5[%c0_7, %c0_8], %8 {strides = array<i32>} : memref<32x128xf32, #tpu.memory_space<vmem>>, vector<32x128xf32>,
    return
  }
  func.func @transform_0(%arg0: i32) -> (i32, i32) {
    %c0_i32 = arith.constant 0 : i32
    %c0_i32_0 = arith.constant 0 : i32
    return %arg0, %c0_i32 : i32, i32
  }
  func.func @transform_1(%arg0: i32) -> (i32, i32) {
    %c0_i32 = arith.constant 0 : i32
    %c0_i32_0 = arith.constant 0 : i32
    %c0_i32_1 = arith.constant 0 : i32
    return %c0_i32, %c0_i32_0 : i32, i32
  }
  func.func @transform_2(%arg0: i32) -> (i32, i32) {
    %c0_i32 = arith.constant 0 : i32
    %c0_i32_0 = arith.constant 0 : i32
    %c0_i32_1 = arith.constant 0 : i32
    return %c0_i32, %c0_i32_0 : i32, i32
  }
  func.func @transform_3(%arg0: i32) -> (i32, i32) {
    %c0_i32 = arith.constant 0 : i32
    %c0_i32_0 = arith.constant 0 : i32
    return %arg0, %c0_i32 : i32, i32
  }
  func.func @transform_4(%arg0: i32) -> (i32, i32) {
    %c0_i32 = arith.constant 0 : i32
    %c0_i32_0 = arith.constant 0 : i32
    return %arg0, %c0_i32 : i32, i32
  }
}

module attributes {stable_mosaic.version = 11 : i64} {
  func.func @_matmul_bias_kernel(%arg0: i32, %arg1: i32, %arg2: i32, %arg3: memref<32x512xbf16, #tpu.memory_space<vmem>>, %arg4: memref<512x256xbf16, #tpu.memory_space<vmem>>, %arg5: memref<1x256xf32, #tpu.memory_space<vmem>>, %arg6: memref<32x256xf32, #tpu.memory_space<vmem>>, %arg7: memref<32x256xf32, #tpu.memory_space<vmem>>) attributes {dimension_semantics = [#tpu.dimension_semantics<parallel>, #tpu.dimension_semantics<parallel>, #tpu.dimension_semantics<arbitrary>], iteration_bounds = array<i64: 1, 2, 1>, scalar_prefetch = 0 : i64, scratch_operands = 1 : i64, tpu.core_type = #tpu.core_type<tc>, window_params = [{transform_indices = @transform_0, window_bounds = array<i64: 32, 512>}, {transform_indices = @transform_1, window_bounds = array<i64: 512, 256>}, {transform_indices = @transform_2, window_bounds = array<i64: 1, 256>}, {transform_indices = @transform_3, window_bounds = array<i64: 32, 256>}]} {
    %c0_i32 = arith.constant 0 : i32
    %0 = arith.cmpi eq, %arg2, %c0_i32 : i32
    %1 = arith.extui %0 : i1 to i32
    %c0_i32_0 = arith.constant 0 : i32
    %2 = arith.cmpi ne, %1, %c0_i32_0 : i32
    scf.if %2 {
      %cst_10 = arith.constant 0.000000e+00 : f32
      %12 = vector.broadcast %cst_10 : f32 to vector<32x256xf32>
      %c0_11 = arith.constant 0 : index
      %c0_12 = arith.constant 0 : index
      %13 = vector.load %arg7[%c0_11, %c0_12] : memref<32x256xf32, #tpu.memory_space<vmem>>, vector<32x256xf32>
      tpu.vector_store %arg7[%c0_11, %c0_12], %12 {strides = array<i32>} : memref<32x256xf32, #tpu.memory_space<vmem>>, vector<32x256xf32>,
    } else {
    }
    %c0 = arith.constant 0 : index
    %c0_1 = arith.constant 0 : index
    %3 = vector.load %arg7[%c0, %c0_1] : memref<32x256xf32, #tpu.memory_space<vmem>>, vector<32x256xf32>
    %c0_2 = arith.constant 0 : index
    %c0_3 = arith.constant 0 : index
    %4 = vector.load %arg3[%c0_2, %c0_3] : memref<32x512xbf16, #tpu.memory_space<vmem>>, vector<32x512xbf16>
    %c0_4 = arith.constant 0 : index
    %c0_5 = arith.constant 0 : index
    %5 = vector.load %arg4[%c0_4, %c0_5] : memref<512x256xbf16, #tpu.memory_space<vmem>>, vector<512x256xbf16>
    %cst = arith.constant dense<0.000000e+00> : vector<32x256xf32>
    %6 = tpu.matmul %4, %5, %cst {dimension_numbers = #tpu.dot_dimension_numbers<[1], [0], [0], [1], [0, 0, 1, 1], [], []>} : vector<32x512xbf16>, vector<512x256xbf16>, vector<32x256xf32> -> vector<32x256xf32>
    %7 = arith.addf %3, %6 : vector<32x256xf32>
    %c0_6 = arith.constant 0 : index
    %c0_7 = arith.constant 0 : index
    %8 = vector.load %arg7[%c0_6, %c0_7] : memref<32x256xf32, #tpu.memory_space<vmem>>, vector<32x256xf32>
    tpu.vector_store %arg7[%c0_6, %c0_7], %7 {strides = array<i32>} : memref<32x256xf32, #tpu.memory_space<vmem>>, vector<32x256xf32>,
    %c0_i32_8 = arith.constant 0 : i32
    %9 = arith.cmpi eq, %arg2, %c0_i32_8 : i32
    %10 = arith.extui %9 : i1 to i32
    %c0_i32_9 = arith.constant 0 : i32
    %11 = arith.cmpi ne, %10, %c0_i32_9 : i32
    scf.if %11 {
      %c0_10 = arith.constant 0 : index
      %c0_11 = arith.constant 0 : index
      %12 = vector.load %arg7[%c0_10, %c0_11] : memref<32x256xf32, #tpu.memory_space<vmem>>, vector<32x256xf32>
      %c0_12 = arith.constant 0 : index
      %c0_13 = arith.constant 0 : index
      %13 = vector.load %arg5[%c0_12, %c0_13] : memref<1x256xf32, #tpu.memory_space<vmem>>, vector<1x256xf32>
      %14 = vector.broadcast %13 : vector<1x256xf32> to vector<32x256xf32>
      %15 = arith.addf %12, %14 : vector<32x256xf32>
      %c0_14 = arith.constant 0 : index
      %c0_15 = arith.constant 0 : index
      %16 = vector.load %arg6[%c0_14, %c0_15] : memref<32x256xf32, #tpu.memory_space<vmem>>, vector<32x256xf32>
      tpu.vector_store %arg6[%c0_14, %c0_15], %15 {strides = array<i32>} : memref<32x256xf32, #tpu.memory_space<vmem>>, vector<32x256xf32>,
    } else {
    }
    return
  }
  func.func @transform_0(%arg0: i32, %arg1: i32, %arg2: i32) -> (i32, i32) {
    %c0_i32 = arith.constant 0 : i32
    return %arg0, %arg2 : i32, i32
  }
  func.func @transform_1(%arg0: i32, %arg1: i32, %arg2: i32) -> (i32, i32) {
    %c0_i32 = arith.constant 0 : i32
    return %arg2, %arg1 : i32, i32
  }
  func.func @transform_2(%arg0: i32, %arg1: i32, %arg2: i32) -> (i32, i32) {
    %c0_i32 = arith.constant 0 : i32
    %c0_i32_0 = arith.constant 0 : i32
    return %c0_i32, %arg1 : i32, i32
  }
  func.func @transform_3(%arg0: i32, %arg1: i32, %arg2: i32) -> (i32, i32) {
    %c0_i32 = arith.constant 0 : i32
    return %arg0, %arg1 : i32, i32
  }
}

module attributes {stable_mosaic.version = 11 : i64} {
  func.func @_matmul_bias_kernel(%arg0: i32, %arg1: i32, %arg2: i32, %arg3: memref<128x512xbf16, #tpu.memory_space<vmem>>, %arg4: memref<512x256xbf16, #tpu.memory_space<vmem>>, %arg5: memref<1x256xf32, #tpu.memory_space<vmem>>, %arg6: memref<128x256xf32, #tpu.memory_space<vmem>>, %arg7: memref<128x256xf32, #tpu.memory_space<vmem>>) attributes {dimension_semantics = [#tpu.dimension_semantics<parallel>, #tpu.dimension_semantics<parallel>, #tpu.dimension_semantics<arbitrary>], iteration_bounds = array<i64: 1, 2, 1>, scalar_prefetch = 0 : i64, scratch_operands = 1 : i64, tpu.core_type = #tpu.core_type<tc>, window_params = [{transform_indices = @transform_0, window_bounds = array<i64: 128, 512>}, {transform_indices = @transform_1, window_bounds = array<i64: 512, 256>}, {transform_indices = @transform_2, window_bounds = array<i64: 1, 256>}, {transform_indices = @transform_3, window_bounds = array<i64: 128, 256>}]} {
    %c0_i32 = arith.constant 0 : i32
    %0 = arith.cmpi eq, %arg2, %c0_i32 : i32
    %1 = arith.extui %0 : i1 to i32
    %c0_i32_0 = arith.constant 0 : i32
    %2 = arith.cmpi ne, %1, %c0_i32_0 : i32
    scf.if %2 {
      %cst_10 = arith.constant 0.000000e+00 : f32
      %12 = vector.broadcast %cst_10 : f32 to vector<128x256xf32>
      %c0_11 = arith.constant 0 : index
      %c0_12 = arith.constant 0 : index
      %13 = vector.load %arg7[%c0_11, %c0_12] : memref<128x256xf32, #tpu.memory_space<vmem>>, vector<128x256xf32>
      tpu.vector_store %arg7[%c0_11, %c0_12], %12 {strides = array<i32>} : memref<128x256xf32, #tpu.memory_space<vmem>>, vector<128x256xf32>,
    } else {
    }
    %c0 = arith.constant 0 : index
    %c0_1 = arith.constant 0 : index
    %3 = vector.load %arg7[%c0, %c0_1] : memref<128x256xf32, #tpu.memory_space<vmem>>, vector<128x256xf32>
    %c0_2 = arith.constant 0 : index
    %c0_3 = arith.constant 0 : index
    %4 = vector.load %arg3[%c0_2, %c0_3] : memref<128x512xbf16, #tpu.memory_space<vmem>>, vector<128x512xbf16>
    %c0_4 = arith.constant 0 : index
    %c0_5 = arith.constant 0 : index
    %5 = vector.load %arg4[%c0_4, %c0_5] : memref<512x256xbf16, #tpu.memory_space<vmem>>, vector<512x256xbf16>
    %cst = arith.constant dense<0.000000e+00> : vector<128x256xf32>
    %6 = tpu.matmul %4, %5, %cst {dimension_numbers = #tpu.dot_dimension_numbers<[1], [0], [0], [1], [0, 0, 1, 1], [], []>} : vector<128x512xbf16>, vector<512x256xbf16>, vector<128x256xf32> -> vector<128x256xf32>
    %7 = arith.addf %3, %6 : vector<128x256xf32>
    %c0_6 = arith.constant 0 : index
    %c0_7 = arith.constant 0 : index
    %8 = vector.load %arg7[%c0_6, %c0_7] : memref<128x256xf32, #tpu.memory_space<vmem>>, vector<128x256xf32>
    tpu.vector_store %arg7[%c0_6, %c0_7], %7 {strides = array<i32>} : memref<128x256xf32, #tpu.memory_space<vmem>>, vector<128x256xf32>,
    %c0_i32_8 = arith.constant 0 : i32
    %9 = arith.cmpi eq, %arg2, %c0_i32_8 : i32
    %10 = arith.extui %9 : i1 to i32
    %c0_i32_9 = arith.constant 0 : i32
    %11 = arith.cmpi ne, %10, %c0_i32_9 : i32
    scf.if %11 {
      %c0_10 = arith.constant 0 : index
      %c0_11 = arith.constant 0 : index
      %12 = vector.load %arg7[%c0_10, %c0_11] : memref<128x256xf32, #tpu.memory_space<vmem>>, vector<128x256xf32>
      %c0_12 = arith.constant 0 : index
      %c0_13 = arith.constant 0 : index
      %13 = vector.load %arg5[%c0_12, %c0_13] : memref<1x256xf32, #tpu.memory_space<vmem>>, vector<1x256xf32>
      %14 = vector.broadcast %13 : vector<1x256xf32> to vector<128x256xf32>
      %15 = arith.addf %12, %14 : vector<128x256xf32>
      %c0_14 = arith.constant 0 : index
      %c0_15 = arith.constant 0 : index
      %16 = vector.load %arg6[%c0_14, %c0_15] : memref<128x256xf32, #tpu.memory_space<vmem>>, vector<128x256xf32>
      tpu.vector_store %arg6[%c0_14, %c0_15], %15 {strides = array<i32>} : memref<128x256xf32, #tpu.memory_space<vmem>>, vector<128x256xf32>,
    } else {
    }
    return
  }
  func.func @transform_0(%arg0: i32, %arg1: i32, %arg2: i32) -> (i32, i32) {
    %c0_i32 = arith.constant 0 : i32
    return %arg0, %arg2 : i32, i32
  }
  func.func @transform_1(%arg0: i32, %arg1: i32, %arg2: i32) -> (i32, i32) {
    %c0_i32 = arith.constant 0 : i32
    return %arg2, %arg1 : i32, i32
  }
  func.func @transform_2(%arg0: i32, %arg1: i32, %arg2: i32) -> (i32, i32) {
    %c0_i32 = arith.constant 0 : i32
    %c0_i32_0 = arith.constant 0 : i32
    return %c0_i32, %arg1 : i32, i32
  }
  func.func @transform_3(%arg0: i32, %arg1: i32, %arg2: i32) -> (i32, i32) {
    %c0_i32 = arith.constant 0 : i32
    return %arg0, %arg1 : i32, i32
  }
}

module attributes {stable_mosaic.version = 11 : i64} {
  func.func @_matmul_bias_kernel(%arg0: i32, %arg1: i32, %arg2: i32, %arg3: memref<256x128xbf16, #tpu.memory_space<vmem>>, %arg4: memref<128x128xbf16, #tpu.memory_space<vmem>>, %arg5: memref<1x128xf32, #tpu.memory_space<vmem>>, %arg6: memref<256x128xf32, #tpu.memory_space<vmem>>, %arg7: memref<256x128xf32, #tpu.memory_space<vmem>>) attributes {dimension_semantics = [#tpu.dimension_semantics<parallel>, #tpu.dimension_semantics<parallel>, #tpu.dimension_semantics<arbitrary>], iteration_bounds = array<i64: 2, 1, 49>, scalar_prefetch = 0 : i64, scratch_operands = 1 : i64, tpu.core_type = #tpu.core_type<tc>, window_params = [{transform_indices = @transform_0, window_bounds = array<i64: 256, 128>}, {transform_indices = @transform_1, window_bounds = array<i64: 128, 128>}, {transform_indices = @transform_2, window_bounds = array<i64: 1, 128>}, {transform_indices = @transform_3, window_bounds = array<i64: 256, 128>}]} {
    %c0_i32 = arith.constant 0 : i32
    %0 = arith.cmpi eq, %arg2, %c0_i32 : i32
    %1 = arith.extui %0 : i1 to i32
    %c0_i32_0 = arith.constant 0 : i32
    %2 = arith.cmpi ne, %1, %c0_i32_0 : i32
    scf.if %2 {
      %cst_9 = arith.constant 0.000000e+00 : f32
      %12 = vector.broadcast %cst_9 : f32 to vector<256x128xf32>
      %c0_10 = arith.constant 0 : index
      %c0_11 = arith.constant 0 : index
      %13 = vector.load %arg7[%c0_10, %c0_11] : memref<256x128xf32, #tpu.memory_space<vmem>>, vector<256x128xf32>
      tpu.vector_store %arg7[%c0_10, %c0_11], %12 {strides = array<i32>} : memref<256x128xf32, #tpu.memory_space<vmem>>, vector<256x128xf32>,
    } else {
    }
    %c0 = arith.constant 0 : index
    %c0_1 = arith.constant 0 : index
    %3 = vector.load %arg7[%c0, %c0_1] : memref<256x128xf32, #tpu.memory_space<vmem>>, vector<256x128xf32>
    %c0_2 = arith.constant 0 : index
    %c0_3 = arith.constant 0 : index
    %4 = vector.load %arg3[%c0_2, %c0_3] : memref<256x128xbf16, #tpu.memory_space<vmem>>, vector<256x128xbf16>
    %c0_4 = arith.constant 0 : index
    %c0_5 = arith.constant 0 : index
    %5 = vector.load %arg4[%c0_4, %c0_5] : memref<128x128xbf16, #tpu.memory_space<vmem>>, vector<128x128xbf16>
    %cst = arith.constant dense<0.000000e+00> : vector<256x128xf32>
    %6 = tpu.matmul %4, %5, %cst {dimension_numbers = #tpu.dot_dimension_numbers<[1], [0], [0], [1], [0, 0, 1, 1], [], []>} : vector<256x128xbf16>, vector<128x128xbf16>, vector<256x128xf32> -> vector<256x128xf32>
    %7 = arith.addf %3, %6 : vector<256x128xf32>
    %c0_6 = arith.constant 0 : index
    %c0_7 = arith.constant 0 : index
    %8 = vector.load %arg7[%c0_6, %c0_7] : memref<256x128xf32, #tpu.memory_space<vmem>>, vector<256x128xf32>
    tpu.vector_store %arg7[%c0_6, %c0_7], %7 {strides = array<i32>} : memref<256x128xf32, #tpu.memory_space<vmem>>, vector<256x128xf32>,
    %c48_i32 = arith.constant 48 : i32
    %9 = arith.cmpi eq, %arg2, %c48_i32 : i32
    %10 = arith.extui %9 : i1 to i32
    %c0_i32_8 = arith.constant 0 : i32
    %11 = arith.cmpi ne, %10, %c0_i32_8 : i32
    scf.if %11 {
      %c0_9 = arith.constant 0 : index
      %c0_10 = arith.constant 0 : index
      %12 = vector.load %arg7[%c0_9, %c0_10] : memref<256x128xf32, #tpu.memory_space<vmem>>, vector<256x128xf32>
      %c0_11 = arith.constant 0 : index
      %c0_12 = arith.constant 0 : index
      %13 = vector.load %arg5[%c0_11, %c0_12] : memref<1x128xf32, #tpu.memory_space<vmem>>, vector<1x128xf32>
      %14 = vector.broadcast %13 : vector<1x128xf32> to vector<256x128xf32>
      %15 = arith.addf %12, %14 : vector<256x128xf32>
      %16 = math.tanh %15 : vector<256x128xf32>
      %c0_13 = arith.constant 0 : index
      %c0_14 = arith.constant 0 : index
      %17 = vector.load %arg6[%c0_13, %c0_14] : memref<256x128xf32, #tpu.memory_space<vmem>>, vector<256x128xf32>
      tpu.vector_store %arg6[%c0_13, %c0_14], %16 {strides = array<i32>} : memref<256x128xf32, #tpu.memory_space<vmem>>, vector<256x128xf32>,
    } else {
    }
    return
  }
  func.func @transform_0(%arg0: i32, %arg1: i32, %arg2: i32) -> (i32, i32) {
    %c0_i32 = arith.constant 0 : i32
    return %arg0, %arg2 : i32, i32
  }
  func.func @transform_1(%arg0: i32, %arg1: i32, %arg2: i32) -> (i32, i32) {
    %c0_i32 = arith.constant 0 : i32
    return %arg2, %arg1 : i32, i32
  }
  func.func @transform_2(%arg0: i32, %arg1: i32, %arg2: i32) -> (i32, i32) {
    %c0_i32 = arith.constant 0 : i32
    %c0_i32_0 = arith.constant 0 : i32
    return %c0_i32, %arg1 : i32, i32
  }
  func.func @transform_3(%arg0: i32, %arg1: i32, %arg2: i32) -> (i32, i32) {
    %c0_i32 = arith.constant 0 : i32
    return %arg0, %arg1 : i32, i32
  }
}

</mosaic_0001>

<bundles_post_ra>
// kernel: resnet_generator_forward.28
= control target key start
LH: loop header
LB: loop body
LE: loop exit
PB: predicated region body
PF: predicated region fallthrough
CT: control target
= control target key end

     0   :  { %s1419_s12 = smov 0   ;;  %s1421_s13 = smov 0   ;;  %s1680_s0 = inlined_call_operand.vmem [shape: bf16[512,6272], index: 0, kind: input, shape index: {}]   ;;  %s1681_s1 = inlined_call_operand.vmem [shape: bf16[6272,128], index: 1, kind: input, shape index: {}]   ;;  %s1682_s2 = inlined_call_operand.vmem [shape: f32[1,128], index: 2, kind: input, shape index: {}]   ;;  %s1683_s3 = inlined_call_operand.vmem [shape: f32[512,128], index: 3, kind: output, shape index: {}]  }
   0x1   :  { %s1423_s14 = smov 0   ;;  %s1425_s15 = smov 0  }
   0x2   :  { %s1427_s16 = smov 0   ;;  %s1429_s17 = smov 0  }
   0x3   :  { %s1431_s18 = smov 0  }
   0x4 LB: > { %s25_s19 = sadd.s32 1, %s1388_s16  ;;  %s32_s20 = sadd.s32 1, %s1392_s17  ;;  %s1396_s18 = sphi %s1431_s18, %s13_s18   ;;  %s1392_s17 = sphi %s1429_s17, %s1689_s17   ;;  %s1388_s16 = sphi %s1427_s16, %s1688_s16   ;;  %s1384_s15 = sphi %s1425_s15, %s1687_s15   ;;  %s1380_s14 = sphi %s1423_s14, %s1686_s14   ;;  %s1376_s13 = sphi %s1421_s13, %s1685_s13   ;;  %s1372_s12 = sphi %s1419_s12, %s1684_s12  }
   0x5   : > { %p26_p0 = scmp.ge.s32.totalorder %s25_s19, 49  ;;  %p48_p1 = scmp.ne.s32.totalorder %s1376_s13, %s1372_s12 }
   0x6   : > { %p49_p2 = scmp.eq.s32.totalorder %s1396_s18, 0  ;;  %s41_s24 = sadd.s32 1, %s1376_s13 }
   0x7   : > { %s1691_s19 = smov (%p26_p0, %s25_s19), 0  ;;  %s1693_s20 = smov (!%p26_p0, %s32_s20), %s1392_s17 }
   0x8   : > { %p50_p3 = por %p49_p2, %p48_p1  ;;  %p34_p4 = scmp.ge.s32.totalorder %s1693_s20, 2 }
   0x9   : > { %s37_s21 = ssub.s32 %s1388_s16, %s1691_s19  ;;  %p1132_p6 = scmp.ge.s32.totalorder %s1396_s18, 98 }
   0xa   : > { %s1695_s20 = smov (%p34_p4, %s1693_s20), 0 }
   0xb   : > { %s36_s22 = ssub.s32 %s1392_s17, %s1695_s20  ;;  %162 = sbr.rel (%p1132_p6) target bundleno = 44 (0x2c), region = 20 }
   0xc   : > { %s38_s23 = sor.u32 %s37_s21, %s36_s22 }
   0xd   : > { %p39_p5 = scmp.eq.s32.totalorder %s38_s23, 0 }
   0xf   : > { %s1470_s25 = scalar_select %p39_p5, %s1376_s13, %s41_s24  }
  0x10   : > { %165 = sbr.rel (!%p50_p3) target bundleno = 44 (0x2c), region = 24  ;;  %s167_s26 = sand.u32 (%p50_p3), 1, %s1376_s13  }
  0x11   : > { %s1260_s27 = smul.u32 (%p50_p3), 1568, %s1392_s17  ;;  %s1133_s28 = sshll.u32 (%p50_p3), %s167_s26, 7 }
  0x12   : > { %s1484_s7 = scalar_lea.vmem (%p50_p3), [#allocation3], %s1133_s28 }
  0x13   : > { %s172_s29 = sadd.s32 (%p50_p3), %s1388_s16, %s1260_s27 }
  0x14   : > { %s1136_s30 = sshll.u32 (%p50_p3), %s172_s29, 2 }
  0x15   : > { %s1479_s6 = scalar_lea.vmem %s1680_s0, %s1136_s30 }
  0x16   : > { %v191_v0 = vld [vmem:[%s1479_s6] sm:$0xf]  ;;  %v193_v1 = vld [vmem:[%s1479_s6 + $0xc4] sm:$0xf]  ;;  %v195_v2 = vld [vmem:[%s1479_s6 + $0x188] sm:$0xf] }
  0x17   : > { %192 = vst [vmem:[%s1484_s7] sm:$0xf] %v191_v0  ;;  %194 = vst [vmem:[%s1484_s7 + $0x4] sm:$0xf] %v193_v1  ;;  %v197_v3 = vld [vmem:[%s1479_s6 + $0x24c] sm:$0xf] }
  0x18   : > { %196 = vst [vmem:[%s1484_s7 + $0x8] sm:$0xf] %v195_v2  ;;  %v199_v4 = vld [vmem:[%s1479_s6 + $0x310] sm:$0xf]  ;;  %v201_v5 = vld [vmem:[%s1479_s6 + $0x3d4] sm:$0xf] }
  0x19   : > { %198 = vst [vmem:[%s1484_s7 + $0xc] sm:$0xf] %v197_v3  ;;  %200 = vst [vmem:[%s1484_s7 + $0x10] sm:$0xf] %v199_v4  ;;  %v203_v6 = vld [vmem:[%s1479_s6 + $0x498] sm:$0xf] }
  0x1a   : > { %202 = vst [vmem:[%s1484_s7 + $0x14] sm:$0xf] %v201_v5  ;;  %v205_v7 = vld [vmem:[%s1479_s6 + $0x55c] sm:$0xf]  ;;  %v207_v8 = vld [vmem:[%s1479_s6 + $0x620] sm:$0xf] }
  0x1b   : > { %204 = vst [vmem:[%s1484_s7 + $0x18] sm:$0xf] %v203_v6  ;;  %206 = vst [vmem:[%s1484_s7 + $0x1c] sm:$0xf] %v205_v7  ;;  %v209_v9 = vld [vmem:[%s1479_s6 + $0x6e4] sm:$0xf] }
  0x1c   : > { %208 = vst [vmem:[%s1484_s7 + $0x20] sm:$0xf] %v207_v8  ;;  %v211_v10 = vld [vmem:[%s1479_s6 + $0x7a8] sm:$0xf]  ;;  %v213_v11 = vld [vmem:[%s1479_s6 + $0x86c] sm:$0xf] }
  0x1d   : > { %210 = vst [vmem:[%s1484_s7 + $0x24] sm:$0xf] %v209_v9  ;;  %212 = vst [vmem:[%s1484_s7 + $0x28] sm:$0xf] %v211_v10  ;;  %v215_v12 = vld [vmem:[%s1479_s6 + $0x930] sm:$0xf] }
  0x1e   : > { %214 = vst [vmem:[%s1484_s7 + $0x2c] sm:$0xf] %v213_v11  ;;  %v217_v13 = vld [vmem:[%s1479_s6 + $0x9f4] sm:$0xf]  ;;  %v219_v14 = vld [vmem:[%s1479_s6 + $0xab8] sm:$0xf] }
  0x1f   : > { %216 = vst [vmem:[%s1484_s7 + $0x30] sm:$0xf] %v215_v12  ;;  %218 = vst [vmem:[%s1484_s7 + $0x34] sm:$0xf] %v217_v13  ;;  %v221_v15 = vld [vmem:[%s1479_s6 + $0xb7c] sm:$0xf] }
  0x20   : > { %220 = vst [vmem:[%s1484_s7 + $0x38] sm:$0xf] %v219_v14  ;;  %v223_v16 = vld [vmem:[%s1479_s6 + $0xc40] sm:$0xf]  ;;  %v225_v17 = vld [vmem:[%s1479_s6 + $0xd04] sm:$0xf] }
  0x21   : > { %222 = vst [vmem:[%s1484_s7 + $0x3c] sm:$0xf] %v221_v15  ;;  %224 = vst [vmem:[%s1484_s7 + $0x40] sm:$0xf] %v223_v16  ;;  %v227_v18 = vld [vmem:[%s1479_s6 + $0xdc8] sm:$0xf] }
  0x22   : > { %226 = vst [vmem:[%s1484_s7 + $0x44] sm:$0xf] %v225_v17  ;;  %v229_v19 = vld [vmem:[%s1479_s6 + $0xe8c] sm:$0xf]  ;;  %v231_v20 = vld [vmem:[%s1479_s6 + $0xf50] sm:$0xf] }
  0x23   : > { %228 = vst [vmem:[%s1484_s7 + $0x48] sm:$0xf] %v227_v18  ;;  %230 = vst [vmem:[%s1484_s7 + $0x4c] sm:$0xf] %v229_v19  ;;  %v233_v21 = vld [vmem:[%s1479_s6 + $0x1014] sm:$0xf] }
  0x24   : > { %232 = vst [vmem:[%s1484_s7 + $0x50] sm:$0xf] %v231_v20  ;;  %v235_v22 = vld [vmem:[%s1479_s6 + $0x10d8] sm:$0xf]  ;;  %v237_v23 = vld [vmem:[%s1479_s6 + $0x119c] sm:$0xf] }
  0x25   : > { %234 = vst [vmem:[%s1484_s7 + $0x54] sm:$0xf] %v233_v21  ;;  %236 = vst [vmem:[%s1484_s7 + $0x58] sm:$0xf] %v235_v22  ;;  %v239_v24 = vld [vmem:[%s1479_s6 + $0x1260] sm:$0xf] }
  0x26   : > { %238 = vst [vmem:[%s1484_s7 + $0x5c] sm:$0xf] %v237_v23  ;;  %v241_v25 = vld [vmem:[%s1479_s6 + $0x1324] sm:$0xf]  ;;  %v243_v26 = vld [vmem:[%s1479_s6 + $0x13e8] sm:$0xf] }
  0x27   : > { %240 = vst [vmem:[%s1484_s7 + $0x60] sm:$0xf] %v239_v24  ;;  %242 = vst [vmem:[%s1484_s7 + $0x64] sm:$0xf] %v241_v25  ;;  %v245_v27 = vld [vmem:[%s1479_s6 + $0x14ac] sm:$0xf] }
  0x28   : > { %244 = vst [vmem:[%s1484_s7 + $0x68] sm:$0xf] %v243_v26  ;;  %v247_v28 = vld [vmem:[%s1479_s6 + $0x1570] sm:$0xf]  ;;  %v249_v29 = vld [vmem:[%s1479_s6 + $0x1634] sm:$0xf] }
  0x29   : > { %246 = vst [vmem:[%s1484_s7 + $0x6c] sm:$0xf] %v245_v27  ;;  %248 = vst [vmem:[%s1484_s7 + $0x70] sm:$0xf] %v247_v28  ;;  %v251_v30 = vld [vmem:[%s1479_s6 + $0x16f8] sm:$0xf] }
  0x2a   : > { %250 = vst [vmem:[%s1484_s7 + $0x74] sm:$0xf] %v249_v29  ;;  %v253_v31 = vld [vmem:[%s1479_s6 + $0x17bc] sm:$0xf]  ;;  %252 = vst [vmem:[%s1484_s7 + $0x78] sm:$0xf] %v251_v30 }
  0x2b   : > { %254 = vst [vmem:[%s1484_s7 + $0x7c] sm:$0xf] %v253_v31 }
  0x2c PF: > { %p1137_p7 = scmp.ge.s32.totalorder %s1396_s18, 1  ;;  %p353_p8 = scmp.lt.s32.totalorder %s1396_s18, 99 }
  0x2e   : > { %p354_p9 = pnand %p1137_p7, %p353_p8 }
  0x2f   : > { %s360_s8 = sand.u32 (!%p354_p9), 1, %s1372_s12   ;;  %s1139_s9 = sshll.u32 (!%p354_p9), %s1380_s14, 4 }
  0x30   : > { %357 = sbr.rel (%p354_p9) target bundleno = 356 (0x164), region = 69  ;;  %s1138_s10 = sshll.u32 (!%p354_p9), %s360_s8, 7 }
  0x31   : > { %p399_p10 = scmp.lt.s32.totalorder (!%p354_p9), %s1139_s9, 783  ;;  %s1141_s11 = sshll.u32 (!%p354_p9), %s1384_s15, 5 }
  0x32   : > { %p411_p11 = scmp.lt.s32.totalorder (!%p354_p9), %s1141_s11, 63  ;;  %s1562_s12 = scalar_lea.vmem (!%p354_p9), [#allocation3], %s1138_s10 }
  0x33   : > { %p1143_p12 = scmp.ne.s32.totalorder (!%p354_p9), %s1380_s14, 0 }
  0x35   : > { %s1697_s9 = smov (!%p399_p10, %s1139_s9), 783  ;;  %s1699_s11 = smov (!%p411_p11, %s1141_s11), 63 }
  0x36   : > { %s1140_s21 = sshll.u32 %s1697_s9, 2  ;;  %s1142_s26 = sshll.u32 %s1699_s11, 3 }
  0x37   : > { %s1555_s24 = scalar_lea.vmem %s1681_s1, %s1140_s21  ;;  %s1560_s29 = scalar_lea.vmem %s1683_s3, %s1142_s26 }
  0x38   : > { %423 = sbr.rel (%p1143_p12) target bundleno = 78 (0x4e), region = 77 }
  0x3d   : > { %v1398_v32 = vmov 0.0  }
  0x3e   : > { %424 = vst [vmem:[#allocation2 + $0xb0] sm:$0xff] %v1398_v32  ;;  %425 = vst [vmem:[#allocation2] sm:$0xff] %v1398_v32 }
  0x3f   : > { %426 = vst [vmem:[#allocation2 + $0xd8] sm:$0xff] %v1398_v32  ;;  %427 = vst [vmem:[#allocation2 + $0x18] sm:$0xff] %v1398_v32 }
  0x40   : > { %428 = vst [vmem:[#allocation2 + $0x50] sm:$0xff] %v1398_v32  ;;  %429 = vst [vmem:[#allocation2 + $0x68] sm:$0xff] %v1398_v32 }
  0x41   : > { %430 = vst [vmem:[#allocation2 + $0x30] sm:$0xff] %v1398_v32  ;;  %431 = vst [vmem:[#allocation2 + $0x48] sm:$0xff] %v1398_v32 }
  0x42   : > { %432 = vst [vmem:[#allocation2 + $0x80] sm:$0xff] %v1398_v32  ;;  %433 = vst [vmem:[#allocation2 + $0x88] sm:$0xff] %v1398_v32 }
  0x43   : > { %434 = vst [vmem:[#allocation2 + $0xe8] sm:$0xff] %v1398_v32  ;;  %435 = vst [vmem:[#allocation2 + $0xb8] sm:$0xff] %v1398_v32 }
  0x44   : > { %436 = vst [vmem:[#allocation2 + $0x60] sm:$0xff] %v1398_v32  ;;  %437 = vst [vmem:[#allocation2 + $0xf0] sm:$0xff] %v1398_v32 }
  0x45   : > { %438 = vst [vmem:[#allocation2 + $0x8] sm:$0xff] %v1398_v32  ;;  %439 = vst [vmem:[#allocation2 + $0x78] sm:$0xff] %v1398_v32 }
  0x46   : > { %440 = vst [vmem:[#allocation2 + $0x38] sm:$0xff] %v1398_v32  ;;  %441 = vst [vmem:[#allocation2 + $0x58] sm:$0xff] %v1398_v32 }
  0x47   : > { %442 = vst [vmem:[#allocation2 + $0x40] sm:$0xff] %v1398_v32  ;;  %443 = vst [vmem:[#allocation2 + $0xc8] sm:$0xff] %v1398_v32 }
  0x48   : > { %444 = vst [vmem:[#allocation2 + $0xe0] sm:$0xff] %v1398_v32  ;;  %445 = vst [vmem:[#allocation2 + $0x90] sm:$0xff] %v1398_v32 }
  0x49   : > { %446 = vst [vmem:[#allocation2 + $0x70] sm:$0xff] %v1398_v32  ;;  %447 = vst [vmem:[#allocation2 + $0xc0] sm:$0xff] %v1398_v32 }
  0x4a   : > { %448 = vst [vmem:[#allocation2 + $0xa8] sm:$0xff] %v1398_v32  ;;  %449 = vst [vmem:[#allocation2 + $0xd0] sm:$0xff] %v1398_v32 }
  0x4b   : > { %450 = vst [vmem:[#allocation2 + $0x10] sm:$0xff] %v1398_v32  ;;  %451 = vst [vmem:[#allocation2 + $0x28] sm:$0xff] %v1398_v32 }
  0x4c   : > { %452 = vst [vmem:[#allocation2 + $0xa0] sm:$0xff] %v1398_v32  ;;  %453 = vst [vmem:[#allocation2 + $0xf8] sm:$0xff] %v1398_v32 }
  0x4d   : > { %454 = vst [vmem:[#allocation2 + $0x20] sm:$0xff] %v1398_v32  ;;  %455 = vst [vmem:[#allocation2 + $0x98] sm:$0xff] %v1398_v32 }
  0x4e PF: > { %v1318_v33 = vld [vmem:[%s1555_s24 + $0x38] sm:$0xff]   ;;  %v1319_v34 = vld [vmem:[%s1555_s24 + $0x30] sm:$0xff]   ;;  %v1320_v35 = vld [vmem:[%s1555_s24 + $0x28] sm:$0xff]   ;;  %p1168_p13 = scmp.ne.s32.totalorder %s1380_s14, 48 }
  0x4f   : > { %1196 = vmatprep.subr.bf16.mxu0 %v1318_v33  ;;  %1244 = vmatprep.subr.bf16.mxu1 %v1318_v33  ;;  %v1321_v36 = vld [vmem:[%s1555_s24 + $0x20] sm:$0xff]   ;;  %v1322_v39 = vld [vmem:[%s1555_s24 + $0x18] sm:$0xff]   ;;  %v1323_v40 = vld [vmem:[%s1555_s24 + $0x10] sm:$0xff]  }
  0x50   : > { %1197 = vmatpush3.bf16.msra.mxu0 %v1318_v33  ;;  %1252 = vmatpush3.bf16.msra.mxu1 %v1318_v33  ;;  %v1326_v37 = vld [vmem:[%s1562_s12] sm:$0xff]   ;;  %v1324_v41 = vld [vmem:[%s1555_s24 + $0x8] sm:$0xff]   ;;  %v1330_v45 = vld [vmem:[%s1562_s12 + $0x10] sm:$0xff]  }
  0x51   : > { %1198 = vmatprep.subr.bf16.mxu0 %v1319_v34  ;;  %1245 = vmatprep.subr.bf16.mxu1 %v1319_v34  ;;  %v1327_v38 = vld [vmem:[%s1562_s12 + $0x40] sm:$0xff]   ;;  %v1328_v43 = vld [vmem:[%s1562_s12 + $0x8] sm:$0xff]   ;;  %v1331_v46 = vld [vmem:[%s1562_s12 + $0x50] sm:$0xff]  }
  0x52   : > { %1212 = vmatprep.mubr.bf16.mxu0 %v1326_v37  ;;  %1228 = vmatprep.mubr.bf16.mxu1 %v1327_v38  ;;  %v1325_v42 = vld [vmem:[%s1555_s24] sm:$0xff]   ;;  %v1329_v44 = vld [vmem:[%s1562_s12 + $0x48] sm:$0xff]   ;;  %v1332_v47 = vld [vmem:[%s1562_s12 + $0x18] sm:$0xff]  }
  0x53   : > { %v1333_v48 = vld [vmem:[%s1562_s12 + $0x58] sm:$0xff]   ;;  %v1334_v49 = vld [vmem:[%s1562_s12 + $0x20] sm:$0xff]   ;;  %v1336_v51 = vld [vmem:[%s1562_s12 + $0x28] sm:$0xff]  }
  0x54   : > { %1199 = vmatpush3.bf16.msra.mxu0 %v1319_v34  ;;  %1253 = vmatpush3.bf16.msra.mxu1 %v1319_v34  ;;  %v1335_v50 = vld [vmem:[%s1562_s12 + $0x60] sm:$0xff]   ;;  %v1337_v52 = vld [vmem:[%s1562_s12 + $0x68] sm:$0xff]   ;;  %v1338_v53 = vld [vmem:[%s1562_s12 + $0x30] sm:$0xff]  }
  0x55   : > { %1200 = vmatprep.subr.bf16.mxu0 %v1320_v35  ;;  %1246 = vmatprep.subr.bf16.mxu1 %v1320_v35  ;;  %v1339_v54 = vld [vmem:[%s1562_s12 + $0x70] sm:$0xff]   ;;  %v1340_v55 = vld [vmem:[%s1562_s12 + $0x38] sm:$0xff]   ;;  %v474_v58 = vld [vmem:[#allocation2 + $0x40] sm:$0xff] }
  0x56   : > { %v1341_v56 = vld [vmem:[%s1562_s12 + $0x78] sm:$0xff]   ;;  %v456_v61 = vld [vmem:[#allocation2 + $0xb0] sm:$0xff]  ;;  %v475_v4 = vld [vmem:[#allocation2 + $0xc8] sm:$0xff] }
  0x57   : > { %v458_v57 = vld [vmem:[#allocation2 + $0xd8] sm:$0xff]  ;;  %v457_v9 = vld [vmem:[#allocation2] sm:$0xff]  ;;  %v462_v15 = vld [vmem:[#allocation2 + $0x30] sm:$0xff] }
  0x58   : > { %1201 = vmatpush3.bf16.msra.mxu0 %v1320_v35  ;;  %1254 = vmatpush3.bf16.msra.mxu1 %v1320_v35  ;;  %v472_v62 = vld [vmem:[#allocation2 + $0x38] sm:$0xff]  ;;  %v478_v16 = vld [vmem:[#allocation2 + $0x70] sm:$0xff]  ;;  %v476_v22 = vld [vmem:[#allocation2 + $0xe0] sm:$0xff] }
  0x59   : > { %1202 = vmatprep.subr.bf16.mxu0 %v1321_v36  ;;  %1247 = vmatprep.subr.bf16.mxu1 %v1321_v36  ;;  %v459_v3 = vld [vmem:[#allocation2 + $0x18] sm:$0xff]  ;;  %v460_v21 = vld [vmem:[#allocation2 + $0x50] sm:$0xff]  ;;  %v463_v27 = vld [vmem:[#allocation2 + $0x48] sm:$0xff] }
  0x5a   : > { %v473_v10 = vld [vmem:[#allocation2 + $0x58] sm:$0xff]  ;;  %v479_v28 = vld [vmem:[#allocation2 + $0xc0] sm:$0xff]  ;;  %v461_v33 = vld [vmem:[#allocation2 + $0x68] sm:$0xff] }
  0x5b   : > { %v477_v34 = vld [vmem:[#allocation2 + $0x90] sm:$0xff] }
  0x5c   : > { %1203 = vmatpush3.bf16.msra.mxu0 %v1321_v36  ;;  %1255 = vmatpush3.bf16.msra.mxu1 %v1321_v36 }
  0x5d   : > { %1204 = vmatprep.subr.bf16.mxu0 %v1322_v39  ;;  %1248 = vmatprep.subr.bf16.mxu1 %v1322_v39 }
  0x60   : > { %1205 = vmatpush3.bf16.msra.mxu0 %v1322_v39  ;;  %1256 = vmatpush3.bf16.msra.mxu1 %v1322_v39  ;;  %v466_v39 = vld [vmem:[#allocation2 + $0xe8] sm:$0xff] }
  0x61   : > { %1206 = vmatprep.subr.bf16.mxu0 %v1323_v40  ;;  %1249 = vmatprep.subr.bf16.mxu1 %v1323_v40 }
  0x64   : > { %1207 = vmatpush3.bf16.msra.mxu0 %v1323_v40  ;;  %1257 = vmatpush3.bf16.msra.mxu1 %v1323_v40  ;;  %v482_v40 = vld [vmem:[#allocation2 + $0x10] sm:$0xff] }
  0x65   : > { %1208 = vmatprep.subr.bf16.mxu0 %v1324_v41  ;;  %1250 = vmatprep.subr.bf16.mxu1 %v1324_v41 }
  0x68   : > { %1209 = vmatpush3.bf16.msra.mxu0 %v1324_v41  ;;  %1258 = vmatpush3.bf16.msra.mxu1 %v1324_v41 }
  0x69   : > { %1210 = vmatprep.subr.bf16.mxu0 %v1325_v42  ;;  %1251 = vmatprep.subr.bf16.mxu1 %v1325_v42 }
  0x6c   : > { %1211 = vmatpush3.bf16.msra.mxu0 %v1325_v42  ;;  %1259 = vmatpush3.bf16.msra.mxu1 %v1325_v42 }
  0x6f   : > { %1213 = vmatmul.mubr.bf16.vlgmr.msra.gmra.mxu0 %v1328_v43  ;;  %1229 = vmatmul.mubr.bf16.vlgmr.msra.gmra.mxu1 %v1329_v44 }
  0x70   : > { %1216 = vmatprep.mubr.bf16.mxu0 %v1330_v45  ;;  %1232 = vmatprep.mubr.bf16.mxu1 %v1331_v46  ;;  %v464_v45 = vld [vmem:[#allocation2 + $0x80] sm:$0xff]  ;;  %v480_v46 = vld [vmem:[#allocation2 + $0xa8] sm:$0xff] }
  0x77   : > { %1217 = vmatmul.mubr.bf16.gmra.mxu0 %v1332_v47  ;;  %1233 = vmatmul.mubr.bf16.gmra.mxu1 %v1333_v48 }
  0x78   : > { %1220 = vmatprep.mubr.bf16.mxu0 %v1334_v49  ;;  %1236 = vmatprep.mubr.bf16.mxu1 %v1335_v50 }
  0x7f   : > { %1221 = vmatmul.mubr.bf16.gmra.mxu0 %v1336_v51  ;;  %1237 = vmatmul.mubr.bf16.gmra.mxu1 %v1337_v52  ;;  %v467_v51 = vld [vmem:[#allocation2 + $0xb8] sm:$0xff]  ;;  %v483_v52 = vld [vmem:[#allocation2 + $0x28] sm:$0xff] }
  0x80   : > { %1224 = vmatprep.mubr.bf16.mxu0 %v1338_v53  ;;  %1240 = vmatprep.mubr.bf16.mxu1 %v1339_v54 }
  0x87   : > { %1225 = vmatmul.mubr.bf16.gmra.mxu0 %v1340_v55  ;;  %1241 = vmatmul.mubr.bf16.gmra.mxu1 %v1341_v56 }
 0x12f   : > { %v1214_v59 = vpop.f32.mrf.mxu0  ;;  %v1230_v60 = vpop.f32.mrf.mxu1 }
 0x130   : > { %v843_v63 = vadd.f32 %v1214_v59, %v458_v57  ;;  %v859_v0 = vadd.f32 %v1230_v60, %v474_v58  ;;  %v465_v57 = vld [vmem:[#allocation2 + $0x88] sm:$0xff]  ;;  %v481_v58 = vld [vmem:[#allocation2 + $0xd0] sm:$0xff] }
 0x131   : > { %v714_v1 = vpop.f32.mrf.mxu0  ;;  %v778_v2 = vpop.f32.mrf.mxu1 }
 0x132   : > { %875 = vst [vmem:[#allocation2 + $0xd8] sm:$0xff] %v843_v63  ;;  %891 = vst [vmem:[#allocation2 + $0x40] sm:$0xff] %v859_v0  ;;  %v841_v5 = vadd.f32 %v714_v1, %v456_v61  ;;  %v857_v6 = vadd.f32 %v778_v2, %v472_v62  ;;  %v470_v63 = vld [vmem:[#allocation2 + $0x8] sm:$0xff]  ;;  %v486_v0 = vld [vmem:[#allocation2 + $0x20] sm:$0xff] }
 0x133   : > { %v1215_v7 = vpop.f32.mrf.mxu0  ;;  %v1231_v8 = vpop.f32.mrf.mxu1 }
 0x134   : > { %873 = vst [vmem:[#allocation2 + $0xb0] sm:$0xff] %v841_v5  ;;  %889 = vst [vmem:[#allocation2 + $0x38] sm:$0xff] %v857_v6  ;;  %v844_v11 = vadd.f32 %v1215_v7, %v459_v3  ;;  %v860_v12 = vadd.f32 %v1231_v8, %v475_v4  ;;  %v468_v5 = vld [vmem:[#allocation2 + $0x60] sm:$0xff] }
 0x135   : > { %v717_v13 = vpop.f32.mrf.mxu0  ;;  %v781_v14 = vpop.f32.mrf.mxu1  ;;  %v484_v6 = vld [vmem:[#allocation2 + $0xa0] sm:$0xff] }
 0x136   : > { %876 = vst [vmem:[#allocation2 + $0x18] sm:$0xff] %v844_v11  ;;  %892 = vst [vmem:[#allocation2 + $0xc8] sm:$0xff] %v860_v12  ;;  %v842_v17 = vadd.f32 %v717_v13, %v457_v9  ;;  %v858_v18 = vadd.f32 %v781_v14, %v473_v10  ;;  %v471_v11 = vld [vmem:[#allocation2 + $0x78] sm:$0xff] }
 0x137   : > { %v1218_v19 = vpop.f32.mrf.mxu0  ;;  %v1234_v20 = vpop.f32.mrf.mxu1  ;;  %v487_v12 = vld [vmem:[#allocation2 + $0x98] sm:$0xff] }
 0x138   : > { %874 = vst [vmem:[#allocation2] sm:$0xff] %v842_v17  ;;  %890 = vst [vmem:[#allocation2 + $0x58] sm:$0xff] %v858_v18  ;;  %v847_v23 = vadd.f32 %v1218_v19, %v462_v15  ;;  %v863_v24 = vadd.f32 %v1234_v20, %v478_v16  ;;  %v469_v17 = vld [vmem:[#allocation2 + $0xf0] sm:$0xff]  ;;  %v485_v18 = vld [vmem:[#allocation2 + $0xf8] sm:$0xff] }
 0x139   : > { %v730_v25 = vpop.f32.mrf.mxu0  ;;  %v794_v26 = vpop.f32.mrf.mxu1 }
 0x13a   : > { %879 = vst [vmem:[#allocation2 + $0x30] sm:$0xff] %v847_v23  ;;  %895 = vst [vmem:[#allocation2 + $0x70] sm:$0xff] %v863_v24  ;;  %v845_v29 = vadd.f32 %v730_v25, %v460_v21  ;;  %v861_v30 = vadd.f32 %v794_v26, %v476_v22 }
 0x13b   : > { %v1219_v31 = vpop.f32.mrf.mxu0  ;;  %v1235_v32 = vpop.f32.mrf.mxu1 }
 0x13c   : > { %877 = vst [vmem:[#allocation2 + $0x50] sm:$0xff] %v845_v29  ;;  %893 = vst [vmem:[#allocation2 + $0xe0] sm:$0xff] %v861_v30  ;;  %v848_v35 = vadd.f32 %v1219_v31, %v463_v27  ;;  %v864_v36 = vadd.f32 %v1235_v32, %v479_v28 }
 0x13d   : > { %v733_v37 = vpop.f32.mrf.mxu0  ;;  %v797_v38 = vpop.f32.mrf.mxu1 }
 0x13e   : > { %880 = vst [vmem:[#allocation2 + $0x48] sm:$0xff] %v848_v35  ;;  %896 = vst [vmem:[#allocation2 + $0xc0] sm:$0xff] %v864_v36  ;;  %v846_v41 = vadd.f32 %v733_v37, %v461_v33  ;;  %v862_v42 = vadd.f32 %v797_v38, %v477_v34 }
 0x13f   : > { %v1222_v43 = vpop.f32.mrf.mxu0  ;;  %v1238_v44 = vpop.f32.mrf.mxu1 }
 0x140   : > { %878 = vst [vmem:[#allocation2 + $0x68] sm:$0xff] %v846_v41  ;;  %894 = vst [vmem:[#allocation2 + $0x90] sm:$0xff] %v862_v42  ;;  %v851_v47 = vadd.f32 %v1222_v43, %v466_v39  ;;  %v867_v48 = vadd.f32 %v1238_v44, %v482_v40 }
 0x141   : > { %v746_v49 = vpop.f32.mrf.mxu0  ;;  %v810_v50 = vpop.f32.mrf.mxu1 }
 0x142   : > { %883 = vst [vmem:[#allocation2 + $0xe8] sm:$0xff] %v851_v47  ;;  %899 = vst [vmem:[#allocation2 + $0x10] sm:$0xff] %v867_v48  ;;  %v849_v53 = vadd.f32 %v746_v49, %v464_v45  ;;  %v865_v54 = vadd.f32 %v810_v50, %v480_v46 }
 0x143   : > { %v1223_v55 = vpop.f32.mrf.mxu0  ;;  %v1239_v56 = vpop.f32.mrf.mxu1 }
 0x144   : > { %881 = vst [vmem:[#allocation2 + $0x80] sm:$0xff] %v849_v53  ;;  %897 = vst [vmem:[#allocation2 + $0xa8] sm:$0xff] %v865_v54  ;;  %v852_v59 = vadd.f32 %v1223_v55, %v467_v51  ;;  %v868_v60 = vadd.f32 %v1239_v56, %v483_v52 }
 0x145   : > { %v749_v61 = vpop.f32.mrf.mxu0  ;;  %v813_v62 = vpop.f32.mrf.mxu1 }
 0x146   : > { %884 = vst [vmem:[#allocation2 + $0xb8] sm:$0xff] %v852_v59  ;;  %900 = vst [vmem:[#allocation2 + $0x28] sm:$0xff] %v868_v60  ;;  %v850_v1 = vadd.f32 %v749_v61, %v465_v57  ;;  %v866_v2 = vadd.f32 %v813_v62, %v481_v58 }
 0x147   : > { %v1226_v3 = vpop.f32.mrf.mxu0  ;;  %v1242_v4 = vpop.f32.mrf.mxu1 }
 0x148   : > { %882 = vst [vmem:[#allocation2 + $0x88] sm:$0xff] %v850_v1  ;;  %898 = vst [vmem:[#allocation2 + $0xd0] sm:$0xff] %v866_v2  ;;  %v855_v7 = vadd.f32 %v1226_v3, %v470_v63  ;;  %v871_v8 = vadd.f32 %v1242_v4, %v486_v0 }
 0x149   : > { %v762_v9 = vpop.f32.mrf.mxu0  ;;  %v826_v10 = vpop.f32.mrf.mxu1 }
 0x14a   : > { %887 = vst [vmem:[#allocation2 + $0x8] sm:$0xff] %v855_v7  ;;  %903 = vst [vmem:[#allocation2 + $0x20] sm:$0xff] %v871_v8  ;;  %v853_v13 = vadd.f32 %v762_v9, %v468_v5  ;;  %v869_v14 = vadd.f32 %v826_v10, %v484_v6 }
 0x14b   : > { %v1227_v15 = vpop.f32.mrf.mxu0  ;;  %v1243_v16 = vpop.f32.mrf.mxu1 }
 0x14c   : > { %885 = vst [vmem:[#allocation2 + $0x60] sm:$0xff] %v853_v13  ;;  %901 = vst [vmem:[#allocation2 + $0xa0] sm:$0xff] %v869_v14  ;;  %v856_v19 = vadd.f32 %v1227_v15, %v471_v11  ;;  %v872_v20 = vadd.f32 %v1243_v16, %v487_v12  ;;  %908 = sbr.rel (%p1168_p13) target bundleno = 356 (0x164), region = 81 }
 0x14d   : > { %v765_v21 = vpop.f32.mrf.mxu0  ;;  %v829_v22 = vpop.f32.mrf.mxu1 }
 0x14e   : > { %888 = vst [vmem:[#allocation2 + $0x78] sm:$0xff] %v856_v19  ;;  %904 = vst [vmem:[#allocation2 + $0x98] sm:$0xff] %v872_v20  ;;  %v854_v23 = vadd.f32 %v765_v21, %v469_v17  ;;  %v870_v24 = vadd.f32 %v829_v22, %v485_v18 }
 0x150   : > { %886 = vst [vmem:[#allocation2 + $0xf0] sm:$0xff] %v854_v23  ;;  %902 = vst [vmem:[#allocation2 + $0xf8] sm:$0xff] %v870_v24 }
 0x151   : > { %v909_v25 = vld [vmem:[#allocation2 + $0xb0] sm:$0xff]  ;;  %v1593_v26 = vld [vmem:[%s1682_s2] ss:$0 sm:$0xff]  ;;  %v911_v30 = vld [vmem:[#allocation2 + $0xd8] sm:$0xff] }
 0x152   : > { %v910_v27 = vld [vmem:[#allocation2] sm:$0xff]  ;;  %v948_v28 = vadd.f32 %v1593_v26, %v909_v25  ;;  %v912_v31 = vld [vmem:[#allocation2 + $0x18] sm:$0xff]  ;;  %v913_v32 = vld [vmem:[#allocation2 + $0x50] sm:$0xff]  ;;  %v950_v33 = vadd.f32 %v1593_v26, %v911_v30 }
 0x153   : > { %v949_v29 = vadd.f32 %v1593_v26, %v910_v27  ;;  %v951_v34 = vadd.f32 %v1593_v26, %v912_v31  ;;  %v952_v35 = vadd.f32 %v1593_v26, %v913_v32  ;;  %v914_v36 = vld [vmem:[#allocation2 + $0x68] sm:$0xff]  ;;  %v915_v37 = vld [vmem:[#allocation2 + $0x30] sm:$0xff]  ;;  %v917_v42 = vld [vmem:[#allocation2 + $0x80] sm:$0xff] }
 0x154   : > { %v916_v38 = vld [vmem:[#allocation2 + $0x48] sm:$0xff]  ;;  %980 = vst [vmem:[%s1560_s29] sm:$0xff] %v948_v28  ;;  %v953_v39 = vadd.f32 %v1593_v26, %v914_v36  ;;  %v954_v40 = vadd.f32 %v1593_v26, %v915_v37  ;;  %982 = vst [vmem:[%s1560_s29 + $0x10] sm:$0xff] %v950_v33  ;;  %v956_v45 = vadd.f32 %v1593_v26, %v917_v42  ;;  %v920_v48 = vld [vmem:[#allocation2 + $0xb8] sm:$0xff] }
 0x155   : > { %981 = vst [vmem:[%s1560_s29 + $0x8] sm:$0xff] %v949_v29  ;;  %v955_v41 = vadd.f32 %v1593_v26, %v916_v38  ;;  %v918_v43 = vld [vmem:[#allocation2 + $0x88] sm:$0xff]  ;;  %983 = vst [vmem:[%s1560_s29 + $0x18] sm:$0xff] %v951_v34  ;;  %v921_v49 = vld [vmem:[#allocation2 + $0x60] sm:$0xff]  ;;  %v959_v51 = vadd.f32 %v1593_v26, %v920_v48 }
 0x156   : > { %v919_v44 = vld [vmem:[#allocation2 + $0xe8] sm:$0xff]  ;;  %984 = vst [vmem:[%s1560_s29 + $0x20] sm:$0xff] %v952_v35  ;;  %v957_v46 = vadd.f32 %v1593_v26, %v918_v43  ;;  %985 = vst [vmem:[%s1560_s29 + $0x28] sm:$0xff] %v953_v39  ;;  %v960_v52 = vadd.f32 %v1593_v26, %v921_v49  ;;  %v924_v55 = vld [vmem:[#allocation2 + $0x78] sm:$0xff] }
 0x157   : > { %v958_v47 = vadd.f32 %v1593_v26, %v919_v44  ;;  %v922_v50 = vld [vmem:[#allocation2 + $0xf0] sm:$0xff]  ;;  %986 = vst [vmem:[%s1560_s29 + $0x30] sm:$0xff] %v954_v40  ;;  %987 = vst [vmem:[%s1560_s29 + $0x38] sm:$0xff] %v955_v41  ;;  %v923_v54 = vld [vmem:[#allocation2 + $0x8] sm:$0xff]  ;;  %v963_v58 = vadd.f32 %v1593_v26, %v924_v55 }
 0x158   : > { %v961_v53 = vadd.f32 %v1593_v26, %v922_v50  ;;  %v925_v56 = vld [vmem:[#allocation2 + $0x38] sm:$0xff]  ;;  %988 = vst [vmem:[%s1560_s29 + $0x40] sm:$0xff] %v956_v45  ;;  %989 = vst [vmem:[%s1560_s29 + $0x48] sm:$0xff] %v957_v46  ;;  %v962_v57 = vadd.f32 %v1593_v26, %v923_v54  ;;  %v927_v61 = vld [vmem:[#allocation2 + $0x40] sm:$0xff] }
 0x159   : > { %990 = vst [vmem:[%s1560_s29 + $0x50] sm:$0xff] %v958_v47  ;;  %v964_v59 = vadd.f32 %v1593_v26, %v925_v56  ;;  %v926_v60 = vld [vmem:[#allocation2 + $0x58] sm:$0xff]  ;;  %v928_v62 = vld [vmem:[#allocation2 + $0xc8] sm:$0xff]  ;;  %991 = vst [vmem:[%s1560_s29 + $0x58] sm:$0xff] %v959_v51  ;;  %v966_v0 = vadd.f32 %v1593_v26, %v927_v61 }
 0x15a   : > { %992 = vst [vmem:[%s1560_s29 + $0x60] sm:$0xff] %v960_v52  ;;  %993 = vst [vmem:[%s1560_s29 + $0x68] sm:$0xff] %v961_v53  ;;  %v965_v63 = vadd.f32 %v1593_v26, %v926_v60  ;;  %v967_v1 = vadd.f32 %v1593_v26, %v928_v62  ;;  %v929_v2 = vld [vmem:[#allocation2 + $0xe0] sm:$0xff]  ;;  %v930_v3 = vld [vmem:[#allocation2 + $0x90] sm:$0xff] }
 0x15b   : > { %v931_v4 = vld [vmem:[#allocation2 + $0x70] sm:$0xff]  ;;  %994 = vst [vmem:[%s1560_s29 + $0x70] sm:$0xff] %v962_v57  ;;  %995 = vst [vmem:[%s1560_s29 + $0x78] sm:$0xff] %v963_v58  ;;  %v968_v5 = vadd.f32 %v1593_v26, %v929_v2  ;;  %v969_v6 = vadd.f32 %v1593_v26, %v930_v3  ;;  %v932_v8 = vld [vmem:[#allocation2 + $0xc0] sm:$0xff] }
 0x15c   : > { %996 = vst [vmem:[%s1560_s29 + $0x80] sm:$0xff] %v964_v59  ;;  %v970_v7 = vadd.f32 %v1593_v26, %v931_v4  ;;  %v933_v9 = vld [vmem:[#allocation2 + $0xa8] sm:$0xff]  ;;  %v934_v10 = vld [vmem:[#allocation2 + $0xd0] sm:$0xff]  ;;  %997 = vst [vmem:[%s1560_s29 + $0x88] sm:$0xff] %v965_v63  ;;  %v971_v11 = vadd.f32 %v1593_v26, %v932_v8 }
 0x15d   : > { %998 = vst [vmem:[%s1560_s29 + $0x90] sm:$0xff] %v966_v0  ;;  %999 = vst [vmem:[%s1560_s29 + $0x98] sm:$0xff] %v967_v1  ;;  %v972_v12 = vadd.f32 %v1593_v26, %v933_v9  ;;  %v973_v13 = vadd.f32 %v1593_v26, %v934_v10  ;;  %v935_v14 = vld [vmem:[#allocation2 + $0x10] sm:$0xff]  ;;  %v936_v15 = vld [vmem:[#allocation2 + $0x28] sm:$0xff] }
 0x15e   : > { %v937_v16 = vld [vmem:[#allocation2 + $0xa0] sm:$0xff]  ;;  %1000 = vst [vmem:[%s1560_s29 + $0xa0] sm:$0xff] %v968_v5  ;;  %1001 = vst [vmem:[%s1560_s29 + $0xa8] sm:$0xff] %v969_v6  ;;  %v974_v17 = vadd.f32 %v1593_v26, %v935_v14  ;;  %v975_v18 = vadd.f32 %v1593_v26, %v936_v15  ;;  %v938_v20 = vld [vmem:[#allocation2 + $0xf8] sm:$0xff] }
 0x15f   : > { %1002 = vst [vmem:[%s1560_s29 + $0xb0] sm:$0xff] %v970_v7  ;;  %v976_v19 = vadd.f32 %v1593_v26, %v937_v16  ;;  %v939_v21 = vld [vmem:[#allocation2 + $0x20] sm:$0xff]  ;;  %v940_v22 = vld [vmem:[#allocation2 + $0x98] sm:$0xff]  ;;  %1003 = vst [vmem:[%s1560_s29 + $0xb8] sm:$0xff] %v971_v11  ;;  %v977_v23 = vadd.f32 %v1593_v26, %v938_v20 }
 0x160   : > { %1004 = vst [vmem:[%s1560_s29 + $0xc0] sm:$0xff] %v972_v12  ;;  %1005 = vst [vmem:[%s1560_s29 + $0xc8] sm:$0xff] %v973_v13  ;;  %v978_v24 = vadd.f32 %v1593_v26, %v939_v21  ;;  %v979_v25 = vadd.f32 %v1593_v26, %v940_v22 }
 0x161   : > { %1006 = vst [vmem:[%s1560_s29 + $0xd0] sm:$0xff] %v974_v17  ;;  %1007 = vst [vmem:[%s1560_s29 + $0xd8] sm:$0xff] %v975_v18 }
 0x162   : > { %1008 = vst [vmem:[%s1560_s29 + $0xe0] sm:$0xff] %v976_v19  ;;  %1009 = vst [vmem:[%s1560_s29 + $0xe8] sm:$0xff] %v977_v23 }
 0x163   : > { %1010 = vst [vmem:[%s1560_s29 + $0xf0] sm:$0xff] %v978_v24  ;;  %1011 = vst [vmem:[%s1560_s29 + $0xf8] sm:$0xff] %v979_v25 }
 0x164 PF: > { %s13_s18 = sadd.s32 1, %s1396_s18   ;;  %s1684_s12 = smov %s1376_s13 }
 0x165   : > { %p10_p0 = scmp.ge.s32.totalorder %s13_s18, 100   ;;  %s1685_s13 = smov %s1470_s25 }
 0x166   : > { %s1686_s14 = smov %s1388_s16  ;;  %s1687_s15 = smov %s1392_s17 }
 0x167   : > { %s1688_s16 = smov %s1691_s19  ;;  %s1689_s17 = smov %s1695_s20 }
 0x168   :  { %12 = sbr.rel (!%p10_p0) target bundleno = 4 (0x4), region = 122 }

// kernel: resnet_generator_forward.29
= control target key start
LH: loop header
LB: loop body
LE: loop exit
PB: predicated region body
PF: predicated region fallthrough
CT: control target
= control target key end

     0   :  { %v297_v0 = vmov 0.0   ;;  %s523_s0 = inlined_call_operand.vmem [shape: f32[512,128], index: 0, kind: input, shape index: {}]   ;;  %s524_s1 = inlined_call_operand.vmem [shape: f32[1,128], index: 1, kind: output, shape index: {0}]   ;;  %s525_s2 = inlined_call_operand.vmem [shape: f32[1,128], index: 2, kind: output, shape index: {1}]  }
   0x1   :  { %14 = vst [vmem:[%s524_s1] sm:$0x1] %v297_v0  ;;  %15 = vst [vmem:[%s525_s2] sm:$0x1] %v297_v0  ;;  %v16_v1 = vld [vmem:[%s523_s0] sm:$0xff]  ;;  %v17_v2 = vld [vmem:[%s523_s0 + $0x8] sm:$0xff] }
   0x2   :  { %v18_v3 = vld [vmem:[%s523_s0 + $0x10] sm:$0xff]  ;;  %v19_v4 = vld [vmem:[%s523_s0 + $0x18] sm:$0xff]  ;;  %v81_v5 = vadd.f32 %v17_v2, %v16_v1  ;;  %v153_v6 = vmul.f32 %v16_v1, %v16_v1  ;;  %v154_v7 = vmul.f32 %v17_v2, %v17_v2  ;;  %v20_v9 = vld [vmem:[%s523_s0 + $0x20] sm:$0xff] }
   0x3   :  { %v155_v8 = vmul.f32 %v18_v3, %v18_v3  ;;  %v156_v11 = vmul.f32 %v19_v4, %v19_v4  ;;  %v21_v13 = vld [vmem:[%s523_s0 + $0x28] sm:$0xff]  ;;  %v157_v15 = vmul.f32 %v20_v9, %v20_v9  ;;  %v22_v17 = vld [vmem:[%s523_s0 + $0x30] sm:$0xff]  ;;  %v23_v21 = vld [vmem:[%s523_s0 + $0x38] sm:$0xff] }
   0x4   :  { %v82_v10 = vadd.f32 %v81_v5, %v18_v3  ;;  %v217_v12 = vadd.f32 %v154_v7, %v153_v6  ;;  %v158_v19 = vmul.f32 %v21_v13, %v21_v13  ;;  %v159_v23 = vmul.f32 %v22_v17, %v22_v17  ;;  %v24_v25 = vld [vmem:[%s523_s0 + $0x40] sm:$0xff]  ;;  %v25_v29 = vld [vmem:[%s523_s0 + $0x48] sm:$0xff]  ;;  %v26_v33 = vld [vmem:[%s523_s0 + $0x50] sm:$0xff] }
   0x5   :  { %v160_v27 = vmul.f32 %v23_v21, %v23_v21  ;;  %v161_v31 = vmul.f32 %v24_v25, %v24_v25  ;;  %v162_v35 = vmul.f32 %v25_v29, %v25_v29  ;;  %v27_v37 = vld [vmem:[%s523_s0 + $0x58] sm:$0xff]  ;;  %v163_v39 = vmul.f32 %v26_v33, %v26_v33  ;;  %v28_v41 = vld [vmem:[%s523_s0 + $0x60] sm:$0xff]  ;;  %v29_v45 = vld [vmem:[%s523_s0 + $0x68] sm:$0xff] }
   0x6   :  { %v83_v14 = vadd.f32 %v82_v10, %v19_v4  ;;  %v218_v16 = vadd.f32 %v217_v12, %v155_v8  ;;  %v164_v43 = vmul.f32 %v27_v37, %v27_v37  ;;  %v165_v47 = vmul.f32 %v28_v41, %v28_v41  ;;  %v30_v49 = vld [vmem:[%s523_s0 + $0x70] sm:$0xff]  ;;  %v31_v53 = vld [vmem:[%s523_s0 + $0x78] sm:$0xff]  ;;  %v32_v57 = vld [vmem:[%s523_s0 + $0x80] sm:$0xff] }
   0x7   :  { %v166_v51 = vmul.f32 %v29_v45, %v29_v45  ;;  %v167_v55 = vmul.f32 %v30_v49, %v30_v49  ;;  %v168_v59 = vmul.f32 %v31_v53, %v31_v53  ;;  %v33_v61 = vld [vmem:[%s523_s0 + $0x88] sm:$0xff]  ;;  %v169_v63 = vmul.f32 %v32_v57, %v32_v57  ;;  %v34_v1 = vld [vmem:[%s523_s0 + $0x90] sm:$0xff]  ;;  %v35_v5 = vld [vmem:[%s523_s0 + $0x98] sm:$0xff] }
   0x8   :  { %v84_v18 = vadd.f32 %v83_v14, %v20_v9  ;;  %v219_v20 = vadd.f32 %v218_v16, %v156_v11  ;;  %v170_v3 = vmul.f32 %v33_v61, %v33_v61  ;;  %v171_v7 = vmul.f32 %v34_v1, %v34_v1  ;;  %v36_v9 = vld [vmem:[%s523_s0 + $0xa0] sm:$0xff] }
   0x9   :  { %v172_v11 = vmul.f32 %v35_v5, %v35_v5 }
   0xa   :  { %v85_v22 = vadd.f32 %v84_v18, %v21_v13  ;;  %v220_v24 = vadd.f32 %v219_v20, %v157_v15  ;;  %v37_v13 = vld [vmem:[%s523_s0 + $0xa8] sm:$0xff]  ;;  %v173_v15 = vmul.f32 %v36_v9, %v36_v9 }
   0xc   :  { %v86_v26 = vadd.f32 %v85_v22, %v22_v17  ;;  %v221_v28 = vadd.f32 %v220_v24, %v158_v19  ;;  %v38_v17 = vld [vmem:[%s523_s0 + $0xb0] sm:$0xff]  ;;  %v174_v19 = vmul.f32 %v37_v13, %v37_v13 }
   0xe   :  { %v87_v30 = vadd.f32 %v86_v26, %v23_v21  ;;  %v222_v32 = vadd.f32 %v221_v28, %v159_v23  ;;  %v39_v21 = vld [vmem:[%s523_s0 + $0xb8] sm:$0xff]  ;;  %v175_v23 = vmul.f32 %v38_v17, %v38_v17 }
  0x10   :  { %v88_v34 = vadd.f32 %v87_v30, %v24_v25  ;;  %v223_v36 = vadd.f32 %v222_v32, %v160_v27  ;;  %v40_v25 = vld [vmem:[%s523_s0 + $0xc0] sm:$0xff]  ;;  %v176_v27 = vmul.f32 %v39_v21, %v39_v21 }
  0x12   :  { %v89_v38 = vadd.f32 %v88_v34, %v25_v29  ;;  %v224_v40 = vadd.f32 %v223_v36, %v161_v31  ;;  %v41_v29 = vld [vmem:[%s523_s0 + $0xc8] sm:$0xff]  ;;  %v177_v31 = vmul.f32 %v40_v25, %v40_v25 }
  0x14   :  { %v90_v42 = vadd.f32 %v89_v38, %v26_v33  ;;  %v225_v44 = vadd.f32 %v224_v40, %v162_v35  ;;  %v42_v33 = vld [vmem:[%s523_s0 + $0xd0] sm:$0xff]  ;;  %v178_v35 = vmul.f32 %v41_v29, %v41_v29 }
  0x16   :  { %v91_v46 = vadd.f32 %v90_v42, %v27_v37  ;;  %v226_v48 = vadd.f32 %v225_v44, %v163_v39  ;;  %v43_v37 = vld [vmem:[%s523_s0 + $0xd8] sm:$0xff]  ;;  %v179_v39 = vmul.f32 %v42_v33, %v42_v33 }
  0x18   :  { %v92_v50 = vadd.f32 %v91_v46, %v28_v41  ;;  %v227_v52 = vadd.f32 %v226_v48, %v164_v43  ;;  %v44_v41 = vld [vmem:[%s523_s0 + $0xe0] sm:$0xff]  ;;  %v180_v43 = vmul.f32 %v43_v37, %v43_v37 }
  0x1a   :  { %v93_v54 = vadd.f32 %v92_v50, %v29_v45  ;;  %v228_v56 = vadd.f32 %v227_v52, %v165_v47  ;;  %v45_v45 = vld [vmem:[%s523_s0 + $0xe8] sm:$0xff]  ;;  %v181_v47 = vmul.f32 %v44_v41, %v44_v41 }
  0x1c   :  { %v94_v58 = vadd.f32 %v93_v54, %v30_v49  ;;  %v229_v60 = vadd.f32 %v228_v56, %v166_v51  ;;  %v46_v49 = vld [vmem:[%s523_s0 + $0xf0] sm:$0xff]  ;;  %v182_v51 = vmul.f32 %v45_v45, %v45_v45 }
  0x1e   :  { %v95_v62 = vadd.f32 %v94_v58, %v31_v53  ;;  %v230_v0 = vadd.f32 %v229_v60, %v167_v55  ;;  %v47_v53 = vld [vmem:[%s523_s0 + $0xf8] sm:$0xff]  ;;  %v183_v55 = vmul.f32 %v46_v49, %v46_v49 }
  0x20   :  { %v96_v2 = vadd.f32 %v95_v62, %v32_v57  ;;  %v231_v4 = vadd.f32 %v230_v0, %v168_v59  ;;  %v48_v57 = vld [vmem:[%s523_s0 + $0x100] sm:$0xff]  ;;  %v184_v59 = vmul.f32 %v47_v53, %v47_v53 }
  0x22   :  { %v97_v6 = vadd.f32 %v96_v2, %v33_v61  ;;  %v232_v8 = vadd.f32 %v231_v4, %v169_v63  ;;  %v49_v61 = vld [vmem:[%s523_s0 + $0x108] sm:$0xff]  ;;  %v185_v63 = vmul.f32 %v48_v57, %v48_v57 }
  0x24   :  { %v98_v10 = vadd.f32 %v97_v6, %v34_v1  ;;  %v233_v12 = vadd.f32 %v232_v8, %v170_v3  ;;  %v50_v1 = vld [vmem:[%s523_s0 + $0x110] sm:$0xff]  ;;  %v186_v3 = vmul.f32 %v49_v61, %v49_v61 }
  0x26   :  { %v99_v14 = vadd.f32 %v98_v10, %v35_v5  ;;  %v234_v16 = vadd.f32 %v233_v12, %v171_v7  ;;  %v51_v5 = vld [vmem:[%s523_s0 + $0x118] sm:$0xff]  ;;  %v187_v7 = vmul.f32 %v50_v1, %v50_v1 }
  0x28   :  { %v100_v18 = vadd.f32 %v99_v14, %v36_v9  ;;  %v235_v20 = vadd.f32 %v234_v16, %v172_v11  ;;  %v52_v9 = vld [vmem:[%s523_s0 + $0x120] sm:$0xff]  ;;  %v188_v11 = vmul.f32 %v51_v5, %v51_v5 }
  0x2a   :  { %v101_v22 = vadd.f32 %v100_v18, %v37_v13  ;;  %v236_v24 = vadd.f32 %v235_v20, %v173_v15  ;;  %v53_v13 = vld [vmem:[%s523_s0 + $0x128] sm:$0xff]  ;;  %v189_v15 = vmul.f32 %v52_v9, %v52_v9 }
  0x2c   :  { %v102_v26 = vadd.f32 %v101_v22, %v38_v17  ;;  %v237_v28 = vadd.f32 %v236_v24, %v174_v19  ;;  %v54_v17 = vld [vmem:[%s523_s0 + $0x130] sm:$0xff]  ;;  %v190_v19 = vmul.f32 %v53_v13, %v53_v13 }
  0x2e   :  { %v103_v30 = vadd.f32 %v102_v26, %v39_v21  ;;  %v238_v32 = vadd.f32 %v237_v28, %v175_v23  ;;  %v55_v21 = vld [vmem:[%s523_s0 + $0x138] sm:$0xff]  ;;  %v191_v23 = vmul.f32 %v54_v17, %v54_v17 }
  0x30   :  { %v104_v34 = vadd.f32 %v103_v30, %v40_v25  ;;  %v239_v36 = vadd.f32 %v238_v32, %v176_v27  ;;  %v56_v25 = vld [vmem:[%s523_s0 + $0x140] sm:$0xff]  ;;  %v192_v27 = vmul.f32 %v55_v21, %v55_v21 }
  0x32   :  { %v105_v38 = vadd.f32 %v104_v34, %v41_v29  ;;  %v240_v40 = vadd.f32 %v239_v36, %v177_v31  ;;  %v57_v29 = vld [vmem:[%s523_s0 + $0x148] sm:$0xff]  ;;  %v193_v31 = vmul.f32 %v56_v25, %v56_v25 }
  0x34   :  { %v106_v42 = vadd.f32 %v105_v38, %v42_v33  ;;  %v241_v44 = vadd.f32 %v240_v40, %v178_v35  ;;  %v58_v33 = vld [vmem:[%s523_s0 + $0x150] sm:$0xff]  ;;  %v194_v35 = vmul.f32 %v57_v29, %v57_v29 }
  0x36   :  { %v107_v46 = vadd.f32 %v106_v42, %v43_v37  ;;  %v242_v48 = vadd.f32 %v241_v44, %v179_v39  ;;  %v59_v37 = vld [vmem:[%s523_s0 + $0x158] sm:$0xff]  ;;  %v195_v39 = vmul.f32 %v58_v33, %v58_v33 }
  0x38   :  { %v108_v50 = vadd.f32 %v107_v46, %v44_v41  ;;  %v243_v52 = vadd.f32 %v242_v48, %v180_v43  ;;  %v60_v41 = vld [vmem:[%s523_s0 + $0x160] sm:$0xff]  ;;  %v196_v43 = vmul.f32 %v59_v37, %v59_v37 }
  0x3a   :  { %v109_v54 = vadd.f32 %v108_v50, %v45_v45  ;;  %v244_v56 = vadd.f32 %v243_v52, %v181_v47  ;;  %v61_v45 = vld [vmem:[%s523_s0 + $0x168] sm:$0xff]  ;;  %v197_v47 = vmul.f32 %v60_v41, %v60_v41 }
  0x3c   :  { %v110_v58 = vadd.f32 %v109_v54, %v46_v49  ;;  %v245_v60 = vadd.f32 %v244_v56, %v182_v51  ;;  %v62_v49 = vld [vmem:[%s523_s0 + $0x170] sm:$0xff]  ;;  %v198_v51 = vmul.f32 %v61_v45, %v61_v45 }
  0x3e   :  { %v111_v62 = vadd.f32 %v110_v58, %v47_v53  ;;  %v246_v0 = vadd.f32 %v245_v60, %v183_v55  ;;  %v63_v53 = vld [vmem:[%s523_s0 + $0x178] sm:$0xff]  ;;  %v199_v55 = vmul.f32 %v62_v49, %v62_v49 }
  0x40   :  { %v112_v2 = vadd.f32 %v111_v62, %v48_v57  ;;  %v247_v4 = vadd.f32 %v246_v0, %v184_v59  ;;  %v64_v57 = vld [vmem:[%s523_s0 + $0x180] sm:$0xff]  ;;  %v200_v59 = vmul.f32 %v63_v53, %v63_v53 }
  0x42   :  { %v113_v6 = vadd.f32 %v112_v2, %v49_v61  ;;  %v248_v8 = vadd.f32 %v247_v4, %v185_v63  ;;  %v65_v61 = vld [vmem:[%s523_s0 + $0x188] sm:$0xff]  ;;  %v201_v63 = vmul.f32 %v64_v57, %v64_v57 }
  0x44   :  { %v114_v10 = vadd.f32 %v113_v6, %v50_v1  ;;  %v249_v12 = vadd.f32 %v248_v8, %v186_v3  ;;  %v66_v1 = vld [vmem:[%s523_s0 + $0x190] sm:$0xff]  ;;  %v202_v3 = vmul.f32 %v65_v61, %v65_v61 }
  0x46   :  { %v115_v14 = vadd.f32 %v114_v10, %v51_v5  ;;  %v250_v16 = vadd.f32 %v249_v12, %v187_v7  ;;  %v67_v5 = vld [vmem:[%s523_s0 + $0x198] sm:$0xff]  ;;  %v203_v7 = vmul.f32 %v66_v1, %v66_v1 }
  0x48   :  { %v116_v18 = vadd.f32 %v115_v14, %v52_v9  ;;  %v251_v20 = vadd.f32 %v250_v16, %v188_v11  ;;  %v68_v9 = vld [vmem:[%s523_s0 + $0x1a0] sm:$0xff]  ;;  %v204_v11 = vmul.f32 %v67_v5, %v67_v5 }
  0x4a   :  { %v117_v22 = vadd.f32 %v116_v18, %v53_v13  ;;  %v252_v24 = vadd.f32 %v251_v20, %v189_v15  ;;  %v69_v13 = vld [vmem:[%s523_s0 + $0x1a8] sm:$0xff]  ;;  %v205_v15 = vmul.f32 %v68_v9, %v68_v9 }
  0x4c   :  { %v118_v26 = vadd.f32 %v117_v22, %v54_v17  ;;  %v253_v28 = vadd.f32 %v252_v24, %v190_v19  ;;  %v70_v17 = vld [vmem:[%s523_s0 + $0x1b0] sm:$0xff]  ;;  %v206_v19 = vmul.f32 %v69_v13, %v69_v13 }
  0x4e   :  { %v119_v30 = vadd.f32 %v118_v26, %v55_v21  ;;  %v254_v32 = vadd.f32 %v253_v28, %v191_v23  ;;  %v71_v21 = vld [vmem:[%s523_s0 + $0x1b8] sm:$0xff]  ;;  %v207_v23 = vmul.f32 %v70_v17, %v70_v17 }
  0x50   :  { %v120_v34 = vadd.f32 %v119_v30, %v56_v25  ;;  %v255_v36 = vadd.f32 %v254_v32, %v192_v27  ;;  %v72_v25 = vld [vmem:[%s523_s0 + $0x1c0] sm:$0xff]  ;;  %v208_v27 = vmul.f32 %v71_v21, %v71_v21 }
  0x52   :  { %v121_v38 = vadd.f32 %v120_v34, %v57_v29  ;;  %v256_v40 = vadd.f32 %v255_v36, %v193_v31  ;;  %v73_v29 = vld [vmem:[%s523_s0 + $0x1c8] sm:$0xff]  ;;  %v209_v31 = vmul.f32 %v72_v25, %v72_v25 }
  0x54   :  { %v122_v42 = vadd.f32 %v121_v38, %v58_v33  ;;  %v257_v44 = vadd.f32 %v256_v40, %v194_v35  ;;  %v74_v33 = vld [vmem:[%s523_s0 + $0x1d0] sm:$0xff]  ;;  %v210_v35 = vmul.f32 %v73_v29, %v73_v29 }
  0x56   :  { %v123_v46 = vadd.f32 %v122_v42, %v59_v37  ;;  %v258_v48 = vadd.f32 %v257_v44, %v195_v39  ;;  %v75_v37 = vld [vmem:[%s523_s0 + $0x1d8] sm:$0xff]  ;;  %v211_v39 = vmul.f32 %v74_v33, %v74_v33 }
  0x58   :  { %v124_v50 = vadd.f32 %v123_v46, %v60_v41  ;;  %v259_v52 = vadd.f32 %v258_v48, %v196_v43  ;;  %v76_v41 = vld [vmem:[%s523_s0 + $0x1e0] sm:$0xff]  ;;  %v212_v43 = vmul.f32 %v75_v37, %v75_v37 }
  0x5a   :  { %v125_v54 = vadd.f32 %v124_v50, %v61_v45  ;;  %v260_v56 = vadd.f32 %v259_v52, %v197_v47  ;;  %v77_v45 = vld [vmem:[%s523_s0 + $0x1e8] sm:$0xff]  ;;  %v213_v47 = vmul.f32 %v76_v41, %v76_v41 }
  0x5c   :  { %v126_v58 = vadd.f32 %v125_v54, %v62_v49  ;;  %v261_v60 = vadd.f32 %v260_v56, %v198_v51  ;;  %v78_v49 = vld [vmem:[%s523_s0 + $0x1f0] sm:$0xff]  ;;  %v214_v51 = vmul.f32 %v77_v45, %v77_v45 }
  0x5e   :  { %v127_v62 = vadd.f32 %v126_v58, %v63_v53  ;;  %v262_v0 = vadd.f32 %v261_v60, %v199_v55  ;;  %v79_v53 = vld [vmem:[%s523_s0 + $0x1f8] sm:$0xff]  ;;  %v215_v55 = vmul.f32 %v78_v49, %v78_v49 }
  0x5f   :  { %v216_v58 = vmul.f32 %v79_v53, %v79_v53 }
  0x60   :  { %v128_v2 = vadd.f32 %v127_v62, %v64_v57  ;;  %v263_v4 = vadd.f32 %v262_v0, %v200_v59 }
  0x62   :  { %v129_v6 = vadd.f32 %v128_v2, %v65_v61  ;;  %v264_v8 = vadd.f32 %v263_v4, %v201_v63 }
  0x64   :  { %v130_v10 = vadd.f32 %v129_v6, %v66_v1  ;;  %v265_v12 = vadd.f32 %v264_v8, %v202_v3 }
  0x66   :  { %v131_v14 = vadd.f32 %v130_v10, %v67_v5  ;;  %v266_v16 = vadd.f32 %v265_v12, %v203_v7  ;;  %v80_v7 = vld [vmem:[%s524_s1] sm:$0x1] }
  0x67   :  { %v152_v12 = vld [vmem:[%s525_s2] sm:$0x1] }
  0x68   :  { %v132_v18 = vadd.f32 %v131_v14, %v68_v9  ;;  %v267_v20 = vadd.f32 %v266_v16, %v204_v11 }
  0x6a   :  { %v133_v22 = vadd.f32 %v132_v18, %v69_v13  ;;  %v268_v24 = vadd.f32 %v267_v20, %v205_v15 }
  0x6c   :  { %v134_v26 = vadd.f32 %v133_v22, %v70_v17  ;;  %v269_v28 = vadd.f32 %v268_v24, %v206_v19 }
  0x6e   :  { %v135_v30 = vadd.f32 %v134_v26, %v71_v21  ;;  %v270_v32 = vadd.f32 %v269_v28, %v207_v23 }
  0x70   :  { %v136_v34 = vadd.f32 %v135_v30, %v72_v25  ;;  %v271_v36 = vadd.f32 %v270_v32, %v208_v27 }
  0x72   :  { %v137_v38 = vadd.f32 %v136_v34, %v73_v29  ;;  %v272_v40 = vadd.f32 %v271_v36, %v209_v31 }
  0x74   :  { %v138_v42 = vadd.f32 %v137_v38, %v74_v33  ;;  %v273_v44 = vadd.f32 %v272_v40, %v210_v35 }
  0x76   :  { %v139_v46 = vadd.f32 %v138_v42, %v75_v37  ;;  %v274_v48 = vadd.f32 %v273_v44, %v211_v39 }
  0x78   :  { %v140_v50 = vadd.f32 %v139_v46, %v76_v41  ;;  %v275_v52 = vadd.f32 %v274_v48, %v212_v43 }
  0x7a   :  { %v141_v54 = vadd.f32 %v140_v50, %v77_v45  ;;  %v276_v56 = vadd.f32 %v275_v52, %v213_v47 }
  0x7c   :  { %v142_v57 = vadd.f32 %v141_v54, %v78_v49  ;;  %v277_v59 = vadd.f32 %v276_v56, %v214_v51 }
  0x7e   :  { %v143_v60 = vadd.f32 %v142_v57, %v79_v53  ;;  %v278_v61 = vadd.f32 %v277_v59, %v215_v55 }
  0x80   :  { %v144_v62 = vrot.slane %v143_v60, 4  ;;  %v279_v63 = vadd.f32 %v278_v61, %v216_v58 }
  0x82   :  { %v145_v0 = vadd.f32 %v144_v62, %v143_v60  ;;  %v280_v1 = vrot.slane %v279_v63, 4 }
  0x84   :  { %v146_v2 = vrot.slane %v145_v0, 2  ;;  %v281_v3 = vadd.f32 %v280_v1, %v279_v63 }
  0x86   :  { %v147_v4 = vadd.f32 %v146_v2, %v145_v0  ;;  %v282_v5 = vrot.slane %v281_v3, 2 }
  0x88   :  { %v148_v6 = vrot.slane %v147_v4, 1  ;;  %v283_v8 = vadd.f32 %v282_v5, %v281_v3 }
  0x8a   :  { %v149_v9 = vadd.f32 %v148_v6, %v147_v4  ;;  %v284_v10 = vrot.slane %v283_v8, 1 }
  0x8c   :  { %v150_v11 = vadd.f32 %v149_v9, %v80_v7  ;;  %v285_v13 = vadd.f32 %v284_v10, %v283_v8 }
  0x8e   :  { %151 = vst [vmem:[%s524_s1] sm:$0x1] %v150_v11  ;;  %v286_v14 = vadd.f32 %v285_v13, %v152_v12 }
  0x90   :  { %287 = vst [vmem:[%s525_s2] sm:$0x1] %v286_v14 }

// kernel: resnet_generator_forward.30
= control target key start
LH: loop header
LB: loop body
LE: loop exit
PB: predicated region body
PF: predicated region fallthrough
CT: control target
= control target key end

     0   :  { %s896_s0 = inlined_call_operand.vmem [shape: f32[512,128], index: 0, kind: input, shape index: {}]   ;;  %s897_s1 = inlined_call_operand.vmem [shape: f32[1,128], index: 1, kind: input, shape index: {}]   ;;  %s898_s2 = inlined_call_operand.vmem [shape: f32[1,128], index: 2, kind: input, shape index: {}]   ;;  %s899_s3 = inlined_call_operand.vmem [shape: f32[512,128], index: 3, kind: output, shape index: {}]  }
   0x1   :  { %v14_v0 = vld [vmem:[%s896_s0] sm:$0xff]  ;;  %v15_v4 = vld [vmem:[%s896_s0 + $0x8] sm:$0xff]  ;;  %v16_v5 = vld [vmem:[%s896_s0 + $0x10] sm:$0xff] }
   0x2   :  { %v380_v1 = vld [vmem:[%s897_s1] ss:$0 sm:$0xff]  ;;  %v17_v6 = vld [vmem:[%s896_s0 + $0x18] sm:$0xff]  ;;  %v19_v11 = vld [vmem:[%s896_s0 + $0x28] sm:$0xff] }
   0x3   :  { %v385_v2 = vld [vmem:[%s898_s2] ss:$0 sm:$0xff]  ;;  %v85_v3 = vmul.f32 %v380_v1, %v14_v0  ;;  %v86_v7 = vmul.f32 %v380_v1, %v15_v4  ;;  %v87_v8 = vmul.f32 %v380_v1, %v16_v5  ;;  %v88_v9 = vmul.f32 %v380_v1, %v17_v6  ;;  %v20_v12 = vld [vmem:[%s896_s0 + $0x30] sm:$0xff]  ;;  %v21_v17 = vld [vmem:[%s896_s0 + $0x38] sm:$0xff] }
   0x4   :  { %v18_v10 = vld [vmem:[%s896_s0 + $0x20] sm:$0xff]  ;;  %v90_v15 = vmul.f32 %v380_v1, %v19_v11  ;;  %v91_v16 = vmul.f32 %v380_v1, %v20_v12  ;;  %v92_v21 = vmul.f32 %v380_v1, %v21_v17  ;;  %v23_v27 = vld [vmem:[%s896_s0 + $0x48] sm:$0xff]  ;;  %v24_v28 = vld [vmem:[%s896_s0 + $0x50] sm:$0xff] }
   0x5   :  { %v156_v13 = vadd.f32 %v385_v2, %v85_v3  ;;  %v89_v14 = vmul.f32 %v380_v1, %v18_v10  ;;  %v157_v18 = vadd.f32 %v385_v2, %v86_v7  ;;  %v158_v19 = vadd.f32 %v385_v2, %v87_v8  ;;  %v22_v22 = vld [vmem:[%s896_s0 + $0x40] sm:$0xff]  ;;  %v25_v29 = vld [vmem:[%s896_s0 + $0x58] sm:$0xff]  ;;  %v27_v35 = vld [vmem:[%s896_s0 + $0x68] sm:$0xff] }
   0x6   :  { %v159_v20 = vadd.f32 %v385_v2, %v88_v9  ;;  %v161_v25 = vadd.f32 %v385_v2, %v90_v15  ;;  %v162_v26 = vadd.f32 %v385_v2, %v91_v16  ;;  %v163_v33 = vadd.f32 %v385_v2, %v92_v21  ;;  %v26_v34 = vld [vmem:[%s896_s0 + $0x60] sm:$0xff]  ;;  %v28_v36 = vld [vmem:[%s896_s0 + $0x70] sm:$0xff]  ;;  %v29_v41 = vld [vmem:[%s896_s0 + $0x78] sm:$0xff] }
   0x7   :  { %v220_v23 = vmax.f32 %v156_v13, 0.0  ;;  %v160_v24 = vadd.f32 %v385_v2, %v89_v14  ;;  %v221_v30 = vmax.f32 %v157_v18, 0.0  ;;  %v222_v31 = vmax.f32 %v158_v19, 0.0  ;;  %v30_v54 = vld [vmem:[%s896_s0 + $0x80] sm:$0xff]  ;;  %v31_v59 = vld [vmem:[%s896_s0 + $0x88] sm:$0xff]  ;;  %v32_v60 = vld [vmem:[%s896_s0 + $0x90] sm:$0xff] }
   0x8   :  { %v223_v32 = vmax.f32 %v159_v20, 0.0  ;;  %v225_v38 = vmax.f32 %v161_v25, 0.0  ;;  %v226_v39 = vmax.f32 %v162_v26, 0.0  ;;  %v93_v40 = vmul.f32 %v380_v1, %v22_v22  ;;  %v33_v61 = vld [vmem:[%s896_s0 + $0x98] sm:$0xff]  ;;  %v34_v4 = vld [vmem:[%s896_s0 + $0xa0] sm:$0xff]  ;;  %v35_v5 = vld [vmem:[%s896_s0 + $0xa8] sm:$0xff] }
   0x9   :  { %284 = vst [vmem:[%s899_s3] sm:$0xff] %v220_v23  ;;  %v224_v37 = vmax.f32 %v160_v24, 0.0  ;;  %285 = vst [vmem:[%s899_s3 + $0x8] sm:$0xff] %v221_v30  ;;  %v227_v42 = vmax.f32 %v163_v33, 0.0  ;;  %v94_v43 = vmul.f32 %v380_v1, %v23_v27  ;;  %v95_v44 = vmul.f32 %v380_v1, %v24_v28  ;;  %v36_v6 = vld [vmem:[%s896_s0 + $0xb0] sm:$0xff]  ;;  %v37_v11 = vld [vmem:[%s896_s0 + $0xb8] sm:$0xff] }
   0xa   :  { %286 = vst [vmem:[%s899_s3 + $0x10] sm:$0xff] %v222_v31  ;;  %287 = vst [vmem:[%s899_s3 + $0x18] sm:$0xff] %v223_v32  ;;  %v96_v45 = vmul.f32 %v380_v1, %v25_v29  ;;  %v164_v46 = vadd.f32 %v385_v2, %v93_v40  ;;  %v97_v47 = vmul.f32 %v380_v1, %v26_v34  ;;  %v38_v24 = vld [vmem:[%s896_s0 + $0xc0] sm:$0xff]  ;;  %v39_v29 = vld [vmem:[%s896_s0 + $0xc8] sm:$0xff] }
   0xb   :  { %288 = vst [vmem:[%s899_s3 + $0x20] sm:$0xff] %v224_v37  ;;  %289 = vst [vmem:[%s899_s3 + $0x28] sm:$0xff] %v225_v38  ;;  %v98_v48 = vmul.f32 %v380_v1, %v27_v35  ;;  %v99_v49 = vmul.f32 %v380_v1, %v28_v36  ;;  %v165_v50 = vadd.f32 %v385_v2, %v94_v43  ;;  %v40_v30 = vld [vmem:[%s896_s0 + $0xd0] sm:$0xff]  ;;  %v41_v31 = vld [vmem:[%s896_s0 + $0xd8] sm:$0xff] }
   0xc   :  { %290 = vst [vmem:[%s899_s3 + $0x30] sm:$0xff] %v226_v39  ;;  %291 = vst [vmem:[%s899_s3 + $0x38] sm:$0xff] %v227_v42  ;;  %v166_v51 = vadd.f32 %v385_v2, %v95_v44  ;;  %v167_v52 = vadd.f32 %v385_v2, %v96_v45  ;;  %v100_v53 = vmul.f32 %v380_v1, %v29_v41  ;;  %v228_v55 = vmax.f32 %v164_v46, 0.0  ;;  %v42_v36 = vld [vmem:[%s896_s0 + $0xe0] sm:$0xff]  ;;  %v43_v37 = vld [vmem:[%s896_s0 + $0xe8] sm:$0xff] }
   0xd   :  { %v168_v56 = vadd.f32 %v385_v2, %v97_v47  ;;  %v169_v57 = vadd.f32 %v385_v2, %v98_v48  ;;  %v170_v58 = vadd.f32 %v385_v2, %v99_v49  ;;  %v229_v62 = vmax.f32 %v165_v50, 0.0  ;;  %v44_v38 = vld [vmem:[%s896_s0 + $0xf0] sm:$0xff]  ;;  %v45_v43 = vld [vmem:[%s896_s0 + $0xf8] sm:$0xff] }
   0xe   :  { %v230_v63 = vmax.f32 %v166_v51, 0.0  ;;  %v231_v0 = vmax.f32 %v167_v52, 0.0  ;;  %v171_v3 = vadd.f32 %v385_v2, %v100_v53  ;;  %292 = vst [vmem:[%s899_s3 + $0x40] sm:$0xff] %v228_v55  ;;  %v101_v10 = vmul.f32 %v380_v1, %v30_v54 }
   0xf   :  { %v232_v7 = vmax.f32 %v168_v56, 0.0  ;;  %v233_v8 = vmax.f32 %v169_v57, 0.0  ;;  %v234_v9 = vmax.f32 %v170_v58, 0.0  ;;  %293 = vst [vmem:[%s899_s3 + $0x48] sm:$0xff] %v229_v62  ;;  %v102_v13 = vmul.f32 %v380_v1, %v31_v59  ;;  %v46_v56 = vld [vmem:[%s896_s0 + $0x100] sm:$0xff]  ;;  %v48_v62 = vld [vmem:[%s896_s0 + $0x110] sm:$0xff] }
  0x10   :  { %294 = vst [vmem:[%s899_s3 + $0x50] sm:$0xff] %v230_v63  ;;  %295 = vst [vmem:[%s899_s3 + $0x58] sm:$0xff] %v231_v0  ;;  %v235_v12 = vmax.f32 %v171_v3, 0.0  ;;  %v103_v14 = vmul.f32 %v380_v1, %v32_v60  ;;  %v104_v15 = vmul.f32 %v380_v1, %v33_v61  ;;  %v172_v16 = vadd.f32 %v385_v2, %v101_v10  ;;  %v47_v61 = vld [vmem:[%s896_s0 + $0x108] sm:$0xff]  ;;  %v49_v63 = vld [vmem:[%s896_s0 + $0x118] sm:$0xff] }
  0x11   :  { %296 = vst [vmem:[%s899_s3 + $0x60] sm:$0xff] %v232_v7  ;;  %297 = vst [vmem:[%s899_s3 + $0x68] sm:$0xff] %v233_v8  ;;  %v105_v17 = vmul.f32 %v380_v1, %v34_v4  ;;  %v106_v18 = vmul.f32 %v380_v1, %v35_v5  ;;  %v107_v19 = vmul.f32 %v380_v1, %v36_v6  ;;  %v50_v6 = vld [vmem:[%s896_s0 + $0x120] sm:$0xff]  ;;  %v51_v7 = vld [vmem:[%s896_s0 + $0x128] sm:$0xff] }
  0x12   :  { %298 = vst [vmem:[%s899_s3 + $0x70] sm:$0xff] %v234_v9  ;;  %299 = vst [vmem:[%s899_s3 + $0x78] sm:$0xff] %v235_v12  ;;  %v173_v20 = vadd.f32 %v385_v2, %v102_v13  ;;  %v174_v21 = vadd.f32 %v385_v2, %v103_v14  ;;  %v175_v22 = vadd.f32 %v385_v2, %v104_v15  ;;  %v236_v25 = vmax.f32 %v172_v16, 0.0  ;;  %v52_v8 = vld [vmem:[%s896_s0 + $0x130] sm:$0xff]  ;;  %v53_v13 = vld [vmem:[%s896_s0 + $0x138] sm:$0xff] }
  0x13   :  { %v108_v23 = vmul.f32 %v380_v1, %v37_v11  ;;  %v176_v26 = vadd.f32 %v385_v2, %v105_v17  ;;  %v177_v27 = vadd.f32 %v385_v2, %v106_v18  ;;  %v178_v28 = vadd.f32 %v385_v2, %v107_v19 }
  0x14   :  { %v237_v32 = vmax.f32 %v173_v20, 0.0  ;;  %v238_v33 = vmax.f32 %v174_v21, 0.0  ;;  %v239_v34 = vmax.f32 %v175_v22, 0.0  ;;  %300 = vst [vmem:[%s899_s3 + $0x80] sm:$0xff] %v236_v25  ;;  %v109_v42 = vmul.f32 %v380_v1, %v38_v24 }
  0x15   :  { %v179_v35 = vadd.f32 %v385_v2, %v108_v23  ;;  %v240_v39 = vmax.f32 %v176_v26, 0.0  ;;  %v241_v40 = vmax.f32 %v177_v27, 0.0  ;;  %v242_v41 = vmax.f32 %v178_v28, 0.0  ;;  %v54_v26 = vld [vmem:[%s896_s0 + $0x140] sm:$0xff] }
  0x16   :  { %301 = vst [vmem:[%s899_s3 + $0x88] sm:$0xff] %v237_v32  ;;  %302 = vst [vmem:[%s899_s3 + $0x90] sm:$0xff] %v238_v33  ;;  %v110_v45 = vmul.f32 %v380_v1, %v39_v29  ;;  %v111_v46 = vmul.f32 %v380_v1, %v40_v30  ;;  %v112_v47 = vmul.f32 %v380_v1, %v41_v31  ;;  %v55_v31 = vld [vmem:[%s896_s0 + $0x148] sm:$0xff]  ;;  %v56_v32 = vld [vmem:[%s896_s0 + $0x150] sm:$0xff] }
  0x17   :  { %303 = vst [vmem:[%s899_s3 + $0x98] sm:$0xff] %v239_v34  ;;  %v243_v44 = vmax.f32 %v179_v35, 0.0  ;;  %304 = vst [vmem:[%s899_s3 + $0xa0] sm:$0xff] %v240_v39  ;;  %v180_v48 = vadd.f32 %v385_v2, %v109_v42  ;;  %v113_v49 = vmul.f32 %v380_v1, %v42_v36  ;;  %v114_v50 = vmul.f32 %v380_v1, %v43_v37  ;;  %v57_v33 = vld [vmem:[%s896_s0 + $0x158] sm:$0xff]  ;;  %v59_v39 = vld [vmem:[%s896_s0 + $0x168] sm:$0xff] }
  0x18   :  { %305 = vst [vmem:[%s899_s3 + $0xa8] sm:$0xff] %v241_v40  ;;  %306 = vst [vmem:[%s899_s3 + $0xb0] sm:$0xff] %v242_v41  ;;  %v115_v51 = vmul.f32 %v380_v1, %v44_v38  ;;  %v181_v52 = vadd.f32 %v385_v2, %v110_v45  ;;  %v182_v53 = vadd.f32 %v385_v2, %v111_v46  ;;  %v58_v38 = vld [vmem:[%s896_s0 + $0x160] sm:$0xff]  ;;  %v60_v40 = vld [vmem:[%s896_s0 + $0x170] sm:$0xff] }
  0x19   :  { %307 = vst [vmem:[%s899_s3 + $0xb8] sm:$0xff] %v243_v44  ;;  %v183_v54 = vadd.f32 %v385_v2, %v112_v47  ;;  %v116_v55 = vmul.f32 %v380_v1, %v45_v43  ;;  %v244_v57 = vmax.f32 %v180_v48, 0.0  ;;  %v184_v58 = vadd.f32 %v385_v2, %v113_v49  ;;  %v61_v45 = vld [vmem:[%s896_s0 + $0x178] sm:$0xff] }
  0x1a   :  { %v185_v59 = vadd.f32 %v385_v2, %v114_v50  ;;  %v186_v60 = vadd.f32 %v385_v2, %v115_v51  ;;  %v245_v0 = vmax.f32 %v181_v52, 0.0  ;;  %v246_v3 = vmax.f32 %v182_v53, 0.0 }
  0x1b   :  { %v247_v4 = vmax.f32 %v183_v54, 0.0  ;;  %v187_v5 = vadd.f32 %v385_v2, %v116_v55  ;;  %308 = vst [vmem:[%s899_s3 + $0xc0] sm:$0xff] %v244_v57  ;;  %v248_v9 = vmax.f32 %v184_v58, 0.0  ;;  %v117_v12 = vmul.f32 %v380_v1, %v46_v56  ;;  %v62_v58 = vld [vmem:[%s896_s0 + $0x180] sm:$0xff] }
  0x1c   :  { %v249_v10 = vmax.f32 %v185_v59, 0.0  ;;  %v250_v11 = vmax.f32 %v186_v60, 0.0  ;;  %309 = vst [vmem:[%s899_s3 + $0xc8] sm:$0xff] %v245_v0  ;;  %310 = vst [vmem:[%s899_s3 + $0xd0] sm:$0xff] %v246_v3  ;;  %v118_v15 = vmul.f32 %v380_v1, %v47_v61  ;;  %v119_v16 = vmul.f32 %v380_v1, %v48_v62  ;;  %v64_v0 = vld [vmem:[%s896_s0 + $0x190] sm:$0xff]  ;;  %v65_v3 = vld [vmem:[%s896_s0 + $0x198] sm:$0xff] }
  0x1d   :  { %311 = vst [vmem:[%s899_s3 + $0xd8] sm:$0xff] %v247_v4  ;;  %v251_v14 = vmax.f32 %v187_v5, 0.0  ;;  %v120_v17 = vmul.f32 %v380_v1, %v49_v63  ;;  %312 = vst [vmem:[%s899_s3 + $0xe0] sm:$0xff] %v248_v9  ;;  %v188_v18 = vadd.f32 %v385_v2, %v117_v12  ;;  %v121_v19 = vmul.f32 %v380_v1, %v50_v6  ;;  %v63_v63 = vld [vmem:[%s896_s0 + $0x188] sm:$0xff] }
  0x1e   :  { %313 = vst [vmem:[%s899_s3 + $0xe8] sm:$0xff] %v249_v10  ;;  %314 = vst [vmem:[%s899_s3 + $0xf0] sm:$0xff] %v250_v11  ;;  %v122_v20 = vmul.f32 %v380_v1, %v51_v7  ;;  %v123_v21 = vmul.f32 %v380_v1, %v52_v8  ;;  %v189_v22 = vadd.f32 %v385_v2, %v118_v15  ;;  %v66_v8 = vld [vmem:[%s896_s0 + $0x1a0] sm:$0xff]  ;;  %v67_v9 = vld [vmem:[%s896_s0 + $0x1a8] sm:$0xff] }
  0x1f   :  { %315 = vst [vmem:[%s899_s3 + $0xf8] sm:$0xff] %v251_v14  ;;  %v190_v23 = vadd.f32 %v385_v2, %v119_v16  ;;  %v191_v24 = vadd.f32 %v385_v2, %v120_v17  ;;  %v124_v25 = vmul.f32 %v380_v1, %v53_v13  ;;  %v252_v27 = vmax.f32 %v188_v18, 0.0  ;;  %v68_v10 = vld [vmem:[%s896_s0 + $0x1b0] sm:$0xff]  ;;  %v69_v15 = vld [vmem:[%s896_s0 + $0x1b8] sm:$0xff] }
  0x20   :  { %v192_v28 = vadd.f32 %v385_v2, %v121_v19  ;;  %v193_v29 = vadd.f32 %v385_v2, %v122_v20  ;;  %v194_v30 = vadd.f32 %v385_v2, %v123_v21  ;;  %v253_v34 = vmax.f32 %v189_v22, 0.0 }
  0x21   :  { %v254_v35 = vmax.f32 %v190_v23, 0.0  ;;  %v255_v36 = vmax.f32 %v191_v24, 0.0  ;;  %v195_v37 = vadd.f32 %v385_v2, %v124_v25  ;;  %316 = vst [vmem:[%s899_s3 + $0x100] sm:$0xff] %v252_v27  ;;  %v125_v44 = vmul.f32 %v380_v1, %v54_v26 }
  0x22   :  { %v256_v41 = vmax.f32 %v192_v28, 0.0  ;;  %v257_v42 = vmax.f32 %v193_v29, 0.0  ;;  %v258_v43 = vmax.f32 %v194_v30, 0.0  ;;  %317 = vst [vmem:[%s899_s3 + $0x108] sm:$0xff] %v253_v34  ;;  %v126_v47 = vmul.f32 %v380_v1, %v55_v31  ;;  %v70_v28 = vld [vmem:[%s896_s0 + $0x1c0] sm:$0xff]  ;;  %v72_v34 = vld [vmem:[%s896_s0 + $0x1d0] sm:$0xff] }
  0x23   :  { %318 = vst [vmem:[%s899_s3 + $0x110] sm:$0xff] %v254_v35  ;;  %319 = vst [vmem:[%s899_s3 + $0x118] sm:$0xff] %v255_v36  ;;  %v259_v46 = vmax.f32 %v195_v37, 0.0  ;;  %v127_v48 = vmul.f32 %v380_v1, %v56_v32  ;;  %v128_v49 = vmul.f32 %v380_v1, %v57_v33  ;;  %v196_v50 = vadd.f32 %v385_v2, %v125_v44  ;;  %v71_v33 = vld [vmem:[%s896_s0 + $0x1c8] sm:$0xff]  ;;  %v73_v35 = vld [vmem:[%s896_s0 + $0x1d8] sm:$0xff] }
  0x24   :  { %320 = vst [vmem:[%s899_s3 + $0x120] sm:$0xff] %v256_v41  ;;  %321 = vst [vmem:[%s899_s3 + $0x128] sm:$0xff] %v257_v42  ;;  %v129_v51 = vmul.f32 %v380_v1, %v58_v38  ;;  %v130_v52 = vmul.f32 %v380_v1, %v59_v39  ;;  %v131_v53 = vmul.f32 %v380_v1, %v60_v40  ;;  %v74_v40 = vld [vmem:[%s896_s0 + $0x1e0] sm:$0xff]  ;;  %v75_v41 = vld [vmem:[%s896_s0 + $0x1e8] sm:$0xff] }
  0x25   :  { %322 = vst [vmem:[%s899_s3 + $0x130] sm:$0xff] %v258_v43  ;;  %323 = vst [vmem:[%s899_s3 + $0x138] sm:$0xff] %v259_v46  ;;  %v197_v54 = vadd.f32 %v385_v2, %v126_v47  ;;  %v198_v55 = vadd.f32 %v385_v2, %v127_v48  ;;  %v199_v56 = vadd.f32 %v385_v2, %v128_v49  ;;  %v260_v59 = vmax.f32 %v196_v50, 0.0  ;;  %v76_v42 = vld [vmem:[%s896_s0 + $0x1f0] sm:$0xff]  ;;  %v77_v47 = vld [vmem:[%s896_s0 + $0x1f8] sm:$0xff] }
  0x26   :  { %v132_v57 = vmul.f32 %v380_v1, %v61_v45  ;;  %v200_v60 = vadd.f32 %v385_v2, %v129_v51  ;;  %v201_v61 = vadd.f32 %v385_v2, %v130_v52  ;;  %v202_v62 = vadd.f32 %v385_v2, %v131_v53 }
  0x27   :  { %v261_v4 = vmax.f32 %v197_v54, 0.0  ;;  %v262_v5 = vmax.f32 %v198_v55, 0.0  ;;  %v263_v6 = vmax.f32 %v199_v56, 0.0  ;;  %324 = vst [vmem:[%s899_s3 + $0x140] sm:$0xff] %v260_v59  ;;  %v133_v14 = vmul.f32 %v380_v1, %v62_v58 }
  0x28   :  { %v203_v7 = vadd.f32 %v385_v2, %v132_v57  ;;  %v264_v11 = vmax.f32 %v200_v60, 0.0  ;;  %v265_v12 = vmax.f32 %v201_v61, 0.0  ;;  %v266_v13 = vmax.f32 %v202_v62, 0.0 }
  0x29   :  { %325 = vst [vmem:[%s899_s3 + $0x148] sm:$0xff] %v261_v4  ;;  %326 = vst [vmem:[%s899_s3 + $0x150] sm:$0xff] %v262_v5  ;;  %v134_v17 = vmul.f32 %v380_v1, %v63_v63  ;;  %v135_v18 = vmul.f32 %v380_v1, %v64_v0  ;;  %v136_v19 = vmul.f32 %v380_v1, %v65_v3 }
  0x2a   :  { %327 = vst [vmem:[%s899_s3 + $0x158] sm:$0xff] %v263_v6  ;;  %v267_v16 = vmax.f32 %v203_v7, 0.0  ;;  %328 = vst [vmem:[%s899_s3 + $0x160] sm:$0xff] %v264_v11  ;;  %v204_v20 = vadd.f32 %v385_v2, %v133_v14  ;;  %v137_v21 = vmul.f32 %v380_v1, %v66_v8  ;;  %v138_v22 = vmul.f32 %v380_v1, %v67_v9 }
  0x2b   :  { %329 = vst [vmem:[%s899_s3 + $0x168] sm:$0xff] %v265_v12  ;;  %330 = vst [vmem:[%s899_s3 + $0x170] sm:$0xff] %v266_v13  ;;  %v139_v23 = vmul.f32 %v380_v1, %v68_v10  ;;  %v205_v24 = vadd.f32 %v385_v2, %v134_v17  ;;  %v206_v25 = vadd.f32 %v385_v2, %v135_v18 }
  0x2c   :  { %331 = vst [vmem:[%s899_s3 + $0x178] sm:$0xff] %v267_v16  ;;  %v207_v26 = vadd.f32 %v385_v2, %v136_v19  ;;  %v140_v27 = vmul.f32 %v380_v1, %v69_v15  ;;  %v268_v29 = vmax.f32 %v204_v20, 0.0  ;;  %v208_v30 = vadd.f32 %v385_v2, %v137_v21 }
  0x2d   :  { %v209_v31 = vadd.f32 %v385_v2, %v138_v22  ;;  %v210_v32 = vadd.f32 %v385_v2, %v139_v23  ;;  %v269_v36 = vmax.f32 %v205_v24, 0.0  ;;  %v270_v37 = vmax.f32 %v206_v25, 0.0 }
  0x2e   :  { %v271_v38 = vmax.f32 %v207_v26, 0.0  ;;  %v211_v39 = vadd.f32 %v385_v2, %v140_v27  ;;  %332 = vst [vmem:[%s899_s3 + $0x180] sm:$0xff] %v268_v29  ;;  %v272_v43 = vmax.f32 %v208_v30, 0.0  ;;  %v141_v46 = vmul.f32 %v380_v1, %v70_v28 }
  0x2f   :  { %v273_v44 = vmax.f32 %v209_v31, 0.0  ;;  %v274_v45 = vmax.f32 %v210_v32, 0.0  ;;  %333 = vst [vmem:[%s899_s3 + $0x188] sm:$0xff] %v269_v36  ;;  %334 = vst [vmem:[%s899_s3 + $0x190] sm:$0xff] %v270_v37  ;;  %v142_v49 = vmul.f32 %v380_v1, %v71_v33  ;;  %v143_v50 = vmul.f32 %v380_v1, %v72_v34 }
  0x30   :  { %335 = vst [vmem:[%s899_s3 + $0x198] sm:$0xff] %v271_v38  ;;  %v275_v48 = vmax.f32 %v211_v39, 0.0  ;;  %v144_v51 = vmul.f32 %v380_v1, %v73_v35  ;;  %336 = vst [vmem:[%s899_s3 + $0x1a0] sm:$0xff] %v272_v43  ;;  %v212_v52 = vadd.f32 %v385_v2, %v141_v46  ;;  %v145_v53 = vmul.f32 %v380_v1, %v74_v40 }
  0x31   :  { %337 = vst [vmem:[%s899_s3 + $0x1a8] sm:$0xff] %v273_v44  ;;  %338 = vst [vmem:[%s899_s3 + $0x1b0] sm:$0xff] %v274_v45  ;;  %v146_v54 = vmul.f32 %v380_v1, %v75_v41  ;;  %v147_v55 = vmul.f32 %v380_v1, %v76_v42  ;;  %v213_v56 = vadd.f32 %v385_v2, %v142_v49 }
  0x32   :  { %339 = vst [vmem:[%s899_s3 + $0x1b8] sm:$0xff] %v275_v48  ;;  %v214_v57 = vadd.f32 %v385_v2, %v143_v50  ;;  %v215_v58 = vadd.f32 %v385_v2, %v144_v51  ;;  %v148_v59 = vmul.f32 %v380_v1, %v77_v47  ;;  %v276_v60 = vmax.f32 %v212_v52, 0.0 }
  0x33   :  { %v216_v61 = vadd.f32 %v385_v2, %v145_v53  ;;  %v217_v62 = vadd.f32 %v385_v2, %v146_v54  ;;  %v218_v63 = vadd.f32 %v385_v2, %v147_v55  ;;  %v277_v0 = vmax.f32 %v213_v56, 0.0 }
  0x34   :  { %v278_v3 = vmax.f32 %v214_v57, 0.0  ;;  %v279_v4 = vmax.f32 %v215_v58, 0.0  ;;  %v219_v5 = vadd.f32 %v385_v2, %v148_v59  ;;  %340 = vst [vmem:[%s899_s3 + $0x1c0] sm:$0xff] %v276_v60 }
  0x35   :  { %v280_v6 = vmax.f32 %v216_v61, 0.0  ;;  %v281_v7 = vmax.f32 %v217_v62, 0.0  ;;  %v282_v8 = vmax.f32 %v218_v63, 0.0  ;;  %341 = vst [vmem:[%s899_s3 + $0x1c8] sm:$0xff] %v277_v0 }
  0x36   :  { %342 = vst [vmem:[%s899_s3 + $0x1d0] sm:$0xff] %v278_v3  ;;  %343 = vst [vmem:[%s899_s3 + $0x1d8] sm:$0xff] %v279_v4  ;;  %v283_v1 = vmax.f32 %v219_v5, 0.0 }
  0x37   :  { %344 = vst [vmem:[%s899_s3 + $0x1e0] sm:$0xff] %v280_v6  ;;  %345 = vst [vmem:[%s899_s3 + $0x1e8] sm:$0xff] %v281_v7 }
  0x38   :  { %346 = vst [vmem:[%s899_s3 + $0x1f0] sm:$0xff] %v282_v8  ;;  %347 = vst [vmem:[%s899_s3 + $0x1f8] sm:$0xff] %v283_v1 }

// kernel: resnet_generator_forward.32
= control target key start
LH: loop header
LB: loop body
LE: loop exit
PB: predicated region body
PF: predicated region fallthrough
CT: control target
= control target key end

     0   :  { %v105_v0 = vmov 0.0   ;;  %s187_s1 = inlined_call_operand.vmem [shape: f32[1,128], index: 1, kind: output, shape index: {0}]   ;;  %s188_s2 = inlined_call_operand.vmem [shape: f32[1,128], index: 2, kind: output, shape index: {1}]   ;;  %s189_s0 = inlined_call_operand.vmem [shape: f32[128,128], index: 0, kind: input, shape index: {}]  }
   0x1   :  { %14 = vst [vmem:[%s187_s1] sm:$0x1] %v105_v0  ;;  %15 = vst [vmem:[%s188_s2] sm:$0x1] %v105_v0  ;;  %v16_v1 = vld [vmem:[%s189_s0] sm:$0xff]  ;;  %v17_v2 = vld [vmem:[%s189_s0 + $0x8] sm:$0xff] }
   0x2   :  { %v18_v3 = vld [vmem:[%s189_s0 + $0x10] sm:$0xff]  ;;  %v19_v4 = vld [vmem:[%s189_s0 + $0x18] sm:$0xff]  ;;  %v33_v5 = vadd.f32 %v17_v2, %v16_v1  ;;  %v57_v6 = vmul.f32 %v16_v1, %v16_v1  ;;  %v58_v7 = vmul.f32 %v17_v2, %v17_v2  ;;  %v20_v9 = vld [vmem:[%s189_s0 + $0x20] sm:$0xff] }
   0x3   :  { %v59_v8 = vmul.f32 %v18_v3, %v18_v3  ;;  %v60_v11 = vmul.f32 %v19_v4, %v19_v4  ;;  %v21_v13 = vld [vmem:[%s189_s0 + $0x28] sm:$0xff]  ;;  %v61_v15 = vmul.f32 %v20_v9, %v20_v9  ;;  %v22_v17 = vld [vmem:[%s189_s0 + $0x30] sm:$0xff]  ;;  %v23_v21 = vld [vmem:[%s189_s0 + $0x38] sm:$0xff] }
   0x4   :  { %v34_v10 = vadd.f32 %v33_v5, %v18_v3  ;;  %v73_v12 = vadd.f32 %v58_v7, %v57_v6  ;;  %v62_v19 = vmul.f32 %v21_v13, %v21_v13  ;;  %v63_v23 = vmul.f32 %v22_v17, %v22_v17  ;;  %v24_v25 = vld [vmem:[%s189_s0 + $0x40] sm:$0xff]  ;;  %v25_v29 = vld [vmem:[%s189_s0 + $0x48] sm:$0xff]  ;;  %v26_v33 = vld [vmem:[%s189_s0 + $0x50] sm:$0xff] }
   0x5   :  { %v64_v27 = vmul.f32 %v23_v21, %v23_v21  ;;  %v65_v31 = vmul.f32 %v24_v25, %v24_v25  ;;  %v66_v35 = vmul.f32 %v25_v29, %v25_v29  ;;  %v27_v37 = vld [vmem:[%s189_s0 + $0x58] sm:$0xff]  ;;  %v67_v39 = vmul.f32 %v26_v33, %v26_v33  ;;  %v28_v41 = vld [vmem:[%s189_s0 + $0x60] sm:$0xff]  ;;  %v29_v45 = vld [vmem:[%s189_s0 + $0x68] sm:$0xff] }
   0x6   :  { %v35_v14 = vadd.f32 %v34_v10, %v19_v4  ;;  %v74_v16 = vadd.f32 %v73_v12, %v59_v8  ;;  %v68_v43 = vmul.f32 %v27_v37, %v27_v37  ;;  %v69_v47 = vmul.f32 %v28_v41, %v28_v41  ;;  %v30_v49 = vld [vmem:[%s189_s0 + $0x70] sm:$0xff]  ;;  %v31_v53 = vld [vmem:[%s189_s0 + $0x78] sm:$0xff] }
   0x7   :  { %v70_v51 = vmul.f32 %v29_v45, %v29_v45  ;;  %v71_v55 = vmul.f32 %v30_v49, %v30_v49  ;;  %v72_v58 = vmul.f32 %v31_v53, %v31_v53 }
   0x8   :  { %v36_v18 = vadd.f32 %v35_v14, %v20_v9  ;;  %v75_v20 = vadd.f32 %v74_v16, %v60_v11  ;;  %v32_v7 = vld [vmem:[%s187_s1] sm:$0x1] }
   0x9   :  { %v56_v12 = vld [vmem:[%s188_s2] sm:$0x1] }
   0xa   :  { %v37_v22 = vadd.f32 %v36_v18, %v21_v13  ;;  %v76_v24 = vadd.f32 %v75_v20, %v61_v15 }
   0xc   :  { %v38_v26 = vadd.f32 %v37_v22, %v22_v17  ;;  %v77_v28 = vadd.f32 %v76_v24, %v62_v19 }
   0xe   :  { %v39_v30 = vadd.f32 %v38_v26, %v23_v21  ;;  %v78_v32 = vadd.f32 %v77_v28, %v63_v23 }
  0x10   :  { %v40_v34 = vadd.f32 %v39_v30, %v24_v25  ;;  %v79_v36 = vadd.f32 %v78_v32, %v64_v27 }
  0x12   :  { %v41_v38 = vadd.f32 %v40_v34, %v25_v29  ;;  %v80_v40 = vadd.f32 %v79_v36, %v65_v31 }
  0x14   :  { %v42_v42 = vadd.f32 %v41_v38, %v26_v33  ;;  %v81_v44 = vadd.f32 %v80_v40, %v66_v35 }
  0x16   :  { %v43_v46 = vadd.f32 %v42_v42, %v27_v37  ;;  %v82_v48 = vadd.f32 %v81_v44, %v67_v39 }
  0x18   :  { %v44_v50 = vadd.f32 %v43_v46, %v28_v41  ;;  %v83_v52 = vadd.f32 %v82_v48, %v68_v43 }
  0x1a   :  { %v45_v54 = vadd.f32 %v44_v50, %v29_v45  ;;  %v84_v56 = vadd.f32 %v83_v52, %v69_v47 }
  0x1c   :  { %v46_v57 = vadd.f32 %v45_v54, %v30_v49  ;;  %v85_v59 = vadd.f32 %v84_v56, %v70_v51 }
  0x1e   :  { %v47_v60 = vadd.f32 %v46_v57, %v31_v53  ;;  %v86_v61 = vadd.f32 %v85_v59, %v71_v55 }
  0x20   :  { %v48_v62 = vrot.slane %v47_v60, 4  ;;  %v87_v63 = vadd.f32 %v86_v61, %v72_v58 }
  0x22   :  { %v49_v0 = vadd.f32 %v48_v62, %v47_v60  ;;  %v88_v1 = vrot.slane %v87_v63, 4 }
  0x24   :  { %v50_v2 = vrot.slane %v49_v0, 2  ;;  %v89_v3 = vadd.f32 %v88_v1, %v87_v63 }
  0x26   :  { %v51_v4 = vadd.f32 %v50_v2, %v49_v0  ;;  %v90_v5 = vrot.slane %v89_v3, 2 }
  0x28   :  { %v52_v6 = vrot.slane %v51_v4, 1  ;;  %v91_v8 = vadd.f32 %v90_v5, %v89_v3 }
  0x2a   :  { %v53_v9 = vadd.f32 %v52_v6, %v51_v4  ;;  %v92_v10 = vrot.slane %v91_v8, 1 }
  0x2c   :  { %v54_v11 = vadd.f32 %v53_v9, %v32_v7  ;;  %v93_v13 = vadd.f32 %v92_v10, %v91_v8 }
  0x2e   :  { %55 = vst [vmem:[%s187_s1] sm:$0x1] %v54_v11  ;;  %v94_v14 = vadd.f32 %v93_v13, %v56_v12 }
  0x30   :  { %95 = vst [vmem:[%s188_s2] sm:$0x1] %v94_v14 }

// kernel: resnet_generator_forward.31
= control target key start
LH: loop header
LB: loop body
LE: loop exit
PB: predicated region body
PF: predicated region fallthrough
CT: control target
= control target key end

     0   :  { %s1501_s12 = smov 0   ;;  %s1503_s13 = smov 0   ;;  %s1739_s0 = inlined_call_operand.vmem [shape: bf16[128,1152], index: 0, kind: input, shape index: {}]   ;;  %s1740_s1 = inlined_call_operand.vmem [shape: bf16[1152,128], index: 1, kind: input, shape index: {}]   ;;  %s1741_s2 = inlined_call_operand.vmem [shape: f32[1,128], index: 2, kind: input, shape index: {}]   ;;  %s1742_s3 = inlined_call_operand.vmem [shape: f32[128,128], index: 3, kind: output, shape index: {}]  }
   0x1   :  { %s1505_s14 = smov 0   ;;  %s1507_s15 = smov 0  }
   0x2   :  { %s1509_s16 = smov 0  }
   0x3 LB: > { %s25_s17 = sadd.s32 1, %s1474_s15  ;;  %p48_p1 = scmp.ne.s32.totalorder %s1466_s13, %s1462_s12  ;;  %s1478_s16 = sphi %s1509_s16, %s13_s16   ;;  %s1474_s15 = sphi %s1507_s15, %s1746_s15   ;;  %s1470_s14 = sphi %s1505_s14, %s1745_s14   ;;  %s1466_s13 = sphi %s1503_s13, %s1744_s13   ;;  %s1462_s12 = sphi %s1501_s12, %s1743_s12  }
   0x4   : > { %p26_p0 = scmp.ge.s32.totalorder %s25_s17, 3  ;;  %p49_p2 = scmp.eq.s32.totalorder %s1478_s16, 0 }
   0x5   : > { %s41_s19 = sadd.s32 1, %s1466_s13  ;;  %p1137_p5 = scmp.ge.s32.totalorder %s1478_s16, 3 }
   0x6   : > { %s1748_s17 = smov (%p26_p0, %s25_s17), 0  ;;  %p50_p3 = por %p49_p2, %p48_p1 }
   0x7   : > { %s37_s18 = ssub.s32 %s1474_s15, %s1748_s17  ;;  %162 = sbr.rel (%p1137_p5) target bundleno = 35 (0x23), region = 20 }
   0x8   : > { %p39_p4 = scmp.eq.s32.totalorder %s37_s18, 0 }
   0xa   : > { %s1536_s20 = scalar_select %p39_p4, %s1466_s13, %s41_s19  }
   0xc   : > { %165 = sbr.rel (!%p50_p3) target bundleno = 35 (0x23), region = 24  ;;  %s167_s21 = sand.u32 (%p50_p3), 1, %s1466_s13  }
   0xd   : > { %s1228_s22 = smul.u32 (%p50_p3), 12, %s1474_s15 }
   0xe   : > { %s1341_s23 = smul.u32 (%p50_p3), 192, %s167_s21 }
   0xf   : > { %s1544_s26 = scalar_lea.vmem (%p50_p3), %s1739_s0, %s1228_s22 }
  0x10   : > { %v190_v0 = vld [vmem:[%s1544_s26] sm:$0xff] (%p50_p3)  ;;  %v194_v2 = vld [vmem:[%s1544_s26 + $0x48] sm:$0xff] (%p50_p3)  ;;  %s1549_s27 = scalar_lea.vmem (%p50_p3), [#allocation3], %s1341_s23  ;;  %v198_v4 = vld [vmem:[%s1544_s26 + $0x90] sm:$0xff] (%p50_p3) }
  0x11   : > { %v192_v1 = vld [vmem:[%s1544_s26 + $0x24] sm:$0xff]  ;;  %191 = vst [vmem:[%s1549_s27] sm:$0xff] %v190_v0  ;;  %195 = vst [vmem:[%s1549_s27 + $0x18] sm:$0xff] %v194_v2  ;;  %v196_v3 = vld [vmem:[%s1544_s26 + $0x6c] sm:$0xff] }
  0x12   : > { %193 = vst [vmem:[%s1549_s27 + $0xc] sm:$0xff] %v192_v1  ;;  %v200_v5 = vld [vmem:[%s1544_s26 + $0xb4] sm:$0xff]  ;;  %197 = vst [vmem:[%s1549_s27 + $0x24] sm:$0xff] %v196_v3  ;;  %v204_v7 = vld [vmem:[%s1544_s26 + $0xfc] sm:$0xff] }
  0x13   : > { %199 = vst [vmem:[%s1549_s27 + $0x30] sm:$0xff] %v198_v4  ;;  %201 = vst [vmem:[%s1549_s27 + $0x3c] sm:$0xff] %v200_v5  ;;  %v202_v6 = vld [vmem:[%s1544_s26 + $0xd8] sm:$0xff]  ;;  %v206_v8 = vld [vmem:[%s1544_s26 + $0x120] sm:$0xff] }
  0x14   : > { %203 = vst [vmem:[%s1549_s27 + $0x48] sm:$0xff] %v202_v6  ;;  %205 = vst [vmem:[%s1549_s27 + $0x54] sm:$0xff] %v204_v7  ;;  %v208_v9 = vld [vmem:[%s1544_s26 + $0x144] sm:$0xff]  ;;  %v212_v11 = vld [vmem:[%s1544_s26 + $0x18c] sm:$0xff] }
  0x15   : > { %207 = vst [vmem:[%s1549_s27 + $0x60] sm:$0xff] %v206_v8  ;;  %v210_v10 = vld [vmem:[%s1544_s26 + $0x168] sm:$0xff]  ;;  %209 = vst [vmem:[%s1549_s27 + $0x6c] sm:$0xff] %v208_v9  ;;  %v214_v12 = vld [vmem:[%s1544_s26 + $0x1b0] sm:$0xff] }
  0x16   : > { %211 = vst [vmem:[%s1549_s27 + $0x78] sm:$0xff] %v210_v10  ;;  %213 = vst [vmem:[%s1549_s27 + $0x84] sm:$0xff] %v212_v11  ;;  %v216_v13 = vld [vmem:[%s1544_s26 + $0x1d4] sm:$0xff]  ;;  %v220_v15 = vld [vmem:[%s1544_s26 + $0x21c] sm:$0xff] }
  0x17   : > { %v218_v14 = vld [vmem:[%s1544_s26 + $0x1f8] sm:$0xff]  ;;  %215 = vst [vmem:[%s1549_s27 + $0x90] sm:$0xff] %v214_v12  ;;  %217 = vst [vmem:[%s1549_s27 + $0x9c] sm:$0xff] %v216_v13  ;;  %v1139_v16 = vld [vmem:[%s1544_s26 + $0x8] sm:$0xf] }
  0x18   : > { %219 = vst [vmem:[%s1549_s27 + $0xa8] sm:$0xff] %v218_v14  ;;  %v1141_v17 = vld [vmem:[%s1544_s26 + $0x2c] sm:$0xf]  ;;  %221 = vst [vmem:[%s1549_s27 + $0xb4] sm:$0xff] %v220_v15  ;;  %v1143_v18 = vld [vmem:[%s1544_s26 + $0x50] sm:$0xf] }
  0x19   : > { %1140 = vst [vmem:[%s1549_s27 + $0x8] sm:$0xf] %v1139_v16  ;;  %1142 = vst [vmem:[%s1549_s27 + $0x14] sm:$0xf] %v1141_v17  ;;  %v1145_v19 = vld [vmem:[%s1544_s26 + $0x74] sm:$0xf] }
  0x1a   : > { %v1147_v20 = vld [vmem:[%s1544_s26 + $0x98] sm:$0xf]  ;;  %1144 = vst [vmem:[%s1549_s27 + $0x20] sm:$0xf] %v1143_v18  ;;  %1146 = vst [vmem:[%s1549_s27 + $0x2c] sm:$0xf] %v1145_v19 }
  0x1b   : > { %1148 = vst [vmem:[%s1549_s27 + $0x38] sm:$0xf] %v1147_v20  ;;  %v1149_v21 = vld [vmem:[%s1544_s26 + $0xbc] sm:$0xf]  ;;  %v1151_v22 = vld [vmem:[%s1544_s26 + $0xe0] sm:$0xf] }
  0x1c   : > { %v1153_v23 = vld [vmem:[%s1544_s26 + $0x104] sm:$0xf]  ;;  %1150 = vst [vmem:[%s1549_s27 + $0x44] sm:$0xf] %v1149_v21  ;;  %1152 = vst [vmem:[%s1549_s27 + $0x50] sm:$0xf] %v1151_v22 }
  0x1d   : > { %1154 = vst [vmem:[%s1549_s27 + $0x5c] sm:$0xf] %v1153_v23  ;;  %v1155_v24 = vld [vmem:[%s1544_s26 + $0x128] sm:$0xf]  ;;  %v1157_v25 = vld [vmem:[%s1544_s26 + $0x14c] sm:$0xf] }
  0x1e   : > { %v1159_v26 = vld [vmem:[%s1544_s26 + $0x170] sm:$0xf]  ;;  %1156 = vst [vmem:[%s1549_s27 + $0x68] sm:$0xf] %v1155_v24  ;;  %1158 = vst [vmem:[%s1549_s27 + $0x74] sm:$0xf] %v1157_v25 }
  0x1f   : > { %1160 = vst [vmem:[%s1549_s27 + $0x80] sm:$0xf] %v1159_v26  ;;  %v1161_v27 = vld [vmem:[%s1544_s26 + $0x194] sm:$0xf]  ;;  %v1163_v28 = vld [vmem:[%s1544_s26 + $0x1b8] sm:$0xf] }
  0x20   : > { %v1165_v29 = vld [vmem:[%s1544_s26 + $0x1dc] sm:$0xf]  ;;  %1162 = vst [vmem:[%s1549_s27 + $0x8c] sm:$0xf] %v1161_v27  ;;  %1164 = vst [vmem:[%s1549_s27 + $0x98] sm:$0xf] %v1163_v28 }
  0x21   : > { %1166 = vst [vmem:[%s1549_s27 + $0xa4] sm:$0xf] %v1165_v29  ;;  %v1167_v30 = vld [vmem:[%s1544_s26 + $0x200] sm:$0xf]  ;;  %v1169_v31 = vld [vmem:[%s1544_s26 + $0x224] sm:$0xf] }
  0x22   : > { %1168 = vst [vmem:[%s1549_s27 + $0xb0] sm:$0xf] %v1167_v30  ;;  %1170 = vst [vmem:[%s1549_s27 + $0xbc] sm:$0xf] %v1169_v31 }
  0x23 PF: > { %p1171_p6 = scmp.ge.s32.totalorder %s1478_s16, 1  ;;  %p278_p7 = scmp.lt.s32.totalorder %s1478_s16, 4 }
  0x25   : > { %p279_p8 = pnand %p1171_p6, %p278_p7 }
  0x26   : > { %s285_s28 = sand.u32 (!%p279_p8), 1, %s1462_s12   ;;  %s324_s29 = smul.u32 (!%p279_p8), 48, %s1470_s14 }
  0x27   : > { %282 = sbr.rel (%p279_p8) target bundleno = 364 (0x16c), region = 54  ;;  %p1173_p10 = scmp.ne.s32.totalorder (!%p279_p8), %s1470_s14, 0 }
  0x28   : > { %s1342_s30 = smul.u32 (!%p279_p8), 192, %s285_s28  ;;  %p325_p9 = scmp.lt.s32.totalorder (!%p279_p8), %s324_s29, 143 }
  0x2a   : > { %s1621_s8 = scalar_lea.vmem (!%p279_p8), [#allocation3], %s1342_s30 }
  0x2c   : > { %s1750_s29 = smov (!%p325_p9, %s324_s29), 143  ;;  %349 = sbr.rel (%p1173_p10) target bundleno = 58 (0x3a), region = 62 }
  0x2d   : > { %s1172_s4 = sshll.u32 %s1750_s29, 2 }
  0x2e   : > { %s1619_s7 = scalar_lea.vmem %s1740_s1, %s1172_s4 }
  0x31   : > { %v1480_v32 = vmov 0.0  }
  0x32   : > { %350 = vst [vmem:[#allocation2 + $0x30] sm:$0xff] %v1480_v32  ;;  %351 = vst [vmem:[#allocation2] sm:$0xff] %v1480_v32 }
  0x33   : > { %352 = vst [vmem:[#allocation2 + $0x58] sm:$0xff] %v1480_v32  ;;  %353 = vst [vmem:[#allocation2 + $0x18] sm:$0xff] %v1480_v32 }
  0x34   : > { %354 = vst [vmem:[#allocation2 + $0x50] sm:$0xff] %v1480_v32  ;;  %355 = vst [vmem:[#allocation2 + $0x68] sm:$0xff] %v1480_v32 }
  0x35   : > { %356 = vst [vmem:[#allocation2 + $0x8] sm:$0xff] %v1480_v32  ;;  %357 = vst [vmem:[#allocation2 + $0x48] sm:$0xff] %v1480_v32 }
  0x36   : > { %358 = vst [vmem:[#allocation2 + $0x40] sm:$0xff] %v1480_v32  ;;  %359 = vst [vmem:[#allocation2 + $0x20] sm:$0xff] %v1480_v32 }
  0x37   : > { %360 = vst [vmem:[#allocation2 + $0x10] sm:$0xff] %v1480_v32  ;;  %361 = vst [vmem:[#allocation2 + $0x38] sm:$0xff] %v1480_v32 }
  0x38   : > { %362 = vst [vmem:[#allocation2 + $0x60] sm:$0xff] %v1480_v32  ;;  %363 = vst [vmem:[#allocation2 + $0x70] sm:$0xff] %v1480_v32 }
  0x39   : > { %364 = vst [vmem:[#allocation2 + $0x78] sm:$0xff] %v1480_v32  ;;  %365 = vst [vmem:[#allocation2 + $0x28] sm:$0xff] %v1480_v32 }
  0x3a PF: > { %v1384_v33 = vld [vmem:[%s1619_s7 + $0x78] sm:$0xff]   ;;  %v1387_v36 = vld [vmem:[%s1619_s7 + $0x70] sm:$0xff]   ;;  %v1390_v39 = vld [vmem:[%s1619_s7 + $0x68] sm:$0xff]   ;;  %p1222_p11 = scmp.ne.s32.totalorder %s1470_s14, 2 }
  0x3b   : > { %v1385_v34 = vld [vmem:[%s1619_s7 + $0x38] sm:$0xff]   ;;  %1229 = vmatprep.subr.bf16.mxu0 %v1384_v33  ;;  %v1388_v37 = vld [vmem:[%s1619_s7 + $0x30] sm:$0xff]   ;;  %v1391_v40 = vld [vmem:[%s1619_s7 + $0x28] sm:$0xff]  }
  0x3c   : > { %v1386_v35 = vld [vmem:[%s1619_s7 + $0xb8] sm:$0xff]   ;;  %1230 = vmatpush3.bf16.msra.mxu0 %v1385_v34  ;;  %v1389_v38 = vld [vmem:[%s1619_s7 + $0xb0] sm:$0xff]   ;;  %v1392_v41 = vld [vmem:[%s1619_s7 + $0xa8] sm:$0xff]  }
  0x3d   : > { %1309 = vmatprep.subr.bf16.mxu1 %v1386_v35  ;;  %1231 = vmatprep.subr.bf16.mxu0 %v1387_v36  ;;  %v1393_v42 = vld [vmem:[%s1619_s7 + $0x60] sm:$0xff]   ;;  %v1396_v45 = vld [vmem:[%s1619_s7 + $0x58] sm:$0xff]   ;;  %v1399_v48 = vld [vmem:[%s1619_s7 + $0x50] sm:$0xff]  }
  0x3e   : > { %1310 = vmatpush3.bf16.msra.mxu1 %v1386_v35  ;;  %v1394_v43 = vld [vmem:[%s1619_s7 + $0x20] sm:$0xff]   ;;  %v1398_v46 = vld [vmem:[%s1619_s7 + $0x98] sm:$0xff]   ;;  %v1401_v49 = vld [vmem:[%s1619_s7 + $0x90] sm:$0xff]  }
  0x3f   : > { %1311 = vmatprep.subr.bf16.mxu1 %v1389_v38  ;;  %v1395_v44 = vld [vmem:[%s1619_s7 + $0xa0] sm:$0xff]   ;;  %v1397_v47 = vld [vmem:[%s1619_s7 + $0x18] sm:$0xff]   ;;  %v1400_v50 = vld [vmem:[%s1619_s7 + $0x10] sm:$0xff]  }
  0x40   : > { %1232 = vmatpush3.bf16.msra.mxu0 %v1388_v37  ;;  %v1402_v51 = vld [vmem:[%s1619_s7 + $0x48] sm:$0xff]   ;;  %v1405_v54 = vld [vmem:[%s1619_s7 + $0x40] sm:$0xff]   ;;  %v1420_v1 = vld [vmem:[%s1621_s8 + $0x50] ss:$12 sps:$4 sm:$0xff]  }
  0x41   : > { %1233 = vmatprep.subr.bf16.mxu0 %v1390_v39  ;;  %v1403_v52 = vld [vmem:[%s1619_s7 + $0x8] sm:$0xff]   ;;  %v1407_v55 = vld [vmem:[%s1619_s7 + $0x80] sm:$0xff]   ;;  %v1418_v3 = vld [vmem:[%s1621_s8 + $0x30] ss:$12 sps:$4 sm:$0xff]  }
  0x42   : > { %1312 = vmatpush3.bf16.msra.mxu1 %v1389_v38  ;;  %v1404_v53 = vld [vmem:[%s1619_s7 + $0x88] sm:$0xff]   ;;  %v1410_v56 = vld [vmem:[%s1621_s8 + $0x4] ss:$12 sps:$4 sm:$0xff]   ;;  %v1416_v0 = vld [vmem:[%s1621_s8 + $0x34] ss:$12 sps:$4 sm:$0xff]  }
  0x43   : > { %1313 = vmatprep.subr.bf16.mxu1 %v1392_v41  ;;  %v1411_v57 = vld [vmem:[%s1621_s8 + $0x8] ss:$12 sps:$4 sm:$0xff]   ;;  %v1406_v58 = vld [vmem:[%s1619_s7] sm:$0xff]   ;;  %766 = vmatprep.mubr.bf16.mxu0 %v1410_v56  ;;  %v1421_v4 = vld [vmem:[%s1621_s8 + $0x4c] ss:$12 sps:$4 sm:$0xff]  }
  0x44   : > { %1234 = vmatpush3.bf16.msra.mxu0 %v1391_v40  ;;  %1325 = vmatprep.mubr.bf16.mxu1 %v1411_v57  ;;  %v1408_v59 = vld [vmem:[%s1621_s8] ss:$12 sps:$4 sm:$0xff]   ;;  %v1413_v60 = vld [vmem:[%s1621_s8 + $0x1c] ss:$12 sps:$4 sm:$0xff]   ;;  %v1419_v62 = vld [vmem:[%s1621_s8 + $0x38] ss:$12 sps:$4 sm:$0xff]  }
  0x45   : > { %1235 = vmatprep.subr.bf16.mxu0 %v1393_v42  ;;  %v1412_v61 = vld [vmem:[%s1621_s8 + $0x20] ss:$12 sps:$4 sm:$0xff]   ;;  %v1415_v63 = vld [vmem:[%s1621_s8 + $0x18] ss:$12 sps:$4 sm:$0xff]   ;;  %v1427_v2 = vld [vmem:[%s1621_s8 + $0x68] ss:$12 sps:$4 sm:$0xff]  }
  0x46   : > { %1314 = vmatpush3.bf16.msra.mxu1 %v1392_v41  ;;  %v1428_v5 = vld [vmem:[%s1621_s8 + $0x80] ss:$12 sps:$4 sm:$0xff]   ;;  %v1435_v6 = vld [vmem:[%s1621_s8 + $0x98] ss:$12 sps:$4 sm:$0xff]   ;;  %v1423_v7 = vld [vmem:[%s1621_s8 + $0x48] ss:$12 sps:$4 sm:$0xff]  }
  0x47   : > { %1315 = vmatprep.subr.bf16.mxu1 %v1395_v44  ;;  %v1424_v8 = vld [vmem:[%s1621_s8 + $0x64] ss:$12 sps:$4 sm:$0xff]   ;;  %v1426_v10 = vld [vmem:[%s1621_s8 + $0x60] ss:$12 sps:$4 sm:$0xff]   ;;  %v1429_v11 = vld [vmem:[%s1621_s8 + $0x7c] ss:$12 sps:$4 sm:$0xff]  }
  0x48   : > { %1236 = vmatpush3.bf16.msra.mxu0 %v1394_v43  ;;  %v1436_v9 = vld [vmem:[%s1621_s8 + $0xb0] ss:$12 sps:$4 sm:$0xff]   ;;  %v1431_v12 = vld [vmem:[%s1621_s8 + $0x78] ss:$12 sps:$4 sm:$0xff]   ;;  %v1432_v13 = vld [vmem:[%s1621_s8 + $0x94] ss:$12 sps:$4 sm:$0xff]  }
  0x49   : > { %1237 = vmatprep.subr.bf16.mxu0 %v1396_v45  ;;  %v1434_v14 = vld [vmem:[%s1621_s8 + $0x90] ss:$12 sps:$4 sm:$0xff]   ;;  %v1437_v15 = vld [vmem:[%s1621_s8 + $0xac] ss:$12 sps:$4 sm:$0xff]   ;;  %v1439_v16 = vld [vmem:[%s1621_s8 + $0xa8] ss:$12 sps:$4 sm:$0xff]  }
  0x4a   : > { %1316 = vmatpush3.bf16.msra.mxu1 %v1395_v44  ;;  %v366_v22 = vld [vmem:[#allocation2 + $0x30] sm:$0xff]  ;;  %v367_v30 = vld [vmem:[#allocation2] sm:$0xff]  ;;  %v368_v37 = vld [vmem:[#allocation2 + $0x58] sm:$0xff] }
  0x4b   : > { %1317 = vmatprep.subr.bf16.mxu1 %v1398_v46  ;;  %v369_v44 = vld [vmem:[#allocation2 + $0x18] sm:$0xff] }
  0x4c   : > { %1238 = vmatpush3.bf16.msra.mxu0 %v1397_v47 }
  0x4d   : > { %1239 = vmatprep.subr.bf16.mxu0 %v1399_v48 }
  0x4e   : > { %1318 = vmatpush3.bf16.msra.mxu1 %v1398_v46 }
  0x4f   : > { %1319 = vmatprep.subr.bf16.mxu1 %v1401_v49 }
  0x50   : > { %1240 = vmatpush3.bf16.msra.mxu0 %v1400_v50 }
  0x51   : > { %1241 = vmatprep.subr.bf16.mxu0 %v1402_v51 }
  0x52   : > { %1320 = vmatpush3.bf16.msra.mxu1 %v1401_v49 }
  0x53   : > { %1321 = vmatprep.subr.bf16.mxu1 %v1404_v53 }
  0x54   : > { %1242 = vmatpush3.bf16.msra.mxu0 %v1403_v52  ;;  %v370_v52 = vld [vmem:[#allocation2 + $0x50] sm:$0xff] }
  0x55   : > { %1243 = vmatprep.subr.bf16.mxu0 %v1405_v54 }
  0x56   : > { %1322 = vmatpush3.bf16.msra.mxu1 %v1404_v53 }
  0x57   : > { %1323 = vmatprep.subr.bf16.mxu1 %v1407_v55 }
  0x58   : > { %1244 = vmatpush3.bf16.msra.mxu0 %v1406_v58 }
  0x5a   : > { %1324 = vmatpush3.bf16.msra.mxu1 %v1407_v55 }
  0x5b   : > { %767 = vmatmul.mubr.bf16.vlgmr.msra.gmra.mxu0 %v1408_v59  ;;  %v371_v59 = vld [vmem:[#allocation2 + $0x68] sm:$0xff] }
  0x5c   : > { %774 = vmatprep.mubr.bf16.mxu0 %v1413_v60 }
  0x5d   : > { %1326 = vmatmul.mubr.bf16.vlgmr.msra.gmra.mxu1 %v1412_v61 }
  0x5e   : > { %1329 = vmatprep.mubr.bf16.mxu1 %v1419_v62 }
  0x63   : > { %775 = vmatmul.mubr.bf16.gmra.mxu0 %v1415_v63 }
  0x64   : > { %782 = vmatprep.mubr.bf16.mxu0 %v1416_v0 }
  0x65   : > { %1330 = vmatmul.mubr.bf16.gmra.mxu1 %v1420_v1  ;;  %v372_v1 = vld [vmem:[#allocation2 + $0x8] sm:$0xff] }
  0x66   : > { %1333 = vmatprep.mubr.bf16.mxu1 %v1427_v2 }
  0x6b   : > { %783 = vmatmul.mubr.bf16.gmra.mxu0 %v1418_v3 }
  0x6c   : > { %790 = vmatprep.mubr.bf16.mxu0 %v1421_v4 }
  0x6d   : > { %1334 = vmatmul.mubr.bf16.gmra.mxu1 %v1428_v5 }
  0x6e   : > { %1337 = vmatprep.mubr.bf16.mxu1 %v1435_v6 }
  0x73   : > { %791 = vmatmul.mubr.bf16.gmra.mxu0 %v1423_v7 }
  0x74   : > { %798 = vmatprep.mubr.bf16.mxu0 %v1424_v8  ;;  %v373_v8 = vld [vmem:[#allocation2 + $0x48] sm:$0xff] }
  0x75   : > { %1338 = vmatmul.mubr.bf16.gmra.mxu1 %v1436_v9 }
  0x7b   : > { %799 = vmatmul.mubr.bf16.gmra.mxu0 %v1426_v10 }
  0x7c   : > { %806 = vmatprep.mubr.bf16.mxu0 %v1429_v11 }
  0x83   : > { %807 = vmatmul.mubr.bf16.gmra.mxu0 %v1431_v12 }
  0x84   : > { %814 = vmatprep.mubr.bf16.mxu0 %v1432_v13 }
  0x8b   : > { %815 = vmatmul.mubr.bf16.gmra.mxu0 %v1434_v14 }
  0x8c   : > { %822 = vmatprep.mubr.bf16.mxu0 %v1437_v15 }
  0x93   : > { %823 = vmatmul.mubr.bf16.gmra.mxu0 %v1439_v16  ;;  %v374_v16 = vld [vmem:[#allocation2 + $0x40] sm:$0xff] }
 0x11b   : > { %v1245_v17 = vpop.f32.mrf.mxu0 }
 0x11d   : > { %v1246_v18 = vpop.f32.mrf.mxu0  ;;  %v1327_v19 = vpop.f32.mrf.mxu1 }
 0x11e   : > { %v1247_v20 = vadd.f32 %v1246_v18, %v1245_v17 }
 0x11f   : > { %v1248_v21 = vpop.f32.mrf.mxu0  ;;  %v865_v23 = vpop.f32.mrf.mxu1 }
 0x120   : > { %v866_v24 = vadd.f32 %v1247_v20, %v865_v23  ;;  %v375_v23 = vld [vmem:[#allocation2 + $0x20] sm:$0xff] }
 0x121   : > { %v1249_v25 = vpop.f32.mrf.mxu0  ;;  %v1328_v26 = vpop.f32.mrf.mxu1 }
 0x122   : > { %v928_v27 = vadd.f32 %v866_v24, %v366_v22  ;;  %v1250_v28 = vadd.f32 %v1249_v25, %v1248_v21 }
 0x123   : > { %v1251_v29 = vpop.f32.mrf.mxu0  ;;  %v868_v31 = vpop.f32.mrf.mxu1 }
 0x124   : > { %944 = vst [vmem:[#allocation2 + $0x30] sm:$0xff] %v928_v27  ;;  %v869_v32 = vadd.f32 %v1250_v28, %v868_v31 }
 0x125   : > { %v1252_v33 = vpop.f32.mrf.mxu0  ;;  %v1331_v34 = vpop.f32.mrf.mxu1 }
 0x126   : > { %v929_v35 = vadd.f32 %v869_v32, %v367_v30  ;;  %v1253_v36 = vadd.f32 %v1252_v33, %v1251_v29  ;;  %v376_v29 = vld [vmem:[#allocation2 + $0x10] sm:$0xff] }
 0x127   : > { %v1254_v38 = vpop.f32.mrf.mxu0  ;;  %v881_v41 = vpop.f32.mrf.mxu1 }
 0x128   : > { %945 = vst [vmem:[#allocation2] sm:$0xff] %v929_v35  ;;  %v874_v39 = vadd.f32 %v1327_v19, %v1253_v36  ;;  %v377_v36 = vld [vmem:[#allocation2 + $0x38] sm:$0xff] }
 0x129   : > { %v1255_v40 = vpop.f32.mrf.mxu0  ;;  %v1332_v48 = vpop.f32.mrf.mxu1 }
 0x12a   : > { %v930_v42 = vadd.f32 %v874_v39, %v368_v37  ;;  %v1256_v43 = vadd.f32 %v1255_v40, %v1254_v38 }
 0x12b   : > { %v1257_v45 = vpop.f32.mrf.mxu0  ;;  %v884_v55 = vpop.f32.mrf.mxu1 }
 0x12c   : > { %946 = vst [vmem:[#allocation2 + $0x58] sm:$0xff] %v930_v42  ;;  %v877_v46 = vadd.f32 %v1328_v26, %v1256_v43 }
 0x12d   : > { %v1258_v47 = vpop.f32.mrf.mxu0  ;;  %v1335_v62 = vpop.f32.mrf.mxu1 }
 0x12e   : > { %v931_v49 = vadd.f32 %v877_v46, %v369_v44  ;;  %v1259_v50 = vadd.f32 %v1258_v47, %v1257_v45  ;;  %v378_v44 = vld [vmem:[#allocation2 + $0x60] sm:$0xff] }
 0x12f   : > { %v1260_v51 = vpop.f32.mrf.mxu0  ;;  %v897_v5 = vpop.f32.mrf.mxu1 }
 0x130   : > { %947 = vst [vmem:[#allocation2 + $0x18] sm:$0xff] %v931_v49  ;;  %v882_v53 = vadd.f32 %v1259_v50, %v881_v41 }
 0x131   : > { %v1261_v54 = vpop.f32.mrf.mxu0  ;;  %v1336_v12 = vpop.f32.mrf.mxu1 }
 0x132   : > { %v932_v56 = vadd.f32 %v882_v53, %v370_v52  ;;  %v1262_v57 = vadd.f32 %v1261_v54, %v1260_v51  ;;  %v379_v51 = vld [vmem:[#allocation2 + $0x70] sm:$0xff] }
 0x133   : > { %v1263_v58 = vpop.f32.mrf.mxu0  ;;  %v900_v19 = vpop.f32.mrf.mxu1 }
 0x134   : > { %948 = vst [vmem:[#allocation2 + $0x50] sm:$0xff] %v932_v56  ;;  %v885_v60 = vadd.f32 %v1262_v57, %v884_v55  ;;  %v380_v56 = vld [vmem:[#allocation2 + $0x78] sm:$0xff] }
 0x135   : > { %v1264_v61 = vpop.f32.mrf.mxu0  ;;  %v1339_v26 = vpop.f32.mrf.mxu1 }
 0x136   : > { %v933_v63 = vadd.f32 %v885_v60, %v371_v59  ;;  %v1265_v0 = vadd.f32 %v1264_v61, %v1263_v58 }
 0x137   : > { %v1266_v2 = vpop.f32.mrf.mxu0  ;;  %v913_v33 = vpop.f32.mrf.mxu1 }
 0x138   : > { %949 = vst [vmem:[#allocation2 + $0x68] sm:$0xff] %v933_v63  ;;  %v890_v3 = vadd.f32 %v1331_v34, %v1265_v0 }
 0x139   : > { %v1267_v4 = vpop.f32.mrf.mxu0  ;;  %v1340_v40 = vpop.f32.mrf.mxu1 }
 0x13a   : > { %v934_v6 = vadd.f32 %v890_v3, %v372_v1  ;;  %v1268_v7 = vadd.f32 %v1267_v4, %v1266_v2 }
 0x13b   : > { %v1269_v9 = vpop.f32.mrf.mxu0  ;;  %v916_v47 = vpop.f32.mrf.mxu1 }
 0x13c   : > { %950 = vst [vmem:[#allocation2 + $0x8] sm:$0xff] %v934_v6  ;;  %v893_v10 = vadd.f32 %v1332_v48, %v1268_v7 }
 0x13d   : > { %v1270_v11 = vpop.f32.mrf.mxu0 }
 0x13e   : > { %v935_v13 = vadd.f32 %v893_v10, %v373_v8  ;;  %v1271_v14 = vadd.f32 %v1270_v11, %v1269_v9 }
 0x13f   : > { %v1272_v15 = vpop.f32.mrf.mxu0 }
 0x140   : > { %951 = vst [vmem:[#allocation2 + $0x48] sm:$0xff] %v935_v13  ;;  %v898_v17 = vadd.f32 %v1271_v14, %v897_v5 }
 0x141   : > { %v1273_v18 = vpop.f32.mrf.mxu0 }
 0x142   : > { %v936_v20 = vadd.f32 %v898_v17, %v374_v16  ;;  %v1274_v21 = vadd.f32 %v1273_v18, %v1272_v15 }
 0x143   : > { %v1275_v22 = vpop.f32.mrf.mxu0 }
 0x144   : > { %952 = vst [vmem:[#allocation2 + $0x40] sm:$0xff] %v936_v20  ;;  %v901_v24 = vadd.f32 %v1274_v21, %v900_v19 }
 0x145   : > { %v1276_v25 = vpop.f32.mrf.mxu0 }
 0x146   : > { %v937_v27 = vadd.f32 %v901_v24, %v375_v23  ;;  %v1277_v28 = vadd.f32 %v1276_v25, %v1275_v22 }
 0x147   : > { %v1278_v30 = vpop.f32.mrf.mxu0 }
 0x148   : > { %953 = vst [vmem:[#allocation2 + $0x20] sm:$0xff] %v937_v27  ;;  %v906_v31 = vadd.f32 %v1335_v62, %v1277_v28  ;;  %v381_v62 = vld [vmem:[#allocation2 + $0x28] sm:$0xff] }
 0x149   : > { %v1279_v32 = vpop.f32.mrf.mxu0 }
 0x14a   : > { %v938_v34 = vadd.f32 %v906_v31, %v376_v29  ;;  %v1280_v35 = vadd.f32 %v1279_v32, %v1278_v30 }
 0x14b   : > { %v1281_v37 = vpop.f32.mrf.mxu0 }
 0x14c   : > { %954 = vst [vmem:[#allocation2 + $0x10] sm:$0xff] %v938_v34  ;;  %v909_v38 = vadd.f32 %v1336_v12, %v1280_v35 }
 0x14d   : > { %v1282_v39 = vpop.f32.mrf.mxu0 }
 0x14e   : > { %v939_v41 = vadd.f32 %v909_v38, %v377_v36  ;;  %v1283_v42 = vadd.f32 %v1282_v39, %v1281_v37 }
 0x14f   : > { %v1284_v43 = vpop.f32.mrf.mxu0 }
 0x150   : > { %955 = vst [vmem:[#allocation2 + $0x38] sm:$0xff] %v939_v41  ;;  %v914_v45 = vadd.f32 %v1283_v42, %v913_v33 }
 0x151   : > { %v1285_v46 = vpop.f32.mrf.mxu0 }
 0x152   : > { %v940_v48 = vadd.f32 %v914_v45, %v378_v44  ;;  %v1286_v49 = vadd.f32 %v1285_v46, %v1284_v43 }
 0x153   : > { %v1287_v50 = vpop.f32.mrf.mxu0 }
 0x154   : > { %956 = vst [vmem:[#allocation2 + $0x60] sm:$0xff] %v940_v48  ;;  %v917_v52 = vadd.f32 %v1286_v49, %v916_v47 }
 0x155   : > { %v1288_v53 = vpop.f32.mrf.mxu0 }
 0x156   : > { %v941_v54 = vadd.f32 %v917_v52, %v379_v51  ;;  %v1289_v55 = vadd.f32 %v1288_v53, %v1287_v50 }
 0x157   : > { %v1290_v57 = vpop.f32.mrf.mxu0 }
 0x158   : > { %957 = vst [vmem:[#allocation2 + $0x70] sm:$0xff] %v941_v54  ;;  %v922_v58 = vadd.f32 %v1339_v26, %v1289_v55 }
 0x159   : > { %v1291_v59 = vpop.f32.mrf.mxu0 }
 0x15a   : > { %v942_v60 = vadd.f32 %v922_v58, %v380_v56  ;;  %v1292_v61 = vadd.f32 %v1291_v59, %v1290_v57 }
 0x15c   : > { %958 = vst [vmem:[#allocation2 + $0x78] sm:$0xff] %v942_v60  ;;  %v925_v63 = vadd.f32 %v1340_v40, %v1292_v61  ;;  %963 = sbr.rel (%p1222_p11) target bundleno = 364 (0x16c), region = 66 }
 0x15e   : > { %v943_v0 = vadd.f32 %v925_v63, %v381_v62 }
 0x160   : > { %959 = vst [vmem:[#allocation2 + $0x28] sm:$0xff] %v943_v0 }
 0x161   : > { %v964_v1 = vld [vmem:[#allocation2 + $0x30] sm:$0xff]  ;;  %v1223_v2 = vld [vmem:[%s1741_s2] ss:$0 sm:$0xff]  ;;  %v966_v6 = vld [vmem:[#allocation2 + $0x58] sm:$0xff] }
 0x162   : > { %v965_v3 = vld [vmem:[#allocation2] sm:$0xff]  ;;  %v987_v4 = vadd.f32 %v1223_v2, %v964_v1  ;;  %v967_v7 = vld [vmem:[#allocation2 + $0x18] sm:$0xff]  ;;  %v968_v8 = vld [vmem:[#allocation2 + $0x50] sm:$0xff]  ;;  %v989_v9 = vadd.f32 %v1223_v2, %v966_v6 }
 0x163   : > { %v988_v5 = vadd.f32 %v1223_v2, %v965_v3  ;;  %v990_v10 = vadd.f32 %v1223_v2, %v967_v7  ;;  %v991_v11 = vadd.f32 %v1223_v2, %v968_v8  ;;  %v969_v12 = vld [vmem:[#allocation2 + $0x68] sm:$0xff]  ;;  %v972_v18 = vld [vmem:[#allocation2 + $0x40] sm:$0xff]  ;;  %v974_v20 = vld [vmem:[#allocation2 + $0x10] sm:$0xff] }
 0x164   : > { %v970_v13 = vld [vmem:[#allocation2 + $0x8] sm:$0xff]  ;;  %1003 = vst [vmem:[%s1742_s3] sm:$0xff] %v987_v4  ;;  %v992_v15 = vadd.f32 %v1223_v2, %v969_v12  ;;  %v973_v19 = vld [vmem:[#allocation2 + $0x20] sm:$0xff]  ;;  %1005 = vst [vmem:[%s1742_s3 + $0x10] sm:$0xff] %v989_v9  ;;  %v995_v21 = vadd.f32 %v1223_v2, %v972_v18  ;;  %v997_v23 = vadd.f32 %v1223_v2, %v974_v20 }
 0x165   : > { %v971_v14 = vld [vmem:[#allocation2 + $0x48] sm:$0xff]  ;;  %1004 = vst [vmem:[%s1742_s3 + $0x8] sm:$0xff] %v988_v5  ;;  %v993_v16 = vadd.f32 %v1223_v2, %v970_v13  ;;  %1006 = vst [vmem:[%s1742_s3 + $0x18] sm:$0xff] %v990_v10  ;;  %v996_v22 = vadd.f32 %v1223_v2, %v973_v19  ;;  %v975_v24 = vld [vmem:[#allocation2 + $0x38] sm:$0xff] }
 0x166   : > { %v994_v17 = vadd.f32 %v1223_v2, %v971_v14  ;;  %1007 = vst [vmem:[%s1742_s3 + $0x20] sm:$0xff] %v991_v11  ;;  %v976_v25 = vld [vmem:[#allocation2 + $0x60] sm:$0xff]  ;;  %v977_v26 = vld [vmem:[#allocation2 + $0x70] sm:$0xff]  ;;  %1008 = vst [vmem:[%s1742_s3 + $0x28] sm:$0xff] %v992_v15  ;;  %v998_v27 = vadd.f32 %v1223_v2, %v975_v24 }
 0x167   : > { %1009 = vst [vmem:[%s1742_s3 + $0x30] sm:$0xff] %v993_v16  ;;  %v999_v28 = vadd.f32 %v1223_v2, %v976_v25  ;;  %v1000_v29 = vadd.f32 %v1223_v2, %v977_v26  ;;  %v978_v30 = vld [vmem:[#allocation2 + $0x78] sm:$0xff]  ;;  %v979_v31 = vld [vmem:[#allocation2 + $0x28] sm:$0xff]  ;;  %1011 = vst [vmem:[%s1742_s3 + $0x40] sm:$0xff] %v995_v21 }
 0x168   : > { %1010 = vst [vmem:[%s1742_s3 + $0x38] sm:$0xff] %v994_v17  ;;  %1012 = vst [vmem:[%s1742_s3 + $0x48] sm:$0xff] %v996_v22  ;;  %v1001_v32 = vadd.f32 %v1223_v2, %v978_v30  ;;  %v1002_v33 = vadd.f32 %v1223_v2, %v979_v31 }
 0x169   : > { %1013 = vst [vmem:[%s1742_s3 + $0x50] sm:$0xff] %v997_v23  ;;  %1014 = vst [vmem:[%s1742_s3 + $0x58] sm:$0xff] %v998_v27 }
 0x16a   : > { %1015 = vst [vmem:[%s1742_s3 + $0x60] sm:$0xff] %v999_v28  ;;  %1016 = vst [vmem:[%s1742_s3 + $0x68] sm:$0xff] %v1000_v29 }
 0x16b   : > { %1017 = vst [vmem:[%s1742_s3 + $0x70] sm:$0xff] %v1001_v32  ;;  %1018 = vst [vmem:[%s1742_s3 + $0x78] sm:$0xff] %v1002_v33 }
 0x16c PF: > { %s13_s16 = sadd.s32 1, %s1478_s16   ;;  %s1743_s12 = smov %s1466_s13 }
 0x16d   : > { %p10_p12 = scmp.ge.s32.totalorder %s13_s16, 5   ;;  %s1744_s13 = smov %s1536_s20 }
 0x16e   : > { %s1745_s14 = smov %s1474_s15  ;;  %s1746_s15 = smov %s1748_s17 }
 0x16f   :  { %12 = sbr.rel (!%p10_p12) target bundleno = 3 (0x3), region = 113 }

// kernel: resnet_generator_forward.33
= control target key start
LH: loop header
LB: loop body
LE: loop exit
PB: predicated region body
PF: predicated region fallthrough
CT: control target
= control target key end

     0   :  { %s254_s0 = inlined_call_operand.vmem [shape: f32[128,128], index: 0, kind: input, shape index: {}]   ;;  %s255_s1 = inlined_call_operand.vmem [shape: f32[1,128], index: 1, kind: input, shape index: {}]   ;;  %s256_s2 = inlined_call_operand.vmem [shape: f32[1,128], index: 2, kind: input, shape index: {}]   ;;  %s257_s3 = inlined_call_operand.vmem [shape: f32[128,128], index: 3, kind: output, shape index: {}]  }
   0x1   :  { %v14_v0 = vld [vmem:[%s254_s0] sm:$0xff]  ;;  %v15_v4 = vld [vmem:[%s254_s0 + $0x8] sm:$0xff]  ;;  %v16_v5 = vld [vmem:[%s254_s0 + $0x10] sm:$0xff] }
   0x2   :  { %v112_v1 = vld [vmem:[%s255_s1] ss:$0 sm:$0xff]  ;;  %v17_v6 = vld [vmem:[%s254_s0 + $0x18] sm:$0xff]  ;;  %v19_v11 = vld [vmem:[%s254_s0 + $0x28] sm:$0xff] }
   0x3   :  { %v143_v2 = vld [vmem:[%s256_s2] ss:$0 sm:$0xff]  ;;  %v37_v3 = vmul.f32 %v112_v1, %v14_v0  ;;  %v38_v7 = vmul.f32 %v112_v1, %v15_v4  ;;  %v39_v8 = vmul.f32 %v112_v1, %v16_v5  ;;  %v40_v9 = vmul.f32 %v112_v1, %v17_v6  ;;  %v20_v12 = vld [vmem:[%s254_s0 + $0x30] sm:$0xff]  ;;  %v21_v17 = vld [vmem:[%s254_s0 + $0x38] sm:$0xff] }
   0x4   :  { %v18_v10 = vld [vmem:[%s254_s0 + $0x20] sm:$0xff]  ;;  %v42_v15 = vmul.f32 %v112_v1, %v19_v11  ;;  %v43_v16 = vmul.f32 %v112_v1, %v20_v12  ;;  %v44_v21 = vmul.f32 %v112_v1, %v21_v17  ;;  %v23_v27 = vld [vmem:[%s254_s0 + $0x48] sm:$0xff]  ;;  %v24_v28 = vld [vmem:[%s254_s0 + $0x50] sm:$0xff] }
   0x5   :  { %v60_v13 = vadd.f32 %v143_v2, %v37_v3  ;;  %v41_v14 = vmul.f32 %v112_v1, %v18_v10  ;;  %v61_v18 = vadd.f32 %v143_v2, %v38_v7  ;;  %v62_v19 = vadd.f32 %v143_v2, %v39_v8  ;;  %v22_v22 = vld [vmem:[%s254_s0 + $0x40] sm:$0xff]  ;;  %v25_v29 = vld [vmem:[%s254_s0 + $0x58] sm:$0xff]  ;;  %v27_v35 = vld [vmem:[%s254_s0 + $0x68] sm:$0xff] }
   0x6   :  { %v63_v20 = vadd.f32 %v143_v2, %v40_v9  ;;  %v65_v25 = vadd.f32 %v143_v2, %v42_v15  ;;  %v66_v26 = vadd.f32 %v143_v2, %v43_v16  ;;  %v67_v33 = vadd.f32 %v143_v2, %v44_v21  ;;  %v26_v34 = vld [vmem:[%s254_s0 + $0x60] sm:$0xff]  ;;  %v28_v36 = vld [vmem:[%s254_s0 + $0x70] sm:$0xff]  ;;  %v29_v41 = vld [vmem:[%s254_s0 + $0x78] sm:$0xff] }
   0x7   :  { %v76_v23 = vmax.f32 %v60_v13, 0.0  ;;  %v64_v24 = vadd.f32 %v143_v2, %v41_v14  ;;  %v77_v30 = vmax.f32 %v61_v18, 0.0  ;;  %v78_v31 = vmax.f32 %v62_v19, 0.0 }
   0x8   :  { %v79_v32 = vmax.f32 %v63_v20, 0.0  ;;  %v81_v38 = vmax.f32 %v65_v25, 0.0  ;;  %v82_v39 = vmax.f32 %v66_v26, 0.0  ;;  %v45_v40 = vmul.f32 %v112_v1, %v22_v22 }
   0x9   :  { %92 = vst [vmem:[%s257_s3] sm:$0xff] %v76_v23  ;;  %v80_v37 = vmax.f32 %v64_v24, 0.0  ;;  %93 = vst [vmem:[%s257_s3 + $0x8] sm:$0xff] %v77_v30  ;;  %v83_v42 = vmax.f32 %v67_v33, 0.0  ;;  %v46_v43 = vmul.f32 %v112_v1, %v23_v27  ;;  %v47_v44 = vmul.f32 %v112_v1, %v24_v28 }
   0xa   :  { %94 = vst [vmem:[%s257_s3 + $0x10] sm:$0xff] %v78_v31  ;;  %95 = vst [vmem:[%s257_s3 + $0x18] sm:$0xff] %v79_v32  ;;  %v48_v45 = vmul.f32 %v112_v1, %v25_v29  ;;  %v68_v46 = vadd.f32 %v143_v2, %v45_v40  ;;  %v49_v47 = vmul.f32 %v112_v1, %v26_v34 }
   0xb   :  { %96 = vst [vmem:[%s257_s3 + $0x20] sm:$0xff] %v80_v37  ;;  %97 = vst [vmem:[%s257_s3 + $0x28] sm:$0xff] %v81_v38  ;;  %v50_v48 = vmul.f32 %v112_v1, %v27_v35  ;;  %v51_v49 = vmul.f32 %v112_v1, %v28_v36  ;;  %v69_v50 = vadd.f32 %v143_v2, %v46_v43 }
   0xc   :  { %98 = vst [vmem:[%s257_s3 + $0x30] sm:$0xff] %v82_v39  ;;  %99 = vst [vmem:[%s257_s3 + $0x38] sm:$0xff] %v83_v42  ;;  %v70_v51 = vadd.f32 %v143_v2, %v47_v44  ;;  %v71_v52 = vadd.f32 %v143_v2, %v48_v45  ;;  %v52_v53 = vmul.f32 %v112_v1, %v29_v41  ;;  %v84_v54 = vmax.f32 %v68_v46, 0.0 }
   0xd   :  { %v72_v55 = vadd.f32 %v143_v2, %v49_v47  ;;  %v73_v56 = vadd.f32 %v143_v2, %v50_v48  ;;  %v74_v57 = vadd.f32 %v143_v2, %v51_v49  ;;  %v85_v58 = vmax.f32 %v69_v50, 0.0 }
   0xe   :  { %v86_v59 = vmax.f32 %v70_v51, 0.0  ;;  %v87_v60 = vmax.f32 %v71_v52, 0.0  ;;  %v75_v61 = vadd.f32 %v143_v2, %v52_v53  ;;  %100 = vst [vmem:[%s257_s3 + $0x40] sm:$0xff] %v84_v54 }
   0xf   :  { %v88_v62 = vmax.f32 %v72_v55, 0.0  ;;  %v89_v63 = vmax.f32 %v73_v56, 0.0  ;;  %v90_v0 = vmax.f32 %v74_v57, 0.0  ;;  %101 = vst [vmem:[%s257_s3 + $0x48] sm:$0xff] %v85_v58 }
  0x10   :  { %102 = vst [vmem:[%s257_s3 + $0x50] sm:$0xff] %v86_v59  ;;  %103 = vst [vmem:[%s257_s3 + $0x58] sm:$0xff] %v87_v60  ;;  %v91_v1 = vmax.f32 %v75_v61, 0.0 }
  0x11   :  { %104 = vst [vmem:[%s257_s3 + $0x60] sm:$0xff] %v88_v62  ;;  %105 = vst [vmem:[%s257_s3 + $0x68] sm:$0xff] %v89_v63 }
  0x12   :  { %106 = vst [vmem:[%s257_s3 + $0x70] sm:$0xff] %v90_v0  ;;  %107 = vst [vmem:[%s257_s3 + $0x78] sm:$0xff] %v91_v1 }

// kernel: resnet_generator_forward.35
= control target key start
LH: loop header
LB: loop body
LE: loop exit
PB: predicated region body
PF: predicated region fallthrough
CT: control target
= control target key end

     0   :  { %v57_v0 = vmov 0.0   ;;  %s103_s1 = inlined_call_operand.vmem [shape: f32[1,128], index: 1, kind: output, shape index: {0}]   ;;  %s104_s2 = inlined_call_operand.vmem [shape: f32[1,128], index: 2, kind: output, shape index: {1}]   ;;  %s105_s0 = inlined_call_operand.vmem [shape: f32[32,128], index: 0, kind: input, shape index: {}]  }
   0x1   :  { %14 = vst [vmem:[%s103_s1] sm:$0x1] %v57_v0  ;;  %15 = vst [vmem:[%s104_s2] sm:$0x1] %v57_v0  ;;  %v16_v1 = vld [vmem:[%s105_s0] sm:$0xff]  ;;  %v17_v2 = vld [vmem:[%s105_s0 + $0x8] sm:$0xff] }
   0x2   :  { %v18_v3 = vld [vmem:[%s105_s0 + $0x10] sm:$0xff]  ;;  %v19_v4 = vld [vmem:[%s105_s0 + $0x18] sm:$0xff]  ;;  %v21_v5 = vadd.f32 %v17_v2, %v16_v1  ;;  %v33_v6 = vmul.f32 %v16_v1, %v16_v1  ;;  %v34_v7 = vmul.f32 %v17_v2, %v17_v2 }
   0x3   :  { %v35_v8 = vmul.f32 %v18_v3, %v18_v3  ;;  %v36_v10 = vmul.f32 %v19_v4, %v19_v4 }
   0x4   :  { %v22_v9 = vadd.f32 %v21_v5, %v18_v3  ;;  %v37_v11 = vadd.f32 %v34_v7, %v33_v6 }
   0x6   :  { %v23_v12 = vadd.f32 %v22_v9, %v19_v4  ;;  %v38_v13 = vadd.f32 %v37_v11, %v35_v8 }
   0x8   :  { %v24_v14 = vrot.slane %v23_v12, 4  ;;  %v39_v15 = vadd.f32 %v38_v13, %v36_v10  ;;  %v20_v24 = vld [vmem:[%s103_s1] sm:$0x1] }
   0x9   :  { %v32_v27 = vld [vmem:[%s104_s2] sm:$0x1] }
   0xa   :  { %v25_v16 = vadd.f32 %v24_v14, %v23_v12  ;;  %v40_v17 = vrot.slane %v39_v15, 4 }
   0xc   :  { %v26_v18 = vrot.slane %v25_v16, 2  ;;  %v41_v19 = vadd.f32 %v40_v17, %v39_v15 }
   0xe   :  { %v27_v20 = vadd.f32 %v26_v18, %v25_v16  ;;  %v42_v21 = vrot.slane %v41_v19, 2 }
  0x10   :  { %v28_v22 = vrot.slane %v27_v20, 1  ;;  %v43_v23 = vadd.f32 %v42_v21, %v41_v19 }
  0x12   :  { %v29_v25 = vadd.f32 %v28_v22, %v27_v20  ;;  %v44_v26 = vrot.slane %v43_v23, 1 }
  0x14   :  { %v30_v28 = vadd.f32 %v29_v25, %v20_v24  ;;  %v45_v29 = vadd.f32 %v44_v26, %v43_v23 }
  0x16   :  { %31 = vst [vmem:[%s103_s1] sm:$0x1] %v30_v28  ;;  %v46_v30 = vadd.f32 %v45_v29, %v32_v27 }
  0x18   :  { %47 = vst [vmem:[%s104_s2] sm:$0x1] %v46_v30 }

// kernel: resnet_generator_forward.34
= control target key start
LH: loop header
LB: loop body
LE: loop exit
PB: predicated region body
PF: predicated region fallthrough
CT: control target
= control target key end

     0   :  { %s1033_s12 = smov 0   ;;  %s1035_s13 = smov 0   ;;  %s1149_s0 = inlined_call_operand.vmem [shape: bf16[32,1152], index: 0, kind: input, shape index: {}]   ;;  %s1150_s1 = inlined_call_operand.vmem [shape: bf16[1152,128], index: 1, kind: input, shape index: {}]   ;;  %s1151_s2 = inlined_call_operand.vmem [shape: f32[1,128], index: 2, kind: input, shape index: {}]   ;;  %s1152_s3 = inlined_call_operand.vmem [shape: f32[32,128], index: 3, kind: output, shape index: {}]  }
   0x1   :  { %s1037_s14 = smov 0   ;;  %s1039_s15 = smov 0  }
   0x2   :  { %s1041_s16 = smov 0  }
   0x3 LB: > { %s25_s17 = sadd.s32 1, %s1006_s15  ;;  %p48_p1 = scmp.ne.s32.totalorder %s998_s13, %s994_s12  ;;  %s1010_s16 = sphi %s1041_s16, %s13_s16   ;;  %s1006_s15 = sphi %s1039_s15, %s1156_s15   ;;  %s1002_s14 = sphi %s1037_s14, %s1155_s14   ;;  %s998_s13 = sphi %s1035_s13, %s1154_s13   ;;  %s994_s12 = sphi %s1033_s12, %s1153_s12  }
   0x4   : > { %p26_p0 = scmp.ge.s32.totalorder %s25_s17, 3  ;;  %p49_p2 = scmp.eq.s32.totalorder %s1010_s16, 0 }
   0x5   : > { %s41_s19 = sadd.s32 1, %s998_s13  ;;  %p789_p5 = scmp.ge.s32.totalorder %s1010_s16, 3 }
   0x6   : > { %s1158_s17 = smov (%p26_p0, %s25_s17), 0  ;;  %p50_p3 = por %p49_p2, %p48_p1 }
   0x7   : > { %s37_s18 = ssub.s32 %s1006_s15, %s1158_s17  ;;  %162 = sbr.rel (%p789_p5) target bundleno = 21 (0x15), region = 20 }
   0x8   : > { %p39_p4 = scmp.eq.s32.totalorder %s37_s18, 0 }
   0xa   : > { %s1068_s20 = scalar_select %p39_p4, %s998_s13, %s41_s19  }
   0xc   : > { %165 = sbr.rel (!%p50_p3) target bundleno = 21 (0x15), region = 24  ;;  %s167_s21 = sand.u32 (%p50_p3), 1, %s998_s13  }
   0xd   : > { %s838_s22 = smul.u32 (%p50_p3), 12, %s1006_s15 }
   0xe   : > { %s897_s23 = smul.u32 (%p50_p3), 48, %s167_s21 }
   0xf   : > { %s175_s26 = scalar_lea.vmem (%p50_p3), %s1149_s0, %s838_s22 }
  0x10   : > { %v190_v0 = vld [vmem:[%s175_s26] sm:$0xff] (%p50_p3)  ;;  %v194_v2 = vld [vmem:[%s175_s26 + $0x48] sm:$0xff] (%p50_p3)  ;;  %s169_s27 = scalar_lea.vmem (%p50_p3), [#allocation3], %s897_s23  ;;  %v795_v6 = vld [vmem:[%s175_s26 + $0x50] sm:$0xf] (%p50_p3) }
  0x11   : > { %v192_v1 = vld [vmem:[%s175_s26 + $0x24] sm:$0xff]  ;;  %191 = vst [vmem:[%s169_s27] sm:$0xff] %v190_v0  ;;  %195 = vst [vmem:[%s169_s27 + $0x18] sm:$0xff] %v194_v2  ;;  %v196_v3 = vld [vmem:[%s175_s26 + $0x6c] sm:$0xff] }
  0x12   : > { %193 = vst [vmem:[%s169_s27 + $0xc] sm:$0xff] %v192_v1  ;;  %v791_v4 = vld [vmem:[%s175_s26 + $0x8] sm:$0xf]  ;;  %v793_v5 = vld [vmem:[%s175_s26 + $0x2c] sm:$0xf]  ;;  %197 = vst [vmem:[%s169_s27 + $0x24] sm:$0xff] %v196_v3 }
  0x13   : > { %792 = vst [vmem:[%s169_s27 + $0x8] sm:$0xf] %v791_v4  ;;  %794 = vst [vmem:[%s169_s27 + $0x14] sm:$0xf] %v793_v5  ;;  %v797_v7 = vld [vmem:[%s175_s26 + $0x74] sm:$0xf] }
  0x14   : > { %796 = vst [vmem:[%s169_s27 + $0x20] sm:$0xf] %v795_v6  ;;  %798 = vst [vmem:[%s169_s27 + $0x2c] sm:$0xf] %v797_v7 }
  0x15 PF: > { %p799_p6 = scmp.ge.s32.totalorder %s1010_s16, 1  ;;  %p230_p7 = scmp.lt.s32.totalorder %s1010_s16, 4 }
  0x17   : > { %p231_p8 = pnand %p799_p6, %p230_p7 }
  0x18   : > { %s237_s28 = sand.u32 (!%p231_p8), 1, %s994_s12   ;;  %s276_s29 = smul.u32 (!%p231_p8), 48, %s1002_s14 }
  0x19   : > { %234 = sbr.rel (%p231_p8) target bundleno = 295 (0x127), region = 54  ;;  %p801_p10 = scmp.ne.s32.totalorder (!%p231_p8), %s1002_s14, 0 }
  0x1a   : > { %s898_s30 = smul.u32 (!%p231_p8), 48, %s237_s28  ;;  %p277_p9 = scmp.lt.s32.totalorder (!%p231_p8), %s276_s29, 143 }
  0x1c   : > { %s1085_s8 = scalar_lea.vmem (!%p231_p8), [#allocation3], %s898_s30 }
  0x1e   : > { %s1160_s29 = smov (!%p277_p9, %s276_s29), 143  ;;  %301 = sbr.rel (%p801_p10) target bundleno = 38 (0x26), region = 62 }
  0x1f   : > { %s800_s4 = sshll.u32 %s1160_s29, 2 }
  0x20   : > { %s1083_s7 = scalar_lea.vmem %s1150_s1, %s800_s4 }
  0x23   : > { %v1012_v8 = vmov 0.0  }
  0x24   : > { %302 = vst [vmem:[#allocation2 + $0x10] sm:$0xff] %v1012_v8  ;;  %303 = vst [vmem:[#allocation2] sm:$0xff] %v1012_v8 }
  0x25   : > { %304 = vst [vmem:[#allocation2 + $0x18] sm:$0xff] %v1012_v8  ;;  %305 = vst [vmem:[#allocation2 + $0x8] sm:$0xff] %v1012_v8 }
  0x26 PF: > { %v940_v9 = vld [vmem:[%s1083_s7 + $0x78] sm:$0xff]   ;;  %v943_v12 = vld [vmem:[%s1083_s7 + $0x70] sm:$0xff]   ;;  %v946_v15 = vld [vmem:[%s1083_s7 + $0x68] sm:$0xff]   ;;  %p832_p11 = scmp.ne.s32.totalorder %s1002_s14, 2 }
  0x27   : > { %v941_v10 = vld [vmem:[%s1083_s7 + $0x38] sm:$0xff]   ;;  %839 = vmatprep.subr.bf16.mxu0 %v940_v9  ;;  %v944_v13 = vld [vmem:[%s1083_s7 + $0x30] sm:$0xff]   ;;  %v947_v16 = vld [vmem:[%s1083_s7 + $0x28] sm:$0xff]  }
  0x28   : > { %v942_v11 = vld [vmem:[%s1083_s7 + $0xb8] sm:$0xff]   ;;  %840 = vmatpush3.bf16.msra.mxu0 %v941_v10  ;;  %v945_v14 = vld [vmem:[%s1083_s7 + $0xb0] sm:$0xff]   ;;  %v948_v17 = vld [vmem:[%s1083_s7 + $0xa8] sm:$0xff]  }
  0x29   : > { %877 = vmatprep.subr.bf16.mxu1 %v942_v11  ;;  %841 = vmatprep.subr.bf16.mxu0 %v943_v12  ;;  %v949_v18 = vld [vmem:[%s1083_s7 + $0x60] sm:$0xff]   ;;  %v952_v21 = vld [vmem:[%s1083_s7 + $0x58] sm:$0xff]   ;;  %v955_v24 = vld [vmem:[%s1083_s7 + $0x50] sm:$0xff]  }
  0x2a   : > { %878 = vmatpush3.bf16.msra.mxu1 %v942_v11  ;;  %v950_v19 = vld [vmem:[%s1083_s7 + $0x20] sm:$0xff]   ;;  %v954_v22 = vld [vmem:[%s1083_s7 + $0x98] sm:$0xff]   ;;  %v957_v25 = vld [vmem:[%s1083_s7 + $0x90] sm:$0xff]  }
  0x2b   : > { %879 = vmatprep.subr.bf16.mxu1 %v945_v14  ;;  %v951_v20 = vld [vmem:[%s1083_s7 + $0xa0] sm:$0xff]   ;;  %v953_v23 = vld [vmem:[%s1083_s7 + $0x18] sm:$0xff]   ;;  %v956_v26 = vld [vmem:[%s1083_s7 + $0x10] sm:$0xff]  }
  0x2c   : > { %842 = vmatpush3.bf16.msra.mxu0 %v944_v13  ;;  %v958_v27 = vld [vmem:[%s1083_s7 + $0x48] sm:$0xff]   ;;  %v961_v30 = vld [vmem:[%s1083_s7 + $0x40] sm:$0xff]   ;;  %v306_v44 = vld [vmem:[#allocation2 + $0x10] sm:$0xff] }
  0x2d   : > { %843 = vmatprep.subr.bf16.mxu0 %v946_v15  ;;  %v959_v28 = vld [vmem:[%s1083_s7 + $0x8] sm:$0xff]   ;;  %v963_v31 = vld [vmem:[%s1083_s7 + $0x80] sm:$0xff]   ;;  %v308_v58 = vld [vmem:[#allocation2 + $0x18] sm:$0xff] }
  0x2e   : > { %880 = vmatpush3.bf16.msra.mxu1 %v945_v14  ;;  %v960_v29 = vld [vmem:[%s1083_s7 + $0x88] sm:$0xff]   ;;  %v966_v32 = vld [vmem:[%s1085_s8 + $0x4] ss:$12 sps:$4 sm:$0xff]  }
  0x2f   : > { %881 = vmatprep.subr.bf16.mxu1 %v948_v17  ;;  %v967_v33 = vld [vmem:[%s1085_s8 + $0x8] ss:$12 sps:$4 sm:$0xff]   ;;  %574 = vmatprep.mubr.bf16.mxu0 %v966_v32  ;;  %v964_v35 = vld [vmem:[%s1085_s8] ss:$12 sps:$4 sm:$0xff]   ;;  %v971_v38 = vld [vmem:[%s1085_s8 + $0x18] ss:$12 sps:$4 sm:$0xff]  }
  0x30   : > { %844 = vmatpush3.bf16.msra.mxu0 %v947_v16  ;;  %v962_v34 = vld [vmem:[%s1083_s7] sm:$0xff]   ;;  %893 = vmatprep.mubr.bf16.mxu1 %v967_v33  ;;  %v969_v36 = vld [vmem:[%s1085_s8 + $0x1c] ss:$12 sps:$4 sm:$0xff]  }
  0x31   : > { %845 = vmatprep.subr.bf16.mxu0 %v949_v18  ;;  %v968_v37 = vld [vmem:[%s1085_s8 + $0x20] ss:$12 sps:$4 sm:$0xff]  }
  0x32   : > { %882 = vmatpush3.bf16.msra.mxu1 %v948_v17  ;;  %v307_v52 = vld [vmem:[#allocation2] sm:$0xff]  ;;  %v309_v0 = vld [vmem:[#allocation2 + $0x8] sm:$0xff] }
  0x33   : > { %883 = vmatprep.subr.bf16.mxu1 %v951_v20 }
  0x34   : > { %846 = vmatpush3.bf16.msra.mxu0 %v950_v19 }
  0x35   : > { %847 = vmatprep.subr.bf16.mxu0 %v952_v21 }
  0x36   : > { %884 = vmatpush3.bf16.msra.mxu1 %v951_v20 }
  0x37   : > { %885 = vmatprep.subr.bf16.mxu1 %v954_v22 }
  0x38   : > { %848 = vmatpush3.bf16.msra.mxu0 %v953_v23 }
  0x39   : > { %849 = vmatprep.subr.bf16.mxu0 %v955_v24 }
  0x3a   : > { %886 = vmatpush3.bf16.msra.mxu1 %v954_v22 }
  0x3b   : > { %887 = vmatprep.subr.bf16.mxu1 %v957_v25 }
  0x3c   : > { %850 = vmatpush3.bf16.msra.mxu0 %v956_v26 }
  0x3d   : > { %851 = vmatprep.subr.bf16.mxu0 %v958_v27 }
  0x3e   : > { %888 = vmatpush3.bf16.msra.mxu1 %v957_v25 }
  0x3f   : > { %889 = vmatprep.subr.bf16.mxu1 %v960_v29 }
  0x40   : > { %852 = vmatpush3.bf16.msra.mxu0 %v959_v28 }
  0x41   : > { %853 = vmatprep.subr.bf16.mxu0 %v961_v30 }
  0x42   : > { %890 = vmatpush3.bf16.msra.mxu1 %v960_v29 }
  0x43   : > { %891 = vmatprep.subr.bf16.mxu1 %v963_v31 }
  0x44   : > { %854 = vmatpush3.bf16.msra.mxu0 %v962_v34 }
  0x46   : > { %892 = vmatpush3.bf16.msra.mxu1 %v963_v31 }
  0x47   : > { %575 = vmatmul.mubr.bf16.vlgmr.msra.gmra.mxu0 %v964_v35 }
  0x48   : > { %582 = vmatprep.mubr.bf16.mxu0 %v969_v36 }
  0x49   : > { %894 = vmatmul.mubr.bf16.vlgmr.msra.gmra.mxu1 %v968_v37 }
  0x4f   : > { %583 = vmatmul.mubr.bf16.gmra.mxu0 %v971_v38 }
 0x107   : > { %v855_v39 = vpop.f32.mrf.mxu0 }
 0x109   : > { %v856_v40 = vpop.f32.mrf.mxu0  ;;  %v895_v41 = vpop.f32.mrf.mxu1 }
 0x10a   : > { %v857_v42 = vadd.f32 %v856_v40, %v855_v39 }
 0x10b   : > { %v858_v43 = vpop.f32.mrf.mxu0  ;;  %v625_v45 = vpop.f32.mrf.mxu1 }
 0x10c   : > { %v626_v46 = vadd.f32 %v857_v42, %v625_v45 }
 0x10d   : > { %v859_v47 = vpop.f32.mrf.mxu0  ;;  %v896_v48 = vpop.f32.mrf.mxu1 }
 0x10e   : > { %v640_v49 = vadd.f32 %v626_v46, %v306_v44  ;;  %v860_v50 = vadd.f32 %v859_v47, %v858_v43 }
 0x10f   : > { %v861_v51 = vpop.f32.mrf.mxu0  ;;  %v628_v53 = vpop.f32.mrf.mxu1 }
 0x110   : > { %644 = vst [vmem:[#allocation2 + $0x10] sm:$0xff] %v640_v49  ;;  %v629_v54 = vadd.f32 %v860_v50, %v628_v53 }
 0x111   : > { %v862_v55 = vpop.f32.mrf.mxu0 }
 0x112   : > { %v641_v56 = vadd.f32 %v629_v54, %v307_v52  ;;  %v863_v57 = vadd.f32 %v862_v55, %v861_v51 }
 0x113   : > { %v864_v59 = vpop.f32.mrf.mxu0 }
 0x114   : > { %645 = vst [vmem:[#allocation2] sm:$0xff] %v641_v56  ;;  %v634_v60 = vadd.f32 %v895_v41, %v863_v57 }
 0x115   : > { %v865_v61 = vpop.f32.mrf.mxu0 }
 0x116   : > { %v642_v62 = vadd.f32 %v634_v60, %v308_v58  ;;  %v866_v63 = vadd.f32 %v865_v61, %v864_v59 }
 0x118   : > { %646 = vst [vmem:[#allocation2 + $0x18] sm:$0xff] %v642_v62  ;;  %v637_v1 = vadd.f32 %v896_v48, %v866_v63  ;;  %651 = sbr.rel (%p832_p11) target bundleno = 295 (0x127), region = 66 }
 0x11a   : > { %v643_v2 = vadd.f32 %v637_v1, %v309_v0 }
 0x11c   : > { %647 = vst [vmem:[#allocation2 + $0x8] sm:$0xff] %v643_v2 }
 0x11d   : > { %v652_v3 = vld [vmem:[#allocation2 + $0x10] sm:$0xff]  ;;  %v833_v4 = vld [vmem:[%s1151_s2] ss:$0 sm:$0xff] }
 0x11e   : > { %v653_v5 = vld [vmem:[#allocation2] sm:$0xff]  ;;  %v663_v6 = vadd.f32 %v833_v4, %v652_v3 }
 0x11f   : > { %v664_v7 = vadd.f32 %v833_v4, %v653_v5  ;;  %v654_v8 = vld [vmem:[#allocation2 + $0x18] sm:$0xff] }
 0x120   : > { %v665_v10 = vadd.f32 %v833_v4, %v654_v8  ;;  %667 = vst [vmem:[%s1152_s3] sm:$0xff] %v663_v6 }
 0x121   : > { %668 = vst [vmem:[%s1152_s3 + $0x8] sm:$0xff] %v664_v7 }
 0x122   : > { %669 = vst [vmem:[%s1152_s3 + $0x10] sm:$0xff] %v665_v10 }
 0x123   : > { %v655_v9 = vld [vmem:[#allocation2 + $0x8] sm:$0xff] }
 0x124   : > { %v666_v11 = vadd.f32 %v833_v4, %v655_v9 }
 0x126   : > { %670 = vst [vmem:[%s1152_s3 + $0x18] sm:$0xff] %v666_v11 }
 0x127 PF: > { %s13_s16 = sadd.s32 1, %s1010_s16   ;;  %s1153_s12 = smov %s998_s13 }
 0x128   : > { %p10_p12 = scmp.ge.s32.totalorder %s13_s16, 5   ;;  %s1154_s13 = smov %s1068_s20 }
 0x129   : > { %s1155_s14 = smov %s1006_s15  ;;  %s1156_s15 = smov %s1158_s17 }
 0x12a   :  { %12 = sbr.rel (!%p10_p12) target bundleno = 3 (0x3), region = 113 }

// kernel: resnet_generator_forward.36
= control target key start
LH: loop header
LB: loop body
LE: loop exit
PB: predicated region body
PF: predicated region fallthrough
CT: control target
= control target key end

     0   :  { %s104_s0 = inlined_call_operand.vmem [shape: f32[32,128], index: 0, kind: input, shape index: {}]   ;;  %s105_s1 = inlined_call_operand.vmem [shape: f32[1,128], index: 1, kind: input, shape index: {}]   ;;  %s106_s2 = inlined_call_operand.vmem [shape: f32[1,128], index: 2, kind: input, shape index: {}]   ;;  %s107_s3 = inlined_call_operand.vmem [shape: f32[32,128], index: 3, kind: output, shape index: {}]  }
   0x1   :  { %v14_v0 = vld [vmem:[%s104_s0] sm:$0xff]  ;;  %v15_v4 = vld [vmem:[%s104_s0 + $0x8] sm:$0xff]  ;;  %v16_v5 = vld [vmem:[%s104_s0 + $0x10] sm:$0xff] }
   0x2   :  { %v52_v1 = vld [vmem:[%s105_s1] ss:$0 sm:$0xff]  ;;  %v17_v6 = vld [vmem:[%s104_s0 + $0x18] sm:$0xff] }
   0x3   :  { %v53_v2 = vld [vmem:[%s106_s2] ss:$0 sm:$0xff]  ;;  %v25_v3 = vmul.f32 %v52_v1, %v14_v0  ;;  %v26_v7 = vmul.f32 %v52_v1, %v15_v4  ;;  %v27_v8 = vmul.f32 %v52_v1, %v16_v5  ;;  %v28_v9 = vmul.f32 %v52_v1, %v17_v6 }
   0x5   :  { %v36_v10 = vadd.f32 %v53_v2, %v25_v3  ;;  %v37_v11 = vadd.f32 %v53_v2, %v26_v7  ;;  %v38_v12 = vadd.f32 %v53_v2, %v27_v8  ;;  %v39_v13 = vadd.f32 %v53_v2, %v28_v9 }
   0x7   :  { %v40_v14 = vmax.f32 %v36_v10, 0.0  ;;  %v41_v15 = vmax.f32 %v37_v11, 0.0  ;;  %v42_v16 = vmax.f32 %v38_v12, 0.0  ;;  %v43_v17 = vmax.f32 %v39_v13, 0.0 }
   0x9   :  { %44 = vst [vmem:[%s107_s3] sm:$0xff] %v40_v14  ;;  %45 = vst [vmem:[%s107_s3 + $0x8] sm:$0xff] %v41_v15 }
   0xa   :  { %46 = vst [vmem:[%s107_s3 + $0x10] sm:$0xff] %v42_v16  ;;  %47 = vst [vmem:[%s107_s3 + $0x18] sm:$0xff] %v43_v17 }

// kernel: resnet_generator_forward.42
= control target key start
LH: loop header
LB: loop body
LE: loop exit
PB: predicated region body
PF: predicated region fallthrough
CT: control target
= control target key end

     0   :  { %s128_s0 = inlined_call_operand.vmem [shape: f32[32,128], index: 0, kind: input, shape index: {}]   ;;  %s129_s1 = inlined_call_operand.vmem [shape: f32[1,128], index: 1, kind: input, shape index: {}]   ;;  %s130_s2 = inlined_call_operand.vmem [shape: f32[1,128], index: 2, kind: input, shape index: {}]   ;;  %s131_s3 = inlined_call_operand.vmem [shape: f32[32,128], index: 3, kind: input, shape index: {}]   ;;  %s132_s4 = inlined_call_operand.vmem [shape: f32[32,128], index: 4, kind: output, shape index: {}]  }
   0x1   :  { %v17_v0 = vld [vmem:[%s128_s0] sm:$0xff]  ;;  %v18_v4 = vld [vmem:[%s128_s0 + $0x8] sm:$0xff]  ;;  %v19_v7 = vld [vmem:[%s128_s0 + $0x10] sm:$0xff] }
   0x2   :  { %v59_v1 = vld [vmem:[%s129_s1] ss:$0 sm:$0xff]  ;;  %v20_v8 = vld [vmem:[%s128_s0 + $0x18] sm:$0xff]  ;;  %v44_v10 = vld [vmem:[%s131_s3 + $0x8] sm:$0xff] }
   0x3   :  { %v60_v2 = vld [vmem:[%s130_s2] ss:$0 sm:$0xff]  ;;  %v28_v3 = vmul.f32 %v59_v1, %v17_v0  ;;  %v29_v6 = vmul.f32 %v59_v1, %v18_v4  ;;  %v30_v11 = vmul.f32 %v59_v1, %v19_v7  ;;  %v31_v12 = vmul.f32 %v59_v1, %v20_v8  ;;  %v45_v14 = vld [vmem:[%s131_s3 + $0x10] sm:$0xff]  ;;  %v46_v15 = vld [vmem:[%s131_s3 + $0x18] sm:$0xff] }
   0x4   :  { %v43_v5 = vld [vmem:[%s131_s3] sm:$0xff] }
   0x5   :  { %v39_v9 = vadd.f32 %v60_v2, %v28_v3  ;;  %v40_v13 = vadd.f32 %v60_v2, %v29_v6  ;;  %v41_v17 = vadd.f32 %v60_v2, %v30_v11  ;;  %v42_v18 = vadd.f32 %v60_v2, %v31_v12 }
   0x7   :  { %v47_v16 = vadd.f32 %v43_v5, %v39_v9  ;;  %v48_v19 = vadd.f32 %v44_v10, %v40_v13  ;;  %v49_v20 = vadd.f32 %v45_v14, %v41_v17  ;;  %v50_v21 = vadd.f32 %v46_v15, %v42_v18 }
   0x9   :  { %51 = vst [vmem:[%s132_s4] sm:$0xff] %v47_v16  ;;  %52 = vst [vmem:[%s132_s4 + $0x8] sm:$0xff] %v48_v19 }
   0xa   :  { %53 = vst [vmem:[%s132_s4 + $0x10] sm:$0xff] %v49_v20  ;;  %54 = vst [vmem:[%s132_s4 + $0x18] sm:$0xff] %v50_v21 }

// kernel: resnet_generator_forward.49
= control target key start
LH: loop header
LB: loop body
LE: loop exit
PB: predicated region body
PF: predicated region fallthrough
CT: control target
= control target key end

     0   :  { %s1603_s12 = smov 0   ;;  %s1605_s13 = smov 0   ;;  %s1923_s0 = inlined_call_operand.vmem [shape: bf16[32,512], index: 0, kind: input, shape index: {}]   ;;  %s1924_s1 = inlined_call_operand.vmem [shape: bf16[512,512], index: 1, kind: input, shape index: {}]   ;;  %s1925_s2 = inlined_call_operand.vmem [shape: f32[1,512], index: 2, kind: input, shape index: {}]   ;;  %s1926_s3 = inlined_call_operand.vmem [shape: f32[32,512], index: 3, kind: output, shape index: {}]  }
   0x1   :  { %s1607_s14 = smov 0   ;;  %s1609_s15 = smov 0  }
   0x2   :  { %s1611_s16 = smov 0  }
   0x3 LB: > { %s28_s17 = sadd.s32 1, %s1577_s15  ;;  %s1304_s18 = sadd.s32 4294967295, %s1581_s16   ;;  %s1581_s16 = sphi %s1611_s16, %s13_s16   ;;  %s1577_s15 = sphi %s1609_s15, %s1931_s15   ;;  %s1573_s14 = sphi %s1607_s14, %s1930_s14   ;;  %s1569_s13 = sphi %s1605_s13, %s1929_s13   ;;  %s1565_s12 = sphi %s1603_s12, %s1928_s12  }
   0x4   : > { %p30_p0 = scmp.ge.s32.totalorder %s28_s17, 2  ;;  %p76_p1 = scmp.ne.s32.totalorder %s1569_s13, %s1565_s12 }
   0x5   : > { %p77_p2 = scmp.eq.s32.totalorder %s1581_s16, 0  ;;  %p134_p4 = scmp.eq.s32.totalorder %s1304_s18, 1 }
   0x6   : > { %s1933_s17 = smov (%p30_p0, %s28_s17), 0  ;;  %s69_s20 = sadd.s32 1, %s1569_s13 }
   0x7   : > { %p78_p3 = por %p77_p2, %p76_p1  ;;  %s65_s19 = ssub.s32 %s1577_s15, %s1933_s17 }
   0x8   : > { %p67_p5 = scmp.eq.s32.totalorder %s65_s19, 0  ;;  %p1638_p6 = por %p134_p4, %p76_p1 }
   0x9   : > { %p1308_p7 = scmp.ge.s32.totalorder %s1581_s16, 2 }
   0xa   : > { %s1643_s22 = scalar_select %p67_p5, %s1569_s13, %s69_s20  }
   0xb   : > { %171 = sbr.rel (%p1308_p7) target bundleno = 52 (0x34), region = 20 }
  0x10   : > { %174 = sbr.rel (!%p78_p3) target bundleno = 52 (0x34), region = 24  ;;  %s176_s23 = sand.u32 (%p78_p3), 1, %s1569_s13  }
  0x11   : > { %s1393_s24 = sshll.u32 (%p78_p3), %s1577_s15, 3  ;;  %s1309_s25 = sshll.u32 (%p78_p3), %s176_s23, 9 }
  0x12   : > { %s1651_s28 = scalar_lea.vmem (%p78_p3), %s1924_s1, %s1393_s24  ;;  %s1656_s29 = scalar_lea.vmem (%p78_p3), [#allocation3], %s1309_s25 }
  0x13   : > { %v339_v0 = vld [vmem:[%s1651_s28] sm:$0xff] (%p78_p3)  ;;  %v341_v1 = vld [vmem:[%s1651_s28 + $0x10] sm:$0xff] (%p78_p3) }
  0x14   : > { %v343_v2 = vld [vmem:[%s1651_s28 + $0x20] sm:$0xff] (%p78_p3)  ;;  %340 = vst [vmem:[%s1656_s29] sm:$0xff] (%p78_p3), %v339_v0  ;;  %342 = vst [vmem:[%s1656_s29 + $0x8] sm:$0xff] (%p78_p3), %v341_v1  ;;  %v345_v3 = vld [vmem:[%s1651_s28 + $0x30] sm:$0xff] (%p78_p3) }
  0x15   : > { %344 = vst [vmem:[%s1656_s29 + $0x10] sm:$0xff] %v343_v2  ;;  %v347_v4 = vld [vmem:[%s1651_s28 + $0x40] sm:$0xff]  ;;  %v349_v5 = vld [vmem:[%s1651_s28 + $0x50] sm:$0xff]  ;;  %346 = vst [vmem:[%s1656_s29 + $0x18] sm:$0xff] %v345_v3 }
  0x16   : > { %348 = vst [vmem:[%s1656_s29 + $0x20] sm:$0xff] %v347_v4  ;;  %350 = vst [vmem:[%s1656_s29 + $0x28] sm:$0xff] %v349_v5  ;;  %v351_v6 = vld [vmem:[%s1651_s28 + $0x60] sm:$0xff]  ;;  %v353_v7 = vld [vmem:[%s1651_s28 + $0x70] sm:$0xff] }
  0x17   : > { %v355_v8 = vld [vmem:[%s1651_s28 + $0x80] sm:$0xff]  ;;  %352 = vst [vmem:[%s1656_s29 + $0x30] sm:$0xff] %v351_v6  ;;  %354 = vst [vmem:[%s1656_s29 + $0x38] sm:$0xff] %v353_v7  ;;  %v357_v9 = vld [vmem:[%s1651_s28 + $0x90] sm:$0xff] }
  0x18   : > { %356 = vst [vmem:[%s1656_s29 + $0x40] sm:$0xff] %v355_v8  ;;  %v359_v10 = vld [vmem:[%s1651_s28 + $0xa0] sm:$0xff]  ;;  %v361_v11 = vld [vmem:[%s1651_s28 + $0xb0] sm:$0xff]  ;;  %358 = vst [vmem:[%s1656_s29 + $0x48] sm:$0xff] %v357_v9 }
  0x19   : > { %360 = vst [vmem:[%s1656_s29 + $0x50] sm:$0xff] %v359_v10  ;;  %362 = vst [vmem:[%s1656_s29 + $0x58] sm:$0xff] %v361_v11  ;;  %v363_v12 = vld [vmem:[%s1651_s28 + $0xc0] sm:$0xff]  ;;  %v365_v13 = vld [vmem:[%s1651_s28 + $0xd0] sm:$0xff] }
  0x1a   : > { %v367_v14 = vld [vmem:[%s1651_s28 + $0xe0] sm:$0xff]  ;;  %364 = vst [vmem:[%s1656_s29 + $0x60] sm:$0xff] %v363_v12  ;;  %366 = vst [vmem:[%s1656_s29 + $0x68] sm:$0xff] %v365_v13  ;;  %v369_v15 = vld [vmem:[%s1651_s28 + $0xf0] sm:$0xff] }
  0x1b   : > { %368 = vst [vmem:[%s1656_s29 + $0x70] sm:$0xff] %v367_v14  ;;  %v371_v16 = vld [vmem:[%s1651_s28 + $0x100] sm:$0xff]  ;;  %v373_v17 = vld [vmem:[%s1651_s28 + $0x110] sm:$0xff]  ;;  %370 = vst [vmem:[%s1656_s29 + $0x78] sm:$0xff] %v369_v15 }
  0x1c   : > { %372 = vst [vmem:[%s1656_s29 + $0x80] sm:$0xff] %v371_v16  ;;  %374 = vst [vmem:[%s1656_s29 + $0x88] sm:$0xff] %v373_v17  ;;  %v375_v18 = vld [vmem:[%s1651_s28 + $0x120] sm:$0xff]  ;;  %v377_v19 = vld [vmem:[%s1651_s28 + $0x130] sm:$0xff] }
  0x1d   : > { %v379_v20 = vld [vmem:[%s1651_s28 + $0x140] sm:$0xff]  ;;  %376 = vst [vmem:[%s1656_s29 + $0x90] sm:$0xff] %v375_v18  ;;  %378 = vst [vmem:[%s1656_s29 + $0x98] sm:$0xff] %v377_v19  ;;  %v381_v21 = vld [vmem:[%s1651_s28 + $0x150] sm:$0xff] }
  0x1e   : > { %380 = vst [vmem:[%s1656_s29 + $0xa0] sm:$0xff] %v379_v20  ;;  %v383_v22 = vld [vmem:[%s1651_s28 + $0x160] sm:$0xff]  ;;  %v385_v23 = vld [vmem:[%s1651_s28 + $0x170] sm:$0xff]  ;;  %382 = vst [vmem:[%s1656_s29 + $0xa8] sm:$0xff] %v381_v21 }
  0x1f   : > { %384 = vst [vmem:[%s1656_s29 + $0xb0] sm:$0xff] %v383_v22  ;;  %386 = vst [vmem:[%s1656_s29 + $0xb8] sm:$0xff] %v385_v23  ;;  %v387_v24 = vld [vmem:[%s1651_s28 + $0x180] sm:$0xff]  ;;  %v389_v25 = vld [vmem:[%s1651_s28 + $0x190] sm:$0xff] }
  0x20   : > { %v391_v26 = vld [vmem:[%s1651_s28 + $0x1a0] sm:$0xff]  ;;  %388 = vst [vmem:[%s1656_s29 + $0xc0] sm:$0xff] %v387_v24  ;;  %390 = vst [vmem:[%s1656_s29 + $0xc8] sm:$0xff] %v389_v25  ;;  %v393_v27 = vld [vmem:[%s1651_s28 + $0x1b0] sm:$0xff] }
  0x21   : > { %392 = vst [vmem:[%s1656_s29 + $0xd0] sm:$0xff] %v391_v26  ;;  %v395_v28 = vld [vmem:[%s1651_s28 + $0x1c0] sm:$0xff]  ;;  %v397_v29 = vld [vmem:[%s1651_s28 + $0x1d0] sm:$0xff]  ;;  %394 = vst [vmem:[%s1656_s29 + $0xd8] sm:$0xff] %v393_v27 }
  0x22   : > { %396 = vst [vmem:[%s1656_s29 + $0xe0] sm:$0xff] %v395_v28  ;;  %398 = vst [vmem:[%s1656_s29 + $0xe8] sm:$0xff] %v397_v29  ;;  %v399_v30 = vld [vmem:[%s1651_s28 + $0x1e0] sm:$0xff]  ;;  %v401_v31 = vld [vmem:[%s1651_s28 + $0x1f0] sm:$0xff] }
  0x23   : > { %v403_v32 = vld [vmem:[%s1651_s28 + $0x200] sm:$0xff]  ;;  %400 = vst [vmem:[%s1656_s29 + $0xf0] sm:$0xff] %v399_v30  ;;  %402 = vst [vmem:[%s1656_s29 + $0xf8] sm:$0xff] %v401_v31  ;;  %v405_v33 = vld [vmem:[%s1651_s28 + $0x210] sm:$0xff] }
  0x24   : > { %404 = vst [vmem:[%s1656_s29 + $0x100] sm:$0xff] %v403_v32  ;;  %v407_v34 = vld [vmem:[%s1651_s28 + $0x220] sm:$0xff]  ;;  %v409_v35 = vld [vmem:[%s1651_s28 + $0x230] sm:$0xff]  ;;  %406 = vst [vmem:[%s1656_s29 + $0x108] sm:$0xff] %v405_v33 }
  0x25   : > { %408 = vst [vmem:[%s1656_s29 + $0x110] sm:$0xff] %v407_v34  ;;  %410 = vst [vmem:[%s1656_s29 + $0x118] sm:$0xff] %v409_v35  ;;  %v411_v36 = vld [vmem:[%s1651_s28 + $0x240] sm:$0xff]  ;;  %v413_v37 = vld [vmem:[%s1651_s28 + $0x250] sm:$0xff] }
  0x26   : > { %v415_v38 = vld [vmem:[%s1651_s28 + $0x260] sm:$0xff]  ;;  %412 = vst [vmem:[%s1656_s29 + $0x120] sm:$0xff] %v411_v36  ;;  %414 = vst [vmem:[%s1656_s29 + $0x128] sm:$0xff] %v413_v37  ;;  %v417_v39 = vld [vmem:[%s1651_s28 + $0x270] sm:$0xff] }
  0x27   : > { %416 = vst [vmem:[%s1656_s29 + $0x130] sm:$0xff] %v415_v38  ;;  %v419_v40 = vld [vmem:[%s1651_s28 + $0x280] sm:$0xff]  ;;  %v421_v41 = vld [vmem:[%s1651_s28 + $0x290] sm:$0xff]  ;;  %418 = vst [vmem:[%s1656_s29 + $0x138] sm:$0xff] %v417_v39 }
  0x28   : > { %420 = vst [vmem:[%s1656_s29 + $0x140] sm:$0xff] %v419_v40  ;;  %422 = vst [vmem:[%s1656_s29 + $0x148] sm:$0xff] %v421_v41  ;;  %v423_v42 = vld [vmem:[%s1651_s28 + $0x2a0] sm:$0xff]  ;;  %v425_v43 = vld [vmem:[%s1651_s28 + $0x2b0] sm:$0xff] }
  0x29   : > { %v427_v44 = vld [vmem:[%s1651_s28 + $0x2c0] sm:$0xff]  ;;  %424 = vst [vmem:[%s1656_s29 + $0x150] sm:$0xff] %v423_v42  ;;  %426 = vst [vmem:[%s1656_s29 + $0x158] sm:$0xff] %v425_v43  ;;  %v429_v45 = vld [vmem:[%s1651_s28 + $0x2d0] sm:$0xff] }
  0x2a   : > { %428 = vst [vmem:[%s1656_s29 + $0x160] sm:$0xff] %v427_v44  ;;  %v431_v46 = vld [vmem:[%s1651_s28 + $0x2e0] sm:$0xff]  ;;  %v433_v47 = vld [vmem:[%s1651_s28 + $0x2f0] sm:$0xff]  ;;  %430 = vst [vmem:[%s1656_s29 + $0x168] sm:$0xff] %v429_v45 }
  0x2b   : > { %432 = vst [vmem:[%s1656_s29 + $0x170] sm:$0xff] %v431_v46  ;;  %434 = vst [vmem:[%s1656_s29 + $0x178] sm:$0xff] %v433_v47  ;;  %v435_v48 = vld [vmem:[%s1651_s28 + $0x300] sm:$0xff]  ;;  %v437_v49 = vld [vmem:[%s1651_s28 + $0x310] sm:$0xff] }
  0x2c   : > { %v439_v50 = vld [vmem:[%s1651_s28 + $0x320] sm:$0xff]  ;;  %436 = vst [vmem:[%s1656_s29 + $0x180] sm:$0xff] %v435_v48  ;;  %438 = vst [vmem:[%s1656_s29 + $0x188] sm:$0xff] %v437_v49  ;;  %v441_v51 = vld [vmem:[%s1651_s28 + $0x330] sm:$0xff] }
  0x2d   : > { %440 = vst [vmem:[%s1656_s29 + $0x190] sm:$0xff] %v439_v50  ;;  %v443_v52 = vld [vmem:[%s1651_s28 + $0x340] sm:$0xff]  ;;  %v445_v53 = vld [vmem:[%s1651_s28 + $0x350] sm:$0xff]  ;;  %442 = vst [vmem:[%s1656_s29 + $0x198] sm:$0xff] %v441_v51 }
  0x2e   : > { %444 = vst [vmem:[%s1656_s29 + $0x1a0] sm:$0xff] %v443_v52  ;;  %446 = vst [vmem:[%s1656_s29 + $0x1a8] sm:$0xff] %v445_v53  ;;  %v447_v54 = vld [vmem:[%s1651_s28 + $0x360] sm:$0xff]  ;;  %v449_v55 = vld [vmem:[%s1651_s28 + $0x370] sm:$0xff] }
  0x2f   : > { %v451_v56 = vld [vmem:[%s1651_s28 + $0x380] sm:$0xff]  ;;  %448 = vst [vmem:[%s1656_s29 + $0x1b0] sm:$0xff] %v447_v54  ;;  %450 = vst [vmem:[%s1656_s29 + $0x1b8] sm:$0xff] %v449_v55  ;;  %v453_v57 = vld [vmem:[%s1651_s28 + $0x390] sm:$0xff] }
  0x30   : > { %452 = vst [vmem:[%s1656_s29 + $0x1c0] sm:$0xff] %v451_v56  ;;  %v455_v58 = vld [vmem:[%s1651_s28 + $0x3a0] sm:$0xff]  ;;  %v457_v59 = vld [vmem:[%s1651_s28 + $0x3b0] sm:$0xff]  ;;  %454 = vst [vmem:[%s1656_s29 + $0x1c8] sm:$0xff] %v453_v57 }
  0x31   : > { %456 = vst [vmem:[%s1656_s29 + $0x1d0] sm:$0xff] %v455_v58  ;;  %458 = vst [vmem:[%s1656_s29 + $0x1d8] sm:$0xff] %v457_v59  ;;  %v459_v60 = vld [vmem:[%s1651_s28 + $0x3c0] sm:$0xff]  ;;  %v461_v61 = vld [vmem:[%s1651_s28 + $0x3d0] sm:$0xff] }
  0x32   : > { %v463_v62 = vld [vmem:[%s1651_s28 + $0x3e0] sm:$0xff]  ;;  %460 = vst [vmem:[%s1656_s29 + $0x1e0] sm:$0xff] %v459_v60  ;;  %462 = vst [vmem:[%s1656_s29 + $0x1e8] sm:$0xff] %v461_v61  ;;  %v465_v63 = vld [vmem:[%s1651_s28 + $0x3f0] sm:$0xff] }
  0x33   : > { %464 = vst [vmem:[%s1656_s29 + $0x1f0] sm:$0xff] %v463_v62  ;;  %466 = vst [vmem:[%s1656_s29 + $0x1f8] sm:$0xff] %v465_v63 }
  0x34 PF: > { %p1312_p8 = scmp.ge.s32.totalorder %s1581_s16, 1  ;;  %p479_p9 = scmp.lt.s32.totalorder %s1581_s16, 3 }
  0x36   : > { %p480_p10 = pnand %p1312_p8, %p479_p9 }
  0x37   : > { %s486_s30 = sand.u32 (!%p480_p10), 1, %s1565_s12  }
  0x38   : > { %483 = sbr.rel (%p480_p10) target bundleno = 348 (0x15c), region = 66  ;;  %s1313_s4 = sshll.u32 (!%p480_p10), %s486_s30, 9 }
  0x39   : > { %s1794_s9 = scalar_lea.vmem (!%p480_p10), [#allocation3], %s1313_s4  ;;  %s1315_s4 = sshll.u32 (!%p480_p10), %s1573_s14, 1 }
  0x3a   : > { %p537_p11 = scmp.lt.s32.totalorder (!%p480_p10), %s1315_s4, 3  ;;  %s1314_s8 = sshll.u32 (!%p480_p10), %s486_s30, 6 }
  0x3d   : > { %v1533_v0 = vld [vmem:[%s1923_s0 + $0x4] ss:$16 sps:$4 sm:$0xff]   ;;  %v1536_v1 = vld [vmem:[%s1923_s0 + $0xc] ss:$16 sps:$4 sm:$0xff]   ;;  %v1439_v4 = vld [vmem:[%s1794_s9 + $0x70] ss:$8 sps:$4 sm:$0xff]  }
  0x3e   : > { %v1435_v2 = vld [vmem:[%s1794_s9 + $0x74] ss:$8 sps:$4 sm:$0xff]   ;;  %1027 = vmatprep.mubr.bf16.mxu0 %v1533_v0  ;;  %1080 = vmatprep.mubr.bf16.mxu1 %v1536_v1  ;;  %v1440_v5 = vld [vmem:[%s1794_s9 + $0x170] ss:$8 sps:$4 sm:$0xff]   ;;  %v1441_v6 = vld [vmem:[%s1794_s9 + $0x64] ss:$8 sps:$4 sm:$0xff]  }
  0x3f   : > { %v1437_v3 = vld [vmem:[%s1794_s9 + $0x174] ss:$8 sps:$4 sm:$0xff]   ;;  %995 = vmatprep.subr.bf16.mxu0 %v1435_v2  ;;  %v1443_v7 = vld [vmem:[%s1794_s9 + $0x164] ss:$8 sps:$4 sm:$0xff]   ;;  %v1445_v8 = vld [vmem:[%s1794_s9 + $0x60] ss:$8 sps:$4 sm:$0xff]  }
  0x40   : > { %1048 = vmatprep.subr.bf16.mxu1 %v1437_v3  ;;  %996 = vmatpush1.bf16.msra.mxu0 %v1439_v4  ;;  %v1446_v9 = vld [vmem:[%s1794_s9 + $0x160] ss:$8 sps:$4 sm:$0xff]   ;;  %v1447_v10 = vld [vmem:[%s1794_s9 + $0x54] ss:$8 sps:$4 sm:$0xff]   ;;  %v1451_v12 = vld [vmem:[%s1794_s9 + $0x50] ss:$8 sps:$4 sm:$0xff]  }
  0x41   : > { %1049 = vmatpush1.bf16.msra.mxu1 %v1440_v5  ;;  %997 = vmatprep.subr.bf16.mxu0 %v1441_v6  ;;  %v1449_v11 = vld [vmem:[%s1794_s9 + $0x154] ss:$8 sps:$4 sm:$0xff]   ;;  %v1452_v13 = vld [vmem:[%s1794_s9 + $0x150] ss:$8 sps:$4 sm:$0xff]   ;;  %v1453_v14 = vld [vmem:[%s1794_s9 + $0x44] ss:$8 sps:$4 sm:$0xff]  }
  0x42   : > { %1050 = vmatprep.subr.bf16.mxu1 %v1443_v7  ;;  %v1455_v15 = vld [vmem:[%s1794_s9 + $0x144] ss:$8 sps:$4 sm:$0xff]   ;;  %v1457_v16 = vld [vmem:[%s1794_s9 + $0x40] ss:$8 sps:$4 sm:$0xff]   ;;  %v1459_v18 = vld [vmem:[%s1794_s9 + $0x34] ss:$8 sps:$4 sm:$0xff]  }
  0x43   : > { %v1458_v17 = vld [vmem:[%s1794_s9 + $0x140] ss:$8 sps:$4 sm:$0xff]   ;;  %v1461_v19 = vld [vmem:[%s1794_s9 + $0x134] ss:$8 sps:$4 sm:$0xff]   ;;  %v1463_v20 = vld [vmem:[%s1794_s9 + $0x30] ss:$8 sps:$4 sm:$0xff]  }
  0x44   : > { %998 = vmatpush1.bf16.msra.mxu0 %v1445_v8  ;;  %v1464_v21 = vld [vmem:[%s1794_s9 + $0x130] ss:$8 sps:$4 sm:$0xff]   ;;  %v1465_v22 = vld [vmem:[%s1794_s9 + $0x24] ss:$8 sps:$4 sm:$0xff]   ;;  %v1469_v24 = vld [vmem:[%s1794_s9 + $0x20] ss:$8 sps:$4 sm:$0xff]   ;;  %v1130_v8 = vlaneseq }
  0x45   : > { %1051 = vmatpush1.bf16.msra.mxu1 %v1446_v9  ;;  %999 = vmatprep.subr.bf16.mxu0 %v1447_v10  ;;  %v1467_v23 = vld [vmem:[%s1794_s9 + $0x124] ss:$8 sps:$4 sm:$0xff]   ;;  %v1470_v25 = vld [vmem:[%s1794_s9 + $0x120] ss:$8 sps:$4 sm:$0xff]   ;;  %v1471_v26 = vld [vmem:[%s1794_s9 + $0x14] ss:$8 sps:$4 sm:$0xff]  }
  0x46   : > { %1052 = vmatprep.subr.bf16.mxu1 %v1449_v11  ;;  %v1473_v27 = vld [vmem:[%s1794_s9 + $0x114] ss:$8 sps:$4 sm:$0xff]   ;;  %v1475_v28 = vld [vmem:[%s1794_s9 + $0x10] ss:$8 sps:$4 sm:$0xff]   ;;  %v1477_v30 = vld [vmem:[%s1794_s9 + $0x4] ss:$8 sps:$4 sm:$0xff]  }
  0x47   : > { %v1476_v29 = vld [vmem:[%s1794_s9 + $0x110] ss:$8 sps:$4 sm:$0xff]   ;;  %v1479_v31 = vld [vmem:[%s1794_s9 + $0x104] ss:$8 sps:$4 sm:$0xff]   ;;  %v1481_v32 = vld [vmem:[%s1794_s9] ss:$8 sps:$4 sm:$0xff]  }
  0x48   : > { %1000 = vmatpush1.bf16.msra.mxu0 %v1451_v12  ;;  %v1482_v33 = vld [vmem:[%s1794_s9 + $0x100] ss:$8 sps:$4 sm:$0xff]   ;;  %v1483_v34 = vld [vmem:[%s1794_s9 + $0xf4] ss:$8 sps:$4 sm:$0xff]   ;;  %v1487_v36 = vld [vmem:[%s1794_s9 + $0xf0] ss:$8 sps:$4 sm:$0xff]  }
  0x49   : > { %1053 = vmatpush1.bf16.msra.mxu1 %v1452_v13  ;;  %1001 = vmatprep.subr.bf16.mxu0 %v1453_v14  ;;  %v1485_v35 = vld [vmem:[%s1794_s9 + $0x1f4] ss:$8 sps:$4 sm:$0xff]   ;;  %v1488_v37 = vld [vmem:[%s1794_s9 + $0x1f0] ss:$8 sps:$4 sm:$0xff]   ;;  %v1489_v38 = vld [vmem:[%s1794_s9 + $0xe4] ss:$8 sps:$4 sm:$0xff]  }
  0x4a   : > { %1054 = vmatprep.subr.bf16.mxu1 %v1455_v15  ;;  %v1491_v39 = vld [vmem:[%s1794_s9 + $0x1e4] ss:$8 sps:$4 sm:$0xff]   ;;  %v1493_v40 = vld [vmem:[%s1794_s9 + $0xe0] ss:$8 sps:$4 sm:$0xff]   ;;  %v1495_v42 = vld [vmem:[%s1794_s9 + $0xd4] ss:$8 sps:$4 sm:$0xff]  }
  0x4b   : > { %v1494_v41 = vld [vmem:[%s1794_s9 + $0x1e0] ss:$8 sps:$4 sm:$0xff]   ;;  %v1497_v43 = vld [vmem:[%s1794_s9 + $0x1d4] ss:$8 sps:$4 sm:$0xff]   ;;  %v1499_v44 = vld [vmem:[%s1794_s9 + $0xd0] ss:$8 sps:$4 sm:$0xff]  }
  0x4c   : > { %1002 = vmatpush1.bf16.msra.mxu0 %v1457_v16  ;;  %v1500_v45 = vld [vmem:[%s1794_s9 + $0x1d0] ss:$8 sps:$4 sm:$0xff]   ;;  %v1501_v46 = vld [vmem:[%s1794_s9 + $0xc4] ss:$8 sps:$4 sm:$0xff]   ;;  %v1505_v48 = vld [vmem:[%s1794_s9 + $0xc0] ss:$8 sps:$4 sm:$0xff]  }
  0x4d   : > { %1055 = vmatpush1.bf16.msra.mxu1 %v1458_v17  ;;  %1003 = vmatprep.subr.bf16.mxu0 %v1459_v18  ;;  %v1503_v47 = vld [vmem:[%s1794_s9 + $0x1c4] ss:$8 sps:$4 sm:$0xff]   ;;  %v1506_v49 = vld [vmem:[%s1794_s9 + $0x1c0] ss:$8 sps:$4 sm:$0xff]   ;;  %v1507_v50 = vld [vmem:[%s1794_s9 + $0xb4] ss:$8 sps:$4 sm:$0xff]  }
  0x4e   : > { %1056 = vmatprep.subr.bf16.mxu1 %v1461_v19  ;;  %v1509_v51 = vld [vmem:[%s1794_s9 + $0x1b4] ss:$8 sps:$4 sm:$0xff]   ;;  %v1511_v52 = vld [vmem:[%s1794_s9 + $0xb0] ss:$8 sps:$4 sm:$0xff]   ;;  %v1513_v54 = vld [vmem:[%s1794_s9 + $0xa4] ss:$8 sps:$4 sm:$0xff]  }
  0x4f   : > { %v1512_v53 = vld [vmem:[%s1794_s9 + $0x1b0] ss:$8 sps:$4 sm:$0xff]   ;;  %v1515_v55 = vld [vmem:[%s1794_s9 + $0x1a4] ss:$8 sps:$4 sm:$0xff]   ;;  %v1517_v56 = vld [vmem:[%s1794_s9 + $0xa0] ss:$8 sps:$4 sm:$0xff]  }
  0x50   : > { %1004 = vmatpush1.bf16.msra.mxu0 %v1463_v20  ;;  %v1518_v57 = vld [vmem:[%s1794_s9 + $0x1a0] ss:$8 sps:$4 sm:$0xff]   ;;  %v1519_v58 = vld [vmem:[%s1794_s9 + $0x94] ss:$8 sps:$4 sm:$0xff]   ;;  %v1523_v60 = vld [vmem:[%s1794_s9 + $0x90] ss:$8 sps:$4 sm:$0xff]  }
  0x51   : > { %1057 = vmatpush1.bf16.msra.mxu1 %v1464_v21  ;;  %1005 = vmatprep.subr.bf16.mxu0 %v1465_v22  ;;  %v1521_v59 = vld [vmem:[%s1794_s9 + $0x194] ss:$8 sps:$4 sm:$0xff]   ;;  %v1524_v61 = vld [vmem:[%s1794_s9 + $0x190] ss:$8 sps:$4 sm:$0xff]   ;;  %v1525_v62 = vld [vmem:[%s1794_s9 + $0x84] ss:$8 sps:$4 sm:$0xff]  }
  0x52   : > { %1058 = vmatprep.subr.bf16.mxu1 %v1467_v23  ;;  %v1527_v63 = vld [vmem:[%s1794_s9 + $0x184] ss:$8 sps:$4 sm:$0xff]   ;;  %v1529_v0 = vld [vmem:[%s1794_s9 + $0x80] ss:$8 sps:$4 sm:$0xff]   ;;  %s1935_s4 = smov (!%p537_p11, %s1315_s4), 3  ;;  %v1131_v9 = vshrl.u32 %v1130_v8, 7 }
  0x53   : > { %v1530_v1 = vld [vmem:[%s1794_s9 + $0x180] ss:$8 sps:$4 sm:$0xff]   ;;  %v1537_v4 = vld [vmem:[%s1923_s0 + $0x24] ss:$16 sps:$4 sm:$0xff]   ;;  %v1539_v5 = vld [vmem:[%s1923_s0 + $0x2c] ss:$16 sps:$4 sm:$0xff]   ;;  %s539_s7 = scalar_lea.vmem %s1925_s2, %s1935_s4 }
  0x54   : > { %1006 = vmatpush1.bf16.msra.mxu0 %v1469_v24  ;;  %v1531_v2 = vld [vmem:[%s1923_s0] ss:$16 sps:$4 sm:$0xff]   ;;  %v1534_v3 = vld [vmem:[%s1923_s0 + $0x8] ss:$16 sps:$4 sm:$0xff]   ;;  %v1132_v10 = vsub.s32 0, %v1131_v9  ;;  %v1136_v12 = vsub.s32 1, %v1131_v9 }
  0x55   : > { %1059 = vmatpush1.bf16.msra.mxu1 %v1470_v25  ;;  %1007 = vmatprep.subr.bf16.mxu0 %v1471_v26  ;;  %v1541_v6 = vld [vmem:[%s1923_s0 + $0x20] ss:$16 sps:$4 sm:$0xff]   ;;  %v1542_v7 = vld [vmem:[%s1923_s0 + $0x28] ss:$16 sps:$4 sm:$0xff]   ;;  %s1884_s9 = scalar_lea.vmem [#allocation4], %s1314_s8  ;;  %s1394_s12 = sshll.u32 (%p1638_p6), %s1573_s14, 4 }
  0x56   : > { %1060 = vmatprep.subr.bf16.mxu1 %v1473_v27  ;;  %v1128_v11 = vld [vmem:[%s539_s7] sm:$0x3]  ;;  %s1168_s11 = scalar_lea.vmem (%p1638_p6), %s1926_s3, %s1394_s12 }
  0x57   : > { %v1133_v13 = vrot.slane %v1128_v11, %v1132_v10  ;;  %v1137_v17 = vrot.slane %v1128_v11, %v1136_v12 }
  0x58   : > { %1008 = vmatpush1.bf16.msra.mxu0 %v1475_v28 }
  0x59   : > { %1061 = vmatpush1.bf16.msra.mxu1 %v1476_v29  ;;  %1009 = vmatprep.subr.bf16.mxu0 %v1477_v30 }
  0x5a   : > { %1062 = vmatprep.subr.bf16.mxu1 %v1479_v31 }
  0x5c   : > { %1010 = vmatpush1.bf16.msra.mxu0 %v1481_v32 }
  0x5d   : > { %1063 = vmatpush1.bf16.msra.mxu1 %v1482_v33  ;;  %1011 = vmatprep.subr.bf16.mxu0 %v1483_v34 }
  0x5e   : > { %1064 = vmatprep.subr.bf16.mxu1 %v1485_v35 }
  0x60   : > { %1012 = vmatpush2.bf16.msra.mxu0 %v1487_v36 }
  0x61   : > { %1065 = vmatpush2.bf16.msra.mxu1 %v1488_v37  ;;  %1013 = vmatprep.subr.bf16.mxu0 %v1489_v38 }
  0x62   : > { %1066 = vmatprep.subr.bf16.mxu1 %v1491_v39 }
  0x64   : > { %1014 = vmatpush2.bf16.msra.mxu0 %v1493_v40 }
  0x65   : > { %1067 = vmatpush2.bf16.msra.mxu1 %v1494_v41  ;;  %1015 = vmatprep.subr.bf16.mxu0 %v1495_v42 }
  0x66   : > { %1068 = vmatprep.subr.bf16.mxu1 %v1497_v43 }
  0x68   : > { %1016 = vmatpush2.bf16.msra.mxu0 %v1499_v44 }
  0x69   : > { %1069 = vmatpush2.bf16.msra.mxu1 %v1500_v45  ;;  %1017 = vmatprep.subr.bf16.mxu0 %v1501_v46 }
  0x6a   : > { %1070 = vmatprep.subr.bf16.mxu1 %v1503_v47 }
  0x6c   : > { %1018 = vmatpush2.bf16.msra.mxu0 %v1505_v48 }
  0x6d   : > { %1071 = vmatpush2.bf16.msra.mxu1 %v1506_v49  ;;  %1019 = vmatprep.subr.bf16.mxu0 %v1507_v50 }
  0x6e   : > { %1072 = vmatprep.subr.bf16.mxu1 %v1509_v51 }
  0x70   : > { %1020 = vmatpush2.bf16.msra.mxu0 %v1511_v52 }
  0x71   : > { %1073 = vmatpush2.bf16.msra.mxu1 %v1512_v53  ;;  %1021 = vmatprep.subr.bf16.mxu0 %v1513_v54 }
  0x72   : > { %1074 = vmatprep.subr.bf16.mxu1 %v1515_v55 }
  0x74   : > { %1022 = vmatpush2.bf16.msra.mxu0 %v1517_v56 }
  0x75   : > { %1075 = vmatpush2.bf16.msra.mxu1 %v1518_v57  ;;  %1023 = vmatprep.subr.bf16.mxu0 %v1519_v58 }
  0x76   : > { %1076 = vmatprep.subr.bf16.mxu1 %v1521_v59 }
  0x78   : > { %1024 = vmatpush2.bf16.msra.mxu0 %v1523_v60 }
  0x79   : > { %1077 = vmatpush2.bf16.msra.mxu1 %v1524_v61  ;;  %1025 = vmatprep.subr.bf16.mxu0 %v1525_v62 }
  0x7a   : > { %1078 = vmatprep.subr.bf16.mxu1 %v1527_v63 }
  0x7c   : > { %1026 = vmatpush2.bf16.msra.mxu0 %v1529_v0 }
  0x7d   : > { %1079 = vmatpush2.bf16.msra.mxu1 %v1530_v1 }
  0x7f   : > { %1028 = vmatmul.mubr.bf16.vlgmr.msra.gmra.mxu0 %v1531_v2 }
  0x80   : > { %1081 = vmatmul.mubr.bf16.vlgmr.msra.gmra.mxu1 %v1534_v3  ;;  %1037 = vmatprep.mubr.bf16.mxu0 %v1537_v4 }
  0x81   : > { %1090 = vmatprep.mubr.bf16.mxu1 %v1539_v5 }
  0x87   : > { %1038 = vmatmul.mubr.bf16.gmra.mxu0 %v1541_v6 }
  0x88   : > { %1091 = vmatmul.mubr.bf16.gmra.mxu1 %v1542_v7 }
 0x13f   : > { %v1029_v14 = vpop.f32.mrf.mxu0 }
 0x140   : > { %v1082_v15 = vpop.f32.mrf.mxu1 }
 0x141   : > { %v1083_v16 = vadd.f32 %v1082_v15, %v1029_v14  ;;  %v1031_v18 = vpop.f32.mrf.mxu0 }
 0x142   : > { %v1084_v19 = vpop.f32.mrf.mxu1 }
 0x143   : > { %v1140_v20 = vadd.f32 %v1133_v13, %v1083_v16  ;;  %v1085_v21 = vadd.f32 %v1084_v19, %v1031_v18  ;;  %v1033_v22 = vpop.f32.mrf.mxu0 }
 0x144   : > { %v1086_v23 = vpop.f32.mrf.mxu1 }
 0x145   : > { %1148 = vst [vmem:[%s1884_s9] sm:$0xff] %v1140_v20  ;;  %v1141_v24 = vadd.f32 %v1137_v17, %v1085_v21  ;;  %v1087_v25 = vadd.f32 %v1086_v23, %v1033_v22  ;;  %v1035_v26 = vpop.f32.mrf.mxu0 }
 0x146   : > { %v1088_v27 = vpop.f32.mrf.mxu1 }
 0x147   : > { %1149 = vst [vmem:[%s1884_s9 + $0x8] sm:$0xff] %v1141_v24  ;;  %v1142_v28 = vadd.f32 %v1133_v13, %v1087_v25  ;;  %v1089_v29 = vadd.f32 %v1088_v27, %v1035_v26  ;;  %v1039_v30 = vpop.f32.mrf.mxu0 }
 0x148   : > { %v1092_v31 = vpop.f32.mrf.mxu1 }
 0x149   : > { %1150 = vst [vmem:[%s1884_s9 + $0x10] sm:$0xff] %v1142_v28  ;;  %v1143_v32 = vadd.f32 %v1137_v17, %v1089_v29  ;;  %v1093_v33 = vadd.f32 %v1092_v31, %v1039_v30  ;;  %v1041_v34 = vpop.f32.mrf.mxu0 }
 0x14a   : > { %v1094_v35 = vpop.f32.mrf.mxu1 }
 0x14b   : > { %1151 = vst [vmem:[%s1884_s9 + $0x18] sm:$0xff] %v1143_v32  ;;  %v1144_v36 = vadd.f32 %v1133_v13, %v1093_v33  ;;  %v1095_v37 = vadd.f32 %v1094_v35, %v1041_v34  ;;  %v1043_v38 = vpop.f32.mrf.mxu0 }
 0x14c   : > { %v1096_v39 = vpop.f32.mrf.mxu1  ;;  %v1181_v47 = vld [vmem:[%s1884_s9] sm:$0xff] (%p1638_p6) }
 0x14d   : > { %1152 = vst [vmem:[%s1884_s9 + $0x20] sm:$0xff] %v1144_v36  ;;  %v1145_v40 = vadd.f32 %v1137_v17, %v1095_v37  ;;  %v1097_v41 = vadd.f32 %v1096_v39, %v1043_v38  ;;  %v1045_v42 = vpop.f32.mrf.mxu0  ;;  %1182 = vst [vmem:[%s1168_s11] sm:$0xff] (%p1638_p6), %v1181_v47 }
 0x14e   : > { %v1098_v43 = vpop.f32.mrf.mxu1  ;;  %v1183_v48 = vld [vmem:[%s1884_s9 + $0x8] sm:$0xff] (%p1638_p6) }
 0x14f   : > { %1153 = vst [vmem:[%s1884_s9 + $0x28] sm:$0xff] %v1145_v40  ;;  %v1146_v44 = vadd.f32 %v1133_v13, %v1097_v41  ;;  %v1099_v45 = vadd.f32 %v1098_v43, %v1045_v42  ;;  %1162 = sbr.rel (!%p1638_p6) target bundleno = 348 (0x15c), region = 82  ;;  %1184 = vst [vmem:[%s1168_s11 + $0x8] sm:$0xff] (%p1638_p6), %v1183_v48 }
 0x150   : > { %v1185_v49 = vld [vmem:[%s1884_s9 + $0x10] sm:$0xff] (%p1638_p6) }
 0x151   : > { %1154 = vst [vmem:[%s1884_s9 + $0x30] sm:$0xff] %v1146_v44  ;;  %v1147_v46 = vadd.f32 %v1137_v17, %v1099_v45  ;;  %1186 = vst [vmem:[%s1168_s11 + $0x20] sm:$0xff] (%p1638_p6), %v1185_v49 }
 0x152   : > { %v1187_v50 = vld [vmem:[%s1884_s9 + $0x18] sm:$0xff] (%p1638_p6) }
 0x153   : > { %1155 = vst [vmem:[%s1884_s9 + $0x38] sm:$0xff] %v1147_v46  ;;  %1188 = vst [vmem:[%s1168_s11 + $0x28] sm:$0xff] (%p1638_p6), %v1187_v50 }
 0x154   : > { %v1189_v51 = vld [vmem:[%s1884_s9 + $0x20] sm:$0xff] }
 0x155   : > { %1190 = vst [vmem:[%s1168_s11 + $0x40] sm:$0xff] %v1189_v51 }
 0x156   : > { %v1191_v52 = vld [vmem:[%s1884_s9 + $0x28] sm:$0xff] }
 0x157   : > { %1192 = vst [vmem:[%s1168_s11 + $0x48] sm:$0xff] %v1191_v52 }
 0x158   : > { %v1193_v53 = vld [vmem:[%s1884_s9 + $0x30] sm:$0xff] }
 0x159   : > { %1194 = vst [vmem:[%s1168_s11 + $0x60] sm:$0xff] %v1193_v53 }
 0x15a   : > { %v1195_v54 = vld [vmem:[%s1884_s9 + $0x38] sm:$0xff] }
 0x15b   : > { %1196 = vst [vmem:[%s1168_s11 + $0x68] sm:$0xff] %v1195_v54 }
 0x15c PF: > { %s13_s16 = sadd.s32 1, %s1581_s16   ;;  %s1928_s12 = smov %s1569_s13 }
 0x15d   : > { %p10_p12 = scmp.ge.s32.totalorder %s13_s16, 4   ;;  %s1929_s13 = smov %s1643_s22 }
 0x15e   : > { %s1930_s14 = smov %s1577_s15  ;;  %s1931_s15 = smov %s1933_s17 }
 0x15f   :  { %12 = sbr.rel (!%p10_p12) target bundleno = 3 (0x3), region = 142 }

// kernel: resnet_generator_forward.52
= control target key start
LH: loop header
LB: loop body
LE: loop exit
PB: predicated region body
PF: predicated region fallthrough
CT: control target
= control target key end

     0   :  { %s2143_s12 = smov 0   ;;  %s2145_s13 = smov 0   ;;  %s2653_s0 = inlined_call_operand.vmem [shape: bf16[128,512], index: 0, kind: input, shape index: {}]   ;;  %s2654_s1 = inlined_call_operand.vmem [shape: bf16[512,512], index: 1, kind: input, shape index: {}]   ;;  %s2655_s2 = inlined_call_operand.vmem [shape: f32[1,512], index: 2, kind: input, shape index: {}]   ;;  %s2656_s3 = inlined_call_operand.vmem [shape: f32[128,512], index: 3, kind: output, shape index: {}]  }
   0x1   :  { %s2147_s14 = smov 0   ;;  %s2149_s15 = smov 0  }
   0x2   :  { %s2151_s16 = smov 0  }
   0x3 LB: > { %s28_s17 = sadd.s32 1, %s2117_s15  ;;  %s1784_s18 = sadd.s32 4294967295, %s2121_s16   ;;  %s2121_s16 = sphi %s2151_s16, %s13_s16   ;;  %s2117_s15 = sphi %s2149_s15, %s2661_s15   ;;  %s2113_s14 = sphi %s2147_s14, %s2660_s14   ;;  %s2109_s13 = sphi %s2145_s13, %s2659_s13   ;;  %s2105_s12 = sphi %s2143_s12, %s2658_s12  }
   0x4   : > { %p30_p0 = scmp.ge.s32.totalorder %s28_s17, 2  ;;  %p76_p1 = scmp.ne.s32.totalorder %s2109_s13, %s2105_s12 }
   0x5   : > { %p77_p2 = scmp.eq.s32.totalorder %s2121_s16, 0  ;;  %p134_p4 = scmp.eq.s32.totalorder %s1784_s18, 1 }
   0x6   : > { %s2663_s17 = smov (%p30_p0, %s28_s17), 0  ;;  %s69_s20 = sadd.s32 1, %s2109_s13 }
   0x7   : > { %p78_p3 = por %p77_p2, %p76_p1  ;;  %s65_s19 = ssub.s32 %s2117_s15, %s2663_s17 }
   0x8   : > { %p67_p5 = scmp.eq.s32.totalorder %s65_s19, 0  ;;  %p2178_p6 = por %p134_p4, %p76_p1 }
   0x9   : > { %p1788_p7 = scmp.ge.s32.totalorder %s2121_s16, 2 }
   0xa   : > { %s2183_s22 = scalar_select %p67_p5, %s2109_s13, %s69_s20  }
   0xb   : > { %171 = sbr.rel (%p1788_p7) target bundleno = 52 (0x34), region = 20 }
  0x10   : > { %174 = sbr.rel (!%p78_p3) target bundleno = 52 (0x34), region = 24  ;;  %s176_s23 = sand.u32 (%p78_p3), 1, %s2109_s13  }
  0x11   : > { %s1897_s24 = sshll.u32 (%p78_p3), %s2117_s15, 3  ;;  %s1789_s25 = sshll.u32 (%p78_p3), %s176_s23, 9 }
  0x12   : > { %s2191_s28 = scalar_lea.vmem (%p78_p3), %s2654_s1, %s1897_s24  ;;  %s2196_s29 = scalar_lea.vmem (%p78_p3), [#allocation3], %s1789_s25 }
  0x13   : > { %v339_v0 = vld [vmem:[%s2191_s28] sm:$0xff] (%p78_p3)  ;;  %v341_v1 = vld [vmem:[%s2191_s28 + $0x10] sm:$0xff] (%p78_p3) }
  0x14   : > { %v343_v2 = vld [vmem:[%s2191_s28 + $0x20] sm:$0xff] (%p78_p3)  ;;  %340 = vst [vmem:[%s2196_s29] sm:$0xff] (%p78_p3), %v339_v0  ;;  %342 = vst [vmem:[%s2196_s29 + $0x8] sm:$0xff] (%p78_p3), %v341_v1  ;;  %v345_v3 = vld [vmem:[%s2191_s28 + $0x30] sm:$0xff] (%p78_p3) }
  0x15   : > { %344 = vst [vmem:[%s2196_s29 + $0x10] sm:$0xff] %v343_v2  ;;  %v347_v4 = vld [vmem:[%s2191_s28 + $0x40] sm:$0xff]  ;;  %v349_v5 = vld [vmem:[%s2191_s28 + $0x50] sm:$0xff]  ;;  %346 = vst [vmem:[%s2196_s29 + $0x18] sm:$0xff] %v345_v3 }
  0x16   : > { %348 = vst [vmem:[%s2196_s29 + $0x20] sm:$0xff] %v347_v4  ;;  %350 = vst [vmem:[%s2196_s29 + $0x28] sm:$0xff] %v349_v5  ;;  %v351_v6 = vld [vmem:[%s2191_s28 + $0x60] sm:$0xff]  ;;  %v353_v7 = vld [vmem:[%s2191_s28 + $0x70] sm:$0xff] }
  0x17   : > { %v355_v8 = vld [vmem:[%s2191_s28 + $0x80] sm:$0xff]  ;;  %352 = vst [vmem:[%s2196_s29 + $0x30] sm:$0xff] %v351_v6  ;;  %354 = vst [vmem:[%s2196_s29 + $0x38] sm:$0xff] %v353_v7  ;;  %v357_v9 = vld [vmem:[%s2191_s28 + $0x90] sm:$0xff] }
  0x18   : > { %356 = vst [vmem:[%s2196_s29 + $0x40] sm:$0xff] %v355_v8  ;;  %v359_v10 = vld [vmem:[%s2191_s28 + $0xa0] sm:$0xff]  ;;  %v361_v11 = vld [vmem:[%s2191_s28 + $0xb0] sm:$0xff]  ;;  %358 = vst [vmem:[%s2196_s29 + $0x48] sm:$0xff] %v357_v9 }
  0x19   : > { %360 = vst [vmem:[%s2196_s29 + $0x50] sm:$0xff] %v359_v10  ;;  %362 = vst [vmem:[%s2196_s29 + $0x58] sm:$0xff] %v361_v11  ;;  %v363_v12 = vld [vmem:[%s2191_s28 + $0xc0] sm:$0xff]  ;;  %v365_v13 = vld [vmem:[%s2191_s28 + $0xd0] sm:$0xff] }
  0x1a   : > { %v367_v14 = vld [vmem:[%s2191_s28 + $0xe0] sm:$0xff]  ;;  %364 = vst [vmem:[%s2196_s29 + $0x60] sm:$0xff] %v363_v12  ;;  %366 = vst [vmem:[%s2196_s29 + $0x68] sm:$0xff] %v365_v13  ;;  %v369_v15 = vld [vmem:[%s2191_s28 + $0xf0] sm:$0xff] }
  0x1b   : > { %368 = vst [vmem:[%s2196_s29 + $0x70] sm:$0xff] %v367_v14  ;;  %v371_v16 = vld [vmem:[%s2191_s28 + $0x100] sm:$0xff]  ;;  %v373_v17 = vld [vmem:[%s2191_s28 + $0x110] sm:$0xff]  ;;  %370 = vst [vmem:[%s2196_s29 + $0x78] sm:$0xff] %v369_v15 }
  0x1c   : > { %372 = vst [vmem:[%s2196_s29 + $0x80] sm:$0xff] %v371_v16  ;;  %374 = vst [vmem:[%s2196_s29 + $0x88] sm:$0xff] %v373_v17  ;;  %v375_v18 = vld [vmem:[%s2191_s28 + $0x120] sm:$0xff]  ;;  %v377_v19 = vld [vmem:[%s2191_s28 + $0x130] sm:$0xff] }
  0x1d   : > { %v379_v20 = vld [vmem:[%s2191_s28 + $0x140] sm:$0xff]  ;;  %376 = vst [vmem:[%s2196_s29 + $0x90] sm:$0xff] %v375_v18  ;;  %378 = vst [vmem:[%s2196_s29 + $0x98] sm:$0xff] %v377_v19  ;;  %v381_v21 = vld [vmem:[%s2191_s28 + $0x150] sm:$0xff] }
  0x1e   : > { %380 = vst [vmem:[%s2196_s29 + $0xa0] sm:$0xff] %v379_v20  ;;  %v383_v22 = vld [vmem:[%s2191_s28 + $0x160] sm:$0xff]  ;;  %v385_v23 = vld [vmem:[%s2191_s28 + $0x170] sm:$0xff]  ;;  %382 = vst [vmem:[%s2196_s29 + $0xa8] sm:$0xff] %v381_v21 }
  0x1f   : > { %384 = vst [vmem:[%s2196_s29 + $0xb0] sm:$0xff] %v383_v22  ;;  %386 = vst [vmem:[%s2196_s29 + $0xb8] sm:$0xff] %v385_v23  ;;  %v387_v24 = vld [vmem:[%s2191_s28 + $0x180] sm:$0xff]  ;;  %v389_v25 = vld [vmem:[%s2191_s28 + $0x190] sm:$0xff] }
  0x20   : > { %v391_v26 = vld [vmem:[%s2191_s28 + $0x1a0] sm:$0xff]  ;;  %388 = vst [vmem:[%s2196_s29 + $0xc0] sm:$0xff] %v387_v24  ;;  %390 = vst [vmem:[%s2196_s29 + $0xc8] sm:$0xff] %v389_v25  ;;  %v393_v27 = vld [vmem:[%s2191_s28 + $0x1b0] sm:$0xff] }
  0x21   : > { %392 = vst [vmem:[%s2196_s29 + $0xd0] sm:$0xff] %v391_v26  ;;  %v395_v28 = vld [vmem:[%s2191_s28 + $0x1c0] sm:$0xff]  ;;  %v397_v29 = vld [vmem:[%s2191_s28 + $0x1d0] sm:$0xff]  ;;  %394 = vst [vmem:[%s2196_s29 + $0xd8] sm:$0xff] %v393_v27 }
  0x22   : > { %396 = vst [vmem:[%s2196_s29 + $0xe0] sm:$0xff] %v395_v28  ;;  %398 = vst [vmem:[%s2196_s29 + $0xe8] sm:$0xff] %v397_v29  ;;  %v399_v30 = vld [vmem:[%s2191_s28 + $0x1e0] sm:$0xff]  ;;  %v401_v31 = vld [vmem:[%s2191_s28 + $0x1f0] sm:$0xff] }
  0x23   : > { %v403_v32 = vld [vmem:[%s2191_s28 + $0x200] sm:$0xff]  ;;  %400 = vst [vmem:[%s2196_s29 + $0xf0] sm:$0xff] %v399_v30  ;;  %402 = vst [vmem:[%s2196_s29 + $0xf8] sm:$0xff] %v401_v31  ;;  %v405_v33 = vld [vmem:[%s2191_s28 + $0x210] sm:$0xff] }
  0x24   : > { %404 = vst [vmem:[%s2196_s29 + $0x100] sm:$0xff] %v403_v32  ;;  %v407_v34 = vld [vmem:[%s2191_s28 + $0x220] sm:$0xff]  ;;  %v409_v35 = vld [vmem:[%s2191_s28 + $0x230] sm:$0xff]  ;;  %406 = vst [vmem:[%s2196_s29 + $0x108] sm:$0xff] %v405_v33 }
  0x25   : > { %408 = vst [vmem:[%s2196_s29 + $0x110] sm:$0xff] %v407_v34  ;;  %410 = vst [vmem:[%s2196_s29 + $0x118] sm:$0xff] %v409_v35  ;;  %v411_v36 = vld [vmem:[%s2191_s28 + $0x240] sm:$0xff]  ;;  %v413_v37 = vld [vmem:[%s2191_s28 + $0x250] sm:$0xff] }
  0x26   : > { %v415_v38 = vld [vmem:[%s2191_s28 + $0x260] sm:$0xff]  ;;  %412 = vst [vmem:[%s2196_s29 + $0x120] sm:$0xff] %v411_v36  ;;  %414 = vst [vmem:[%s2196_s29 + $0x128] sm:$0xff] %v413_v37  ;;  %v417_v39 = vld [vmem:[%s2191_s28 + $0x270] sm:$0xff] }
  0x27   : > { %416 = vst [vmem:[%s2196_s29 + $0x130] sm:$0xff] %v415_v38  ;;  %v419_v40 = vld [vmem:[%s2191_s28 + $0x280] sm:$0xff]  ;;  %v421_v41 = vld [vmem:[%s2191_s28 + $0x290] sm:$0xff]  ;;  %418 = vst [vmem:[%s2196_s29 + $0x138] sm:$0xff] %v417_v39 }
  0x28   : > { %420 = vst [vmem:[%s2196_s29 + $0x140] sm:$0xff] %v419_v40  ;;  %422 = vst [vmem:[%s2196_s29 + $0x148] sm:$0xff] %v421_v41  ;;  %v423_v42 = vld [vmem:[%s2191_s28 + $0x2a0] sm:$0xff]  ;;  %v425_v43 = vld [vmem:[%s2191_s28 + $0x2b0] sm:$0xff] }
  0x29   : > { %v427_v44 = vld [vmem:[%s2191_s28 + $0x2c0] sm:$0xff]  ;;  %424 = vst [vmem:[%s2196_s29 + $0x150] sm:$0xff] %v423_v42  ;;  %426 = vst [vmem:[%s2196_s29 + $0x158] sm:$0xff] %v425_v43  ;;  %v429_v45 = vld [vmem:[%s2191_s28 + $0x2d0] sm:$0xff] }
  0x2a   : > { %428 = vst [vmem:[%s2196_s29 + $0x160] sm:$0xff] %v427_v44  ;;  %v431_v46 = vld [vmem:[%s2191_s28 + $0x2e0] sm:$0xff]  ;;  %v433_v47 = vld [vmem:[%s2191_s28 + $0x2f0] sm:$0xff]  ;;  %430 = vst [vmem:[%s2196_s29 + $0x168] sm:$0xff] %v429_v45 }
  0x2b   : > { %432 = vst [vmem:[%s2196_s29 + $0x170] sm:$0xff] %v431_v46  ;;  %434 = vst [vmem:[%s2196_s29 + $0x178] sm:$0xff] %v433_v47  ;;  %v435_v48 = vld [vmem:[%s2191_s28 + $0x300] sm:$0xff]  ;;  %v437_v49 = vld [vmem:[%s2191_s28 + $0x310] sm:$0xff] }
  0x2c   : > { %v439_v50 = vld [vmem:[%s2191_s28 + $0x320] sm:$0xff]  ;;  %436 = vst [vmem:[%s2196_s29 + $0x180] sm:$0xff] %v435_v48  ;;  %438 = vst [vmem:[%s2196_s29 + $0x188] sm:$0xff] %v437_v49  ;;  %v441_v51 = vld [vmem:[%s2191_s28 + $0x330] sm:$0xff] }
  0x2d   : > { %440 = vst [vmem:[%s2196_s29 + $0x190] sm:$0xff] %v439_v50  ;;  %v443_v52 = vld [vmem:[%s2191_s28 + $0x340] sm:$0xff]  ;;  %v445_v53 = vld [vmem:[%s2191_s28 + $0x350] sm:$0xff]  ;;  %442 = vst [vmem:[%s2196_s29 + $0x198] sm:$0xff] %v441_v51 }
  0x2e   : > { %444 = vst [vmem:[%s2196_s29 + $0x1a0] sm:$0xff] %v443_v52  ;;  %446 = vst [vmem:[%s2196_s29 + $0x1a8] sm:$0xff] %v445_v53  ;;  %v447_v54 = vld [vmem:[%s2191_s28 + $0x360] sm:$0xff]  ;;  %v449_v55 = vld [vmem:[%s2191_s28 + $0x370] sm:$0xff] }
  0x2f   : > { %v451_v56 = vld [vmem:[%s2191_s28 + $0x380] sm:$0xff]  ;;  %448 = vst [vmem:[%s2196_s29 + $0x1b0] sm:$0xff] %v447_v54  ;;  %450 = vst [vmem:[%s2196_s29 + $0x1b8] sm:$0xff] %v449_v55  ;;  %v453_v57 = vld [vmem:[%s2191_s28 + $0x390] sm:$0xff] }
  0x30   : > { %452 = vst [vmem:[%s2196_s29 + $0x1c0] sm:$0xff] %v451_v56  ;;  %v455_v58 = vld [vmem:[%s2191_s28 + $0x3a0] sm:$0xff]  ;;  %v457_v59 = vld [vmem:[%s2191_s28 + $0x3b0] sm:$0xff]  ;;  %454 = vst [vmem:[%s2196_s29 + $0x1c8] sm:$0xff] %v453_v57 }
  0x31   : > { %456 = vst [vmem:[%s2196_s29 + $0x1d0] sm:$0xff] %v455_v58  ;;  %458 = vst [vmem:[%s2196_s29 + $0x1d8] sm:$0xff] %v457_v59  ;;  %v459_v60 = vld [vmem:[%s2191_s28 + $0x3c0] sm:$0xff]  ;;  %v461_v61 = vld [vmem:[%s2191_s28 + $0x3d0] sm:$0xff] }
  0x32   : > { %v463_v62 = vld [vmem:[%s2191_s28 + $0x3e0] sm:$0xff]  ;;  %460 = vst [vmem:[%s2196_s29 + $0x1e0] sm:$0xff] %v459_v60  ;;  %462 = vst [vmem:[%s2196_s29 + $0x1e8] sm:$0xff] %v461_v61  ;;  %v465_v63 = vld [vmem:[%s2191_s28 + $0x3f0] sm:$0xff] }
  0x33   : > { %464 = vst [vmem:[%s2196_s29 + $0x1f0] sm:$0xff] %v463_v62  ;;  %466 = vst [vmem:[%s2196_s29 + $0x1f8] sm:$0xff] %v465_v63 }
  0x34 PF: > { %p1792_p8 = scmp.ge.s32.totalorder %s2121_s16, 1  ;;  %p479_p9 = scmp.lt.s32.totalorder %s2121_s16, 3 }
  0x36   : > { %p480_p10 = pnand %p1792_p8, %p479_p9 }
  0x37   : > { %s486_s30 = sand.u32 (!%p480_p10), 1, %s2105_s12   ;;  %s1795_s24 = sshll.u32 (!%p480_p10), %s2113_s14, 1 }
  0x38   : > { %483 = sbr.rel (%p480_p10) target bundleno = 396 (0x18c), region = 66  ;;  %s1793_s4 = sshll.u32 (!%p480_p10), %s486_s30, 9 }
  0x39   : > { %s2334_s9 = scalar_lea.vmem (!%p480_p10), [#allocation3], %s1793_s4  ;;  %p537_p11 = scmp.lt.s32.totalorder (!%p480_p10), %s1795_s24, 3 }
  0x3a   : > { %s1794_s28 = sshll.u32 (!%p480_p10), %s486_s30, 8 }
  0x3b   : > { %s2501_s29 = scalar_lea.vmem (!%p480_p10), [#allocation4], %s1794_s28 }
  0x3d   : > { %v2037_v0 = vld [vmem:[%s2653_s0 + $0x4] ss:$16 sps:$4 sm:$0xff]   ;;  %v2040_v1 = vld [vmem:[%s2653_s0 + $0xc] ss:$16 sps:$4 sm:$0xff]   ;;  %v1943_v4 = vld [vmem:[%s2334_s9 + $0x70] ss:$8 sps:$4 sm:$0xff]  }
  0x3e   : > { %v1939_v2 = vld [vmem:[%s2334_s9 + $0x74] ss:$8 sps:$4 sm:$0xff]   ;;  %1219 = vmatprep.mubr.bf16.mxu0 %v2037_v0  ;;  %1332 = vmatprep.mubr.bf16.mxu1 %v2040_v1  ;;  %v1944_v5 = vld [vmem:[%s2334_s9 + $0x170] ss:$8 sps:$4 sm:$0xff]   ;;  %v1945_v6 = vld [vmem:[%s2334_s9 + $0x64] ss:$8 sps:$4 sm:$0xff]  }
  0x3f   : > { %v1941_v3 = vld [vmem:[%s2334_s9 + $0x174] ss:$8 sps:$4 sm:$0xff]   ;;  %1187 = vmatprep.subr.bf16.mxu0 %v1939_v2  ;;  %v1947_v7 = vld [vmem:[%s2334_s9 + $0x164] ss:$8 sps:$4 sm:$0xff]   ;;  %v1949_v8 = vld [vmem:[%s2334_s9 + $0x60] ss:$8 sps:$4 sm:$0xff]  }
  0x40   : > { %1300 = vmatprep.subr.bf16.mxu1 %v1941_v3  ;;  %1188 = vmatpush1.bf16.msra.mxu0 %v1943_v4  ;;  %v1950_v9 = vld [vmem:[%s2334_s9 + $0x160] ss:$8 sps:$4 sm:$0xff]   ;;  %v1951_v10 = vld [vmem:[%s2334_s9 + $0x54] ss:$8 sps:$4 sm:$0xff]   ;;  %v1955_v12 = vld [vmem:[%s2334_s9 + $0x50] ss:$8 sps:$4 sm:$0xff]  }
  0x41   : > { %1301 = vmatpush1.bf16.msra.mxu1 %v1944_v5  ;;  %1189 = vmatprep.subr.bf16.mxu0 %v1945_v6  ;;  %v1953_v11 = vld [vmem:[%s2334_s9 + $0x154] ss:$8 sps:$4 sm:$0xff]   ;;  %v1956_v13 = vld [vmem:[%s2334_s9 + $0x150] ss:$8 sps:$4 sm:$0xff]   ;;  %v1957_v14 = vld [vmem:[%s2334_s9 + $0x44] ss:$8 sps:$4 sm:$0xff]  }
  0x42   : > { %1302 = vmatprep.subr.bf16.mxu1 %v1947_v7  ;;  %v1959_v15 = vld [vmem:[%s2334_s9 + $0x144] ss:$8 sps:$4 sm:$0xff]   ;;  %v1961_v16 = vld [vmem:[%s2334_s9 + $0x40] ss:$8 sps:$4 sm:$0xff]   ;;  %v1963_v18 = vld [vmem:[%s2334_s9 + $0x34] ss:$8 sps:$4 sm:$0xff]  }
  0x43   : > { %v1962_v17 = vld [vmem:[%s2334_s9 + $0x140] ss:$8 sps:$4 sm:$0xff]   ;;  %v1965_v19 = vld [vmem:[%s2334_s9 + $0x134] ss:$8 sps:$4 sm:$0xff]   ;;  %v1967_v20 = vld [vmem:[%s2334_s9 + $0x30] ss:$8 sps:$4 sm:$0xff]  }
  0x44   : > { %1190 = vmatpush1.bf16.msra.mxu0 %v1949_v8  ;;  %v1968_v21 = vld [vmem:[%s2334_s9 + $0x130] ss:$8 sps:$4 sm:$0xff]   ;;  %v1969_v22 = vld [vmem:[%s2334_s9 + $0x24] ss:$8 sps:$4 sm:$0xff]   ;;  %v1973_v24 = vld [vmem:[%s2334_s9 + $0x20] ss:$8 sps:$4 sm:$0xff]  }
  0x45   : > { %1303 = vmatpush1.bf16.msra.mxu1 %v1950_v9  ;;  %1191 = vmatprep.subr.bf16.mxu0 %v1951_v10  ;;  %v1971_v23 = vld [vmem:[%s2334_s9 + $0x124] ss:$8 sps:$4 sm:$0xff]   ;;  %v1974_v25 = vld [vmem:[%s2334_s9 + $0x120] ss:$8 sps:$4 sm:$0xff]   ;;  %v1975_v26 = vld [vmem:[%s2334_s9 + $0x14] ss:$8 sps:$4 sm:$0xff]  }
  0x46   : > { %1304 = vmatprep.subr.bf16.mxu1 %v1953_v11  ;;  %v1977_v27 = vld [vmem:[%s2334_s9 + $0x114] ss:$8 sps:$4 sm:$0xff]   ;;  %v1979_v28 = vld [vmem:[%s2334_s9 + $0x10] ss:$8 sps:$4 sm:$0xff]   ;;  %v1981_v30 = vld [vmem:[%s2334_s9 + $0x4] ss:$8 sps:$4 sm:$0xff]  }
  0x47   : > { %v1980_v29 = vld [vmem:[%s2334_s9 + $0x110] ss:$8 sps:$4 sm:$0xff]   ;;  %v1983_v31 = vld [vmem:[%s2334_s9 + $0x104] ss:$8 sps:$4 sm:$0xff]   ;;  %v1985_v32 = vld [vmem:[%s2334_s9] ss:$8 sps:$4 sm:$0xff]  }
  0x48   : > { %1192 = vmatpush1.bf16.msra.mxu0 %v1955_v12  ;;  %v1986_v33 = vld [vmem:[%s2334_s9 + $0x100] ss:$8 sps:$4 sm:$0xff]   ;;  %v1987_v34 = vld [vmem:[%s2334_s9 + $0xf4] ss:$8 sps:$4 sm:$0xff]   ;;  %v1991_v36 = vld [vmem:[%s2334_s9 + $0xf0] ss:$8 sps:$4 sm:$0xff]  }
  0x49   : > { %1305 = vmatpush1.bf16.msra.mxu1 %v1956_v13  ;;  %1193 = vmatprep.subr.bf16.mxu0 %v1957_v14  ;;  %v1989_v35 = vld [vmem:[%s2334_s9 + $0x1f4] ss:$8 sps:$4 sm:$0xff]   ;;  %v1992_v37 = vld [vmem:[%s2334_s9 + $0x1f0] ss:$8 sps:$4 sm:$0xff]   ;;  %v1993_v38 = vld [vmem:[%s2334_s9 + $0xe4] ss:$8 sps:$4 sm:$0xff]  }
  0x4a   : > { %1306 = vmatprep.subr.bf16.mxu1 %v1959_v15  ;;  %v1995_v39 = vld [vmem:[%s2334_s9 + $0x1e4] ss:$8 sps:$4 sm:$0xff]   ;;  %v1997_v40 = vld [vmem:[%s2334_s9 + $0xe0] ss:$8 sps:$4 sm:$0xff]   ;;  %v1999_v42 = vld [vmem:[%s2334_s9 + $0xd4] ss:$8 sps:$4 sm:$0xff]  }
  0x4b   : > { %v1998_v41 = vld [vmem:[%s2334_s9 + $0x1e0] ss:$8 sps:$4 sm:$0xff]   ;;  %v2001_v43 = vld [vmem:[%s2334_s9 + $0x1d4] ss:$8 sps:$4 sm:$0xff]   ;;  %v2003_v44 = vld [vmem:[%s2334_s9 + $0xd0] ss:$8 sps:$4 sm:$0xff]  }
  0x4c   : > { %1194 = vmatpush1.bf16.msra.mxu0 %v1961_v16  ;;  %v2004_v45 = vld [vmem:[%s2334_s9 + $0x1d0] ss:$8 sps:$4 sm:$0xff]   ;;  %v2005_v46 = vld [vmem:[%s2334_s9 + $0xc4] ss:$8 sps:$4 sm:$0xff]   ;;  %v2009_v48 = vld [vmem:[%s2334_s9 + $0xc0] ss:$8 sps:$4 sm:$0xff]  }
  0x4d   : > { %1307 = vmatpush1.bf16.msra.mxu1 %v1962_v17  ;;  %1195 = vmatprep.subr.bf16.mxu0 %v1963_v18  ;;  %v2007_v47 = vld [vmem:[%s2334_s9 + $0x1c4] ss:$8 sps:$4 sm:$0xff]   ;;  %v2010_v49 = vld [vmem:[%s2334_s9 + $0x1c0] ss:$8 sps:$4 sm:$0xff]   ;;  %v2011_v50 = vld [vmem:[%s2334_s9 + $0xb4] ss:$8 sps:$4 sm:$0xff]  }
  0x4e   : > { %1308 = vmatprep.subr.bf16.mxu1 %v1965_v19  ;;  %v2013_v51 = vld [vmem:[%s2334_s9 + $0x1b4] ss:$8 sps:$4 sm:$0xff]   ;;  %v2015_v52 = vld [vmem:[%s2334_s9 + $0xb0] ss:$8 sps:$4 sm:$0xff]   ;;  %v2017_v54 = vld [vmem:[%s2334_s9 + $0xa4] ss:$8 sps:$4 sm:$0xff]  }
  0x4f   : > { %v2016_v53 = vld [vmem:[%s2334_s9 + $0x1b0] ss:$8 sps:$4 sm:$0xff]   ;;  %v2019_v55 = vld [vmem:[%s2334_s9 + $0x1a4] ss:$8 sps:$4 sm:$0xff]   ;;  %v2021_v56 = vld [vmem:[%s2334_s9 + $0xa0] ss:$8 sps:$4 sm:$0xff]  }
  0x50   : > { %1196 = vmatpush1.bf16.msra.mxu0 %v1967_v20  ;;  %v2022_v57 = vld [vmem:[%s2334_s9 + $0x1a0] ss:$8 sps:$4 sm:$0xff]   ;;  %v2023_v58 = vld [vmem:[%s2334_s9 + $0x94] ss:$8 sps:$4 sm:$0xff]   ;;  %v2027_v60 = vld [vmem:[%s2334_s9 + $0x90] ss:$8 sps:$4 sm:$0xff]  }
  0x51   : > { %1309 = vmatpush1.bf16.msra.mxu1 %v1968_v21  ;;  %1197 = vmatprep.subr.bf16.mxu0 %v1969_v22  ;;  %v2025_v59 = vld [vmem:[%s2334_s9 + $0x194] ss:$8 sps:$4 sm:$0xff]   ;;  %v2028_v61 = vld [vmem:[%s2334_s9 + $0x190] ss:$8 sps:$4 sm:$0xff]   ;;  %v2029_v62 = vld [vmem:[%s2334_s9 + $0x84] ss:$8 sps:$4 sm:$0xff]  }
  0x52   : > { %1310 = vmatprep.subr.bf16.mxu1 %v1971_v23  ;;  %v2031_v63 = vld [vmem:[%s2334_s9 + $0x184] ss:$8 sps:$4 sm:$0xff]   ;;  %v2033_v0 = vld [vmem:[%s2334_s9 + $0x80] ss:$8 sps:$4 sm:$0xff]   ;;  %s2665_s24 = smov (!%p537_p11, %s1795_s24), 3  ;;  %s1898_s12 = sshll.u32 (%p2178_p6), %s2113_s14, 4 }
  0x53   : > { %v2034_v1 = vld [vmem:[%s2334_s9 + $0x180] ss:$8 sps:$4 sm:$0xff]   ;;  %v2041_v4 = vld [vmem:[%s2653_s0 + $0x24] ss:$16 sps:$4 sm:$0xff]   ;;  %v2043_v5 = vld [vmem:[%s2653_s0 + $0x2c] ss:$16 sps:$4 sm:$0xff]   ;;  %s539_s27 = scalar_lea.vmem %s2655_s2, %s2665_s24  ;;  %s2575_s5 = scalar_lea.vmem (%p2178_p6), %s2656_s3, %s1898_s12 }
  0x54   : > { %1198 = vmatpush1.bf16.msra.mxu0 %v1973_v24  ;;  %v2035_v2 = vld [vmem:[%s2653_s0] ss:$16 sps:$4 sm:$0xff]   ;;  %v2038_v3 = vld [vmem:[%s2653_s0 + $0x8] ss:$16 sps:$4 sm:$0xff]   ;;  %v2047_v8 = vld [vmem:[%s2653_s0 + $0x44] ss:$16 sps:$4 sm:$0xff]  }
  0x55   : > { %1311 = vmatpush1.bf16.msra.mxu1 %v1974_v25  ;;  %1199 = vmatprep.subr.bf16.mxu0 %v1975_v26  ;;  %v2045_v6 = vld [vmem:[%s2653_s0 + $0x20] ss:$16 sps:$4 sm:$0xff]   ;;  %v2046_v7 = vld [vmem:[%s2653_s0 + $0x28] ss:$16 sps:$4 sm:$0xff]   ;;  %v2049_v9 = vld [vmem:[%s2653_s0 + $0x4c] ss:$16 sps:$4 sm:$0xff]  }
  0x56   : > { %1312 = vmatprep.subr.bf16.mxu1 %v1977_v27  ;;  %v2051_v10 = vld [vmem:[%s2653_s0 + $0x40] ss:$16 sps:$4 sm:$0xff]   ;;  %v2052_v11 = vld [vmem:[%s2653_s0 + $0x48] ss:$16 sps:$4 sm:$0xff]   ;;  %v2053_v12 = vld [vmem:[%s2653_s0 + $0x64] ss:$16 sps:$4 sm:$0xff]  }
  0x57   : > { %v2055_v13 = vld [vmem:[%s2653_s0 + $0x6c] ss:$16 sps:$4 sm:$0xff]   ;;  %v2057_v14 = vld [vmem:[%s2653_s0 + $0x60] ss:$16 sps:$4 sm:$0xff]   ;;  %v2058_v15 = vld [vmem:[%s2653_s0 + $0x68] ss:$16 sps:$4 sm:$0xff]  }
  0x58   : > { %1200 = vmatpush1.bf16.msra.mxu0 %v1979_v28  ;;  %v2059_v16 = vld [vmem:[%s2653_s0 + $0x84] ss:$16 sps:$4 sm:$0xff]   ;;  %v2061_v17 = vld [vmem:[%s2653_s0 + $0x8c] ss:$16 sps:$4 sm:$0xff]   ;;  %v2063_v18 = vld [vmem:[%s2653_s0 + $0x80] ss:$16 sps:$4 sm:$0xff]  }
  0x59   : > { %1313 = vmatpush1.bf16.msra.mxu1 %v1980_v29  ;;  %1201 = vmatprep.subr.bf16.mxu0 %v1981_v30  ;;  %v2064_v19 = vld [vmem:[%s2653_s0 + $0x88] ss:$16 sps:$4 sm:$0xff]   ;;  %v2065_v20 = vld [vmem:[%s2653_s0 + $0xa4] ss:$16 sps:$4 sm:$0xff]   ;;  %v2067_v21 = vld [vmem:[%s2653_s0 + $0xac] ss:$16 sps:$4 sm:$0xff]  }
  0x5a   : > { %1314 = vmatprep.subr.bf16.mxu1 %v1983_v31  ;;  %v2069_v22 = vld [vmem:[%s2653_s0 + $0xa0] ss:$16 sps:$4 sm:$0xff]   ;;  %v2070_v23 = vld [vmem:[%s2653_s0 + $0xa8] ss:$16 sps:$4 sm:$0xff]   ;;  %v2071_v24 = vld [vmem:[%s2653_s0 + $0xc4] ss:$16 sps:$4 sm:$0xff]  }
  0x5b   : > { %v2073_v25 = vld [vmem:[%s2653_s0 + $0xcc] ss:$16 sps:$4 sm:$0xff]   ;;  %v2075_v26 = vld [vmem:[%s2653_s0 + $0xc0] ss:$16 sps:$4 sm:$0xff]   ;;  %v2076_v27 = vld [vmem:[%s2653_s0 + $0xc8] ss:$16 sps:$4 sm:$0xff]  }
  0x5c   : > { %1202 = vmatpush1.bf16.msra.mxu0 %v1985_v32  ;;  %v2077_v28 = vld [vmem:[%s2653_s0 + $0xe4] ss:$16 sps:$4 sm:$0xff]   ;;  %v2079_v29 = vld [vmem:[%s2653_s0 + $0xec] ss:$16 sps:$4 sm:$0xff]   ;;  %v2081_v30 = vld [vmem:[%s2653_s0 + $0xe0] ss:$16 sps:$4 sm:$0xff]   ;;  %v1514_v32 = vlaneseq }
  0x5d   : > { %1315 = vmatpush1.bf16.msra.mxu1 %v1986_v33  ;;  %1203 = vmatprep.subr.bf16.mxu0 %v1987_v34  ;;  %v2082_v31 = vld [vmem:[%s2653_s0 + $0xe8] ss:$16 sps:$4 sm:$0xff]  }
  0x5e   : > { %1316 = vmatprep.subr.bf16.mxu1 %v1989_v35  ;;  %v1515_v33 = vshrl.u32 %v1514_v32, 7  ;;  %v1512_v35 = vld [vmem:[%s539_s27] sm:$0x3] }
  0x60   : > { %1204 = vmatpush2.bf16.msra.mxu0 %v1991_v36  ;;  %v1516_v34 = vsub.s32 0, %v1515_v33  ;;  %v1520_v36 = vsub.s32 1, %v1515_v33 }
  0x61   : > { %1317 = vmatpush2.bf16.msra.mxu1 %v1992_v37  ;;  %1205 = vmatprep.subr.bf16.mxu0 %v1993_v38 }
  0x62   : > { %1318 = vmatprep.subr.bf16.mxu1 %v1995_v39  ;;  %v2496_v37 = vrot.slane %v1512_v35, %v1516_v34 }
  0x64   : > { %1206 = vmatpush2.bf16.msra.mxu0 %v1997_v40 }
  0x65   : > { %1319 = vmatpush2.bf16.msra.mxu1 %v1998_v41  ;;  %1207 = vmatprep.subr.bf16.mxu0 %v1999_v42  ;;  %v2498_v41 = vrot.slane %v1512_v35, %v1520_v36 }
  0x66   : > { %1320 = vmatprep.subr.bf16.mxu1 %v2001_v43 }
  0x68   : > { %1208 = vmatpush2.bf16.msra.mxu0 %v2003_v44 }
  0x69   : > { %1321 = vmatpush2.bf16.msra.mxu1 %v2004_v45  ;;  %1209 = vmatprep.subr.bf16.mxu0 %v2005_v46 }
  0x6a   : > { %1322 = vmatprep.subr.bf16.mxu1 %v2007_v47 }
  0x6c   : > { %1210 = vmatpush2.bf16.msra.mxu0 %v2009_v48 }
  0x6d   : > { %1323 = vmatpush2.bf16.msra.mxu1 %v2010_v49  ;;  %1211 = vmatprep.subr.bf16.mxu0 %v2011_v50 }
  0x6e   : > { %1324 = vmatprep.subr.bf16.mxu1 %v2013_v51 }
  0x70   : > { %1212 = vmatpush2.bf16.msra.mxu0 %v2015_v52 }
  0x71   : > { %1325 = vmatpush2.bf16.msra.mxu1 %v2016_v53  ;;  %1213 = vmatprep.subr.bf16.mxu0 %v2017_v54 }
  0x72   : > { %1326 = vmatprep.subr.bf16.mxu1 %v2019_v55 }
  0x74   : > { %1214 = vmatpush2.bf16.msra.mxu0 %v2021_v56 }
  0x75   : > { %1327 = vmatpush2.bf16.msra.mxu1 %v2022_v57  ;;  %1215 = vmatprep.subr.bf16.mxu0 %v2023_v58 }
  0x76   : > { %1328 = vmatprep.subr.bf16.mxu1 %v2025_v59 }
  0x78   : > { %1216 = vmatpush2.bf16.msra.mxu0 %v2027_v60 }
  0x79   : > { %1329 = vmatpush2.bf16.msra.mxu1 %v2028_v61  ;;  %1217 = vmatprep.subr.bf16.mxu0 %v2029_v62 }
  0x7a   : > { %1330 = vmatprep.subr.bf16.mxu1 %v2031_v63 }
  0x7c   : > { %1218 = vmatpush2.bf16.msra.mxu0 %v2033_v0 }
  0x7d   : > { %1331 = vmatpush2.bf16.msra.mxu1 %v2034_v1 }
  0x7f   : > { %1220 = vmatmul.mubr.bf16.vlgmr.msra.gmra.mxu0 %v2035_v2 }
  0x80   : > { %1333 = vmatmul.mubr.bf16.vlgmr.msra.gmra.mxu1 %v2038_v3  ;;  %1229 = vmatprep.mubr.bf16.mxu0 %v2041_v4 }
  0x81   : > { %1342 = vmatprep.mubr.bf16.mxu1 %v2043_v5 }
  0x87   : > { %1230 = vmatmul.mubr.bf16.gmra.mxu0 %v2045_v6 }
  0x88   : > { %1343 = vmatmul.mubr.bf16.gmra.mxu1 %v2046_v7  ;;  %1239 = vmatprep.mubr.bf16.mxu0 %v2047_v8 }
  0x89   : > { %1352 = vmatprep.mubr.bf16.mxu1 %v2049_v9 }
  0x8f   : > { %1240 = vmatmul.mubr.bf16.gmra.mxu0 %v2051_v10 }
  0x90   : > { %1353 = vmatmul.mubr.bf16.gmra.mxu1 %v2052_v11  ;;  %1249 = vmatprep.mubr.bf16.mxu0 %v2053_v12 }
  0x91   : > { %1362 = vmatprep.mubr.bf16.mxu1 %v2055_v13 }
  0x97   : > { %1250 = vmatmul.mubr.bf16.gmra.mxu0 %v2057_v14 }
  0x98   : > { %1363 = vmatmul.mubr.bf16.gmra.mxu1 %v2058_v15  ;;  %1259 = vmatprep.mubr.bf16.mxu0 %v2059_v16 }
  0x99   : > { %1372 = vmatprep.mubr.bf16.mxu1 %v2061_v17 }
  0x9f   : > { %1260 = vmatmul.mubr.bf16.gmra.mxu0 %v2063_v18 }
  0xa0   : > { %1373 = vmatmul.mubr.bf16.gmra.mxu1 %v2064_v19  ;;  %1269 = vmatprep.mubr.bf16.mxu0 %v2065_v20 }
  0xa1   : > { %1382 = vmatprep.mubr.bf16.mxu1 %v2067_v21 }
  0xa7   : > { %1270 = vmatmul.mubr.bf16.gmra.mxu0 %v2069_v22 }
  0xa8   : > { %1383 = vmatmul.mubr.bf16.gmra.mxu1 %v2070_v23  ;;  %1279 = vmatprep.mubr.bf16.mxu0 %v2071_v24 }
  0xa9   : > { %1392 = vmatprep.mubr.bf16.mxu1 %v2073_v25 }
  0xaf   : > { %1280 = vmatmul.mubr.bf16.gmra.mxu0 %v2075_v26 }
  0xb0   : > { %1393 = vmatmul.mubr.bf16.gmra.mxu1 %v2076_v27  ;;  %1289 = vmatprep.mubr.bf16.mxu0 %v2077_v28 }
  0xb1   : > { %1402 = vmatprep.mubr.bf16.mxu1 %v2079_v29 }
  0xb7   : > { %1290 = vmatmul.mubr.bf16.gmra.mxu0 %v2081_v30 }
  0xb8   : > { %1403 = vmatmul.mubr.bf16.gmra.mxu1 %v2082_v31 }
 0x13f   : > { %v1221_v38 = vpop.f32.mrf.mxu0 }
 0x140   : > { %v1334_v39 = vpop.f32.mrf.mxu1 }
 0x141   : > { %v1335_v40 = vadd.f32 %v1334_v39, %v1221_v38  ;;  %v1223_v42 = vpop.f32.mrf.mxu0 }
 0x142   : > { %v1336_v43 = vpop.f32.mrf.mxu1 }
 0x143   : > { %v1524_v44 = vadd.f32 %v2496_v37, %v1335_v40  ;;  %v1337_v45 = vadd.f32 %v1336_v43, %v1223_v42  ;;  %v1225_v46 = vpop.f32.mrf.mxu0 }
 0x144   : > { %v1338_v47 = vpop.f32.mrf.mxu1 }
 0x145   : > { %1556 = vst [vmem:[%s2501_s29] sm:$0xff] %v1524_v44  ;;  %v1525_v48 = vadd.f32 %v2498_v41, %v1337_v45  ;;  %v1339_v49 = vadd.f32 %v1338_v47, %v1225_v46  ;;  %v1227_v50 = vpop.f32.mrf.mxu0 }
 0x146   : > { %v1340_v51 = vpop.f32.mrf.mxu1 }
 0x147   : > { %1557 = vst [vmem:[%s2501_s29 + $0x8] sm:$0xff] %v1525_v48  ;;  %v1526_v52 = vadd.f32 %v2496_v37, %v1339_v49  ;;  %v1341_v53 = vadd.f32 %v1340_v51, %v1227_v50  ;;  %v1231_v54 = vpop.f32.mrf.mxu0 }
 0x148   : > { %v1344_v55 = vpop.f32.mrf.mxu1 }
 0x149   : > { %1558 = vst [vmem:[%s2501_s29 + $0x10] sm:$0xff] %v1526_v52  ;;  %v1527_v56 = vadd.f32 %v2498_v41, %v1341_v53  ;;  %v1345_v57 = vadd.f32 %v1344_v55, %v1231_v54  ;;  %v1233_v58 = vpop.f32.mrf.mxu0 }
 0x14a   : > { %v1346_v59 = vpop.f32.mrf.mxu1 }
 0x14b   : > { %1559 = vst [vmem:[%s2501_s29 + $0x18] sm:$0xff] %v1527_v56  ;;  %v1528_v60 = vadd.f32 %v2496_v37, %v1345_v57  ;;  %v1347_v61 = vadd.f32 %v1346_v59, %v1233_v58  ;;  %v1235_v62 = vpop.f32.mrf.mxu0 }
 0x14c   : > { %v1348_v63 = vpop.f32.mrf.mxu1 }
 0x14d   : > { %1560 = vst [vmem:[%s2501_s29 + $0x20] sm:$0xff] %v1528_v60  ;;  %v1529_v0 = vadd.f32 %v2498_v41, %v1347_v61  ;;  %v1349_v1 = vadd.f32 %v1348_v63, %v1235_v62  ;;  %v1237_v2 = vpop.f32.mrf.mxu0 }
 0x14e   : > { %v1350_v3 = vpop.f32.mrf.mxu1 }
 0x14f   : > { %1561 = vst [vmem:[%s2501_s29 + $0x28] sm:$0xff] %v1529_v0  ;;  %v1530_v4 = vadd.f32 %v2496_v37, %v1349_v1  ;;  %v1351_v5 = vadd.f32 %v1350_v3, %v1237_v2  ;;  %v1241_v6 = vpop.f32.mrf.mxu0 }
 0x150   : > { %v1354_v7 = vpop.f32.mrf.mxu1 }
 0x151   : > { %1562 = vst [vmem:[%s2501_s29 + $0x30] sm:$0xff] %v1530_v4  ;;  %v1531_v8 = vadd.f32 %v2498_v41, %v1351_v5  ;;  %v1355_v9 = vadd.f32 %v1354_v7, %v1241_v6  ;;  %v1243_v10 = vpop.f32.mrf.mxu0 }
 0x152   : > { %v1356_v11 = vpop.f32.mrf.mxu1 }
 0x153   : > { %1563 = vst [vmem:[%s2501_s29 + $0x38] sm:$0xff] %v1531_v8  ;;  %v1532_v12 = vadd.f32 %v2496_v37, %v1355_v9  ;;  %v1357_v13 = vadd.f32 %v1356_v11, %v1243_v10  ;;  %v1245_v14 = vpop.f32.mrf.mxu0 }
 0x154   : > { %v1358_v15 = vpop.f32.mrf.mxu1 }
 0x155   : > { %1564 = vst [vmem:[%s2501_s29 + $0x40] sm:$0xff] %v1532_v12  ;;  %v1533_v16 = vadd.f32 %v2498_v41, %v1357_v13  ;;  %v1359_v17 = vadd.f32 %v1358_v15, %v1245_v14  ;;  %v1247_v18 = vpop.f32.mrf.mxu0 }
 0x156   : > { %v1360_v19 = vpop.f32.mrf.mxu1 }
 0x157   : > { %1565 = vst [vmem:[%s2501_s29 + $0x48] sm:$0xff] %v1533_v16  ;;  %v1534_v20 = vadd.f32 %v2496_v37, %v1359_v17  ;;  %v1361_v21 = vadd.f32 %v1360_v19, %v1247_v18  ;;  %v1251_v22 = vpop.f32.mrf.mxu0 }
 0x158   : > { %v1364_v23 = vpop.f32.mrf.mxu1 }
 0x159   : > { %1566 = vst [vmem:[%s2501_s29 + $0x50] sm:$0xff] %v1534_v20  ;;  %v1535_v24 = vadd.f32 %v2498_v41, %v1361_v21  ;;  %v1365_v25 = vadd.f32 %v1364_v23, %v1251_v22  ;;  %v1253_v26 = vpop.f32.mrf.mxu0 }
 0x15a   : > { %v1366_v27 = vpop.f32.mrf.mxu1 }
 0x15b   : > { %1567 = vst [vmem:[%s2501_s29 + $0x58] sm:$0xff] %v1535_v24  ;;  %v1536_v28 = vadd.f32 %v2496_v37, %v1365_v25  ;;  %v1367_v29 = vadd.f32 %v1366_v27, %v1253_v26  ;;  %v1255_v30 = vpop.f32.mrf.mxu0 }
 0x15c   : > { %v1368_v31 = vpop.f32.mrf.mxu1 }
 0x15d   : > { %1568 = vst [vmem:[%s2501_s29 + $0x60] sm:$0xff] %v1536_v28  ;;  %v1537_v32 = vadd.f32 %v2498_v41, %v1367_v29  ;;  %v1369_v33 = vadd.f32 %v1368_v31, %v1255_v30  ;;  %v1257_v34 = vpop.f32.mrf.mxu0 }
 0x15e   : > { %v1370_v35 = vpop.f32.mrf.mxu1 }
 0x15f   : > { %1569 = vst [vmem:[%s2501_s29 + $0x68] sm:$0xff] %v1537_v32  ;;  %v1538_v36 = vadd.f32 %v2496_v37, %v1369_v33  ;;  %v1371_v38 = vadd.f32 %v1370_v35, %v1257_v34  ;;  %v1261_v39 = vpop.f32.mrf.mxu0 }
 0x160   : > { %v1374_v40 = vpop.f32.mrf.mxu1 }
 0x161   : > { %1570 = vst [vmem:[%s2501_s29 + $0x70] sm:$0xff] %v1538_v36  ;;  %v1539_v42 = vadd.f32 %v2498_v41, %v1371_v38  ;;  %v1375_v43 = vadd.f32 %v1374_v40, %v1261_v39  ;;  %v1263_v44 = vpop.f32.mrf.mxu0 }
 0x162   : > { %v1376_v45 = vpop.f32.mrf.mxu1 }
 0x163   : > { %1571 = vst [vmem:[%s2501_s29 + $0x78] sm:$0xff] %v1539_v42  ;;  %v1540_v46 = vadd.f32 %v2496_v37, %v1375_v43  ;;  %v1377_v47 = vadd.f32 %v1376_v45, %v1263_v44  ;;  %v1265_v48 = vpop.f32.mrf.mxu0  ;;  %v1615_v43 = vld [vmem:[%s2501_s29 + $0x8] sm:$0xff] (%p2178_p6)  ;;  %v1617_v44 = vld [vmem:[%s2501_s29 + $0x10] sm:$0xff] (%p2178_p6)  ;;  %v1621_v45 = vld [vmem:[%s2501_s29 + $0x20] sm:$0xff] (%p2178_p6) }
 0x164   : > { %v1378_v49 = vpop.f32.mrf.mxu1  ;;  %1616 = vst [vmem:[%s2575_s5 + $0x8] sm:$0xff] (%p2178_p6), %v1615_v43  ;;  %1618 = vst [vmem:[%s2575_s5 + $0x20] sm:$0xff] (%p2178_p6), %v1617_v44 }
 0x165   : > { %1572 = vst [vmem:[%s2501_s29 + $0x80] sm:$0xff] %v1540_v46  ;;  %v1541_v50 = vadd.f32 %v2498_v41, %v1377_v47  ;;  %v1379_v51 = vadd.f32 %v1378_v49, %v1265_v48  ;;  %v1267_v52 = vpop.f32.mrf.mxu0  ;;  %v1623_v46 = vld [vmem:[%s2501_s29 + $0x28] sm:$0xff] (%p2178_p6)  ;;  %1622 = vst [vmem:[%s2575_s5 + $0x40] sm:$0xff] (%p2178_p6), %v1621_v45  ;;  %v1625_v47 = vld [vmem:[%s2501_s29 + $0x30] sm:$0xff] (%p2178_p6) }
 0x166   : > { %v1380_v53 = vpop.f32.mrf.mxu1  ;;  %1624 = vst [vmem:[%s2575_s5 + $0x48] sm:$0xff] (%p2178_p6), %v1623_v46  ;;  %v1627_v48 = vld [vmem:[%s2501_s29 + $0x38] sm:$0xff] (%p2178_p6)  ;;  %v1629_v49 = vld [vmem:[%s2501_s29 + $0x40] sm:$0xff] (%p2178_p6)  ;;  %1626 = vst [vmem:[%s2575_s5 + $0x60] sm:$0xff] (%p2178_p6), %v1625_v47 }
 0x167   : > { %1573 = vst [vmem:[%s2501_s29 + $0x88] sm:$0xff] %v1541_v50  ;;  %v1542_v54 = vadd.f32 %v2496_v37, %v1379_v51  ;;  %v1381_v55 = vadd.f32 %v1380_v53, %v1267_v52  ;;  %v1271_v56 = vpop.f32.mrf.mxu0  ;;  %1628 = vst [vmem:[%s2575_s5 + $0x68] sm:$0xff] (%p2178_p6), %v1627_v48  ;;  %v1631_v50 = vld [vmem:[%s2501_s29 + $0x48] sm:$0xff] (%p2178_p6)  ;;  %v1633_v51 = vld [vmem:[%s2501_s29 + $0x50] sm:$0xff] (%p2178_p6) }
 0x168   : > { %v1384_v57 = vpop.f32.mrf.mxu1  ;;  %1630 = vst [vmem:[%s2575_s5 + $0x80] sm:$0xff] (%p2178_p6), %v1629_v49  ;;  %v1635_v52 = vld [vmem:[%s2501_s29 + $0x58] sm:$0xff] (%p2178_p6)  ;;  %1632 = vst [vmem:[%s2575_s5 + $0x88] sm:$0xff] (%p2178_p6), %v1631_v50  ;;  %v1637_v53 = vld [vmem:[%s2501_s29 + $0x60] sm:$0xff] (%p2178_p6) }
 0x169   : > { %1574 = vst [vmem:[%s2501_s29 + $0x90] sm:$0xff] %v1542_v54  ;;  %v1543_v58 = vadd.f32 %v2498_v41, %v1381_v55  ;;  %v1385_v59 = vadd.f32 %v1384_v57, %v1271_v56  ;;  %v1273_v60 = vpop.f32.mrf.mxu0  ;;  %1634 = vst [vmem:[%s2575_s5 + $0xa0] sm:$0xff] (%p2178_p6), %v1633_v51  ;;  %v1639_v54 = vld [vmem:[%s2501_s29 + $0x68] sm:$0xff] (%p2178_p6)  ;;  %v1641_v55 = vld [vmem:[%s2501_s29 + $0x70] sm:$0xff] (%p2178_p6) }
 0x16a   : > { %v1386_v61 = vpop.f32.mrf.mxu1  ;;  %1636 = vst [vmem:[%s2575_s5 + $0xa8] sm:$0xff] (%p2178_p6), %v1635_v52  ;;  %1638 = vst [vmem:[%s2575_s5 + $0xc0] sm:$0xff] (%p2178_p6), %v1637_v53  ;;  %v1643_v56 = vld [vmem:[%s2501_s29 + $0x78] sm:$0xff] (%p2178_p6) }
 0x16b   : > { %1575 = vst [vmem:[%s2501_s29 + $0x98] sm:$0xff] %v1543_v58  ;;  %v1544_v62 = vadd.f32 %v2496_v37, %v1385_v59  ;;  %v1387_v63 = vadd.f32 %v1386_v61, %v1273_v60  ;;  %v1275_v0 = vpop.f32.mrf.mxu0  ;;  %1640 = vst [vmem:[%s2575_s5 + $0xc8] sm:$0xff] (%p2178_p6), %v1639_v54 }
 0x16c   : > { %v1388_v1 = vpop.f32.mrf.mxu1  ;;  %1642 = vst [vmem:[%s2575_s5 + $0xe0] sm:$0xff] (%p2178_p6), %v1641_v55  ;;  %v1645_v57 = vld [vmem:[%s2501_s29 + $0x80] sm:$0xff] (%p2178_p6)  ;;  %1644 = vst [vmem:[%s2575_s5 + $0xe8] sm:$0xff] (%p2178_p6), %v1643_v56 }
 0x16d   : > { %1576 = vst [vmem:[%s2501_s29 + $0xa0] sm:$0xff] %v1544_v62  ;;  %v1545_v2 = vadd.f32 %v2498_v41, %v1387_v63  ;;  %v1389_v3 = vadd.f32 %v1388_v1, %v1275_v0  ;;  %v1277_v4 = vpop.f32.mrf.mxu0  ;;  %1646 = vst [vmem:[%s2575_s5 + $0x100] sm:$0xff] (%p2178_p6), %v1645_v57 }
 0x16e   : > { %v1390_v5 = vpop.f32.mrf.mxu1  ;;  %v1647_v58 = vld [vmem:[%s2501_s29 + $0x88] sm:$0xff] (%p2178_p6) }
 0x16f   : > { %1577 = vst [vmem:[%s2501_s29 + $0xa8] sm:$0xff] %v1545_v2  ;;  %v1546_v6 = vadd.f32 %v2496_v37, %v1389_v3  ;;  %v1391_v7 = vadd.f32 %v1390_v5, %v1277_v4  ;;  %v1281_v8 = vpop.f32.mrf.mxu0  ;;  %1648 = vst [vmem:[%s2575_s5 + $0x108] sm:$0xff] (%p2178_p6), %v1647_v58 }
 0x170   : > { %v1394_v9 = vpop.f32.mrf.mxu1  ;;  %v1649_v59 = vld [vmem:[%s2501_s29 + $0x90] sm:$0xff] (%p2178_p6) }
 0x171   : > { %1578 = vst [vmem:[%s2501_s29 + $0xb0] sm:$0xff] %v1546_v6  ;;  %v1547_v10 = vadd.f32 %v2498_v41, %v1391_v7  ;;  %v1395_v11 = vadd.f32 %v1394_v9, %v1281_v8  ;;  %v1283_v12 = vpop.f32.mrf.mxu0  ;;  %1650 = vst [vmem:[%s2575_s5 + $0x120] sm:$0xff] (%p2178_p6), %v1649_v59 }
 0x172   : > { %v1396_v13 = vpop.f32.mrf.mxu1  ;;  %v1651_v60 = vld [vmem:[%s2501_s29 + $0x98] sm:$0xff] (%p2178_p6) }
 0x173   : > { %1579 = vst [vmem:[%s2501_s29 + $0xb8] sm:$0xff] %v1547_v10  ;;  %v1548_v14 = vadd.f32 %v2496_v37, %v1395_v11  ;;  %v1397_v15 = vadd.f32 %v1396_v13, %v1283_v12  ;;  %v1285_v16 = vpop.f32.mrf.mxu0  ;;  %1652 = vst [vmem:[%s2575_s5 + $0x128] sm:$0xff] (%p2178_p6), %v1651_v60 }
 0x174   : > { %v1398_v17 = vpop.f32.mrf.mxu1  ;;  %v1653_v61 = vld [vmem:[%s2501_s29 + $0xa0] sm:$0xff] (%p2178_p6) }
 0x175   : > { %1580 = vst [vmem:[%s2501_s29 + $0xc0] sm:$0xff] %v1548_v14  ;;  %v1549_v18 = vadd.f32 %v2498_v41, %v1397_v15  ;;  %v1399_v19 = vadd.f32 %v1398_v17, %v1285_v16  ;;  %v1287_v20 = vpop.f32.mrf.mxu0  ;;  %1654 = vst [vmem:[%s2575_s5 + $0x140] sm:$0xff] (%p2178_p6), %v1653_v61 }
 0x176   : > { %v1400_v21 = vpop.f32.mrf.mxu1  ;;  %v1655_v62 = vld [vmem:[%s2501_s29 + $0xa8] sm:$0xff] (%p2178_p6) }
 0x177   : > { %1581 = vst [vmem:[%s2501_s29 + $0xc8] sm:$0xff] %v1549_v18  ;;  %v1550_v22 = vadd.f32 %v2496_v37, %v1399_v19  ;;  %v1401_v23 = vadd.f32 %v1400_v21, %v1287_v20  ;;  %v1291_v24 = vpop.f32.mrf.mxu0  ;;  %1656 = vst [vmem:[%s2575_s5 + $0x148] sm:$0xff] (%p2178_p6), %v1655_v62 }
 0x178   : > { %v1404_v25 = vpop.f32.mrf.mxu1  ;;  %v1657_v63 = vld [vmem:[%s2501_s29 + $0xb0] sm:$0xff] (%p2178_p6) }
 0x179   : > { %1582 = vst [vmem:[%s2501_s29 + $0xd0] sm:$0xff] %v1550_v22  ;;  %v1551_v26 = vadd.f32 %v2498_v41, %v1401_v23  ;;  %v1405_v27 = vadd.f32 %v1404_v25, %v1291_v24  ;;  %v1293_v28 = vpop.f32.mrf.mxu0  ;;  %1658 = vst [vmem:[%s2575_s5 + $0x160] sm:$0xff] (%p2178_p6), %v1657_v63 }
 0x17a   : > { %v1406_v29 = vpop.f32.mrf.mxu1  ;;  %v1659_v0 = vld [vmem:[%s2501_s29 + $0xb8] sm:$0xff] (%p2178_p6) }
 0x17b   : > { %1583 = vst [vmem:[%s2501_s29 + $0xd8] sm:$0xff] %v1551_v26  ;;  %v1552_v30 = vadd.f32 %v2496_v37, %v1405_v27  ;;  %v1407_v31 = vadd.f32 %v1406_v29, %v1293_v28  ;;  %v1295_v32 = vpop.f32.mrf.mxu0  ;;  %1660 = vst [vmem:[%s2575_s5 + $0x168] sm:$0xff] (%p2178_p6), %v1659_v0 }
 0x17c   : > { %v1408_v33 = vpop.f32.mrf.mxu1  ;;  %v1661_v1 = vld [vmem:[%s2501_s29 + $0xc0] sm:$0xff] (%p2178_p6) }
 0x17d   : > { %1584 = vst [vmem:[%s2501_s29 + $0xe0] sm:$0xff] %v1552_v30  ;;  %v1553_v34 = vadd.f32 %v2498_v41, %v1407_v31  ;;  %v1409_v35 = vadd.f32 %v1408_v33, %v1295_v32  ;;  %v1297_v36 = vpop.f32.mrf.mxu0  ;;  %1662 = vst [vmem:[%s2575_s5 + $0x180] sm:$0xff] (%p2178_p6), %v1661_v1 }
 0x17e   : > { %v1410_v38 = vpop.f32.mrf.mxu1  ;;  %v1663_v2 = vld [vmem:[%s2501_s29 + $0xc8] sm:$0xff] (%p2178_p6) }
 0x17f   : > { %1585 = vst [vmem:[%s2501_s29 + $0xe8] sm:$0xff] %v1553_v34  ;;  %v1554_v39 = vadd.f32 %v2496_v37, %v1409_v35  ;;  %v1411_v40 = vadd.f32 %v1410_v38, %v1297_v36  ;;  %1594 = sbr.rel (!%p2178_p6) target bundleno = 396 (0x18c), region = 82  ;;  %v1613_v37 = vld [vmem:[%s2501_s29] sm:$0xff] (%p2178_p6)  ;;  %1664 = vst [vmem:[%s2575_s5 + $0x188] sm:$0xff] (%p2178_p6), %v1663_v2 }
 0x180   : > { %1614 = vst [vmem:[%s2575_s5] sm:$0xff] (%p2178_p6), %v1613_v37  ;;  %v1665_v3 = vld [vmem:[%s2501_s29 + $0xd0] sm:$0xff] (%p2178_p6) }
 0x181   : > { %1586 = vst [vmem:[%s2501_s29 + $0xf0] sm:$0xff] %v1554_v39  ;;  %v1555_v42 = vadd.f32 %v2498_v41, %v1411_v40  ;;  %v1619_v41 = vld [vmem:[%s2501_s29 + $0x18] sm:$0xff] (%p2178_p6)  ;;  %1666 = vst [vmem:[%s2575_s5 + $0x1a0] sm:$0xff] (%p2178_p6), %v1665_v3 }
 0x182   : > { %1620 = vst [vmem:[%s2575_s5 + $0x28] sm:$0xff] (%p2178_p6), %v1619_v41  ;;  %v1667_v4 = vld [vmem:[%s2501_s29 + $0xd8] sm:$0xff] (%p2178_p6) }
 0x183   : > { %1587 = vst [vmem:[%s2501_s29 + $0xf8] sm:$0xff] %v1555_v42  ;;  %1668 = vst [vmem:[%s2575_s5 + $0x1a8] sm:$0xff] (%p2178_p6), %v1667_v4 }
 0x184   : > { %v1669_v5 = vld [vmem:[%s2501_s29 + $0xe0] sm:$0xff] }
 0x185   : > { %1670 = vst [vmem:[%s2575_s5 + $0x1c0] sm:$0xff] %v1669_v5 }
 0x186   : > { %v1671_v6 = vld [vmem:[%s2501_s29 + $0xe8] sm:$0xff] }
 0x187   : > { %1672 = vst [vmem:[%s2575_s5 + $0x1c8] sm:$0xff] %v1671_v6 }
 0x188   : > { %v1673_v7 = vld [vmem:[%s2501_s29 + $0xf0] sm:$0xff] }
 0x189   : > { %1674 = vst [vmem:[%s2575_s5 + $0x1e0] sm:$0xff] %v1673_v7 }
 0x18a   : > { %v1675_v8 = vld [vmem:[%s2501_s29 + $0xf8] sm:$0xff] }
 0x18b   : > { %1676 = vst [vmem:[%s2575_s5 + $0x1e8] sm:$0xff] %v1675_v8 }
 0x18c PF: > { %s13_s16 = sadd.s32 1, %s2121_s16   ;;  %s2658_s12 = smov %s2109_s13 }
 0x18d   : > { %p10_p12 = scmp.ge.s32.totalorder %s13_s16, 4   ;;  %s2659_s13 = smov %s2183_s22 }
 0x18e   : > { %s2660_s14 = smov %s2117_s15  ;;  %s2661_s15 = smov %s2663_s17 }
 0x18f   :  { %12 = sbr.rel (!%p10_p12) target bundleno = 3 (0x3), region = 142 }

// kernel: resnet_generator_forward.55
= control target key start
LH: loop header
LB: loop body
LE: loop exit
PB: predicated region body
PF: predicated region fallthrough
CT: control target
= control target key end

     0   :  { %s1515_s12 = smov 0   ;;  %s1517_s13 = smov 0   ;;  %s1776_s0 = inlined_call_operand.vmem [shape: bf16[512,6272], index: 0, kind: input, shape index: {}]   ;;  %s1777_s1 = inlined_call_operand.vmem [shape: bf16[6272,128], index: 1, kind: input, shape index: {}]   ;;  %s1778_s2 = inlined_call_operand.vmem [shape: f32[1,128], index: 2, kind: input, shape index: {}]   ;;  %s1779_s3 = inlined_call_operand.vmem [shape: f32[512,128], index: 3, kind: output, shape index: {}]  }
   0x1   :  { %s1519_s14 = smov 0   ;;  %s1521_s15 = smov 0  }
   0x2   :  { %s1523_s16 = smov 0   ;;  %s1525_s17 = smov 0  }
   0x3   :  { %s1527_s18 = smov 0  }
   0x4 LB: > { %s25_s19 = sadd.s32 1, %s1484_s16  ;;  %s32_s20 = sadd.s32 1, %s1488_s17  ;;  %s1492_s18 = sphi %s1527_s18, %s13_s18   ;;  %s1488_s17 = sphi %s1525_s17, %s1785_s17   ;;  %s1484_s16 = sphi %s1523_s16, %s1784_s16   ;;  %s1480_s15 = sphi %s1521_s15, %s1783_s15   ;;  %s1476_s14 = sphi %s1519_s14, %s1782_s14   ;;  %s1472_s13 = sphi %s1517_s13, %s1781_s13   ;;  %s1468_s12 = sphi %s1515_s12, %s1780_s12  }
   0x5   : > { %p26_p0 = scmp.ge.s32.totalorder %s25_s19, 49  ;;  %p48_p1 = scmp.ne.s32.totalorder %s1472_s13, %s1468_s12 }
   0x6   : > { %p49_p2 = scmp.eq.s32.totalorder %s1492_s18, 0  ;;  %s41_s24 = sadd.s32 1, %s1472_s13 }
   0x7   : > { %s1787_s19 = smov (%p26_p0, %s25_s19), 0  ;;  %s1789_s20 = smov (!%p26_p0, %s32_s20), %s1488_s17 }
   0x8   : > { %p50_p3 = por %p49_p2, %p48_p1  ;;  %p34_p4 = scmp.ge.s32.totalorder %s1789_s20, 2 }
   0x9   : > { %s37_s21 = ssub.s32 %s1484_s16, %s1787_s19  ;;  %p1164_p6 = scmp.ge.s32.totalorder %s1492_s18, 98 }
   0xa   : > { %s1791_s20 = smov (%p34_p4, %s1789_s20), 0 }
   0xb   : > { %s36_s22 = ssub.s32 %s1488_s17, %s1791_s20  ;;  %162 = sbr.rel (%p1164_p6) target bundleno = 44 (0x2c), region = 20 }
   0xc   : > { %s38_s23 = sor.u32 %s37_s21, %s36_s22 }
   0xd   : > { %p39_p5 = scmp.eq.s32.totalorder %s38_s23, 0 }
   0xf   : > { %s1566_s25 = scalar_select %p39_p5, %s1472_s13, %s41_s24  }
  0x10   : > { %165 = sbr.rel (!%p50_p3) target bundleno = 44 (0x2c), region = 24  ;;  %s167_s26 = sand.u32 (%p50_p3), 1, %s1472_s13  }
  0x11   : > { %s1292_s27 = smul.u32 (%p50_p3), 1568, %s1488_s17  ;;  %s1165_s28 = sshll.u32 (%p50_p3), %s167_s26, 7 }
  0x12   : > { %s1580_s7 = scalar_lea.vmem (%p50_p3), [#allocation3], %s1165_s28 }
  0x13   : > { %s172_s29 = sadd.s32 (%p50_p3), %s1484_s16, %s1292_s27 }
  0x14   : > { %s1168_s30 = sshll.u32 (%p50_p3), %s172_s29, 2 }
  0x15   : > { %s1575_s6 = scalar_lea.vmem %s1776_s0, %s1168_s30 }
  0x16   : > { %v191_v0 = vld [vmem:[%s1575_s6] sm:$0xf]  ;;  %v193_v1 = vld [vmem:[%s1575_s6 + $0xc4] sm:$0xf]  ;;  %v195_v2 = vld [vmem:[%s1575_s6 + $0x188] sm:$0xf] }
  0x17   : > { %192 = vst [vmem:[%s1580_s7] sm:$0xf] %v191_v0  ;;  %194 = vst [vmem:[%s1580_s7 + $0x4] sm:$0xf] %v193_v1  ;;  %v197_v3 = vld [vmem:[%s1575_s6 + $0x24c] sm:$0xf] }
  0x18   : > { %196 = vst [vmem:[%s1580_s7 + $0x8] sm:$0xf] %v195_v2  ;;  %v199_v4 = vld [vmem:[%s1575_s6 + $0x310] sm:$0xf]  ;;  %v201_v5 = vld [vmem:[%s1575_s6 + $0x3d4] sm:$0xf] }
  0x19   : > { %198 = vst [vmem:[%s1580_s7 + $0xc] sm:$0xf] %v197_v3  ;;  %200 = vst [vmem:[%s1580_s7 + $0x10] sm:$0xf] %v199_v4  ;;  %v203_v6 = vld [vmem:[%s1575_s6 + $0x498] sm:$0xf] }
  0x1a   : > { %202 = vst [vmem:[%s1580_s7 + $0x14] sm:$0xf] %v201_v5  ;;  %v205_v7 = vld [vmem:[%s1575_s6 + $0x55c] sm:$0xf]  ;;  %v207_v8 = vld [vmem:[%s1575_s6 + $0x620] sm:$0xf] }
  0x1b   : > { %204 = vst [vmem:[%s1580_s7 + $0x18] sm:$0xf] %v203_v6  ;;  %206 = vst [vmem:[%s1580_s7 + $0x1c] sm:$0xf] %v205_v7  ;;  %v209_v9 = vld [vmem:[%s1575_s6 + $0x6e4] sm:$0xf] }
  0x1c   : > { %208 = vst [vmem:[%s1580_s7 + $0x20] sm:$0xf] %v207_v8  ;;  %v211_v10 = vld [vmem:[%s1575_s6 + $0x7a8] sm:$0xf]  ;;  %v213_v11 = vld [vmem:[%s1575_s6 + $0x86c] sm:$0xf] }
  0x1d   : > { %210 = vst [vmem:[%s1580_s7 + $0x24] sm:$0xf] %v209_v9  ;;  %212 = vst [vmem:[%s1580_s7 + $0x28] sm:$0xf] %v211_v10  ;;  %v215_v12 = vld [vmem:[%s1575_s6 + $0x930] sm:$0xf] }
  0x1e   : > { %214 = vst [vmem:[%s1580_s7 + $0x2c] sm:$0xf] %v213_v11  ;;  %v217_v13 = vld [vmem:[%s1575_s6 + $0x9f4] sm:$0xf]  ;;  %v219_v14 = vld [vmem:[%s1575_s6 + $0xab8] sm:$0xf] }
  0x1f   : > { %216 = vst [vmem:[%s1580_s7 + $0x30] sm:$0xf] %v215_v12  ;;  %218 = vst [vmem:[%s1580_s7 + $0x34] sm:$0xf] %v217_v13  ;;  %v221_v15 = vld [vmem:[%s1575_s6 + $0xb7c] sm:$0xf] }
  0x20   : > { %220 = vst [vmem:[%s1580_s7 + $0x38] sm:$0xf] %v219_v14  ;;  %v223_v16 = vld [vmem:[%s1575_s6 + $0xc40] sm:$0xf]  ;;  %v225_v17 = vld [vmem:[%s1575_s6 + $0xd04] sm:$0xf] }
  0x21   : > { %222 = vst [vmem:[%s1580_s7 + $0x3c] sm:$0xf] %v221_v15  ;;  %224 = vst [vmem:[%s1580_s7 + $0x40] sm:$0xf] %v223_v16  ;;  %v227_v18 = vld [vmem:[%s1575_s6 + $0xdc8] sm:$0xf] }
  0x22   : > { %226 = vst [vmem:[%s1580_s7 + $0x44] sm:$0xf] %v225_v17  ;;  %v229_v19 = vld [vmem:[%s1575_s6 + $0xe8c] sm:$0xf]  ;;  %v231_v20 = vld [vmem:[%s1575_s6 + $0xf50] sm:$0xf] }
  0x23   : > { %228 = vst [vmem:[%s1580_s7 + $0x48] sm:$0xf] %v227_v18  ;;  %230 = vst [vmem:[%s1580_s7 + $0x4c] sm:$0xf] %v229_v19  ;;  %v233_v21 = vld [vmem:[%s1575_s6 + $0x1014] sm:$0xf] }
  0x24   : > { %232 = vst [vmem:[%s1580_s7 + $0x50] sm:$0xf] %v231_v20  ;;  %v235_v22 = vld [vmem:[%s1575_s6 + $0x10d8] sm:$0xf]  ;;  %v237_v23 = vld [vmem:[%s1575_s6 + $0x119c] sm:$0xf] }
  0x25   : > { %234 = vst [vmem:[%s1580_s7 + $0x54] sm:$0xf] %v233_v21  ;;  %236 = vst [vmem:[%s1580_s7 + $0x58] sm:$0xf] %v235_v22  ;;  %v239_v24 = vld [vmem:[%s1575_s6 + $0x1260] sm:$0xf] }
  0x26   : > { %238 = vst [vmem:[%s1580_s7 + $0x5c] sm:$0xf] %v237_v23  ;;  %v241_v25 = vld [vmem:[%s1575_s6 + $0x1324] sm:$0xf]  ;;  %v243_v26 = vld [vmem:[%s1575_s6 + $0x13e8] sm:$0xf] }
  0x27   : > { %240 = vst [vmem:[%s1580_s7 + $0x60] sm:$0xf] %v239_v24  ;;  %242 = vst [vmem:[%s1580_s7 + $0x64] sm:$0xf] %v241_v25  ;;  %v245_v27 = vld [vmem:[%s1575_s6 + $0x14ac] sm:$0xf] }
  0x28   : > { %244 = vst [vmem:[%s1580_s7 + $0x68] sm:$0xf] %v243_v26  ;;  %v247_v28 = vld [vmem:[%s1575_s6 + $0x1570] sm:$0xf]  ;;  %v249_v29 = vld [vmem:[%s1575_s6 + $0x1634] sm:$0xf] }
  0x29   : > { %246 = vst [vmem:[%s1580_s7 + $0x6c] sm:$0xf] %v245_v27  ;;  %248 = vst [vmem:[%s1580_s7 + $0x70] sm:$0xf] %v247_v28  ;;  %v251_v30 = vld [vmem:[%s1575_s6 + $0x16f8] sm:$0xf] }
  0x2a   : > { %250 = vst [vmem:[%s1580_s7 + $0x74] sm:$0xf] %v249_v29  ;;  %v253_v31 = vld [vmem:[%s1575_s6 + $0x17bc] sm:$0xf]  ;;  %252 = vst [vmem:[%s1580_s7 + $0x78] sm:$0xf] %v251_v30 }
  0x2b   : > { %254 = vst [vmem:[%s1580_s7 + $0x7c] sm:$0xf] %v253_v31 }
  0x2c PF: > { %p1169_p7 = scmp.ge.s32.totalorder %s1492_s18, 1  ;;  %p353_p8 = scmp.lt.s32.totalorder %s1492_s18, 99 }
  0x2e   : > { %p354_p9 = pnand %p1169_p7, %p353_p8 }
  0x2f   : > { %s360_s8 = sand.u32 (!%p354_p9), 1, %s1468_s12   ;;  %s1171_s9 = sshll.u32 (!%p354_p9), %s1476_s14, 4 }
  0x30   : > { %357 = sbr.rel (%p354_p9) target bundleno = 386 (0x182), region = 69  ;;  %s1170_s10 = sshll.u32 (!%p354_p9), %s360_s8, 7 }
  0x31   : > { %p399_p10 = scmp.lt.s32.totalorder (!%p354_p9), %s1171_s9, 783  ;;  %s1173_s11 = sshll.u32 (!%p354_p9), %s1480_s15, 5 }
  0x32   : > { %p411_p11 = scmp.lt.s32.totalorder (!%p354_p9), %s1173_s11, 63  ;;  %s1658_s12 = scalar_lea.vmem (!%p354_p9), [#allocation3], %s1170_s10 }
  0x33   : > { %p1175_p12 = scmp.ne.s32.totalorder (!%p354_p9), %s1476_s14, 0 }
  0x35   : > { %s1793_s9 = smov (!%p399_p10, %s1171_s9), 783  ;;  %s1795_s11 = smov (!%p411_p11, %s1173_s11), 63 }
  0x36   : > { %s1172_s21 = sshll.u32 %s1793_s9, 2  ;;  %s1174_s26 = sshll.u32 %s1795_s11, 3 }
  0x37   : > { %s1651_s24 = scalar_lea.vmem %s1777_s1, %s1172_s21  ;;  %s1656_s29 = scalar_lea.vmem %s1779_s3, %s1174_s26 }
  0x38   : > { %423 = sbr.rel (%p1175_p12) target bundleno = 78 (0x4e), region = 77 }
  0x3d   : > { %v1494_v32 = vmov 0.0  }
  0x3e   : > { %424 = vst [vmem:[#allocation2 + $0xb0] sm:$0xff] %v1494_v32  ;;  %425 = vst [vmem:[#allocation2] sm:$0xff] %v1494_v32 }
  0x3f   : > { %426 = vst [vmem:[#allocation2 + $0xd8] sm:$0xff] %v1494_v32  ;;  %427 = vst [vmem:[#allocation2 + $0x18] sm:$0xff] %v1494_v32 }
  0x40   : > { %428 = vst [vmem:[#allocation2 + $0x50] sm:$0xff] %v1494_v32  ;;  %429 = vst [vmem:[#allocation2 + $0x68] sm:$0xff] %v1494_v32 }
  0x41   : > { %430 = vst [vmem:[#allocation2 + $0x30] sm:$0xff] %v1494_v32  ;;  %431 = vst [vmem:[#allocation2 + $0x48] sm:$0xff] %v1494_v32 }
  0x42   : > { %432 = vst [vmem:[#allocation2 + $0x80] sm:$0xff] %v1494_v32  ;;  %433 = vst [vmem:[#allocation2 + $0x88] sm:$0xff] %v1494_v32 }
  0x43   : > { %434 = vst [vmem:[#allocation2 + $0xe8] sm:$0xff] %v1494_v32  ;;  %435 = vst [vmem:[#allocation2 + $0xb8] sm:$0xff] %v1494_v32 }
  0x44   : > { %436 = vst [vmem:[#allocation2 + $0x60] sm:$0xff] %v1494_v32  ;;  %437 = vst [vmem:[#allocation2 + $0xf0] sm:$0xff] %v1494_v32 }
  0x45   : > { %438 = vst [vmem:[#allocation2 + $0x8] sm:$0xff] %v1494_v32  ;;  %439 = vst [vmem:[#allocation2 + $0x78] sm:$0xff] %v1494_v32 }
  0x46   : > { %440 = vst [vmem:[#allocation2 + $0x38] sm:$0xff] %v1494_v32  ;;  %441 = vst [vmem:[#allocation2 + $0x58] sm:$0xff] %v1494_v32 }
  0x47   : > { %442 = vst [vmem:[#allocation2 + $0x40] sm:$0xff] %v1494_v32  ;;  %443 = vst [vmem:[#allocation2 + $0xc8] sm:$0xff] %v1494_v32 }
  0x48   : > { %444 = vst [vmem:[#allocation2 + $0xe0] sm:$0xff] %v1494_v32  ;;  %445 = vst [vmem:[#allocation2 + $0x90] sm:$0xff] %v1494_v32 }
  0x49   : > { %446 = vst [vmem:[#allocation2 + $0x70] sm:$0xff] %v1494_v32  ;;  %447 = vst [vmem:[#allocation2 + $0xc0] sm:$0xff] %v1494_v32 }
  0x4a   : > { %448 = vst [vmem:[#allocation2 + $0xa8] sm:$0xff] %v1494_v32  ;;  %449 = vst [vmem:[#allocation2 + $0xd0] sm:$0xff] %v1494_v32 }
  0x4b   : > { %450 = vst [vmem:[#allocation2 + $0x10] sm:$0xff] %v1494_v32  ;;  %451 = vst [vmem:[#allocation2 + $0x28] sm:$0xff] %v1494_v32 }
  0x4c   : > { %452 = vst [vmem:[#allocation2 + $0xa0] sm:$0xff] %v1494_v32  ;;  %453 = vst [vmem:[#allocation2 + $0xf8] sm:$0xff] %v1494_v32 }
  0x4d   : > { %454 = vst [vmem:[#allocation2 + $0x20] sm:$0xff] %v1494_v32  ;;  %455 = vst [vmem:[#allocation2 + $0x98] sm:$0xff] %v1494_v32 }
  0x4e PF: > { %v1350_v33 = vld [vmem:[%s1651_s24 + $0x38] sm:$0xff]   ;;  %v1351_v34 = vld [vmem:[%s1651_s24 + $0x30] sm:$0xff]   ;;  %v1352_v35 = vld [vmem:[%s1651_s24 + $0x28] sm:$0xff]   ;;  %p1200_p13 = scmp.ne.s32.totalorder %s1476_s14, 48 }
  0x4f   : > { %1228 = vmatprep.subr.bf16.mxu0 %v1350_v33  ;;  %1276 = vmatprep.subr.bf16.mxu1 %v1350_v33  ;;  %v1353_v36 = vld [vmem:[%s1651_s24 + $0x20] sm:$0xff]   ;;  %v1354_v39 = vld [vmem:[%s1651_s24 + $0x18] sm:$0xff]   ;;  %v1355_v40 = vld [vmem:[%s1651_s24 + $0x10] sm:$0xff]  }
  0x50   : > { %1229 = vmatpush3.bf16.msra.mxu0 %v1350_v33  ;;  %1284 = vmatpush3.bf16.msra.mxu1 %v1350_v33  ;;  %v1358_v37 = vld [vmem:[%s1658_s12] sm:$0xff]   ;;  %v1356_v41 = vld [vmem:[%s1651_s24 + $0x8] sm:$0xff]   ;;  %v1362_v45 = vld [vmem:[%s1658_s12 + $0x10] sm:$0xff]  }
  0x51   : > { %1230 = vmatprep.subr.bf16.mxu0 %v1351_v34  ;;  %1277 = vmatprep.subr.bf16.mxu1 %v1351_v34  ;;  %v1359_v38 = vld [vmem:[%s1658_s12 + $0x40] sm:$0xff]   ;;  %v1360_v43 = vld [vmem:[%s1658_s12 + $0x8] sm:$0xff]   ;;  %v1363_v46 = vld [vmem:[%s1658_s12 + $0x50] sm:$0xff]  }
  0x52   : > { %1244 = vmatprep.mubr.bf16.mxu0 %v1358_v37  ;;  %1260 = vmatprep.mubr.bf16.mxu1 %v1359_v38  ;;  %v1357_v42 = vld [vmem:[%s1651_s24] sm:$0xff]   ;;  %v1361_v44 = vld [vmem:[%s1658_s12 + $0x48] sm:$0xff]   ;;  %v1364_v47 = vld [vmem:[%s1658_s12 + $0x18] sm:$0xff]  }
  0x53   : > { %v1365_v48 = vld [vmem:[%s1658_s12 + $0x58] sm:$0xff]   ;;  %v1366_v49 = vld [vmem:[%s1658_s12 + $0x20] sm:$0xff]   ;;  %v1368_v51 = vld [vmem:[%s1658_s12 + $0x28] sm:$0xff]  }
  0x54   : > { %1231 = vmatpush3.bf16.msra.mxu0 %v1351_v34  ;;  %1285 = vmatpush3.bf16.msra.mxu1 %v1351_v34  ;;  %v1367_v50 = vld [vmem:[%s1658_s12 + $0x60] sm:$0xff]   ;;  %v1369_v52 = vld [vmem:[%s1658_s12 + $0x68] sm:$0xff]   ;;  %v1370_v53 = vld [vmem:[%s1658_s12 + $0x30] sm:$0xff]  }
  0x55   : > { %1232 = vmatprep.subr.bf16.mxu0 %v1352_v35  ;;  %1278 = vmatprep.subr.bf16.mxu1 %v1352_v35  ;;  %v1371_v54 = vld [vmem:[%s1658_s12 + $0x70] sm:$0xff]   ;;  %v1372_v55 = vld [vmem:[%s1658_s12 + $0x38] sm:$0xff]   ;;  %v474_v58 = vld [vmem:[#allocation2 + $0x40] sm:$0xff] }
  0x56   : > { %v1373_v56 = vld [vmem:[%s1658_s12 + $0x78] sm:$0xff]   ;;  %v456_v61 = vld [vmem:[#allocation2 + $0xb0] sm:$0xff]  ;;  %v475_v4 = vld [vmem:[#allocation2 + $0xc8] sm:$0xff] }
  0x57   : > { %v458_v57 = vld [vmem:[#allocation2 + $0xd8] sm:$0xff]  ;;  %v457_v9 = vld [vmem:[#allocation2] sm:$0xff]  ;;  %v462_v15 = vld [vmem:[#allocation2 + $0x30] sm:$0xff] }
  0x58   : > { %1233 = vmatpush3.bf16.msra.mxu0 %v1352_v35  ;;  %1286 = vmatpush3.bf16.msra.mxu1 %v1352_v35  ;;  %v472_v62 = vld [vmem:[#allocation2 + $0x38] sm:$0xff]  ;;  %v478_v16 = vld [vmem:[#allocation2 + $0x70] sm:$0xff]  ;;  %v476_v22 = vld [vmem:[#allocation2 + $0xe0] sm:$0xff] }
  0x59   : > { %1234 = vmatprep.subr.bf16.mxu0 %v1353_v36  ;;  %1279 = vmatprep.subr.bf16.mxu1 %v1353_v36  ;;  %v459_v3 = vld [vmem:[#allocation2 + $0x18] sm:$0xff]  ;;  %v460_v21 = vld [vmem:[#allocation2 + $0x50] sm:$0xff]  ;;  %v463_v27 = vld [vmem:[#allocation2 + $0x48] sm:$0xff] }
  0x5a   : > { %v473_v10 = vld [vmem:[#allocation2 + $0x58] sm:$0xff]  ;;  %v479_v28 = vld [vmem:[#allocation2 + $0xc0] sm:$0xff]  ;;  %v461_v33 = vld [vmem:[#allocation2 + $0x68] sm:$0xff] }
  0x5b   : > { %v477_v34 = vld [vmem:[#allocation2 + $0x90] sm:$0xff] }
  0x5c   : > { %1235 = vmatpush3.bf16.msra.mxu0 %v1353_v36  ;;  %1287 = vmatpush3.bf16.msra.mxu1 %v1353_v36 }
  0x5d   : > { %1236 = vmatprep.subr.bf16.mxu0 %v1354_v39  ;;  %1280 = vmatprep.subr.bf16.mxu1 %v1354_v39 }
  0x60   : > { %1237 = vmatpush3.bf16.msra.mxu0 %v1354_v39  ;;  %1288 = vmatpush3.bf16.msra.mxu1 %v1354_v39  ;;  %v466_v39 = vld [vmem:[#allocation2 + $0xe8] sm:$0xff] }
  0x61   : > { %1238 = vmatprep.subr.bf16.mxu0 %v1355_v40  ;;  %1281 = vmatprep.subr.bf16.mxu1 %v1355_v40 }
  0x64   : > { %1239 = vmatpush3.bf16.msra.mxu0 %v1355_v40  ;;  %1289 = vmatpush3.bf16.msra.mxu1 %v1355_v40  ;;  %v482_v40 = vld [vmem:[#allocation2 + $0x10] sm:$0xff] }
  0x65   : > { %1240 = vmatprep.subr.bf16.mxu0 %v1356_v41  ;;  %1282 = vmatprep.subr.bf16.mxu1 %v1356_v41 }
  0x68   : > { %1241 = vmatpush3.bf16.msra.mxu0 %v1356_v41  ;;  %1290 = vmatpush3.bf16.msra.mxu1 %v1356_v41 }
  0x69   : > { %1242 = vmatprep.subr.bf16.mxu0 %v1357_v42  ;;  %1283 = vmatprep.subr.bf16.mxu1 %v1357_v42 }
  0x6c   : > { %1243 = vmatpush3.bf16.msra.mxu0 %v1357_v42  ;;  %1291 = vmatpush3.bf16.msra.mxu1 %v1357_v42 }
  0x6f   : > { %1245 = vmatmul.mubr.bf16.vlgmr.msra.gmra.mxu0 %v1360_v43  ;;  %1261 = vmatmul.mubr.bf16.vlgmr.msra.gmra.mxu1 %v1361_v44 }
  0x70   : > { %1248 = vmatprep.mubr.bf16.mxu0 %v1362_v45  ;;  %1264 = vmatprep.mubr.bf16.mxu1 %v1363_v46  ;;  %v464_v45 = vld [vmem:[#allocation2 + $0x80] sm:$0xff]  ;;  %v480_v46 = vld [vmem:[#allocation2 + $0xa8] sm:$0xff] }
  0x77   : > { %1249 = vmatmul.mubr.bf16.gmra.mxu0 %v1364_v47  ;;  %1265 = vmatmul.mubr.bf16.gmra.mxu1 %v1365_v48 }
  0x78   : > { %1252 = vmatprep.mubr.bf16.mxu0 %v1366_v49  ;;  %1268 = vmatprep.mubr.bf16.mxu1 %v1367_v50 }
  0x7f   : > { %1253 = vmatmul.mubr.bf16.gmra.mxu0 %v1368_v51  ;;  %1269 = vmatmul.mubr.bf16.gmra.mxu1 %v1369_v52  ;;  %v467_v51 = vld [vmem:[#allocation2 + $0xb8] sm:$0xff]  ;;  %v483_v52 = vld [vmem:[#allocation2 + $0x28] sm:$0xff] }
  0x80   : > { %1256 = vmatprep.mubr.bf16.mxu0 %v1370_v53  ;;  %1272 = vmatprep.mubr.bf16.mxu1 %v1371_v54 }
  0x87   : > { %1257 = vmatmul.mubr.bf16.gmra.mxu0 %v1372_v55  ;;  %1273 = vmatmul.mubr.bf16.gmra.mxu1 %v1373_v56 }
 0x12f   : > { %v1246_v59 = vpop.f32.mrf.mxu0  ;;  %v1262_v60 = vpop.f32.mrf.mxu1 }
 0x130   : > { %v843_v63 = vadd.f32 %v1246_v59, %v458_v57  ;;  %v859_v0 = vadd.f32 %v1262_v60, %v474_v58  ;;  %v465_v57 = vld [vmem:[#allocation2 + $0x88] sm:$0xff]  ;;  %v481_v58 = vld [vmem:[#allocation2 + $0xd0] sm:$0xff] }
 0x131   : > { %v714_v1 = vpop.f32.mrf.mxu0  ;;  %v778_v2 = vpop.f32.mrf.mxu1 }
 0x132   : > { %875 = vst [vmem:[#allocation2 + $0xd8] sm:$0xff] %v843_v63  ;;  %891 = vst [vmem:[#allocation2 + $0x40] sm:$0xff] %v859_v0  ;;  %v841_v5 = vadd.f32 %v714_v1, %v456_v61  ;;  %v857_v6 = vadd.f32 %v778_v2, %v472_v62  ;;  %v470_v63 = vld [vmem:[#allocation2 + $0x8] sm:$0xff]  ;;  %v486_v0 = vld [vmem:[#allocation2 + $0x20] sm:$0xff] }
 0x133   : > { %v1247_v7 = vpop.f32.mrf.mxu0  ;;  %v1263_v8 = vpop.f32.mrf.mxu1 }
 0x134   : > { %873 = vst [vmem:[#allocation2 + $0xb0] sm:$0xff] %v841_v5  ;;  %889 = vst [vmem:[#allocation2 + $0x38] sm:$0xff] %v857_v6  ;;  %v844_v11 = vadd.f32 %v1247_v7, %v459_v3  ;;  %v860_v12 = vadd.f32 %v1263_v8, %v475_v4  ;;  %v468_v5 = vld [vmem:[#allocation2 + $0x60] sm:$0xff] }
 0x135   : > { %v717_v13 = vpop.f32.mrf.mxu0  ;;  %v781_v14 = vpop.f32.mrf.mxu1  ;;  %v484_v6 = vld [vmem:[#allocation2 + $0xa0] sm:$0xff] }
 0x136   : > { %876 = vst [vmem:[#allocation2 + $0x18] sm:$0xff] %v844_v11  ;;  %892 = vst [vmem:[#allocation2 + $0xc8] sm:$0xff] %v860_v12  ;;  %v842_v17 = vadd.f32 %v717_v13, %v457_v9  ;;  %v858_v18 = vadd.f32 %v781_v14, %v473_v10  ;;  %v471_v11 = vld [vmem:[#allocation2 + $0x78] sm:$0xff] }
 0x137   : > { %v1250_v19 = vpop.f32.mrf.mxu0  ;;  %v1266_v20 = vpop.f32.mrf.mxu1  ;;  %v487_v12 = vld [vmem:[#allocation2 + $0x98] sm:$0xff] }
 0x138   : > { %874 = vst [vmem:[#allocation2] sm:$0xff] %v842_v17  ;;  %890 = vst [vmem:[#allocation2 + $0x58] sm:$0xff] %v858_v18  ;;  %v847_v23 = vadd.f32 %v1250_v19, %v462_v15  ;;  %v863_v24 = vadd.f32 %v1266_v20, %v478_v16  ;;  %v469_v17 = vld [vmem:[#allocation2 + $0xf0] sm:$0xff]  ;;  %v485_v18 = vld [vmem:[#allocation2 + $0xf8] sm:$0xff] }
 0x139   : > { %v730_v25 = vpop.f32.mrf.mxu0  ;;  %v794_v26 = vpop.f32.mrf.mxu1 }
 0x13a   : > { %879 = vst [vmem:[#allocation2 + $0x30] sm:$0xff] %v847_v23  ;;  %895 = vst [vmem:[#allocation2 + $0x70] sm:$0xff] %v863_v24  ;;  %v845_v29 = vadd.f32 %v730_v25, %v460_v21  ;;  %v861_v30 = vadd.f32 %v794_v26, %v476_v22 }
 0x13b   : > { %v1251_v31 = vpop.f32.mrf.mxu0  ;;  %v1267_v32 = vpop.f32.mrf.mxu1 }
 0x13c   : > { %877 = vst [vmem:[#allocation2 + $0x50] sm:$0xff] %v845_v29  ;;  %893 = vst [vmem:[#allocation2 + $0xe0] sm:$0xff] %v861_v30  ;;  %v848_v35 = vadd.f32 %v1251_v31, %v463_v27  ;;  %v864_v36 = vadd.f32 %v1267_v32, %v479_v28 }
 0x13d   : > { %v733_v37 = vpop.f32.mrf.mxu0  ;;  %v797_v38 = vpop.f32.mrf.mxu1 }
 0x13e   : > { %880 = vst [vmem:[#allocation2 + $0x48] sm:$0xff] %v848_v35  ;;  %896 = vst [vmem:[#allocation2 + $0xc0] sm:$0xff] %v864_v36  ;;  %v846_v41 = vadd.f32 %v733_v37, %v461_v33  ;;  %v862_v42 = vadd.f32 %v797_v38, %v477_v34 }
 0x13f   : > { %v1254_v43 = vpop.f32.mrf.mxu0  ;;  %v1270_v44 = vpop.f32.mrf.mxu1 }
 0x140   : > { %878 = vst [vmem:[#allocation2 + $0x68] sm:$0xff] %v846_v41  ;;  %894 = vst [vmem:[#allocation2 + $0x90] sm:$0xff] %v862_v42  ;;  %v851_v47 = vadd.f32 %v1254_v43, %v466_v39  ;;  %v867_v48 = vadd.f32 %v1270_v44, %v482_v40 }
 0x141   : > { %v746_v49 = vpop.f32.mrf.mxu0  ;;  %v810_v50 = vpop.f32.mrf.mxu1 }
 0x142   : > { %883 = vst [vmem:[#allocation2 + $0xe8] sm:$0xff] %v851_v47  ;;  %899 = vst [vmem:[#allocation2 + $0x10] sm:$0xff] %v867_v48  ;;  %v849_v53 = vadd.f32 %v746_v49, %v464_v45  ;;  %v865_v54 = vadd.f32 %v810_v50, %v480_v46 }
 0x143   : > { %v1255_v55 = vpop.f32.mrf.mxu0  ;;  %v1271_v56 = vpop.f32.mrf.mxu1 }
 0x144   : > { %881 = vst [vmem:[#allocation2 + $0x80] sm:$0xff] %v849_v53  ;;  %897 = vst [vmem:[#allocation2 + $0xa8] sm:$0xff] %v865_v54  ;;  %v852_v59 = vadd.f32 %v1255_v55, %v467_v51  ;;  %v868_v60 = vadd.f32 %v1271_v56, %v483_v52 }
 0x145   : > { %v749_v61 = vpop.f32.mrf.mxu0  ;;  %v813_v62 = vpop.f32.mrf.mxu1 }
 0x146   : > { %884 = vst [vmem:[#allocation2 + $0xb8] sm:$0xff] %v852_v59  ;;  %900 = vst [vmem:[#allocation2 + $0x28] sm:$0xff] %v868_v60  ;;  %v850_v1 = vadd.f32 %v749_v61, %v465_v57  ;;  %v866_v2 = vadd.f32 %v813_v62, %v481_v58 }
 0x147   : > { %v1258_v3 = vpop.f32.mrf.mxu0  ;;  %v1274_v4 = vpop.f32.mrf.mxu1 }
 0x148   : > { %882 = vst [vmem:[#allocation2 + $0x88] sm:$0xff] %v850_v1  ;;  %898 = vst [vmem:[#allocation2 + $0xd0] sm:$0xff] %v866_v2  ;;  %v855_v7 = vadd.f32 %v1258_v3, %v470_v63  ;;  %v871_v8 = vadd.f32 %v1274_v4, %v486_v0 }
 0x149   : > { %v762_v9 = vpop.f32.mrf.mxu0  ;;  %v826_v10 = vpop.f32.mrf.mxu1 }
 0x14a   : > { %887 = vst [vmem:[#allocation2 + $0x8] sm:$0xff] %v855_v7  ;;  %903 = vst [vmem:[#allocation2 + $0x20] sm:$0xff] %v871_v8  ;;  %v853_v13 = vadd.f32 %v762_v9, %v468_v5  ;;  %v869_v14 = vadd.f32 %v826_v10, %v484_v6 }
 0x14b   : > { %v1259_v15 = vpop.f32.mrf.mxu0  ;;  %v1275_v16 = vpop.f32.mrf.mxu1 }
 0x14c   : > { %885 = vst [vmem:[#allocation2 + $0x60] sm:$0xff] %v853_v13  ;;  %901 = vst [vmem:[#allocation2 + $0xa0] sm:$0xff] %v869_v14  ;;  %v856_v19 = vadd.f32 %v1259_v15, %v471_v11  ;;  %v872_v20 = vadd.f32 %v1275_v16, %v487_v12  ;;  %908 = sbr.rel (%p1200_p13) target bundleno = 386 (0x182), region = 81 }
 0x14d   : > { %v765_v21 = vpop.f32.mrf.mxu0  ;;  %v829_v22 = vpop.f32.mrf.mxu1 }
 0x14e   : > { %888 = vst [vmem:[#allocation2 + $0x78] sm:$0xff] %v856_v19  ;;  %904 = vst [vmem:[#allocation2 + $0x98] sm:$0xff] %v872_v20  ;;  %v854_v23 = vadd.f32 %v765_v21, %v469_v17  ;;  %v870_v24 = vadd.f32 %v829_v22, %v485_v18 }
 0x150   : > { %886 = vst [vmem:[#allocation2 + $0xf0] sm:$0xff] %v854_v23  ;;  %902 = vst [vmem:[#allocation2 + $0xf8] sm:$0xff] %v870_v24 }
 0x151   : > { %v909_v25 = vld [vmem:[#allocation2 + $0xb0] sm:$0xff]  ;;  %v1689_v26 = vld [vmem:[%s1778_s2] ss:$0 sm:$0xff]  ;;  %v911_v30 = vld [vmem:[#allocation2 + $0xd8] sm:$0xff] }
 0x152   : > { %v910_v27 = vld [vmem:[#allocation2] sm:$0xff]  ;;  %v948_v28 = vadd.f32 %v1689_v26, %v909_v25  ;;  %v912_v31 = vld [vmem:[#allocation2 + $0x18] sm:$0xff]  ;;  %v913_v32 = vld [vmem:[#allocation2 + $0x50] sm:$0xff]  ;;  %v950_v33 = vadd.f32 %v1689_v26, %v911_v30 }
 0x153   : > { %v949_v29 = vadd.f32 %v1689_v26, %v910_v27  ;;  %v951_v34 = vadd.f32 %v1689_v26, %v912_v31  ;;  %v914_v35 = vld [vmem:[#allocation2 + $0x68] sm:$0xff]  ;;  %v915_v36 = vld [vmem:[#allocation2 + $0x30] sm:$0xff]  ;;  %v952_v37 = vadd.f32 %v1689_v26, %v913_v32  ;;  %v917_v40 = vld [vmem:[#allocation2 + $0x80] sm:$0xff] }
 0x154   : > { %1374 = vtanh.f32 %v948_v28  ;;  %v916_v38 = vld [vmem:[#allocation2 + $0x48] sm:$0xff]  ;;  %v953_v39 = vadd.f32 %v1689_v26, %v914_v35  ;;  %v954_v41 = vadd.f32 %v1689_v26, %v915_v36  ;;  %v956_v45 = vadd.f32 %v1689_v26, %v917_v40  ;;  %v920_v46 = vld [vmem:[#allocation2 + $0xb8] sm:$0xff]  ;;  %v921_v48 = vld [vmem:[#allocation2 + $0x60] sm:$0xff] }
 0x155   : > { %1376 = vtanh.f32 %v949_v29  ;;  %v918_v42 = vld [vmem:[#allocation2 + $0x88] sm:$0xff]  ;;  %v955_v43 = vadd.f32 %v1689_v26, %v916_v38  ;;  %v959_v51 = vadd.f32 %v1689_v26, %v920_v46  ;;  %v960_v53 = vadd.f32 %v1689_v26, %v921_v48  ;;  %v924_v54 = vld [vmem:[#allocation2 + $0x78] sm:$0xff]  ;;  %v927_v60 = vld [vmem:[#allocation2 + $0x40] sm:$0xff] }
 0x156   : > { %1378 = vtanh.f32 %v950_v33  ;;  %v919_v44 = vld [vmem:[#allocation2 + $0xe8] sm:$0xff]  ;;  %v957_v47 = vadd.f32 %v1689_v26, %v918_v42  ;;  %v925_v56 = vld [vmem:[#allocation2 + $0x38] sm:$0xff]  ;;  %v963_v59 = vadd.f32 %v1689_v26, %v924_v54  ;;  %v929_v1 = vld [vmem:[#allocation2 + $0xe0] sm:$0xff]  ;;  %v966_v3 = vadd.f32 %v1689_v26, %v927_v60 }
 0x157   : > { %1380 = vtanh.f32 %v951_v34  ;;  %v958_v49 = vadd.f32 %v1689_v26, %v919_v44  ;;  %v922_v50 = vld [vmem:[#allocation2 + $0xf0] sm:$0xff]  ;;  %v923_v52 = vld [vmem:[#allocation2 + $0x8] sm:$0xff]  ;;  %v926_v58 = vld [vmem:[#allocation2 + $0x58] sm:$0xff]  ;;  %v964_v61 = vadd.f32 %v1689_v26, %v925_v56  ;;  %v968_v9 = vadd.f32 %v1689_v26, %v929_v1 }
 0x158   : > { %1382 = vtanh.f32 %v952_v37  ;;  %v961_v55 = vadd.f32 %v1689_v26, %v922_v50  ;;  %v962_v57 = vadd.f32 %v1689_v26, %v923_v52  ;;  %v928_v62 = vld [vmem:[#allocation2 + $0xc8] sm:$0xff]  ;;  %v965_v0 = vadd.f32 %v1689_v26, %v926_v58  ;;  %v930_v4 = vld [vmem:[#allocation2 + $0x90] sm:$0xff]  ;;  %v932_v10 = vld [vmem:[#allocation2 + $0xc0] sm:$0xff] }
 0x159   : > { %1384 = vtanh.f32 %v953_v39  ;;  %v967_v6 = vadd.f32 %v1689_v26, %v928_v62  ;;  %v931_v7 = vld [vmem:[#allocation2 + $0x70] sm:$0xff]  ;;  %v969_v12 = vadd.f32 %v1689_v26, %v930_v4  ;;  %v933_v13 = vld [vmem:[#allocation2 + $0xa8] sm:$0xff]  ;;  %v971_v18 = vadd.f32 %v1689_v26, %v932_v10  ;;  %v937_v25 = vld [vmem:[#allocation2 + $0xa0] sm:$0xff] }
 0x15a   : > { %1386 = vtanh.f32 %v954_v41  ;;  %v970_v15 = vadd.f32 %v1689_v26, %v931_v7  ;;  %v934_v16 = vld [vmem:[#allocation2 + $0xd0] sm:$0xff]  ;;  %v972_v21 = vadd.f32 %v1689_v26, %v933_v13  ;;  %v936_v22 = vld [vmem:[#allocation2 + $0x28] sm:$0xff]  ;;  %v938_v29 = vld [vmem:[#allocation2 + $0xf8] sm:$0xff]  ;;  %v976_v34 = vadd.f32 %v1689_v26, %v937_v25 }
 0x15b   : > { %1388 = vtanh.f32 %v955_v43  ;;  %v935_v19 = vld [vmem:[#allocation2 + $0x10] sm:$0xff]  ;;  %v973_v24 = vadd.f32 %v1689_v26, %v934_v16  ;;  %v975_v31 = vadd.f32 %v1689_v26, %v936_v22  ;;  %v939_v32 = vld [vmem:[#allocation2 + $0x20] sm:$0xff]  ;;  %v940_v35 = vld [vmem:[#allocation2 + $0x98] sm:$0xff]  ;;  %v977_v37 = vadd.f32 %v1689_v26, %v938_v29 }
 0x15c   : > { %1390 = vtanh.f32 %v956_v45  ;;  %v974_v28 = vadd.f32 %v1689_v26, %v935_v19  ;;  %v978_v39 = vadd.f32 %v1689_v26, %v939_v32  ;;  %v979_v41 = vadd.f32 %v1689_v26, %v940_v35 }
 0x15d   : > { %1392 = vtanh.f32 %v957_v47 }
 0x15e   : > { %1394 = vtanh.f32 %v958_v49 }
 0x15f   : > { %1396 = vtanh.f32 %v959_v51 }
 0x160   : > { %1398 = vtanh.f32 %v960_v53 }
 0x161   : > { %v1375_v63 = vpop.eup %1374  ;;  %1400 = vtanh.f32 %v961_v55 }
 0x162   : > { %v1377_v2 = vpop.eup %1376  ;;  %1012 = vst [vmem:[%s1656_s29] sm:$0xff] %v1375_v63  ;;  %1402 = vtanh.f32 %v962_v57 }
 0x163   : > { %v1379_v5 = vpop.eup %1378  ;;  %1013 = vst [vmem:[%s1656_s29 + $0x8] sm:$0xff] %v1377_v2  ;;  %1404 = vtanh.f32 %v963_v59 }
 0x164   : > { %v1381_v8 = vpop.eup %1380  ;;  %1014 = vst [vmem:[%s1656_s29 + $0x10] sm:$0xff] %v1379_v5  ;;  %1406 = vtanh.f32 %v964_v61 }
 0x165   : > { %v1383_v11 = vpop.eup %1382  ;;  %1015 = vst [vmem:[%s1656_s29 + $0x18] sm:$0xff] %v1381_v8  ;;  %1408 = vtanh.f32 %v965_v0 }
 0x166   : > { %v1385_v14 = vpop.eup %1384  ;;  %1016 = vst [vmem:[%s1656_s29 + $0x20] sm:$0xff] %v1383_v11  ;;  %1410 = vtanh.f32 %v966_v3 }
 0x167   : > { %v1387_v17 = vpop.eup %1386  ;;  %1017 = vst [vmem:[%s1656_s29 + $0x28] sm:$0xff] %v1385_v14  ;;  %1412 = vtanh.f32 %v967_v6 }
 0x168   : > { %v1389_v20 = vpop.eup %1388  ;;  %1018 = vst [vmem:[%s1656_s29 + $0x30] sm:$0xff] %v1387_v17  ;;  %1414 = vtanh.f32 %v968_v9 }
 0x169   : > { %v1391_v23 = vpop.eup %1390  ;;  %1019 = vst [vmem:[%s1656_s29 + $0x38] sm:$0xff] %v1389_v20  ;;  %1416 = vtanh.f32 %v969_v12 }
 0x16a   : > { %v1393_v27 = vpop.eup %1392  ;;  %1020 = vst [vmem:[%s1656_s29 + $0x40] sm:$0xff] %v1391_v23  ;;  %1418 = vtanh.f32 %v970_v15 }
 0x16b   : > { %v1395_v30 = vpop.eup %1394  ;;  %1021 = vst [vmem:[%s1656_s29 + $0x48] sm:$0xff] %v1393_v27  ;;  %1420 = vtanh.f32 %v971_v18 }
 0x16c   : > { %v1397_v33 = vpop.eup %1396  ;;  %1022 = vst [vmem:[%s1656_s29 + $0x50] sm:$0xff] %v1395_v30  ;;  %1422 = vtanh.f32 %v972_v21 }
 0x16d   : > { %v1399_v36 = vpop.eup %1398  ;;  %1023 = vst [vmem:[%s1656_s29 + $0x58] sm:$0xff] %v1397_v33  ;;  %1424 = vtanh.f32 %v973_v24 }
 0x16e   : > { %v1401_v38 = vpop.eup %1400  ;;  %1024 = vst [vmem:[%s1656_s29 + $0x60] sm:$0xff] %v1399_v36  ;;  %1426 = vtanh.f32 %v974_v28 }
 0x16f   : > { %v1403_v40 = vpop.eup %1402  ;;  %1025 = vst [vmem:[%s1656_s29 + $0x68] sm:$0xff] %v1401_v38  ;;  %1428 = vtanh.f32 %v975_v31 }
 0x170   : > { %v1405_v42 = vpop.eup %1404  ;;  %1026 = vst [vmem:[%s1656_s29 + $0x70] sm:$0xff] %v1403_v40  ;;  %1430 = vtanh.f32 %v976_v34 }
 0x171   : > { %v1407_v43 = vpop.eup %1406  ;;  %1027 = vst [vmem:[%s1656_s29 + $0x78] sm:$0xff] %v1405_v42  ;;  %1432 = vtanh.f32 %v977_v37 }
 0x172   : > { %v1409_v44 = vpop.eup %1408  ;;  %1028 = vst [vmem:[%s1656_s29 + $0x80] sm:$0xff] %v1407_v43  ;;  %1434 = vtanh.f32 %v978_v39 }
 0x173   : > { %v1411_v45 = vpop.eup %1410  ;;  %1029 = vst [vmem:[%s1656_s29 + $0x88] sm:$0xff] %v1409_v44  ;;  %1436 = vtanh.f32 %v979_v41 }
 0x174   : > { %v1413_v26 = vpop.eup %1412  ;;  %1030 = vst [vmem:[%s1656_s29 + $0x90] sm:$0xff] %v1411_v45 }
 0x175   : > { %v1415_v46 = vpop.eup %1414  ;;  %1031 = vst [vmem:[%s1656_s29 + $0x98] sm:$0xff] %v1413_v26 }
 0x176   : > { %v1417_v47 = vpop.eup %1416  ;;  %1032 = vst [vmem:[%s1656_s29 + $0xa0] sm:$0xff] %v1415_v46 }
 0x177   : > { %v1419_v48 = vpop.eup %1418  ;;  %1033 = vst [vmem:[%s1656_s29 + $0xa8] sm:$0xff] %v1417_v47 }
 0x178   : > { %v1421_v49 = vpop.eup %1420  ;;  %1034 = vst [vmem:[%s1656_s29 + $0xb0] sm:$0xff] %v1419_v48 }
 0x179   : > { %v1423_v50 = vpop.eup %1422  ;;  %1035 = vst [vmem:[%s1656_s29 + $0xb8] sm:$0xff] %v1421_v49 }
 0x17a   : > { %v1425_v51 = vpop.eup %1424  ;;  %1036 = vst [vmem:[%s1656_s29 + $0xc0] sm:$0xff] %v1423_v50 }
 0x17b   : > { %v1427_v52 = vpop.eup %1426  ;;  %1037 = vst [vmem:[%s1656_s29 + $0xc8] sm:$0xff] %v1425_v51 }
 0x17c   : > { %v1429_v53 = vpop.eup %1428  ;;  %1038 = vst [vmem:[%s1656_s29 + $0xd0] sm:$0xff] %v1427_v52 }
 0x17d   : > { %v1431_v54 = vpop.eup %1430  ;;  %1039 = vst [vmem:[%s1656_s29 + $0xd8] sm:$0xff] %v1429_v53 }
 0x17e   : > { %v1433_v55 = vpop.eup %1432  ;;  %1040 = vst [vmem:[%s1656_s29 + $0xe0] sm:$0xff] %v1431_v54 }
 0x17f   : > { %v1435_v56 = vpop.eup %1434  ;;  %1041 = vst [vmem:[%s1656_s29 + $0xe8] sm:$0xff] %v1433_v55 }
 0x180   : > { %v1437_v57 = vpop.eup %1436  ;;  %1042 = vst [vmem:[%s1656_s29 + $0xf0] sm:$0xff] %v1435_v56 }
 0x181   : > { %1043 = vst [vmem:[%s1656_s29 + $0xf8] sm:$0xff] %v1437_v57 }
 0x182 PF: > { %s13_s18 = sadd.s32 1, %s1492_s18   ;;  %s1780_s12 = smov %s1472_s13 }
 0x183   : > { %p10_p0 = scmp.ge.s32.totalorder %s13_s18, 100   ;;  %s1781_s13 = smov %s1566_s25 }
 0x184   : > { %s1782_s14 = smov %s1484_s16  ;;  %s1783_s15 = smov %s1488_s17 }
 0x185   : > { %s1784_s16 = smov %s1787_s19  ;;  %s1785_s17 = smov %s1791_s20 }
 0x186   :  { %12 = sbr.rel (!%p10_p0) target bundleno = 4 (0x4), region = 122 }

</bundles_post_ra>
